<compile_context>
chip_gen: v7x
topology: tpu7x:2x2x1
jax: 0.10.0
libtpu: 0.0.40
codegen_flags: <defaults>
</compile_context>

<pallas_src>
import functools
import math

import jax
import jax.numpy as jnp
from jax.experimental import pallas as pl
from jax.experimental.pallas import tpu as pltpu


# ----------------------------- in-kernel helpers -----------------------------

def _layer_norm(x, a, b, eps=1e-6):
    # Matches the PyTorch module's custom LayerNorm: unbiased std (N-1), eps
    # added to the std (not the variance).  Two-pass (centered) variance and an
    # exact reciprocal for numerical parity with the f32 reference.
    d = x.shape[-1]
    mean = jnp.sum(x, axis=-1, keepdims=True) * (1.0 / d)
    c = x - mean
    var = jnp.sum(c * c, axis=-1, keepdims=True) * (1.0 / (d - 1))
    std = jnp.sqrt(var)
    return a * c * (1.0 / (std + eps)) + b


def _log_softmax(z):
    m = jnp.max(z, axis=-1, keepdims=True)
    zs = z - m
    return zs - jnp.log(jnp.sum(jnp.exp(zs), axis=-1, keepdims=True))


def _encoder_branch(x, refs, n_layers, num_heads, pool_scale):
    """Pre-LN encoder stack + final LayerNorm + mean pooling, one batch element.

    x: (S, D) f32.  refs: 18 Refs; per-head attention weights are pre-split /
    pre-transposed host-side and stacked on a leading (layer*head) axis.
    Returns (1, D) f32.
    """
    (ln1a, ln1b, wq, bq, wkT, bkT, wv, bv, wo, bo,
     ln2a, ln2b, w1, b1, w2, b2, fa, fb) = refs
    S, D = x.shape
    d_k = D // num_heads
    scale = 1.0 / math.sqrt(d_k)

    for l in range(n_layers):                      # static (1-2 layers)
        # --- sublayer 0: x + SelfAttn(LayerNorm(x)) ---
        xn_f = _layer_norm(x, ln1a[l], ln1b[l])
        xn = xn_f.astype(jnp.bfloat16)                         # (S, D)
        xnT = jnp.transpose(xn_f).astype(jnp.bfloat16)         # (D, S), 1 transpose/layer

        def head_body(h, acc, _l=l):
            idx = _l * num_heads + h
            # Per-head projections straight from pre-split weights (no slices).
            q = (jnp.dot(xn, wq[idx], preferred_element_type=jnp.float32)
                 + bq[idx])                                    # (S, d_k)
            kT = (jnp.dot(wkT[idx], xnT, preferred_element_type=jnp.float32)
                  + bkT[idx])                                  # (d_k, S)
            v = (jnp.dot(xn, wv[idx], preferred_element_type=jnp.float32)
                 + bv[idx])                                    # (S, d_k)
            # Native (M,K)x(K,N) score matmul (K already transposed), bf16 operands.
            s = jnp.dot(q.astype(jnp.bfloat16), kT.astype(jnp.bfloat16),
                        preferred_element_type=jnp.float32) * scale   # (S, S)
            s = s - jnp.max(s, axis=-1, keepdims=True)
            e = jnp.exp(s)
            p = e * pl.reciprocal(jnp.sum(e, axis=-1, keepdims=True), approx=True)
            pv = jnp.dot(p.astype(jnp.bfloat16), v.astype(jnp.bfloat16),
                         preferred_element_type=jnp.float32)   # (S, d_k)
            # Fold the output projection into the head loop (no concat).
            return acc + jnp.dot(pv.astype(jnp.bfloat16), wo[idx],
                                 preferred_element_type=jnp.float32)  # (S, D)

        attn = jax.lax.fori_loop(0, num_heads, head_body,
                                 jnp.zeros((S, D), jnp.float32))
        x = x + attn + bo[l]

        # --- sublayer 1: x + FFN(LayerNorm(x)) ---
        xn2 = _layer_norm(x, ln2a[l], ln2b[l]).astype(jnp.bfloat16)
        hid = jnp.maximum(
            jnp.dot(xn2, w1[l], preferred_element_type=jnp.float32) + b1[l], 0.0)
        x = x + jnp.dot(hid.astype(jnp.bfloat16), w2[l],
                        preferred_element_type=jnp.float32) + b2[l]

    xn = _layer_norm(x, fa[...], fb[...])
    return jnp.sum(xn, axis=0, keepdims=True) * pool_scale     # (1, D)


# --------------------------------- kernel -------------------------------------

def transformer_m_kernel(x_ref, y_ref, *rest,
                         h_layers, h_heads, v_layers, v_heads,
                         h_pool_scale, v_pool_scale):
    h_refs = rest[0:18]
    v_refs = rest[18:36]
    dense_w, dense_b, linear_w, linear_b = rest[36:40]
    o_ref = rest[40]

    xp = _encoder_branch(x_ref[0], h_refs, h_layers, h_heads, h_pool_scale)  # (1, 90)
    yp = _encoder_branch(y_ref[0], v_refs, v_layers, v_heads, v_pool_scale)  # (1, 200)

    lx = jnp.dot(xp, dense_w[...], preferred_element_type=jnp.float32) + dense_b[...]
    ly = jnp.dot(yp, linear_w[...], preferred_element_type=jnp.float32) + linear_b[...]
    o_ref[0] = _log_softmax(lx) + _log_softmax(ly)                            # (1, 11)


# ------------------------------ pallas wrapper ---------------------------------

def _prep_branch(p, n_heads):
    """Host-side weight repacking for the kernel.

    Q/V weights -> (L*H, D, d_k); K weights pre-transposed -> (L*H, d_k, D);
    output projection split by input rows -> (L*H, d_k, D); matmul weights bf16,
    biases / LayerNorm params f32.
    """
    L, D, _ = p["wq"].shape
    d_k = D // n_heads
    bf = lambda a: a.astype(jnp.bfloat16)

    def split_out(w):        # (L, D, D) -> (L*H, D, d_k)
        return w.reshape(L, D, n_heads, d_k).transpose(0, 2, 1, 3).reshape(L * n_heads, D, d_k)

    def split_out_T(w):      # (L, D, D) -> (L*H, d_k, D)   (per-head transposed)
        return w.reshape(L, D, n_heads, d_k).transpose(0, 2, 3, 1).reshape(L * n_heads, d_k, D)

    def split_in(w):         # (L, D, D) -> (L*H, d_k, D)   (rows per head)
        return w.reshape(L, n_heads, d_k, D).reshape(L * n_heads, d_k, D)

    def split_bias(b):       # (L, 1, D) -> (L*H, 1, d_k)
        return b.reshape(L, n_heads, d_k).reshape(L * n_heads, 1, d_k)

    def split_bias_T(b):     # (L, 1, D) -> (L*H, d_k, 1)
        return b.reshape(L, n_heads, d_k).reshape(L * n_heads, d_k, 1)

    return [
        p["ln1_a"], p["ln1_b"],
        bf(split_out(p["wq"])), split_bias(p["bq"]),
        bf(split_out_T(p["wk"])), split_bias_T(p["bk"]),
        bf(split_out(p["wv"])), split_bias(p["bv"]),
        bf(split_in(p["wo"])), p["bo"],
        p["ln2_a"], p["ln2_b"],
        bf(p["w1"]), p["b1"], bf(p["w2"]), p["b2"],
        p["fa"], p["fb"],
    ]


def _const_spec(arr):
    nd = arr.ndim
    return pl.BlockSpec(arr.shape, lambda b, _nd=nd: (0,) * _nd)


def transformer_m_forward(data, params, args):
    B, L, d3 = data.shape                                           # (B, 200, 90)

    # Branch preprocessing (cheap XLA reshapes/sums, done once outside the kernel).
    x0 = data.reshape(B, -1, args.sample, d3).sum(axis=2) * (1.0 / args.sample)  # (B, 50, 90)
    y0 = jnp.swapaxes(data.reshape(B, 200, 3, 30).sum(axis=2), -1, -2)           # (B, 30, 200)
    Sx, Dx = x0.shape[1], x0.shape[2]
    Sy, Dy = y0.shape[1], y0.shape[2]

    hp = _prep_branch(params["h"], 9)
    vp = _prep_branch(params["v"], 20)
    tail = [params["dense_w"], params["dense_b"], params["linear_w"], params["linear_b"]]
    consts = hp + vp + tail

    kernel = functools.partial(
        transformer_m_kernel,
        h_layers=args.hlayers, h_heads=9,
        v_layers=args.vlayers, v_heads=20,
        h_pool_scale=1.0 / Sx,            # dx = x.size(1)
        v_pool_scale=1.0 / (Sy * 3))      # dy = y.size(1) * 3 (matches the module)

    out = pl.pallas_call(
        kernel,
        out_shape=jax.ShapeDtypeStruct((B, 1, 11), jnp.float32),
        grid=(B,),
        in_specs=[pl.BlockSpec((1, Sx, Dx), lambda b: (b, 0, 0)),
                  pl.BlockSpec((1, Sy, Dy), lambda b: (b, 0, 0))]
                 + [_const_spec(a) for a in consts],
        out_specs=pl.BlockSpec((1, 1, 11), lambda b: (b, 0, 0)),
        compiler_params=pltpu.CompilerParams(
            dimension_semantics=("parallel",)),   # v7x: batch across both TCs
    )(x0, y0, *consts)
    return out[:, 0, :]                                              # (B, 11)


# ------------------------------ parameter setup --------------------------------

def init_branch_params(key, d_model, n_layers, n_heads):
    assert d_model % n_heads == 0
    d_ff = 4 * d_model
    s = 0.05
    k = jax.random.split(key, 6)
    z = lambda *shape: jnp.zeros(shape, jnp.float32)
    return dict(
        ln1_a=jnp.ones((n_layers, 1, d_model), jnp.float32), ln1_b=z(n_layers, 1, d_model),
        wq=s * jax.random.normal(k[0], (n_layers, d_model, d_model), jnp.float32),
        bq=z(n_layers, 1, d_model),
        wk=s * jax.random.normal(k[1], (n_layers, d_model, d_model), jnp.float32),
        bk=z(n_layers, 1, d_model),
        wv=s * jax.random.normal(k[2], (n_layers, d_model, d_model), jnp.float32),
        bv=z(n_layers, 1, d_model),
        wo=s * jax.random.normal(k[3], (n_layers, d_model, d_model), jnp.float32),
        bo=z(n_layers, 1, d_model),
        ln2_a=jnp.ones((n_layers, 1, d_model), jnp.float32), ln2_b=z(n_layers, 1, d_model),
        w1=s * jax.random.normal(k[4], (n_layers, d_model, d_ff), jnp.float32),
        b1=z(n_layers, 1, d_ff),
        w2=s * jax.random.normal(k[5], (n_layers, d_ff, d_model), jnp.float32),
        b2=z(n_layers, 1, d_model),
        fa=jnp.ones((1, d_model), jnp.float32), fb=z(1, d_model),
    )


class Args:
    hlayers = 2   # horizontal transformer layers (d_model=90, 9 heads)
    vlayers = 1   # vertical transformer layers (d_model=200, 20 heads)
    sample = 4    # temporal pooling factor


# ----------------------------------- main ---------------------------------------

if __name__ == "__main__":
    args = Args()
    key = jax.random.PRNGKey(0)
    kd, kh, kv, kw1, kw2 = jax.random.split(key, 5)

    # The module's view(-1, 200, 3, 30) and Transformer(90, ...) force the input
    # layout (batch, 200, 90). Keep batch small.
    data = jax.random.normal(kd, (2, 200, 90), jnp.float32)

    params = dict(
        h=init_branch_params(kh, 90, args.hlayers, 9),
        v=init_branch_params(kv, 200, args.vlayers, 20),
        dense_w=0.05 * jax.random.normal(kw1, (90, 11), jnp.float32),
        dense_b=jnp.zeros((1, 11), jnp.float32),
        linear_w=0.05 * jax.random.normal(kw2, (200, 11), jnp.float32),
        linear_b=jnp.zeros((1, 11), jnp.float32),
    )

    fwd = jax.jit(functools.partial(transformer_m_forward, args=args))
    out = jax.block_until_ready(fwd(data, params))
    assert out.shape == (2, 11) and out.dtype == jnp.float32
    print("KERNEL_OK")
</pallas_src>

<mosaic_0001>
module attributes {stable_mosaic.version = 11 : i64} {
  func.func @transformer_m_kernel(%arg0: i32, %arg1: memref<1x50x90xf32, #tpu.memory_space<vmem>>, %arg2: memref<1x30x200xf32, #tpu.memory_space<vmem>>, %arg3: memref<2x1x90xf32, #tpu.memory_space<vmem>>, %arg4: memref<2x1x90xf32, #tpu.memory_space<vmem>>, %arg5: memref<18x90x10xbf16, #tpu.memory_space<vmem>>, %arg6: memref<18x1x10xf32, #tpu.memory_space<vmem>>, %arg7: memref<18x10x90xbf16, #tpu.memory_space<vmem>>, %arg8: memref<18x10x1xf32, #tpu.memory_space<vmem>>, %arg9: memref<18x90x10xbf16, #tpu.memory_space<vmem>>, %arg10: memref<18x1x10xf32, #tpu.memory_space<vmem>>, %arg11: memref<18x10x90xbf16, #tpu.memory_space<vmem>>, %arg12: memref<2x1x90xf32, #tpu.memory_space<vmem>>, %arg13: memref<2x1x90xf32, #tpu.memory_space<vmem>>, %arg14: memref<2x1x90xf32, #tpu.memory_space<vmem>>, %arg15: memref<2x90x360xbf16, #tpu.memory_space<vmem>>, %arg16: memref<2x1x360xf32, #tpu.memory_space<vmem>>, %arg17: memref<2x360x90xbf16, #tpu.memory_space<vmem>>, %arg18: memref<2x1x90xf32, #tpu.memory_space<vmem>>, %arg19: memref<1x90xf32, #tpu.memory_space<vmem>>, %arg20: memref<1x90xf32, #tpu.memory_space<vmem>>, %arg21: memref<1x1x200xf32, #tpu.memory_space<vmem>>, %arg22: memref<1x1x200xf32, #tpu.memory_space<vmem>>, %arg23: memref<20x200x10xbf16, #tpu.memory_space<vmem>>, %arg24: memref<20x1x10xf32, #tpu.memory_space<vmem>>, %arg25: memref<20x10x200xbf16, #tpu.memory_space<vmem>>, %arg26: memref<20x10x1xf32, #tpu.memory_space<vmem>>, %arg27: memref<20x200x10xbf16, #tpu.memory_space<vmem>>, %arg28: memref<20x1x10xf32, #tpu.memory_space<vmem>>, %arg29: memref<20x10x200xbf16, #tpu.memory_space<vmem>>, %arg30: memref<1x1x200xf32, #tpu.memory_space<vmem>>, %arg31: memref<1x1x200xf32, #tpu.memory_space<vmem>>, %arg32: memref<1x1x200xf32, #tpu.memory_space<vmem>>, %arg33: memref<1x200x800xbf16, #tpu.memory_space<vmem>>, %arg34: memref<1x1x800xf32, #tpu.memory_space<vmem>>, %arg35: memref<1x800x200xbf16, #tpu.memory_space<vmem>>, %arg36: memref<1x1x200xf32, #tpu.memory_space<vmem>>, %arg37: memref<1x200xf32, #tpu.memory_space<vmem>>, %arg38: memref<1x200xf32, #tpu.memory_space<vmem>>, %arg39: memref<90x11xf32, #tpu.memory_space<vmem>>, %arg40: memref<1x11xf32, #tpu.memory_space<vmem>>, %arg41: memref<200x11xf32, #tpu.memory_space<vmem>>, %arg42: memref<1x11xf32, #tpu.memory_space<vmem>>, %arg43: memref<1x1x11xf32, #tpu.memory_space<vmem>>) attributes {dimension_semantics = [#tpu.dimension_semantics<parallel>], iteration_bounds = array<i64: 2>, scalar_prefetch = 0 : i64, scratch_operands = 0 : i64, tpu.core_type = #tpu.core_type<tc>, window_params = [{transform_indices = @transform_0, window_bounds = array<i64: 1, 50, 90>}, {transform_indices = @transform_1, window_bounds = array<i64: 1, 30, 200>}, {pipeline_mode = #tpu.pipeline_mode<synchronous>, transform_indices = @transform_2, window_bounds = array<i64: 2, 1, 90>}, {pipeline_mode = #tpu.pipeline_mode<synchronous>, transform_indices = @transform_3, window_bounds = array<i64: 2, 1, 90>}, {pipeline_mode = #tpu.pipeline_mode<synchronous>, transform_indices = @transform_4, window_bounds = array<i64: 18, 90, 10>}, {pipeline_mode = #tpu.pipeline_mode<synchronous>, transform_indices = @transform_5, window_bounds = array<i64: 18, 1, 10>}, {pipeline_mode = #tpu.pipeline_mode<synchronous>, transform_indices = @transform_6, window_bounds = array<i64: 18, 10, 90>}, {pipeline_mode = #tpu.pipeline_mode<synchronous>, transform_indices = @transform_7, window_bounds = array<i64: 18, 10, 1>}, {pipeline_mode = #tpu.pipeline_mode<synchronous>, transform_indices = @transform_8, window_bounds = array<i64: 18, 90, 10>}, {pipeline_mode = #tpu.pipeline_mode<synchronous>, transform_indices = @transform_9, window_bounds = array<i64: 18, 1, 10>}, {pipeline_mode = #tpu.pipeline_mode<synchronous>, transform_indices = @transform_10, window_bounds = array<i64: 18, 10, 90>}, {pipeline_mode = #tpu.pipeline_mode<synchronous>, transform_indices = @transform_11, window_bounds = array<i64: 2, 1, 90>}, {pipeline_mode = #tpu.pipeline_mode<synchronous>, transform_indices = @transform_12, window_bounds = array<i64: 2, 1, 90>}, {pipeline_mode = #tpu.pipeline_mode<synchronous>, transform_indices = @transform_13, window_bounds = array<i64: 2, 1, 90>}, {pipeline_mode = #tpu.pipeline_mode<synchronous>, transform_indices = @transform_14, window_bounds = array<i64: 2, 90, 360>}, {pipeline_mode = #tpu.pipeline_mode<synchronous>, transform_indices = @transform_15, window_bounds = array<i64: 2, 1, 360>}, {pipeline_mode = #tpu.pipeline_mode<synchronous>, transform_indices = @transform_16, window_bounds = array<i64: 2, 360, 90>}, {pipeline_mode = #tpu.pipeline_mode<synchronous>, transform_indices = @transform_17, window_bounds = array<i64: 2, 1, 90>}, {pipeline_mode = #tpu.pipeline_mode<synchronous>, transform_indices = @transform_18, window_bounds = array<i64: 1, 90>}, {pipeline_mode = #tpu.pipeline_mode<synchronous>, transform_indices = @transform_19, window_bounds = array<i64: 1, 90>}, {pipeline_mode = #tpu.pipeline_mode<synchronous>, transform_indices = @transform_20, window_bounds = array<i64: 1, 1, 200>}, {pipeline_mode = #tpu.pipeline_mode<synchronous>, transform_indices = @transform_21, window_bounds = array<i64: 1, 1, 200>}, {pipeline_mode = #tpu.pipeline_mode<synchronous>, transform_indices = @transform_22, window_bounds = array<i64: 20, 200, 10>}, {pipeline_mode = #tpu.pipeline_mode<synchronous>, transform_indices = @transform_23, window_bounds = array<i64: 20, 1, 10>}, {pipeline_mode = #tpu.pipeline_mode<synchronous>, transform_indices = @transform_24, window_bounds = array<i64: 20, 10, 200>}, {pipeline_mode = #tpu.pipeline_mode<synchronous>, transform_indices = @transform_25, window_bounds = array<i64: 20, 10, 1>}, {pipeline_mode = #tpu.pipeline_mode<synchronous>, transform_indices = @transform_26, window_bounds = array<i64: 20, 200, 10>}, {pipeline_mode = #tpu.pipeline_mode<synchronous>, transform_indices = @transform_27, window_bounds = array<i64: 20, 1, 10>}, {pipeline_mode = #tpu.pipeline_mode<synchronous>, transform_indices = @transform_28, window_bounds = array<i64: 20, 10, 200>}, {pipeline_mode = #tpu.pipeline_mode<synchronous>, transform_indices = @transform_29, window_bounds = array<i64: 1, 1, 200>}, {pipeline_mode = #tpu.pipeline_mode<synchronous>, transform_indices = @transform_30, window_bounds = array<i64: 1, 1, 200>}, {pipeline_mode = #tpu.pipeline_mode<synchronous>, transform_indices = @transform_31, window_bounds = array<i64: 1, 1, 200>}, {pipeline_mode = #tpu.pipeline_mode<synchronous>, transform_indices = @transform_32, window_bounds = array<i64: 1, 200, 800>}, {pipeline_mode = #tpu.pipeline_mode<synchronous>, transform_indices = @transform_33, window_bounds = array<i64: 1, 1, 800>}, {pipeline_mode = #tpu.pipeline_mode<synchronous>, transform_indices = @transform_34, window_bounds = array<i64: 1, 800, 200>}, {pipeline_mode = #tpu.pipeline_mode<synchronous>, transform_indices = @transform_35, window_bounds = array<i64: 1, 1, 200>}, {pipeline_mode = #tpu.pipeline_mode<synchronous>, transform_indices = @transform_36, window_bounds = array<i64: 1, 200>}, {pipeline_mode = #tpu.pipeline_mode<synchronous>, transform_indices = @transform_37, window_bounds = array<i64: 1, 200>}, {pipeline_mode = #tpu.pipeline_mode<synchronous>, transform_indices = @transform_38, window_bounds = array<i64: 90, 11>}, {pipeline_mode = #tpu.pipeline_mode<synchronous>, transform_indices = @transform_39, window_bounds = array<i64: 1, 11>}, {pipeline_mode = #tpu.pipeline_mode<synchronous>, transform_indices = @transform_40, window_bounds = array<i64: 200, 11>}, {pipeline_mode = #tpu.pipeline_mode<synchronous>, transform_indices = @transform_41, window_bounds = array<i64: 1, 11>}, {transform_indices = @transform_42, window_bounds = array<i64: 1, 1, 11>}]} {
    %c0 = arith.constant 0 : index
    %c0_0 = arith.constant 0 : index
    %c0_1 = arith.constant 0 : index
    %0 = vector.load %arg1[%c0, %c0_0, %c0_1] : memref<1x50x90xf32, #tpu.memory_space<vmem>>, vector<1x50x90xf32>
    %1 = vector.shape_cast %0 : vector<1x50x90xf32> to vector<50x90xf32>
    %c0_2 = arith.constant 0 : index
    %c0_3 = arith.constant 0 : index
    %c0_4 = arith.constant 0 : index
    %2 = vector.load %arg3[%c0_2, %c0_3, %c0_4] : memref<2x1x90xf32, #tpu.memory_space<vmem>>, vector<1x1x90xf32>
    %3 = vector.shape_cast %2 : vector<1x1x90xf32> to vector<1x90xf32>
    %c0_5 = arith.constant 0 : index
    %c0_6 = arith.constant 0 : index
    %c0_7 = arith.constant 0 : index
    %4 = vector.load %arg4[%c0_5, %c0_6, %c0_7] : memref<2x1x90xf32, #tpu.memory_space<vmem>>, vector<1x1x90xf32>
    %5 = vector.shape_cast %4 : vector<1x1x90xf32> to vector<1x90xf32>
    %cst = arith.constant dense<0.000000e+00> : vector<50xf32>
    %6 = vector.multi_reduction <add>, %1, %cst [1] : vector<50x90xf32> to vector<50xf32>
    %7 = vector.shape_cast %6 : vector<50xf32> to vector<50x1xf32>
    %cst_8 = arith.constant 0.0111111114 : f32
    %8 = vector.broadcast %cst_8 : f32 to vector<50x1xf32>
    %9 = arith.mulf %7, %8 : vector<50x1xf32>
    %10 = vector.broadcast %9 : vector<50x1xf32> to vector<50x90xf32>
    %11 = arith.subf %1, %10 : vector<50x90xf32>
    %12 = arith.mulf %11, %11 : vector<50x90xf32>
    %cst_9 = arith.constant dense<0.000000e+00> : vector<50xf32>
    %13 = vector.multi_reduction <add>, %12, %cst_9 [1] : vector<50x90xf32> to vector<50xf32>
    %14 = vector.shape_cast %13 : vector<50xf32> to vector<50x1xf32>
    %cst_10 = arith.constant 0.0112359552 : f32
    %15 = vector.broadcast %cst_10 : f32 to vector<50x1xf32>
    %16 = arith.mulf %14, %15 : vector<50x1xf32>
    %17 = math.sqrt %16 : vector<50x1xf32>
    %18 = vector.broadcast %3 : vector<1x90xf32> to vector<50x90xf32>
    %19 = arith.mulf %18, %11 : vector<50x90xf32>
    %cst_11 = arith.constant 9.99999997E-7 : f32
    %20 = vector.broadcast %cst_11 : f32 to vector<50x1xf32>
    %21 = arith.addf %17, %20 : vector<50x1xf32>
    %cst_12 = arith.constant 1.000000e+00 : f32
    %22 = vector.broadcast %cst_12 : f32 to vector<50x1xf32>
    %23 = arith.divf %22, %21 : vector<50x1xf32>
    %24 = vector.broadcast %23 : vector<50x1xf32> to vector<50x90xf32>
    %25 = arith.mulf %19, %24 : vector<50x90xf32>
    %26 = vector.broadcast %5 : vector<1x90xf32> to vector<50x90xf32>
    %27 = arith.addf %25, %26 : vector<50x90xf32>
    %28 = arith.truncf %27 : vector<50x90xf32> to vector<50x90xbf16>
    %29 = tpu.transpose %27, [1, 0] : vector<50x90xf32> -> vector<90x50xf32>
    %30 = arith.truncf %29 : vector<90x50xf32> to vector<90x50xbf16>
    %cst_13 = arith.constant 0.000000e+00 : f32
    %31 = vector.broadcast %cst_13 : f32 to vector<50x90xf32>
    %c0_i32 = arith.constant 0 : i32
    %c9_i32 = arith.constant 9 : i32
    %32 = arith.addi %c0_i32, %c9_i32 : i32
    %c1_i32 = arith.constant 1 : i32
    %33 = scf.for %arg44 = %c0_i32 to %32 step %c1_i32 iter_args(%arg45 = %31) -> (vector<50x90xf32>)  : i32 {
      %c0_i32_181 = arith.constant 0 : i32
      %338 = arith.addi %c0_i32_181, %arg44 : i32
      %339 = arith.index_cast %338 : i32 to index
      %c0_182 = arith.constant 0 : index
      %c0_183 = arith.constant 0 : index
      %340 = vector.load %arg5[%339, %c0_182, %c0_183] : memref<18x90x10xbf16, #tpu.memory_space<vmem>>, vector<1x90x10xbf16>
      %341 = vector.shape_cast %340 : vector<1x90x10xbf16> to vector<90x10xbf16>
      %cst_184 = arith.constant dense<0.000000e+00> : vector<50x10xf32>
      %342 = tpu.matmul %28, %341, %cst_184 {dimension_numbers = #tpu.dot_dimension_numbers<[1], [0], [0], [1], [0, 0, 1, 1], [], []>} : vector<50x90xbf16>, vector<90x10xbf16>, vector<50x10xf32> -> vector<50x10xf32>
      %343 = arith.index_cast %338 : i32 to index
      %c0_185 = arith.constant 0 : index
      %c0_186 = arith.constant 0 : index
      %344 = vector.load %arg6[%343, %c0_185, %c0_186] : memref<18x1x10xf32, #tpu.memory_space<vmem>>, vector<1x1x10xf32>
      %345 = vector.shape_cast %344 : vector<1x1x10xf32> to vector<1x10xf32>
      %346 = vector.broadcast %345 : vector<1x10xf32> to vector<50x10xf32>
      %347 = arith.addf %342, %346 : vector<50x10xf32>
      %348 = arith.index_cast %338 : i32 to index
      %c0_187 = arith.constant 0 : index
      %c0_188 = arith.constant 0 : index
      %349 = vector.load %arg7[%348, %c0_187, %c0_188] : memref<18x10x90xbf16, #tpu.memory_space<vmem>>, vector<1x10x90xbf16>
      %350 = vector.shape_cast %349 : vector<1x10x90xbf16> to vector<10x90xbf16>
      %cst_189 = arith.constant dense<0.000000e+00> : vector<10x50xf32>
      %351 = tpu.matmul %350, %30, %cst_189 {dimension_numbers = #tpu.dot_dimension_numbers<[1], [0], [0], [1], [0, 0, 1, 1], [], []>} : vector<10x90xbf16>, vector<90x50xbf16>, vector<10x50xf32> -> vector<10x50xf32>
      %352 = arith.index_cast %338 : i32 to index
      %c0_190 = arith.constant 0 : index
      %c0_191 = arith.constant 0 : index
      %353 = vector.load %arg8[%352, %c0_190, %c0_191] : memref<18x10x1xf32, #tpu.memory_space<vmem>>, vector<1x10x1xf32>
      %354 = vector.shape_cast %353 : vector<1x10x1xf32> to vector<10x1xf32>
      %355 = vector.broadcast %354 : vector<10x1xf32> to vector<10x50xf32>
      %356 = arith.addf %351, %355 : vector<10x50xf32>
      %357 = arith.index_cast %338 : i32 to index
      %c0_192 = arith.constant 0 : index
      %c0_193 = arith.constant 0 : index
      %358 = vector.load %arg9[%357, %c0_192, %c0_193] : memref<18x90x10xbf16, #tpu.memory_space<vmem>>, vector<1x90x10xbf16>
      %359 = vector.shape_cast %358 : vector<1x90x10xbf16> to vector<90x10xbf16>
      %cst_194 = arith.constant dense<0.000000e+00> : vector<50x10xf32>
      %360 = tpu.matmul %28, %359, %cst_194 {dimension_numbers = #tpu.dot_dimension_numbers<[1], [0], [0], [1], [0, 0, 1, 1], [], []>} : vector<50x90xbf16>, vector<90x10xbf16>, vector<50x10xf32> -> vector<50x10xf32>
      %361 = arith.index_cast %338 : i32 to index
      %c0_195 = arith.constant 0 : index
      %c0_196 = arith.constant 0 : index
      %362 = vector.load %arg10[%361, %c0_195, %c0_196] : memref<18x1x10xf32, #tpu.memory_space<vmem>>, vector<1x1x10xf32>
      %363 = vector.shape_cast %362 : vector<1x1x10xf32> to vector<1x10xf32>
      %364 = vector.broadcast %363 : vector<1x10xf32> to vector<50x10xf32>
      %365 = arith.addf %360, %364 : vector<50x10xf32>
      %366 = arith.truncf %347 : vector<50x10xf32> to vector<50x10xbf16>
      %367 = arith.truncf %356 : vector<10x50xf32> to vector<10x50xbf16>
      %cst_197 = arith.constant dense<0.000000e+00> : vector<50x50xf32>
      %368 = tpu.matmul %366, %367, %cst_197 {dimension_numbers = #tpu.dot_dimension_numbers<[1], [0], [0], [1], [0, 0, 1, 1], [], []>} : vector<50x10xbf16>, vector<10x50xbf16>, vector<50x50xf32> -> vector<50x50xf32>
      %cst_198 = arith.constant 0.316227764 : f32
      %369 = vector.broadcast %cst_198 : f32 to vector<50x50xf32>
      %370 = arith.mulf %368, %369 : vector<50x50xf32>
      %cst_199 = arith.constant dense<0xFF800000> : vector<50xf32>
      %371 = vector.multi_reduction <maximumf>, %370, %cst_199 [1] : vector<50x50xf32> to vector<50xf32>
      %372 = vector.shape_cast %371 : vector<50xf32> to vector<50x1xf32>
      %373 = vector.broadcast %372 : vector<50x1xf32> to vector<50x50xf32>
      %374 = arith.subf %370, %373 : vector<50x50xf32>
      %375 = math.exp %374 : vector<50x50xf32>
      %cst_200 = arith.constant dense<0.000000e+00> : vector<50xf32>
      %376 = vector.multi_reduction <add>, %375, %cst_200 [1] : vector<50x50xf32> to vector<50xf32>
      %377 = vector.shape_cast %376 : vector<50xf32> to vector<50x1xf32>
      %378 = tpu.reciprocal %377 {approx = true} : vector<50x1xf32> -> vector<50x1xf32>
      %379 = vector.broadcast %378 : vector<50x1xf32> to vector<50x50xf32>
      %380 = arith.mulf %375, %379 : vector<50x50xf32>
      %381 = arith.truncf %380 : vector<50x50xf32> to vector<50x50xbf16>
      %382 = arith.truncf %365 : vector<50x10xf32> to vector<50x10xbf16>
      %cst_201 = arith.constant dense<0.000000e+00> : vector<50x10xf32>
      %383 = tpu.matmul %381, %382, %cst_201 {dimension_numbers = #tpu.dot_dimension_numbers<[1], [0], [0], [1], [0, 0, 1, 1], [], []>} : vector<50x50xbf16>, vector<50x10xbf16>, vector<50x10xf32> -> vector<50x10xf32>
      %384 = arith.truncf %383 : vector<50x10xf32> to vector<50x10xbf16>
      %385 = arith.index_cast %338 : i32 to index
      %c0_202 = arith.constant 0 : index
      %c0_203 = arith.constant 0 : index
      %386 = vector.load %arg11[%385, %c0_202, %c0_203] : memref<18x10x90xbf16, #tpu.memory_space<vmem>>, vector<1x10x90xbf16>
      %387 = vector.shape_cast %386 : vector<1x10x90xbf16> to vector<10x90xbf16>
      %cst_204 = arith.constant dense<0.000000e+00> : vector<50x90xf32>
      %388 = tpu.matmul %384, %387, %cst_204 {dimension_numbers = #tpu.dot_dimension_numbers<[1], [0], [0], [1], [0, 0, 1, 1], [], []>} : vector<50x10xbf16>, vector<10x90xbf16>, vector<50x90xf32> -> vector<50x90xf32>
      %389 = arith.addf %arg45, %388 : vector<50x90xf32>
      scf.yield %389 : vector<50x90xf32>
    }
    %c9_i32_14 = arith.constant 9 : i32
    %34 = arith.addf %1, %33 : vector<50x90xf32>
    %c0_15 = arith.constant 0 : index
    %c0_16 = arith.constant 0 : index
    %c0_17 = arith.constant 0 : index
    %35 = vector.load %arg12[%c0_15, %c0_16, %c0_17] : memref<2x1x90xf32, #tpu.memory_space<vmem>>, vector<1x1x90xf32>
    %36 = vector.shape_cast %35 : vector<1x1x90xf32> to vector<1x90xf32>
    %37 = vector.broadcast %36 : vector<1x90xf32> to vector<50x90xf32>
    %38 = arith.addf %34, %37 : vector<50x90xf32>
    %c0_18 = arith.constant 0 : index
    %c0_19 = arith.constant 0 : index
    %c0_20 = arith.constant 0 : index
    %39 = vector.load %arg13[%c0_18, %c0_19, %c0_20] : memref<2x1x90xf32, #tpu.memory_space<vmem>>, vector<1x1x90xf32>
    %40 = vector.shape_cast %39 : vector<1x1x90xf32> to vector<1x90xf32>
    %c0_21 = arith.constant 0 : index
    %c0_22 = arith.constant 0 : index
    %c0_23 = arith.constant 0 : index
    %41 = vector.load %arg14[%c0_21, %c0_22, %c0_23] : memref<2x1x90xf32, #tpu.memory_space<vmem>>, vector<1x1x90xf32>
    %42 = vector.shape_cast %41 : vector<1x1x90xf32> to vector<1x90xf32>
    %cst_24 = arith.constant dense<0.000000e+00> : vector<50xf32>
    %43 = vector.multi_reduction <add>, %38, %cst_24 [1] : vector<50x90xf32> to vector<50xf32>
    %44 = vector.shape_cast %43 : vector<50xf32> to vector<50x1xf32>
    %cst_25 = arith.constant 0.0111111114 : f32
    %45 = vector.broadcast %cst_25 : f32 to vector<50x1xf32>
    %46 = arith.mulf %44, %45 : vector<50x1xf32>
    %47 = vector.broadcast %46 : vector<50x1xf32> to vector<50x90xf32>
    %48 = arith.subf %38, %47 : vector<50x90xf32>
    %49 = arith.mulf %48, %48 : vector<50x90xf32>
    %cst_26 = arith.constant dense<0.000000e+00> : vector<50xf32>
    %50 = vector.multi_reduction <add>, %49, %cst_26 [1] : vector<50x90xf32> to vector<50xf32>
    %51 = vector.shape_cast %50 : vector<50xf32> to vector<50x1xf32>
    %cst_27 = arith.constant 0.0112359552 : f32
    %52 = vector.broadcast %cst_27 : f32 to vector<50x1xf32>
    %53 = arith.mulf %51, %52 : vector<50x1xf32>
    %54 = math.sqrt %53 : vector<50x1xf32>
    %55 = vector.broadcast %40 : vector<1x90xf32> to vector<50x90xf32>
    %56 = arith.mulf %55, %48 : vector<50x90xf32>
    %cst_28 = arith.constant 9.99999997E-7 : f32
    %57 = vector.broadcast %cst_28 : f32 to vector<50x1xf32>
    %58 = arith.addf %54, %57 : vector<50x1xf32>
    %cst_29 = arith.constant 1.000000e+00 : f32
    %59 = vector.broadcast %cst_29 : f32 to vector<50x1xf32>
    %60 = arith.divf %59, %58 : vector<50x1xf32>
    %61 = vector.broadcast %60 : vector<50x1xf32> to vector<50x90xf32>
    %62 = arith.mulf %56, %61 : vector<50x90xf32>
    %63 = vector.broadcast %42 : vector<1x90xf32> to vector<50x90xf32>
    %64 = arith.addf %62, %63 : vector<50x90xf32>
    %65 = arith.truncf %64 : vector<50x90xf32> to vector<50x90xbf16>
    %c0_30 = arith.constant 0 : index
    %c0_31 = arith.constant 0 : index
    %c0_32 = arith.constant 0 : index
    %66 = vector.load %arg15[%c0_30, %c0_31, %c0_32] : memref<2x90x360xbf16, #tpu.memory_space<vmem>>, vector<1x90x360xbf16>
    %67 = vector.shape_cast %66 : vector<1x90x360xbf16> to vector<90x360xbf16>
    %cst_33 = arith.constant dense<0.000000e+00> : vector<50x360xf32>
    %68 = tpu.matmul %65, %67, %cst_33 {dimension_numbers = #tpu.dot_dimension_numbers<[1], [0], [0], [1], [0, 0, 1, 1], [], []>} : vector<50x90xbf16>, vector<90x360xbf16>, vector<50x360xf32> -> vector<50x360xf32>
    %c0_34 = arith.constant 0 : index
    %c0_35 = arith.constant 0 : index
    %c0_36 = arith.constant 0 : index
    %69 = vector.load %arg16[%c0_34, %c0_35, %c0_36] : memref<2x1x360xf32, #tpu.memory_space<vmem>>, vector<1x1x360xf32>
    %70 = vector.shape_cast %69 : vector<1x1x360xf32> to vector<1x360xf32>
    %71 = vector.broadcast %70 : vector<1x360xf32> to vector<50x360xf32>
    %72 = arith.addf %68, %71 : vector<50x360xf32>
    %cst_37 = arith.constant 0.000000e+00 : f32
    %73 = vector.broadcast %cst_37 : f32 to vector<50x360xf32>
    %74 = arith.maximumf %72, %73 : vector<50x360xf32>
    %75 = arith.truncf %74 : vector<50x360xf32> to vector<50x360xbf16>
    %c0_38 = arith.constant 0 : index
    %c0_39 = arith.constant 0 : index
    %c0_40 = arith.constant 0 : index
    %76 = vector.load %arg17[%c0_38, %c0_39, %c0_40] : memref<2x360x90xbf16, #tpu.memory_space<vmem>>, vector<1x360x90xbf16>
    %77 = vector.shape_cast %76 : vector<1x360x90xbf16> to vector<360x90xbf16>
    %cst_41 = arith.constant dense<0.000000e+00> : vector<50x90xf32>
    %78 = tpu.matmul %75, %77, %cst_41 {dimension_numbers = #tpu.dot_dimension_numbers<[1], [0], [0], [1], [0, 0, 1, 1], [], []>} : vector<50x360xbf16>, vector<360x90xbf16>, vector<50x90xf32> -> vector<50x90xf32>
    %79 = arith.addf %38, %78 : vector<50x90xf32>
    %c0_42 = arith.constant 0 : index
    %c0_43 = arith.constant 0 : index
    %c0_44 = arith.constant 0 : index
    %80 = vector.load %arg18[%c0_42, %c0_43, %c0_44] : memref<2x1x90xf32, #tpu.memory_space<vmem>>, vector<1x1x90xf32>
    %81 = vector.shape_cast %80 : vector<1x1x90xf32> to vector<1x90xf32>
    %82 = vector.broadcast %81 : vector<1x90xf32> to vector<50x90xf32>
    %83 = arith.addf %79, %82 : vector<50x90xf32>
    %c1 = arith.constant 1 : index
    %c0_45 = arith.constant 0 : index
    %c0_46 = arith.constant 0 : index
    %84 = vector.load %arg3[%c1, %c0_45, %c0_46] : memref<2x1x90xf32, #tpu.memory_space<vmem>>, vector<1x1x90xf32>
    %85 = vector.shape_cast %84 : vector<1x1x90xf32> to vector<1x90xf32>
    %c1_47 = arith.constant 1 : index
    %c0_48 = arith.constant 0 : index
    %c0_49 = arith.constant 0 : index
    %86 = vector.load %arg4[%c1_47, %c0_48, %c0_49] : memref<2x1x90xf32, #tpu.memory_space<vmem>>, vector<1x1x90xf32>
    %87 = vector.shape_cast %86 : vector<1x1x90xf32> to vector<1x90xf32>
    %cst_50 = arith.constant dense<0.000000e+00> : vector<50xf32>
    %88 = vector.multi_reduction <add>, %83, %cst_50 [1] : vector<50x90xf32> to vector<50xf32>
    %89 = vector.shape_cast %88 : vector<50xf32> to vector<50x1xf32>
    %cst_51 = arith.constant 0.0111111114 : f32
    %90 = vector.broadcast %cst_51 : f32 to vector<50x1xf32>
    %91 = arith.mulf %89, %90 : vector<50x1xf32>
    %92 = vector.broadcast %91 : vector<50x1xf32> to vector<50x90xf32>
    %93 = arith.subf %83, %92 : vector<50x90xf32>
    %94 = arith.mulf %93, %93 : vector<50x90xf32>
    %cst_52 = arith.constant dense<0.000000e+00> : vector<50xf32>
    %95 = vector.multi_reduction <add>, %94, %cst_52 [1] : vector<50x90xf32> to vector<50xf32>
    %96 = vector.shape_cast %95 : vector<50xf32> to vector<50x1xf32>
    %cst_53 = arith.constant 0.0112359552 : f32
    %97 = vector.broadcast %cst_53 : f32 to vector<50x1xf32>
    %98 = arith.mulf %96, %97 : vector<50x1xf32>
    %99 = math.sqrt %98 : vector<50x1xf32>
    %100 = vector.broadcast %85 : vector<1x90xf32> to vector<50x90xf32>
    %101 = arith.mulf %100, %93 : vector<50x90xf32>
    %cst_54 = arith.constant 9.99999997E-7 : f32
    %102 = vector.broadcast %cst_54 : f32 to vector<50x1xf32>
    %103 = arith.addf %99, %102 : vector<50x1xf32>
    %cst_55 = arith.constant 1.000000e+00 : f32
    %104 = vector.broadcast %cst_55 : f32 to vector<50x1xf32>
    %105 = arith.divf %104, %103 : vector<50x1xf32>
    %106 = vector.broadcast %105 : vector<50x1xf32> to vector<50x90xf32>
    %107 = arith.mulf %101, %106 : vector<50x90xf32>
    %108 = vector.broadcast %87 : vector<1x90xf32> to vector<50x90xf32>
    %109 = arith.addf %107, %108 : vector<50x90xf32>
    %110 = arith.truncf %109 : vector<50x90xf32> to vector<50x90xbf16>
    %111 = tpu.transpose %109, [1, 0] : vector<50x90xf32> -> vector<90x50xf32>
    %112 = arith.truncf %111 : vector<90x50xf32> to vector<90x50xbf16>
    %cst_56 = arith.constant 0.000000e+00 : f32
    %113 = vector.broadcast %cst_56 : f32 to vector<50x90xf32>
    %c0_i32_57 = arith.constant 0 : i32
    %c9_i32_58 = arith.constant 9 : i32
    %114 = arith.addi %c0_i32_57, %c9_i32_58 : i32
    %c1_i32_59 = arith.constant 1 : i32
    %115 = scf.for %arg44 = %c0_i32_57 to %114 step %c1_i32_59 iter_args(%arg45 = %113) -> (vector<50x90xf32>)  : i32 {
      %c9_i32_181 = arith.constant 9 : i32
      %338 = arith.addi %c9_i32_181, %arg44 : i32
      %339 = arith.index_cast %338 : i32 to index
      %c0_182 = arith.constant 0 : index
      %c0_183 = arith.constant 0 : index
      %340 = vector.load %arg5[%339, %c0_182, %c0_183] : memref<18x90x10xbf16, #tpu.memory_space<vmem>>, vector<1x90x10xbf16>
      %341 = vector.shape_cast %340 : vector<1x90x10xbf16> to vector<90x10xbf16>
      %cst_184 = arith.constant dense<0.000000e+00> : vector<50x10xf32>
      %342 = tpu.matmul %110, %341, %cst_184 {dimension_numbers = #tpu.dot_dimension_numbers<[1], [0], [0], [1], [0, 0, 1, 1], [], []>} : vector<50x90xbf16>, vector<90x10xbf16>, vector<50x10xf32> -> vector<50x10xf32>
      %343 = arith.index_cast %338 : i32 to index
      %c0_185 = arith.constant 0 : index
      %c0_186 = arith.constant 0 : index
      %344 = vector.load %arg6[%343, %c0_185, %c0_186] : memref<18x1x10xf32, #tpu.memory_space<vmem>>, vector<1x1x10xf32>
      %345 = vector.shape_cast %344 : vector<1x1x10xf32> to vector<1x10xf32>
      %346 = vector.broadcast %345 : vector<1x10xf32> to vector<50x10xf32>
      %347 = arith.addf %342, %346 : vector<50x10xf32>
      %348 = arith.index_cast %338 : i32 to index
      %c0_187 = arith.constant 0 : index
      %c0_188 = arith.constant 0 : index
      %349 = vector.load %arg7[%348, %c0_187, %c0_188] : memref<18x10x90xbf16, #tpu.memory_space<vmem>>, vector<1x10x90xbf16>
      %350 = vector.shape_cast %349 : vector<1x10x90xbf16> to vector<10x90xbf16>
      %cst_189 = arith.constant dense<0.000000e+00> : vector<10x50xf32>
      %351 = tpu.matmul %350, %112, %cst_189 {dimension_numbers = #tpu.dot_dimension_numbers<[1], [0], [0], [1], [0, 0, 1, 1], [], []>} : vector<10x90xbf16>, vector<90x50xbf16>, vector<10x50xf32> -> vector<10x50xf32>
      %352 = arith.index_cast %338 : i32 to index
      %c0_190 = arith.constant 0 : index
      %c0_191 = arith.constant 0 : index
      %353 = vector.load %arg8[%352, %c0_190, %c0_191] : memref<18x10x1xf32, #tpu.memory_space<vmem>>, vector<1x10x1xf32>
      %354 = vector.shape_cast %353 : vector<1x10x1xf32> to vector<10x1xf32>
      %355 = vector.broadcast %354 : vector<10x1xf32> to vector<10x50xf32>
      %356 = arith.addf %351, %355 : vector<10x50xf32>
      %357 = arith.index_cast %338 : i32 to index
      %c0_192 = arith.constant 0 : index
      %c0_193 = arith.constant 0 : index
      %358 = vector.load %arg9[%357, %c0_192, %c0_193] : memref<18x90x10xbf16, #tpu.memory_space<vmem>>, vector<1x90x10xbf16>
      %359 = vector.shape_cast %358 : vector<1x90x10xbf16> to vector<90x10xbf16>
      %cst_194 = arith.constant dense<0.000000e+00> : vector<50x10xf32>
      %360 = tpu.matmul %110, %359, %cst_194 {dimension_numbers = #tpu.dot_dimension_numbers<[1], [0], [0], [1], [0, 0, 1, 1], [], []>} : vector<50x90xbf16>, vector<90x10xbf16>, vector<50x10xf32> -> vector<50x10xf32>
      %361 = arith.index_cast %338 : i32 to index
      %c0_195 = arith.constant 0 : index
      %c0_196 = arith.constant 0 : index
      %362 = vector.load %arg10[%361, %c0_195, %c0_196] : memref<18x1x10xf32, #tpu.memory_space<vmem>>, vector<1x1x10xf32>
      %363 = vector.shape_cast %362 : vector<1x1x10xf32> to vector<1x10xf32>
      %364 = vector.broadcast %363 : vector<1x10xf32> to vector<50x10xf32>
      %365 = arith.addf %360, %364 : vector<50x10xf32>
      %366 = arith.truncf %347 : vector<50x10xf32> to vector<50x10xbf16>
      %367 = arith.truncf %356 : vector<10x50xf32> to vector<10x50xbf16>
      %cst_197 = arith.constant dense<0.000000e+00> : vector<50x50xf32>
      %368 = tpu.matmul %366, %367, %cst_197 {dimension_numbers = #tpu.dot_dimension_numbers<[1], [0], [0], [1], [0, 0, 1, 1], [], []>} : vector<50x10xbf16>, vector<10x50xbf16>, vector<50x50xf32> -> vector<50x50xf32>
      %cst_198 = arith.constant 0.316227764 : f32
      %369 = vector.broadcast %cst_198 : f32 to vector<50x50xf32>
      %370 = arith.mulf %368, %369 : vector<50x50xf32>
      %cst_199 = arith.constant dense<0xFF800000> : vector<50xf32>
      %371 = vector.multi_reduction <maximumf>, %370, %cst_199 [1] : vector<50x50xf32> to vector<50xf32>
      %372 = vector.shape_cast %371 : vector<50xf32> to vector<50x1xf32>
      %373 = vector.broadcast %372 : vector<50x1xf32> to vector<50x50xf32>
      %374 = arith.subf %370, %373 : vector<50x50xf32>
      %375 = math.exp %374 : vector<50x50xf32>
      %cst_200 = arith.constant dense<0.000000e+00> : vector<50xf32>
      %376 = vector.multi_reduction <add>, %375, %cst_200 [1] : vector<50x50xf32> to vector<50xf32>
      %377 = vector.shape_cast %376 : vector<50xf32> to vector<50x1xf32>
      %378 = tpu.reciprocal %377 {approx = true} : vector<50x1xf32> -> vector<50x1xf32>
      %379 = vector.broadcast %378 : vector<50x1xf32> to vector<50x50xf32>
      %380 = arith.mulf %375, %379 : vector<50x50xf32>
      %381 = arith.truncf %380 : vector<50x50xf32> to vector<50x50xbf16>
      %382 = arith.truncf %365 : vector<50x10xf32> to vector<50x10xbf16>
      %cst_201 = arith.constant dense<0.000000e+00> : vector<50x10xf32>
      %383 = tpu.matmul %381, %382, %cst_201 {dimension_numbers = #tpu.dot_dimension_numbers<[1], [0], [0], [1], [0, 0, 1, 1], [], []>} : vector<50x50xbf16>, vector<50x10xbf16>, vector<50x10xf32> -> vector<50x10xf32>
      %384 = arith.truncf %383 : vector<50x10xf32> to vector<50x10xbf16>
      %385 = arith.index_cast %338 : i32 to index
      %c0_202 = arith.constant 0 : index
      %c0_203 = arith.constant 0 : index
      %386 = vector.load %arg11[%385, %c0_202, %c0_203] : memref<18x10x90xbf16, #tpu.memory_space<vmem>>, vector<1x10x90xbf16>
      %387 = vector.shape_cast %386 : vector<1x10x90xbf16> to vector<10x90xbf16>
      %cst_204 = arith.constant dense<0.000000e+00> : vector<50x90xf32>
      %388 = tpu.matmul %384, %387, %cst_204 {dimension_numbers = #tpu.dot_dimension_numbers<[1], [0], [0], [1], [0, 0, 1, 1], [], []>} : vector<50x10xbf16>, vector<10x90xbf16>, vector<50x90xf32> -> vector<50x90xf32>
      %389 = arith.addf %arg45, %388 : vector<50x90xf32>
      scf.yield %389 : vector<50x90xf32>
    }
    %c9_i32_60 = arith.constant 9 : i32
    %116 = arith.addf %83, %115 : vector<50x90xf32>
    %c1_61 = arith.constant 1 : index
    %c0_62 = arith.constant 0 : index
    %c0_63 = arith.constant 0 : index
    %117 = vector.load %arg12[%c1_61, %c0_62, %c0_63] : memref<2x1x90xf32, #tpu.memory_space<vmem>>, vector<1x1x90xf32>
    %118 = vector.shape_cast %117 : vector<1x1x90xf32> to vector<1x90xf32>
    %119 = vector.broadcast %118 : vector<1x90xf32> to vector<50x90xf32>
    %120 = arith.addf %116, %119 : vector<50x90xf32>
    %c1_64 = arith.constant 1 : index
    %c0_65 = arith.constant 0 : index
    %c0_66 = arith.constant 0 : index
    %121 = vector.load %arg13[%c1_64, %c0_65, %c0_66] : memref<2x1x90xf32, #tpu.memory_space<vmem>>, vector<1x1x90xf32>
    %122 = vector.shape_cast %121 : vector<1x1x90xf32> to vector<1x90xf32>
    %c1_67 = arith.constant 1 : index
    %c0_68 = arith.constant 0 : index
    %c0_69 = arith.constant 0 : index
    %123 = vector.load %arg14[%c1_67, %c0_68, %c0_69] : memref<2x1x90xf32, #tpu.memory_space<vmem>>, vector<1x1x90xf32>
    %124 = vector.shape_cast %123 : vector<1x1x90xf32> to vector<1x90xf32>
    %cst_70 = arith.constant dense<0.000000e+00> : vector<50xf32>
    %125 = vector.multi_reduction <add>, %120, %cst_70 [1] : vector<50x90xf32> to vector<50xf32>
    %126 = vector.shape_cast %125 : vector<50xf32> to vector<50x1xf32>
    %cst_71 = arith.constant 0.0111111114 : f32
    %127 = vector.broadcast %cst_71 : f32 to vector<50x1xf32>
    %128 = arith.mulf %126, %127 : vector<50x1xf32>
    %129 = vector.broadcast %128 : vector<50x1xf32> to vector<50x90xf32>
    %130 = arith.subf %120, %129 : vector<50x90xf32>
    %131 = arith.mulf %130, %130 : vector<50x90xf32>
    %cst_72 = arith.constant dense<0.000000e+00> : vector<50xf32>
    %132 = vector.multi_reduction <add>, %131, %cst_72 [1] : vector<50x90xf32> to vector<50xf32>
    %133 = vector.shape_cast %132 : vector<50xf32> to vector<50x1xf32>
    %cst_73 = arith.constant 0.0112359552 : f32
    %134 = vector.broadcast %cst_73 : f32 to vector<50x1xf32>
    %135 = arith.mulf %133, %134 : vector<50x1xf32>
    %136 = math.sqrt %135 : vector<50x1xf32>
    %137 = vector.broadcast %122 : vector<1x90xf32> to vector<50x90xf32>
    %138 = arith.mulf %137, %130 : vector<50x90xf32>
    %cst_74 = arith.constant 9.99999997E-7 : f32
    %139 = vector.broadcast %cst_74 : f32 to vector<50x1xf32>
    %140 = arith.addf %136, %139 : vector<50x1xf32>
    %cst_75 = arith.constant 1.000000e+00 : f32
    %141 = vector.broadcast %cst_75 : f32 to vector<50x1xf32>
    %142 = arith.divf %141, %140 : vector<50x1xf32>
    %143 = vector.broadcast %142 : vector<50x1xf32> to vector<50x90xf32>
    %144 = arith.mulf %138, %143 : vector<50x90xf32>
    %145 = vector.broadcast %124 : vector<1x90xf32> to vector<50x90xf32>
    %146 = arith.addf %144, %145 : vector<50x90xf32>
    %147 = arith.truncf %146 : vector<50x90xf32> to vector<50x90xbf16>
    %c1_76 = arith.constant 1 : index
    %c0_77 = arith.constant 0 : index
    %c0_78 = arith.constant 0 : index
    %148 = vector.load %arg15[%c1_76, %c0_77, %c0_78] : memref<2x90x360xbf16, #tpu.memory_space<vmem>>, vector<1x90x360xbf16>
    %149 = vector.shape_cast %148 : vector<1x90x360xbf16> to vector<90x360xbf16>
    %cst_79 = arith.constant dense<0.000000e+00> : vector<50x360xf32>
    %150 = tpu.matmul %147, %149, %cst_79 {dimension_numbers = #tpu.dot_dimension_numbers<[1], [0], [0], [1], [0, 0, 1, 1], [], []>} : vector<50x90xbf16>, vector<90x360xbf16>, vector<50x360xf32> -> vector<50x360xf32>
    %c1_80 = arith.constant 1 : index
    %c0_81 = arith.constant 0 : index
    %c0_82 = arith.constant 0 : index
    %151 = vector.load %arg16[%c1_80, %c0_81, %c0_82] : memref<2x1x360xf32, #tpu.memory_space<vmem>>, vector<1x1x360xf32>
    %152 = vector.shape_cast %151 : vector<1x1x360xf32> to vector<1x360xf32>
    %153 = vector.broadcast %152 : vector<1x360xf32> to vector<50x360xf32>
    %154 = arith.addf %150, %153 : vector<50x360xf32>
    %cst_83 = arith.constant 0.000000e+00 : f32
    %155 = vector.broadcast %cst_83 : f32 to vector<50x360xf32>
    %156 = arith.maximumf %154, %155 : vector<50x360xf32>
    %157 = arith.truncf %156 : vector<50x360xf32> to vector<50x360xbf16>
    %c1_84 = arith.constant 1 : index
    %c0_85 = arith.constant 0 : index
    %c0_86 = arith.constant 0 : index
    %158 = vector.load %arg17[%c1_84, %c0_85, %c0_86] : memref<2x360x90xbf16, #tpu.memory_space<vmem>>, vector<1x360x90xbf16>
    %159 = vector.shape_cast %158 : vector<1x360x90xbf16> to vector<360x90xbf16>
    %cst_87 = arith.constant dense<0.000000e+00> : vector<50x90xf32>
    %160 = tpu.matmul %157, %159, %cst_87 {dimension_numbers = #tpu.dot_dimension_numbers<[1], [0], [0], [1], [0, 0, 1, 1], [], []>} : vector<50x360xbf16>, vector<360x90xbf16>, vector<50x90xf32> -> vector<50x90xf32>
    %161 = arith.addf %120, %160 : vector<50x90xf32>
    %c1_88 = arith.constant 1 : index
    %c0_89 = arith.constant 0 : index
    %c0_90 = arith.constant 0 : index
    %162 = vector.load %arg18[%c1_88, %c0_89, %c0_90] : memref<2x1x90xf32, #tpu.memory_space<vmem>>, vector<1x1x90xf32>
    %163 = vector.shape_cast %162 : vector<1x1x90xf32> to vector<1x90xf32>
    %164 = vector.broadcast %163 : vector<1x90xf32> to vector<50x90xf32>
    %165 = arith.addf %161, %164 : vector<50x90xf32>
    %c0_91 = arith.constant 0 : index
    %c0_92 = arith.constant 0 : index
    %166 = vector.load %arg19[%c0_91, %c0_92] : memref<1x90xf32, #tpu.memory_space<vmem>>, vector<1x90xf32>
    %c0_93 = arith.constant 0 : index
    %c0_94 = arith.constant 0 : index
    %167 = vector.load %arg20[%c0_93, %c0_94] : memref<1x90xf32, #tpu.memory_space<vmem>>, vector<1x90xf32>
    %cst_95 = arith.constant dense<0.000000e+00> : vector<50xf32>
    %168 = vector.multi_reduction <add>, %165, %cst_95 [1] : vector<50x90xf32> to vector<50xf32>
    %169 = vector.shape_cast %168 : vector<50xf32> to vector<50x1xf32>
    %cst_96 = arith.constant 0.0111111114 : f32
    %170 = vector.broadcast %cst_96 : f32 to vector<50x1xf32>
    %171 = arith.mulf %169, %170 : vector<50x1xf32>
    %172 = vector.broadcast %171 : vector<50x1xf32> to vector<50x90xf32>
    %173 = arith.subf %165, %172 : vector<50x90xf32>
    %174 = arith.mulf %173, %173 : vector<50x90xf32>
    %cst_97 = arith.constant dense<0.000000e+00> : vector<50xf32>
    %175 = vector.multi_reduction <add>, %174, %cst_97 [1] : vector<50x90xf32> to vector<50xf32>
    %176 = vector.shape_cast %175 : vector<50xf32> to vector<50x1xf32>
    %cst_98 = arith.constant 0.0112359552 : f32
    %177 = vector.broadcast %cst_98 : f32 to vector<50x1xf32>
    %178 = arith.mulf %176, %177 : vector<50x1xf32>
    %179 = math.sqrt %178 : vector<50x1xf32>
    %180 = vector.broadcast %166 : vector<1x90xf32> to vector<50x90xf32>
    %181 = arith.mulf %180, %173 : vector<50x90xf32>
    %cst_99 = arith.constant 9.99999997E-7 : f32
    %182 = vector.broadcast %cst_99 : f32 to vector<50x1xf32>
    %183 = arith.addf %179, %182 : vector<50x1xf32>
    %cst_100 = arith.constant 1.000000e+00 : f32
    %184 = vector.broadcast %cst_100 : f32 to vector<50x1xf32>
    %185 = arith.divf %184, %183 : vector<50x1xf32>
    %186 = vector.broadcast %185 : vector<50x1xf32> to vector<50x90xf32>
    %187 = arith.mulf %181, %186 : vector<50x90xf32>
    %188 = vector.broadcast %167 : vector<1x90xf32> to vector<50x90xf32>
    %189 = arith.addf %187, %188 : vector<50x90xf32>
    %cst_101 = arith.constant dense<0.000000e+00> : vector<90xf32>
    %190 = vector.multi_reduction <add>, %189, %cst_101 [0] : vector<50x90xf32> to vector<90xf32>
    %191 = vector.shape_cast %190 : vector<90xf32> to vector<1x90xf32>
    %cst_102 = arith.constant 2.000000e-02 : f32
    %192 = vector.broadcast %cst_102 : f32 to vector<1x90xf32>
    %193 = arith.mulf %191, %192 : vector<1x90xf32>
    %c0_103 = arith.constant 0 : index
    %c0_104 = arith.constant 0 : index
    %c0_105 = arith.constant 0 : index
    %194 = vector.load %arg2[%c0_103, %c0_104, %c0_105] : memref<1x30x200xf32, #tpu.memory_space<vmem>>, vector<1x30x200xf32>
    %195 = vector.shape_cast %194 : vector<1x30x200xf32> to vector<30x200xf32>
    %c0_106 = arith.constant 0 : index
    %c0_107 = arith.constant 0 : index
    %c0_108 = arith.constant 0 : index
    %196 = vector.load %arg21[%c0_106, %c0_107, %c0_108] : memref<1x1x200xf32, #tpu.memory_space<vmem>>, vector<1x1x200xf32>
    %197 = vector.shape_cast %196 : vector<1x1x200xf32> to vector<1x200xf32>
    %c0_109 = arith.constant 0 : index
    %c0_110 = arith.constant 0 : index
    %c0_111 = arith.constant 0 : index
    %198 = vector.load %arg22[%c0_109, %c0_110, %c0_111] : memref<1x1x200xf32, #tpu.memory_space<vmem>>, vector<1x1x200xf32>
    %199 = vector.shape_cast %198 : vector<1x1x200xf32> to vector<1x200xf32>
    %cst_112 = arith.constant dense<0.000000e+00> : vector<30xf32>
    %200 = vector.multi_reduction <add>, %195, %cst_112 [1] : vector<30x200xf32> to vector<30xf32>
    %201 = vector.shape_cast %200 : vector<30xf32> to vector<30x1xf32>
    %cst_113 = arith.constant 5.000000e-03 : f32
    %202 = vector.broadcast %cst_113 : f32 to vector<30x1xf32>
    %203 = arith.mulf %201, %202 : vector<30x1xf32>
    %204 = vector.broadcast %203 : vector<30x1xf32> to vector<30x200xf32>
    %205 = arith.subf %195, %204 : vector<30x200xf32>
    %206 = arith.mulf %205, %205 : vector<30x200xf32>
    %cst_114 = arith.constant dense<0.000000e+00> : vector<30xf32>
    %207 = vector.multi_reduction <add>, %206, %cst_114 [1] : vector<30x200xf32> to vector<30xf32>
    %208 = vector.shape_cast %207 : vector<30xf32> to vector<30x1xf32>
    %cst_115 = arith.constant 0.00502512557 : f32
    %209 = vector.broadcast %cst_115 : f32 to vector<30x1xf32>
    %210 = arith.mulf %208, %209 : vector<30x1xf32>
    %211 = math.sqrt %210 : vector<30x1xf32>
    %212 = vector.broadcast %197 : vector<1x200xf32> to vector<30x200xf32>
    %213 = arith.mulf %212, %205 : vector<30x200xf32>
    %cst_116 = arith.constant 9.99999997E-7 : f32
    %214 = vector.broadcast %cst_116 : f32 to vector<30x1xf32>
    %215 = arith.addf %211, %214 : vector<30x1xf32>
    %cst_117 = arith.constant 1.000000e+00 : f32
    %216 = vector.broadcast %cst_117 : f32 to vector<30x1xf32>
    %217 = arith.divf %216, %215 : vector<30x1xf32>
    %218 = vector.broadcast %217 : vector<30x1xf32> to vector<30x200xf32>
    %219 = arith.mulf %213, %218 : vector<30x200xf32>
    %220 = vector.broadcast %199 : vector<1x200xf32> to vector<30x200xf32>
    %221 = arith.addf %219, %220 : vector<30x200xf32>
    %222 = arith.truncf %221 : vector<30x200xf32> to vector<30x200xbf16>
    %223 = tpu.transpose %221, [1, 0] : vector<30x200xf32> -> vector<200x30xf32>
    %224 = arith.truncf %223 : vector<200x30xf32> to vector<200x30xbf16>
    %cst_118 = arith.constant 0.000000e+00 : f32
    %225 = vector.broadcast %cst_118 : f32 to vector<30x200xf32>
    %c0_i32_119 = arith.constant 0 : i32
    %c20_i32 = arith.constant 20 : i32
    %226 = arith.addi %c0_i32_119, %c20_i32 : i32
    %c1_i32_120 = arith.constant 1 : i32
    %227 = scf.for %arg44 = %c0_i32_119 to %226 step %c1_i32_120 iter_args(%arg45 = %225) -> (vector<30x200xf32>)  : i32 {
      %c0_i32_181 = arith.constant 0 : i32
      %338 = arith.addi %c0_i32_181, %arg44 : i32
      %339 = arith.index_cast %338 : i32 to index
      %c0_182 = arith.constant 0 : index
      %c0_183 = arith.constant 0 : index
      %340 = vector.load %arg23[%339, %c0_182, %c0_183] : memref<20x200x10xbf16, #tpu.memory_space<vmem>>, vector<1x200x10xbf16>
      %341 = vector.shape_cast %340 : vector<1x200x10xbf16> to vector<200x10xbf16>
      %cst_184 = arith.constant dense<0.000000e+00> : vector<30x10xf32>
      %342 = tpu.matmul %222, %341, %cst_184 {dimension_numbers = #tpu.dot_dimension_numbers<[1], [0], [0], [1], [0, 0, 1, 1], [], []>} : vector<30x200xbf16>, vector<200x10xbf16>, vector<30x10xf32> -> vector<30x10xf32>
      %343 = arith.index_cast %338 : i32 to index
      %c0_185 = arith.constant 0 : index
      %c0_186 = arith.constant 0 : index
      %344 = vector.load %arg24[%343, %c0_185, %c0_186] : memref<20x1x10xf32, #tpu.memory_space<vmem>>, vector<1x1x10xf32>
      %345 = vector.shape_cast %344 : vector<1x1x10xf32> to vector<1x10xf32>
      %346 = vector.broadcast %345 : vector<1x10xf32> to vector<30x10xf32>
      %347 = arith.addf %342, %346 : vector<30x10xf32>
      %348 = arith.index_cast %338 : i32 to index
      %c0_187 = arith.constant 0 : index
      %c0_188 = arith.constant 0 : index
      %349 = vector.load %arg25[%348, %c0_187, %c0_188] : memref<20x10x200xbf16, #tpu.memory_space<vmem>>, vector<1x10x200xbf16>
      %350 = vector.shape_cast %349 : vector<1x10x200xbf16> to vector<10x200xbf16>
      %cst_189 = arith.constant dense<0.000000e+00> : vector<10x30xf32>
      %351 = tpu.matmul %350, %224, %cst_189 {dimension_numbers = #tpu.dot_dimension_numbers<[1], [0], [0], [1], [0, 0, 1, 1], [], []>} : vector<10x200xbf16>, vector<200x30xbf16>, vector<10x30xf32> -> vector<10x30xf32>
      %352 = arith.index_cast %338 : i32 to index
      %c0_190 = arith.constant 0 : index
      %c0_191 = arith.constant 0 : index
      %353 = vector.load %arg26[%352, %c0_190, %c0_191] : memref<20x10x1xf32, #tpu.memory_space<vmem>>, vector<1x10x1xf32>
      %354 = vector.shape_cast %353 : vector<1x10x1xf32> to vector<10x1xf32>
      %355 = vector.broadcast %354 : vector<10x1xf32> to vector<10x30xf32>
      %356 = arith.addf %351, %355 : vector<10x30xf32>
      %357 = arith.index_cast %338 : i32 to index
      %c0_192 = arith.constant 0 : index
      %c0_193 = arith.constant 0 : index
      %358 = vector.load %arg27[%357, %c0_192, %c0_193] : memref<20x200x10xbf16, #tpu.memory_space<vmem>>, vector<1x200x10xbf16>
      %359 = vector.shape_cast %358 : vector<1x200x10xbf16> to vector<200x10xbf16>
      %cst_194 = arith.constant dense<0.000000e+00> : vector<30x10xf32>
      %360 = tpu.matmul %222, %359, %cst_194 {dimension_numbers = #tpu.dot_dimension_numbers<[1], [0], [0], [1], [0, 0, 1, 1], [], []>} : vector<30x200xbf16>, vector<200x10xbf16>, vector<30x10xf32> -> vector<30x10xf32>
      %361 = arith.index_cast %338 : i32 to index
      %c0_195 = arith.constant 0 : index
      %c0_196 = arith.constant 0 : index
      %362 = vector.load %arg28[%361, %c0_195, %c0_196] : memref<20x1x10xf32, #tpu.memory_space<vmem>>, vector<1x1x10xf32>
      %363 = vector.shape_cast %362 : vector<1x1x10xf32> to vector<1x10xf32>
      %364 = vector.broadcast %363 : vector<1x10xf32> to vector<30x10xf32>
      %365 = arith.addf %360, %364 : vector<30x10xf32>
      %366 = arith.truncf %347 : vector<30x10xf32> to vector<30x10xbf16>
      %367 = arith.truncf %356 : vector<10x30xf32> to vector<10x30xbf16>
      %cst_197 = arith.constant dense<0.000000e+00> : vector<30x30xf32>
      %368 = tpu.matmul %366, %367, %cst_197 {dimension_numbers = #tpu.dot_dimension_numbers<[1], [0], [0], [1], [0, 0, 1, 1], [], []>} : vector<30x10xbf16>, vector<10x30xbf16>, vector<30x30xf32> -> vector<30x30xf32>
      %cst_198 = arith.constant 0.316227764 : f32
      %369 = vector.broadcast %cst_198 : f32 to vector<30x30xf32>
      %370 = arith.mulf %368, %369 : vector<30x30xf32>
      %cst_199 = arith.constant dense<0xFF800000> : vector<30xf32>
      %371 = vector.multi_reduction <maximumf>, %370, %cst_199 [1] : vector<30x30xf32> to vector<30xf32>
      %372 = vector.shape_cast %371 : vector<30xf32> to vector<30x1xf32>
      %373 = vector.broadcast %372 : vector<30x1xf32> to vector<30x30xf32>
      %374 = arith.subf %370, %373 : vector<30x30xf32>
      %375 = math.exp %374 : vector<30x30xf32>
      %cst_200 = arith.constant dense<0.000000e+00> : vector<30xf32>
      %376 = vector.multi_reduction <add>, %375, %cst_200 [1] : vector<30x30xf32> to vector<30xf32>
      %377 = vector.shape_cast %376 : vector<30xf32> to vector<30x1xf32>
      %378 = tpu.reciprocal %377 {approx = true} : vector<30x1xf32> -> vector<30x1xf32>
      %379 = vector.broadcast %378 : vector<30x1xf32> to vector<30x30xf32>
      %380 = arith.mulf %375, %379 : vector<30x30xf32>
      %381 = arith.truncf %380 : vector<30x30xf32> to vector<30x30xbf16>
      %382 = arith.truncf %365 : vector<30x10xf32> to vector<30x10xbf16>
      %cst_201 = arith.constant dense<0.000000e+00> : vector<30x10xf32>
      %383 = tpu.matmul %381, %382, %cst_201 {dimension_numbers = #tpu.dot_dimension_numbers<[1], [0], [0], [1], [0, 0, 1, 1], [], []>} : vector<30x30xbf16>, vector<30x10xbf16>, vector<30x10xf32> -> vector<30x10xf32>
      %384 = arith.truncf %383 : vector<30x10xf32> to vector<30x10xbf16>
      %385 = arith.index_cast %338 : i32 to index
      %c0_202 = arith.constant 0 : index
      %c0_203 = arith.constant 0 : index
      %386 = vector.load %arg29[%385, %c0_202, %c0_203] : memref<20x10x200xbf16, #tpu.memory_space<vmem>>, vector<1x10x200xbf16>
      %387 = vector.shape_cast %386 : vector<1x10x200xbf16> to vector<10x200xbf16>
      %cst_204 = arith.constant dense<0.000000e+00> : vector<30x200xf32>
      %388 = tpu.matmul %384, %387, %cst_204 {dimension_numbers = #tpu.dot_dimension_numbers<[1], [0], [0], [1], [0, 0, 1, 1], [], []>} : vector<30x10xbf16>, vector<10x200xbf16>, vector<30x200xf32> -> vector<30x200xf32>
      %389 = arith.addf %arg45, %388 : vector<30x200xf32>
      scf.yield %389 : vector<30x200xf32>
    }
    %c20_i32_121 = arith.constant 20 : i32
    %228 = arith.addf %195, %227 : vector<30x200xf32>
    %c0_122 = arith.constant 0 : index
    %c0_123 = arith.constant 0 : index
    %c0_124 = arith.constant 0 : index
    %229 = vector.load %arg30[%c0_122, %c0_123, %c0_124] : memref<1x1x200xf32, #tpu.memory_space<vmem>>, vector<1x1x200xf32>
    %230 = vector.shape_cast %229 : vector<1x1x200xf32> to vector<1x200xf32>
    %231 = vector.broadcast %230 : vector<1x200xf32> to vector<30x200xf32>
    %232 = arith.addf %228, %231 : vector<30x200xf32>
    %c0_125 = arith.constant 0 : index
    %c0_126 = arith.constant 0 : index
    %c0_127 = arith.constant 0 : index
    %233 = vector.load %arg31[%c0_125, %c0_126, %c0_127] : memref<1x1x200xf32, #tpu.memory_space<vmem>>, vector<1x1x200xf32>
    %234 = vector.shape_cast %233 : vector<1x1x200xf32> to vector<1x200xf32>
    %c0_128 = arith.constant 0 : index
    %c0_129 = arith.constant 0 : index
    %c0_130 = arith.constant 0 : index
    %235 = vector.load %arg32[%c0_128, %c0_129, %c0_130] : memref<1x1x200xf32, #tpu.memory_space<vmem>>, vector<1x1x200xf32>
    %236 = vector.shape_cast %235 : vector<1x1x200xf32> to vector<1x200xf32>
    %cst_131 = arith.constant dense<0.000000e+00> : vector<30xf32>
    %237 = vector.multi_reduction <add>, %232, %cst_131 [1] : vector<30x200xf32> to vector<30xf32>
    %238 = vector.shape_cast %237 : vector<30xf32> to vector<30x1xf32>
    %cst_132 = arith.constant 5.000000e-03 : f32
    %239 = vector.broadcast %cst_132 : f32 to vector<30x1xf32>
    %240 = arith.mulf %238, %239 : vector<30x1xf32>
    %241 = vector.broadcast %240 : vector<30x1xf32> to vector<30x200xf32>
    %242 = arith.subf %232, %241 : vector<30x200xf32>
    %243 = arith.mulf %242, %242 : vector<30x200xf32>
    %cst_133 = arith.constant dense<0.000000e+00> : vector<30xf32>
    %244 = vector.multi_reduction <add>, %243, %cst_133 [1] : vector<30x200xf32> to vector<30xf32>
    %245 = vector.shape_cast %244 : vector<30xf32> to vector<30x1xf32>
    %cst_134 = arith.constant 0.00502512557 : f32
    %246 = vector.broadcast %cst_134 : f32 to vector<30x1xf32>
    %247 = arith.mulf %245, %246 : vector<30x1xf32>
    %248 = math.sqrt %247 : vector<30x1xf32>
    %249 = vector.broadcast %234 : vector<1x200xf32> to vector<30x200xf32>
    %250 = arith.mulf %249, %242 : vector<30x200xf32>
    %cst_135 = arith.constant 9.99999997E-7 : f32
    %251 = vector.broadcast %cst_135 : f32 to vector<30x1xf32>
    %252 = arith.addf %248, %251 : vector<30x1xf32>
    %cst_136 = arith.constant 1.000000e+00 : f32
    %253 = vector.broadcast %cst_136 : f32 to vector<30x1xf32>
    %254 = arith.divf %253, %252 : vector<30x1xf32>
    %255 = vector.broadcast %254 : vector<30x1xf32> to vector<30x200xf32>
    %256 = arith.mulf %250, %255 : vector<30x200xf32>
    %257 = vector.broadcast %236 : vector<1x200xf32> to vector<30x200xf32>
    %258 = arith.addf %256, %257 : vector<30x200xf32>
    %259 = arith.truncf %258 : vector<30x200xf32> to vector<30x200xbf16>
    %c0_137 = arith.constant 0 : index
    %c0_138 = arith.constant 0 : index
    %c0_139 = arith.constant 0 : index
    %260 = vector.load %arg33[%c0_137, %c0_138, %c0_139] : memref<1x200x800xbf16, #tpu.memory_space<vmem>>, vector<1x200x800xbf16>
    %261 = vector.shape_cast %260 : vector<1x200x800xbf16> to vector<200x800xbf16>
    %cst_140 = arith.constant dense<0.000000e+00> : vector<30x800xf32>
    %262 = tpu.matmul %259, %261, %cst_140 {dimension_numbers = #tpu.dot_dimension_numbers<[1], [0], [0], [1], [0, 0, 1, 1], [], []>} : vector<30x200xbf16>, vector<200x800xbf16>, vector<30x800xf32> -> vector<30x800xf32>
    %c0_141 = arith.constant 0 : index
    %c0_142 = arith.constant 0 : index
    %c0_143 = arith.constant 0 : index
    %263 = vector.load %arg34[%c0_141, %c0_142, %c0_143] : memref<1x1x800xf32, #tpu.memory_space<vmem>>, vector<1x1x800xf32>
    %264 = vector.shape_cast %263 : vector<1x1x800xf32> to vector<1x800xf32>
    %265 = vector.broadcast %264 : vector<1x800xf32> to vector<30x800xf32>
    %266 = arith.addf %262, %265 : vector<30x800xf32>
    %cst_144 = arith.constant 0.000000e+00 : f32
    %267 = vector.broadcast %cst_144 : f32 to vector<30x800xf32>
    %268 = arith.maximumf %266, %267 : vector<30x800xf32>
    %269 = arith.truncf %268 : vector<30x800xf32> to vector<30x800xbf16>
    %c0_145 = arith.constant 0 : index
    %c0_146 = arith.constant 0 : index
    %c0_147 = arith.constant 0 : index
    %270 = vector.load %arg35[%c0_145, %c0_146, %c0_147] : memref<1x800x200xbf16, #tpu.memory_space<vmem>>, vector<1x800x200xbf16>
    %271 = vector.shape_cast %270 : vector<1x800x200xbf16> to vector<800x200xbf16>
    %cst_148 = arith.constant dense<0.000000e+00> : vector<30x200xf32>
    %272 = tpu.matmul %269, %271, %cst_148 {dimension_numbers = #tpu.dot_dimension_numbers<[1], [0], [0], [1], [0, 0, 1, 1], [], []>} : vector<30x800xbf16>, vector<800x200xbf16>, vector<30x200xf32> -> vector<30x200xf32>
    %273 = arith.addf %232, %272 : vector<30x200xf32>
    %c0_149 = arith.constant 0 : index
    %c0_150 = arith.constant 0 : index
    %c0_151 = arith.constant 0 : index
    %274 = vector.load %arg36[%c0_149, %c0_150, %c0_151] : memref<1x1x200xf32, #tpu.memory_space<vmem>>, vector<1x1x200xf32>
    %275 = vector.shape_cast %274 : vector<1x1x200xf32> to vector<1x200xf32>
    %276 = vector.broadcast %275 : vector<1x200xf32> to vector<30x200xf32>
    %277 = arith.addf %273, %276 : vector<30x200xf32>
    %c0_152 = arith.constant 0 : index
    %c0_153 = arith.constant 0 : index
    %278 = vector.load %arg37[%c0_152, %c0_153] : memref<1x200xf32, #tpu.memory_space<vmem>>, vector<1x200xf32>
    %c0_154 = arith.constant 0 : index
    %c0_155 = arith.constant 0 : index
    %279 = vector.load %arg38[%c0_154, %c0_155] : memref<1x200xf32, #tpu.memory_space<vmem>>, vector<1x200xf32>
    %cst_156 = arith.constant dense<0.000000e+00> : vector<30xf32>
    %280 = vector.multi_reduction <add>, %277, %cst_156 [1] : vector<30x200xf32> to vector<30xf32>
    %281 = vector.shape_cast %280 : vector<30xf32> to vector<30x1xf32>
    %cst_157 = arith.constant 5.000000e-03 : f32
    %282 = vector.broadcast %cst_157 : f32 to vector<30x1xf32>
    %283 = arith.mulf %281, %282 : vector<30x1xf32>
    %284 = vector.broadcast %283 : vector<30x1xf32> to vector<30x200xf32>
    %285 = arith.subf %277, %284 : vector<30x200xf32>
    %286 = arith.mulf %285, %285 : vector<30x200xf32>
    %cst_158 = arith.constant dense<0.000000e+00> : vector<30xf32>
    %287 = vector.multi_reduction <add>, %286, %cst_158 [1] : vector<30x200xf32> to vector<30xf32>
    %288 = vector.shape_cast %287 : vector<30xf32> to vector<30x1xf32>
    %cst_159 = arith.constant 0.00502512557 : f32
    %289 = vector.broadcast %cst_159 : f32 to vector<30x1xf32>
    %290 = arith.mulf %288, %289 : vector<30x1xf32>
    %291 = math.sqrt %290 : vector<30x1xf32>
    %292 = vector.broadcast %278 : vector<1x200xf32> to vector<30x200xf32>
    %293 = arith.mulf %292, %285 : vector<30x200xf32>
    %cst_160 = arith.constant 9.99999997E-7 : f32
    %294 = vector.broadcast %cst_160 : f32 to vector<30x1xf32>
    %295 = arith.addf %291, %294 : vector<30x1xf32>
    %cst_161 = arith.constant 1.000000e+00 : f32
    %296 = vector.broadcast %cst_161 : f32 to vector<30x1xf32>
    %297 = arith.divf %296, %295 : vector<30x1xf32>
    %298 = vector.broadcast %297 : vector<30x1xf32> to vector<30x200xf32>
    %299 = arith.mulf %293, %298 : vector<30x200xf32>
    %300 = vector.broadcast %279 : vector<1x200xf32> to vector<30x200xf32>
    %301 = arith.addf %299, %300 : vector<30x200xf32>
    %cst_162 = arith.constant dense<0.000000e+00> : vector<200xf32>
    %302 = vector.multi_reduction <add>, %301, %cst_162 [0] : vector<30x200xf32> to vector<200xf32>
    %303 = vector.shape_cast %302 : vector<200xf32> to vector<1x200xf32>
    %cst_163 = arith.constant 0.0111111114 : f32
    %304 = vector.broadcast %cst_163 : f32 to vector<1x200xf32>
    %305 = arith.mulf %303, %304 : vector<1x200xf32>
    %c0_164 = arith.constant 0 : index
    %c0_165 = arith.constant 0 : index
    %306 = vector.load %arg39[%c0_164, %c0_165] : memref<90x11xf32, #tpu.memory_space<vmem>>, vector<90x11xf32>
    %cst_166 = arith.constant dense<0.000000e+00> : vector<1x11xf32>
    %307 = tpu.matmul %193, %306, %cst_166 {dimension_numbers = #tpu.dot_dimension_numbers<[1], [0], [0], [1], [0, 0, 1, 1], [], []>} : vector<1x90xf32>, vector<90x11xf32>, vector<1x11xf32> -> vector<1x11xf32>
    %c0_167 = arith.constant 0 : index
    %c0_168 = arith.constant 0 : index
    %308 = vector.load %arg40[%c0_167, %c0_168] : memref<1x11xf32, #tpu.memory_space<vmem>>, vector<1x11xf32>
    %309 = arith.addf %307, %308 : vector<1x11xf32>
    %c0_169 = arith.constant 0 : index
    %c0_170 = arith.constant 0 : index
    %310 = vector.load %arg41[%c0_169, %c0_170] : memref<200x11xf32, #tpu.memory_space<vmem>>, vector<200x11xf32>
    %cst_171 = arith.constant dense<0.000000e+00> : vector<1x11xf32>
    %311 = tpu.matmul %305, %310, %cst_171 {dimension_numbers = #tpu.dot_dimension_numbers<[1], [0], [0], [1], [0, 0, 1, 1], [], []>} : vector<1x200xf32>, vector<200x11xf32>, vector<1x11xf32> -> vector<1x11xf32>
    %c0_172 = arith.constant 0 : index
    %c0_173 = arith.constant 0 : index
    %312 = vector.load %arg42[%c0_172, %c0_173] : memref<1x11xf32, #tpu.memory_space<vmem>>, vector<1x11xf32>
    %313 = arith.addf %311, %312 : vector<1x11xf32>
    %cst_174 = arith.constant dense<0xFF800000> : vector<1xf32>
    %314 = vector.multi_reduction <maximumf>, %309, %cst_174 [1] : vector<1x11xf32> to vector<1xf32>
    %315 = vector.shape_cast %314 : vector<1xf32> to vector<1x1xf32>
    %316 = vector.broadcast %315 : vector<1x1xf32> to vector<1x11xf32>
    %317 = arith.subf %309, %316 : vector<1x11xf32>
    %318 = math.exp %317 : vector<1x11xf32>
    %cst_175 = arith.constant dense<0.000000e+00> : vector<1xf32>
    %319 = vector.multi_reduction <add>, %318, %cst_175 [1] : vector<1x11xf32> to vector<1xf32>
    %320 = vector.shape_cast %319 : vector<1xf32> to vector<1x1xf32>
    %321 = math.log %320 : vector<1x1xf32>
    %322 = vector.broadcast %321 : vector<1x1xf32> to vector<1x11xf32>
    %323 = arith.subf %317, %322 : vector<1x11xf32>
    %cst_176 = arith.constant dense<0xFF800000> : vector<1xf32>
    %324 = vector.multi_reduction <maximumf>, %313, %cst_176 [1] : vector<1x11xf32> to vector<1xf32>
    %325 = vector.shape_cast %324 : vector<1xf32> to vector<1x1xf32>
    %326 = vector.broadcast %325 : vector<1x1xf32> to vector<1x11xf32>
    %327 = arith.subf %313, %326 : vector<1x11xf32>
    %328 = math.exp %327 : vector<1x11xf32>
    %cst_177 = arith.constant dense<0.000000e+00> : vector<1xf32>
    %329 = vector.multi_reduction <add>, %328, %cst_177 [1] : vector<1x11xf32> to vector<1xf32>
    %330 = vector.shape_cast %329 : vector<1xf32> to vector<1x1xf32>
    %331 = math.log %330 : vector<1x1xf32>
    %332 = vector.broadcast %331 : vector<1x1xf32> to vector<1x11xf32>
    %333 = arith.subf %327, %332 : vector<1x11xf32>
    %334 = arith.addf %323, %333 : vector<1x11xf32>
    %c0_178 = arith.constant 0 : index
    %c0_179 = arith.constant 0 : index
    %c0_180 = arith.constant 0 : index
    %335 = vector.load %arg43[%c0_178, %c0_179, %c0_180] : memref<1x1x11xf32, #tpu.memory_space<vmem>>, vector<1x1x11xf32>
    %336 = vector.shape_cast %335 : vector<1x1x11xf32> to vector<1x11xf32>
    %337 = vector.shape_cast %334 : vector<1x11xf32> to vector<1x1x11xf32>
    tpu.vector_store %arg43[%c0_178, %c0_179, %c0_180], %337 {strides = array<i32>} : memref<1x1x11xf32, #tpu.memory_space<vmem>>, vector<1x1x11xf32>,
    return
  }
  func.func @transform_0(%arg0: i32) -> (i32, i32, i32) {
    %c0_i32 = arith.constant 0 : i32
    %c0_i32_0 = arith.constant 0 : i32
    %c0_i32_1 = arith.constant 0 : i32
    return %arg0, %c0_i32, %c0_i32_0 : i32, i32, i32
  }
  func.func @transform_1(%arg0: i32) -> (i32, i32, i32) {
    %c0_i32 = arith.constant 0 : i32
    %c0_i32_0 = arith.constant 0 : i32
    %c0_i32_1 = arith.constant 0 : i32
    return %arg0, %c0_i32, %c0_i32_0 : i32, i32, i32
  }
  func.func @transform_2(%arg0: i32) -> (i32, i32, i32) {
    %c0_i32 = arith.constant 0 : i32
    %c0_i32_0 = arith.constant 0 : i32
    %c0_i32_1 = arith.constant 0 : i32
    %c0_i32_2 = arith.constant 0 : i32
    return %c0_i32, %c0_i32_0, %c0_i32_1 : i32, i32, i32
  }
  func.func @transform_3(%arg0: i32) -> (i32, i32, i32) {
    %c0_i32 = arith.constant 0 : i32
    %c0_i32_0 = arith.constant 0 : i32
    %c0_i32_1 = arith.constant 0 : i32
    %c0_i32_2 = arith.constant 0 : i32
    return %c0_i32, %c0_i32_0, %c0_i32_1 : i32, i32, i32
  }
  func.func @transform_4(%arg0: i32) -> (i32, i32, i32) {
    %c0_i32 = arith.constant 0 : i32
    %c0_i32_0 = arith.constant 0 : i32
    %c0_i32_1 = arith.constant 0 : i32
    %c0_i32_2 = arith.constant 0 : i32
    return %c0_i32, %c0_i32_0, %c0_i32_1 : i32, i32, i32
  }
  func.func @transform_5(%arg0: i32) -> (i32, i32, i32) {
    %c0_i32 = arith.constant 0 : i32
    %c0_i32_0 = arith.constant 0 : i32
    %c0_i32_1 = arith.constant 0 : i32
    %c0_i32_2 = arith.constant 0 : i32
    return %c0_i32, %c0_i32_0, %c0_i32_1 : i32, i32, i32
  }
  func.func @transform_6(%arg0: i32) -> (i32, i32, i32) {
    %c0_i32 = arith.constant 0 : i32
    %c0_i32_0 = arith.constant 0 : i32
    %c0_i32_1 = arith.constant 0 : i32
    %c0_i32_2 = arith.constant 0 : i32
    return %c0_i32, %c0_i32_0, %c0_i32_1 : i32, i32, i32
  }
  func.func @transform_7(%arg0: i32) -> (i32, i32, i32) {
    %c0_i32 = arith.constant 0 : i32
    %c0_i32_0 = arith.constant 0 : i32
    %c0_i32_1 = arith.constant 0 : i32
    %c0_i32_2 = arith.constant 0 : i32
    return %c0_i32, %c0_i32_0, %c0_i32_1 : i32, i32, i32
  }
  func.func @transform_8(%arg0: i32) -> (i32, i32, i32) {
    %c0_i32 = arith.constant 0 : i32
    %c0_i32_0 = arith.constant 0 : i32
    %c0_i32_1 = arith.constant 0 : i32
    %c0_i32_2 = arith.constant 0 : i32
    return %c0_i32, %c0_i32_0, %c0_i32_1 : i32, i32, i32
  }
  func.func @transform_9(%arg0: i32) -> (i32, i32, i32) {
    %c0_i32 = arith.constant 0 : i32
    %c0_i32_0 = arith.constant 0 : i32
    %c0_i32_1 = arith.constant 0 : i32
    %c0_i32_2 = arith.constant 0 : i32
    return %c0_i32, %c0_i32_0, %c0_i32_1 : i32, i32, i32
  }
  func.func @transform_10(%arg0: i32) -> (i32, i32, i32) {
    %c0_i32 = arith.constant 0 : i32
    %c0_i32_0 = arith.constant 0 : i32
    %c0_i32_1 = arith.constant 0 : i32
    %c0_i32_2 = arith.constant 0 : i32
    return %c0_i32, %c0_i32_0, %c0_i32_1 : i32, i32, i32
  }
  func.func @transform_11(%arg0: i32) -> (i32, i32, i32) {
    %c0_i32 = arith.constant 0 : i32
    %c0_i32_0 = arith.constant 0 : i32
    %c0_i32_1 = arith.constant 0 : i32
    %c0_i32_2 = arith.constant 0 : i32
    return %c0_i32, %c0_i32_0, %c0_i32_1 : i32, i32, i32
  }
  func.func @transform_12(%arg0: i32) -> (i32, i32, i32) {
    %c0_i32 = arith.constant 0 : i32
    %c0_i32_0 = arith.constant 0 : i32
    %c0_i32_1 = arith.constant 0 : i32
    %c0_i32_2 = arith.constant 0 : i32
    return %c0_i32, %c0_i32_0, %c0_i32_1 : i32, i32, i32
  }
  func.func @transform_13(%arg0: i32) -> (i32, i32, i32) {
    %c0_i32 = arith.constant 0 : i32
    %c0_i32_0 = arith.constant 0 : i32
    %c0_i32_1 = arith.constant 0 : i32
    %c0_i32_2 = arith.constant 0 : i32
    return %c0_i32, %c0_i32_0, %c0_i32_1 : i32, i32, i32
  }
  func.func @transform_14(%arg0: i32) -> (i32, i32, i32) {
    %c0_i32 = arith.constant 0 : i32
    %c0_i32_0 = arith.constant 0 : i32
    %c0_i32_1 = arith.constant 0 : i32
    %c0_i32_2 = arith.constant 0 : i32
    return %c0_i32, %c0_i32_0, %c0_i32_1 : i32, i32, i32
  }
  func.func @transform_15(%arg0: i32) -> (i32, i32, i32) {
    %c0_i32 = arith.constant 0 : i32
    %c0_i32_0 = arith.constant 0 : i32
    %c0_i32_1 = arith.constant 0 : i32
    %c0_i32_2 = arith.constant 0 : i32
    return %c0_i32, %c0_i32_0, %c0_i32_1 : i32, i32, i32
  }
  func.func @transform_16(%arg0: i32) -> (i32, i32, i32) {
    %c0_i32 = arith.constant 0 : i32
    %c0_i32_0 = arith.constant 0 : i32
    %c0_i32_1 = arith.constant 0 : i32
    %c0_i32_2 = arith.constant 0 : i32
    return %c0_i32, %c0_i32_0, %c0_i32_1 : i32, i32, i32
  }
  func.func @transform_17(%arg0: i32) -> (i32, i32, i32) {
    %c0_i32 = arith.constant 0 : i32
    %c0_i32_0 = arith.constant 0 : i32
    %c0_i32_1 = arith.constant 0 : i32
    %c0_i32_2 = arith.constant 0 : i32
    return %c0_i32, %c0_i32_0, %c0_i32_1 : i32, i32, i32
  }
  func.func @transform_18(%arg0: i32) -> (i32, i32) {
    %c0_i32 = arith.constant 0 : i32
    %c0_i32_0 = arith.constant 0 : i32
    %c0_i32_1 = arith.constant 0 : i32
    return %c0_i32, %c0_i32_0 : i32, i32
  }
  func.func @transform_19(%arg0: i32) -> (i32, i32) {
    %c0_i32 = arith.constant 0 : i32
    %c0_i32_0 = arith.constant 0 : i32
    %c0_i32_1 = arith.constant 0 : i32
    return %c0_i32, %c0_i32_0 : i32, i32
  }
  func.func @transform_20(%arg0: i32) -> (i32, i32, i32) {
    %c0_i32 = arith.constant 0 : i32
    %c0_i32_0 = arith.constant 0 : i32
    %c0_i32_1 = arith.constant 0 : i32
    %c0_i32_2 = arith.constant 0 : i32
    return %c0_i32, %c0_i32_0, %c0_i32_1 : i32, i32, i32
  }
  func.func @transform_21(%arg0: i32) -> (i32, i32, i32) {
    %c0_i32 = arith.constant 0 : i32
    %c0_i32_0 = arith.constant 0 : i32
    %c0_i32_1 = arith.constant 0 : i32
    %c0_i32_2 = arith.constant 0 : i32
    return %c0_i32, %c0_i32_0, %c0_i32_1 : i32, i32, i32
  }
  func.func @transform_22(%arg0: i32) -> (i32, i32, i32) {
    %c0_i32 = arith.constant 0 : i32
    %c0_i32_0 = arith.constant 0 : i32
    %c0_i32_1 = arith.constant 0 : i32
    %c0_i32_2 = arith.constant 0 : i32
    return %c0_i32, %c0_i32_0, %c0_i32_1 : i32, i32, i32
  }
  func.func @transform_23(%arg0: i32) -> (i32, i32, i32) {
    %c0_i32 = arith.constant 0 : i32
    %c0_i32_0 = arith.constant 0 : i32
    %c0_i32_1 = arith.constant 0 : i32
    %c0_i32_2 = arith.constant 0 : i32
    return %c0_i32, %c0_i32_0, %c0_i32_1 : i32, i32, i32
  }
  func.func @transform_24(%arg0: i32) -> (i32, i32, i32) {
    %c0_i32 = arith.constant 0 : i32
    %c0_i32_0 = arith.constant 0 : i32
    %c0_i32_1 = arith.constant 0 : i32
    %c0_i32_2 = arith.constant 0 : i32
    return %c0_i32, %c0_i32_0, %c0_i32_1 : i32, i32, i32
  }
  func.func @transform_25(%arg0: i32) -> (i32, i32, i32) {
    %c0_i32 = arith.constant 0 : i32
    %c0_i32_0 = arith.constant 0 : i32
    %c0_i32_1 = arith.constant 0 : i32
    %c0_i32_2 = arith.constant 0 : i32
    return %c0_i32, %c0_i32_0, %c0_i32_1 : i32, i32, i32
  }
  func.func @transform_26(%arg0: i32) -> (i32, i32, i32) {
    %c0_i32 = arith.constant 0 : i32
    %c0_i32_0 = arith.constant 0 : i32
    %c0_i32_1 = arith.constant 0 : i32
    %c0_i32_2 = arith.constant 0 : i32
    return %c0_i32, %c0_i32_0, %c0_i32_1 : i32, i32, i32
  }
  func.func @transform_27(%arg0: i32) -> (i32, i32, i32) {
    %c0_i32 = arith.constant 0 : i32
    %c0_i32_0 = arith.constant 0 : i32
    %c0_i32_1 = arith.constant 0 : i32
    %c0_i32_2 = arith.constant 0 : i32
    return %c0_i32, %c0_i32_0, %c0_i32_1 : i32, i32, i32
  }
  func.func @transform_28(%arg0: i32) -> (i32, i32, i32) {
    %c0_i32 = arith.constant 0 : i32
    %c0_i32_0 = arith.constant 0 : i32
    %c0_i32_1 = arith.constant 0 : i32
    %c0_i32_2 = arith.constant 0 : i32
    return %c0_i32, %c0_i32_0, %c0_i32_1 : i32, i32, i32
  }
  func.func @transform_29(%arg0: i32) -> (i32, i32, i32) {
    %c0_i32 = arith.constant 0 : i32
    %c0_i32_0 = arith.constant 0 : i32
    %c0_i32_1 = arith.constant 0 : i32
    %c0_i32_2 = arith.constant 0 : i32
    return %c0_i32, %c0_i32_0, %c0_i32_1 : i32, i32, i32
  }
  func.func @transform_30(%arg0: i32) -> (i32, i32, i32) {
    %c0_i32 = arith.constant 0 : i32
    %c0_i32_0 = arith.constant 0 : i32
    %c0_i32_1 = arith.constant 0 : i32
    %c0_i32_2 = arith.constant 0 : i32
    return %c0_i32, %c0_i32_0, %c0_i32_1 : i32, i32, i32
  }
  func.func @transform_31(%arg0: i32) -> (i32, i32, i32) {
    %c0_i32 = arith.constant 0 : i32
    %c0_i32_0 = arith.constant 0 : i32
    %c0_i32_1 = arith.constant 0 : i32
    %c0_i32_2 = arith.constant 0 : i32
    return %c0_i32, %c0_i32_0, %c0_i32_1 : i32, i32, i32
  }
  func.func @transform_32(%arg0: i32) -> (i32, i32, i32) {
    %c0_i32 = arith.constant 0 : i32
    %c0_i32_0 = arith.constant 0 : i32
    %c0_i32_1 = arith.constant 0 : i32
    %c0_i32_2 = arith.constant 0 : i32
    return %c0_i32, %c0_i32_0, %c0_i32_1 : i32, i32, i32
  }
  func.func @transform_33(%arg0: i32) -> (i32, i32, i32) {
    %c0_i32 = arith.constant 0 : i32
    %c0_i32_0 = arith.constant 0 : i32
    %c0_i32_1 = arith.constant 0 : i32
    %c0_i32_2 = arith.constant 0 : i32
    return %c0_i32, %c0_i32_0, %c0_i32_1 : i32, i32, i32
  }
  func.func @transform_34(%arg0: i32) -> (i32, i32, i32) {
    %c0_i32 = arith.constant 0 : i32
    %c0_i32_0 = arith.constant 0 : i32
    %c0_i32_1 = arith.constant 0 : i32
    %c0_i32_2 = arith.constant 0 : i32
    return %c0_i32, %c0_i32_0, %c0_i32_1 : i32, i32, i32
  }
  func.func @transform_35(%arg0: i32) -> (i32, i32, i32) {
    %c0_i32 = arith.constant 0 : i32
    %c0_i32_0 = arith.constant 0 : i32
    %c0_i32_1 = arith.constant 0 : i32
    %c0_i32_2 = arith.constant 0 : i32
    return %c0_i32, %c0_i32_0, %c0_i32_1 : i32, i32, i32
  }
  func.func @transform_36(%arg0: i32) -> (i32, i32) {
    %c0_i32 = arith.constant 0 : i32
    %c0_i32_0 = arith.constant 0 : i32
    %c0_i32_1 = arith.constant 0 : i32
    return %c0_i32, %c0_i32_0 : i32, i32
  }
  func.func @transform_37(%arg0: i32) -> (i32, i32) {
    %c0_i32 = arith.constant 0 : i32
    %c0_i32_0 = arith.constant 0 : i32
    %c0_i32_1 = arith.constant 0 : i32
    return %c0_i32, %c0_i32_0 : i32, i32
  }
  func.func @transform_38(%arg0: i32) -> (i32, i32) {
    %c0_i32 = arith.constant 0 : i32
    %c0_i32_0 = arith.constant 0 : i32
    %c0_i32_1 = arith.constant 0 : i32
    return %c0_i32, %c0_i32_0 : i32, i32
  }
  func.func @transform_39(%arg0: i32) -> (i32, i32) {
    %c0_i32 = arith.constant 0 : i32
    %c0_i32_0 = arith.constant 0 : i32
    %c0_i32_1 = arith.constant 0 : i32
    return %c0_i32, %c0_i32_0 : i32, i32
  }
  func.func @transform_40(%arg0: i32) -> (i32, i32) {
    %c0_i32 = arith.constant 0 : i32
    %c0_i32_0 = arith.constant 0 : i32
    %c0_i32_1 = arith.constant 0 : i32
    return %c0_i32, %c0_i32_0 : i32, i32
  }
  func.func @transform_41(%arg0: i32) -> (i32, i32) {
    %c0_i32 = arith.constant 0 : i32
    %c0_i32_0 = arith.constant 0 : i32
    %c0_i32_1 = arith.constant 0 : i32
    return %c0_i32, %c0_i32_0 : i32, i32
  }
  func.func @transform_42(%arg0: i32) -> (i32, i32, i32) {
    %c0_i32 = arith.constant 0 : i32
    %c0_i32_0 = arith.constant 0 : i32
    %c0_i32_1 = arith.constant 0 : i32
    return %arg0, %c0_i32, %c0_i32_0 : i32, i32, i32
  }
}

</mosaic_0001>

<bundles_post_ra>
// kernel: transformer_m_forward.1
= control target key start
LH: loop header
LB: loop body
LE: loop exit
PB: predicated region body
PF: predicated region fallthrough
CT: control target
= control target key end

     0   :  { %s11010_s6 = smov 1   ;;  %s11011_s10 = smov 2   ;;  %s13447_s0 = inlined_call_operand.smem [shape: u32[43], index: -1, kind: input, shape index: {}] }
   0x1   :  { %s11073_s5 = sld [smem:[%s13447_s0]]   ;;  %s11012_s14 = smov 3  }
   0x2   :  { %s11078_s9 = sld [smem:[%s13447_s0 + %s11010_s6]]   ;;  %s11013_s18 = smov 4  }
   0x3   :  { %s11083_s13 = sld [smem:[%s13447_s0 + %s11011_s10]]   ;;  %s11014_s22 = smov 5  }
   0x4   :  { %s11088_s17 = sld [smem:[%s13447_s0 + %s11012_s14]]   ;;  %s11015_s26 = smov 6  }
   0x5   :  { %s11093_s21 = sld [smem:[%s13447_s0 + %s11013_s18]]   ;;  %s11016_s30 = smov 7  }
   0x6   :  { %s11098_s25 = sld [smem:[%s13447_s0 + %s11014_s22]]   ;;  %s11017_s4 = smov 8  }
   0x7   :  { %13468 = sst [smem:[#allocation5_spill]] %s11073_s5  ;;  %s11018_s10 = smov 9  }
   0x8   :  { %13469 = sst [smem:[#allocation6_spill]] %s11078_s9  ;;  %s11019_s15 = smov 10  }
   0x9   :  { %s11103_s29 = sld [smem:[%s13447_s0 + %s11015_s26]]   ;;  %s11020_s20 = smov 11  }
   0xa   :  { %s11108_s3 = sld [smem:[%s13447_s0 + %s11016_s30]]   ;;  %s11021_s26 = smov 12  }
   0xb   :  { %s11113_s8 = sld [smem:[%s13447_s0 + %s11017_s4]]   ;;  %s11022_s1 = smov 13  }
   0xc   :  { %s11118_s14 = sld [smem:[%s13447_s0 + %s11018_s10]]   ;;  %s11023_s7 = smov 14  }
   0xd   :  { %s11123_s19 = sld [smem:[%s13447_s0 + %s11019_s15]]   ;;  %s11024_s15 = smov 15  }
   0xe   :  { %s11128_s24 = sld [smem:[%s13447_s0 + %s11020_s20]]   ;;  %s11025_s22 = smov 16  }
   0xf   :  { %s11133_s30 = sld [smem:[%s13447_s0 + %s11021_s26]]   ;;  %s11026_s28 = smov 17  }
  0x10   :  { %13470 = sst [smem:[#allocation7_spill]] %s11108_s3 }
  0x11   :  { %s11138_s6 = sld [smem:[%s13447_s0 + %s11022_s1]]  }
  0x12   :  { %s11143_s12 = sld [smem:[%s13447_s0 + %s11023_s7]]   ;;  %s11027_s7 = smov 18  }
  0x13   :  { %s11148_s20 = sld [smem:[%s13447_s0 + %s11024_s15]]   ;;  %s11028_s15 = smov 19  }
  0x14   :  { %s11153_s27 = sld [smem:[%s13447_s0 + %s11025_s22]]   ;;  %s11029_s22 = smov 20  }
  0x15   :  { %13471 = sst [smem:[#allocation8_spill]] %s11133_s30 }
  0x16   :  { %s11158_s4 = sld [smem:[%s13447_s0 + %s11026_s28]]   ;;  %s11030_s28 = smov 21  }
  0x17   :  { %13472 = sst [smem:[#allocation9_spill]] %s11138_s6 }
  0x18   :  { %s11163_s6 = sld [smem:[%s13447_s0 + %s11027_s7]]   ;;  %s11031_s7 = smov 22  }
  0x19   :  { %13473 = sst [smem:[#allocation10_spill]] %s11148_s20 }
  0x1a   :  { %s11168_s20 = sld [smem:[%s13447_s0 + %s11028_s15]]   ;;  %s11032_s15 = smov 23  }
  0x1b   :  { %s11173_s30 = sld [smem:[%s13447_s0 + %s11029_s22]]   ;;  %s11033_s22 = smov 24  }
  0x1c   :  { %13474 = sst [smem:[#allocation11_spill]] %s11158_s4 }
  0x1d   :  { %s11178_s4 = sld [smem:[%s13447_s0 + %s11030_s28]]   ;;  %s11034_s28 = smov 25  }
  0x1e   :  { %13475 = sst [smem:[#allocation12_spill]] %s11163_s6 }
  0x1f   :  { %s11183_s6 = sld [smem:[%s13447_s0 + %s11031_s7]]   ;;  %s11035_s7 = smov 26  }
  0x20   :  { %13476 = sst [smem:[#allocation13_spill]] %s11168_s20 }
  0x21   :  { %13477 = sst [smem:[#allocation14_spill]] %s11173_s30 }
  0x22   :  { %s11188_s20 = sld [smem:[%s13447_s0 + %s11032_s15]]   ;;  %s11036_s15 = smov 27  }
  0x23   :  { %13478 = sst [smem:[#allocation15_spill]] %s11178_s4 }
  0x24   :  { %s11193_s30 = sld [smem:[%s13447_s0 + %s11033_s22]]   ;;  %s11037_s22 = smov 28  }
  0x25   :  { %13479 = sst [smem:[#allocation16_spill]] %s11183_s6 }
  0x26   :  { %s11198_s4 = sld [smem:[%s13447_s0 + %s11034_s28]]   ;;  %s11038_s28 = smov 29  }
  0x27   :  { %s11203_s6 = sld [smem:[%s13447_s0 + %s11035_s7]]   ;;  %s11039_s7 = smov 30  }
  0x28   :  { %13480 = sst [smem:[#allocation17_spill]] %s11188_s20 }
  0x29   :  { %s11208_s20 = sld [smem:[%s13447_s0 + %s11036_s15]]   ;;  %s11040_s15 = smov 31  }
  0x2a   :  { %13481 = sst [smem:[#allocation18_spill]] %s11193_s30 }
  0x2b   :  { %s11213_s30 = sld [smem:[%s13447_s0 + %s11037_s22]]   ;;  %s11041_s22 = smov 32  }
  0x2c   :  { %13482 = sst [smem:[#allocation19_spill]] %s11198_s4 }
  0x2d   :  { %13483 = sst [smem:[#allocation20_spill]] %s11203_s6 }
  0x2e   :  { %s11218_s4 = sld [smem:[%s13447_s0 + %s11038_s28]]   ;;  %s11042_s28 = smov 33  }
  0x2f   :  { %13484 = sst [smem:[#allocation21_spill]] %s11208_s20 }
  0x30   :  { %s11223_s6 = sld [smem:[%s13447_s0 + %s11039_s7]]   ;;  %s11043_s7 = smov 34  }
  0x31   :  { %13485 = sst [smem:[#allocation22_spill]] %s11213_s30 }
  0x32   :  { %s11228_s20 = sld [smem:[%s13447_s0 + %s11040_s15]]   ;;  %s11044_s15 = smov 35  }
  0x33   :  { %s11233_s30 = sld [smem:[%s13447_s0 + %s11041_s22]]   ;;  %s11045_s22 = smov 36  }
  0x34   :  { %13486 = sst [smem:[#allocation23_spill]] %s11218_s4 }
  0x35   :  { %s11238_s4 = sld [smem:[%s13447_s0 + %s11042_s28]]   ;;  %s11046_s28 = smov 37  }
  0x36   :  { %13487 = sst [smem:[#allocation24_spill]] %s11223_s6 }
  0x37   :  { %s11243_s6 = sld [smem:[%s13447_s0 + %s11043_s7]]   ;;  %s11047_s7 = smov 38  }
  0x38   :  { %13488 = sst [smem:[#allocation25_spill]] %s11228_s20 }
  0x39   :  { %13489 = sst [smem:[#allocation26_spill]] %s11233_s30 }
  0x3a   :  { %s11248_s20 = sld [smem:[%s13447_s0 + %s11044_s15]]   ;;  %s11048_s15 = smov 39  }
  0x3b   :  { %13490 = sst [smem:[#allocation27_spill]] %s11238_s4 }
  0x3c   :  { %s11253_s30 = sld [smem:[%s13447_s0 + %s11045_s22]]   ;;  %s11049_s22 = smov 40  }
  0x3d   :  { %13491 = sst [smem:[#allocation28_spill]] %s11243_s6 }
  0x3e   :  { %s11258_s4 = sld [smem:[%s13447_s0 + %s11046_s28]]   ;;  %s11050_s28 = smov 41  }
  0x3f   :  { %s11263_s6 = sld [smem:[%s13447_s0 + %s11047_s7]]   ;;  %s11051_s7 = smov 42  }
  0x40   :  { %13492 = sst [smem:[#allocation29_spill]] %s11248_s20 }
  0x41   :  { %s11268_s20 = sld [smem:[%s13447_s0 + %s11048_s15]]  }
  0x42   :  { %13493 = sst [smem:[#allocation30_spill]] %s11253_s30 }
  0x43   :  { %s11273_s30 = sld [smem:[%s13447_s0 + %s11049_s22]]  }
  0x44   :  { %13494 = sst [smem:[#allocation31_spill]] %s11258_s4 }
  0x45   :  { %13495 = sst [smem:[#allocation32_spill]] %s11263_s6 }
  0x46   :  { %s11278_s4 = sld [smem:[%s13447_s0 + %s11050_s28]]  }
  0x47   :  { %s11283_s6 = sld [smem:[%s13447_s0 + %s11051_s7]]  }
  0x4c   :  { %13496 = sst [smem:[#allocation33_spill]] %s11278_s4 }
  0x4d   :  { %90 = vsyncpa [#allocation3], 0 }
  0x4e   :  { %92 = vsyncpa [#allocation3 + $0x1], 0  ;;  %s11285_s15 = smov 0   ;;  %s11287_s16 = smov 0  }
  0x4f   :  { %s11289_s18 = smov 0   ;;  %s11291_s22 = smov 0  }
  0x50 LB: > { %s13497_s3 = sld [smem:[#allocation7_spill]]  ;;  %13498 = sst [smem:[#allocation34_spill]] %s10904_s18  ;;  %s10896_s15 = sphi %s11285_s15, %s13593_s15   ;;  %s10908_s22 = sphi %s11291_s22, %s13590_s22   ;;  %s10904_s18 = sphi %s11289_s18, %s13592_s18   ;;  %s10900_s16 = sphi %s11287_s16, %s13594_s16  }
  0x51   : > { %s11306_s0 = sadd.s32 4294967295, %s10908_s22   ;;  %s8519_s23 = sadd.s32 4294967294, %s10908_s22  }
  0x52   : > { %s11310_s26 = sadd.s32 1, %s10908_s22   ;;  %s997_s28 = sadd.s32 1, %s10904_s18 }
  0x53   : > { %13499 = sst [smem:[#allocation35_spill]] %s11310_s26  ;;  %s994_s1 = ssub.s32 %s10908_s22, %s11310_s26 }
  0x54   : > { %p1007_p0 = scmp.ne.s32.totalorder %s10904_s18, %s10900_s16  ;;  %p995_p1 = scmp.eq.s32.totalorder %s994_s1, 0 }
  0x55   : > { %p1008_p2 = scmp.eq.s32.totalorder %s11306_s0, 1  ;;  %p1013_p3 = scmp.ne.s32.totalorder %s10900_s16, %s10896_s15 }
  0x56   : > { %p1014_p4 = scmp.eq.s32.totalorder %s8519_s23, 1  ;;  %p8522_p7 = scmp.ge.s32.totalorder %s10908_s22, 1 }
  0x57   : > { %s11321_s2 = scalar_select %p995_p1, %s10904_s18, %s997_s28  }
  0x58   : > { %p11323_p5 = por %p1008_p2, %p1007_p0  ;;  %p11327_p6 = por %p1014_p4, %p1013_p3 }
  0x59   : > { %13500 = sst [smem:[#allocation36_spill]] %s11321_s2  ;;  %p1168_p8 = scmp.lt.s32.totalorder %s10908_s22, 3 }
  0x5b   : > { %p1169_p9 = pnand %p8522_p7, %p1168_p8 }
  0x5d   : > { %1172 = sbr.rel (%p1169_p9) target bundleno = 8544 (0x2160), region = 188 }
  0x64   : > { %s13503_s9 = sld [smem:[#allocation6_spill]]  ;;  %s13504_s5 = sld [smem:[#allocation5_spill]]  ;;  %vm1294_vm0 = vcmask 736256   ;;  %vm1313_vm1 = vcmask 730112  }
  0x65   : > { %p1274_p10 = scmp.lt.s32.totalorder %s11306_s0, 1 }
  0x67   : > { %s1275_s11 = scalar_select %p1274_p10, %s11306_s0, 1 }
  0x69   : > { %s9750_s23 = smul.u32 56, %s1275_s11  ;;  %s9099_s28 = sshll.u32 %s1275_s11, 6 }
  0x6a   : > { %s11336_s1 = scalar_lea.vmem %s13503_s9, %s9099_s28 }
  0x6b   : > { %s1278_s2 = scalar_lea.vmem %s13504_s5, %s9750_s23  ;;  %s11498_s23 = smov 0  }
  0x6c   : > { %v11339_v0 = vld [vmem:[%s1278_s2] sm:$0xff]  ;;  %v11341_v1 = vld [vmem:[%s1278_s2 + $0x10] sm:$0xff]  ;;  %v11343_v2 = vld [vmem:[%s1278_s2 + $0x8] sm:$0xff] }
  0x6d   : > { %v1295_v3 = vsel %vm1294_vm0, %v11339_v0, 0.0  ;;  %v1301_v4 = vsel %vm1294_vm0, %v11341_v1, 0.0  ;;  %v11349_v5 = vld [vmem:[%s1278_s2 + $0x18] sm:$0xff]  ;;  %v1298_v6 = vsel %vm1294_vm0, %v11343_v2, 0.0  ;;  %v11355_v8 = vld [vmem:[%s1278_s2 + $0x20] sm:$0xff]  ;;  %v11357_v9 = vld [vmem:[%s1278_s2 + $0x28] sm:$0xff] }
  0x6e   : > { %1296 = vadd.xlane.f32.xlu0 %v1295_v3  ;;  %1302 = vadd.xlane.f32.xlu1 %v1301_v4  ;;  %v1304_v7 = vsel %vm1294_vm0, %v11349_v5, 0.0  ;;  %v1307_v10 = vsel %vm1294_vm0, %v11355_v8, 0.0  ;;  %v1310_v11 = vsel %vm1294_vm0, %v11357_v9, 0.0  ;;  %v11363_v12 = vld [vmem:[%s1278_s2 + $0x30] sm:$0x3]  ;;  %s13451_s2 = sand.u32 1, %s10900_s16  }
  0x6f   : > { %v1314_v13 = vsel %vm1313_vm1, %v11363_v12, 0.0  ;;  %s11482_s11 = scalar_lea.vmem [#allocation2], %s13451_s2 }
  0x72   : > { %1299 = vadd.xlane.f32.xlu0 %v1298_v6  ;;  %1305 = vadd.xlane.f32.xlu1 %v1304_v7 }
  0x76   : > { %1308 = vadd.xlane.f32.xlu0 %v1307_v10  ;;  %1311 = vadd.xlane.f32.xlu1 %v1310_v11 }
  0x7a   : > { %1315 = vadd.xlane.f32.xlu0 %v1314_v13 }
  0xfb   : > { %v1297_v14 = vpop.xlane.xlu0 %1296  ;;  %v1303_v15 = vpop.xlane.xlu1 %1302 }
  0xfc   : > { %v1317_v16 = vmul.f32 0.011111111, %v1297_v14  ;;  %v1319_v17 = vmul.f32 0.011111111, %v1303_v15 }
  0xfe   : > { %v11368_v18 = vsub.f32 %v11339_v0, %v1317_v16  ;;  %v11371_v19 = vsub.f32 %v11341_v1, %v1319_v17 }
  0xff   : > { %v1300_v20 = vpop.xlane.xlu0 %1299  ;;  %v1306_v21 = vpop.xlane.xlu1 %1305 }
 0x100   : > { %v1318_v22 = vmul.f32 0.011111111, %v1300_v20  ;;  %v1320_v23 = vmul.f32 0.011111111, %v1306_v21  ;;  %v1331_v24 = vmul.f32 %v11368_v18, %v11368_v18  ;;  %v1333_v25 = vmul.f32 %v11371_v19, %v11371_v19 }
 0x102   : > { %v11378_v26 = vsub.f32 %v11343_v2, %v1318_v22  ;;  %v11381_v27 = vsub.f32 %v11349_v5, %v1320_v23  ;;  %v1338_v28 = vsel %vm1294_vm0, %v1331_v24, 0.0  ;;  %v1344_v33 = vsel %vm1294_vm0, %v1333_v25, 0.0 }
 0x103   : > { %v1309_v29 = vpop.xlane.xlu0 %1308  ;;  %v1312_v30 = vpop.xlane.xlu1 %1311  ;;  %1339 = vadd.xlane.f32.xlu1 %v1338_v28 }
 0x104   : > { %v1321_v31 = vmul.f32 0.011111111, %v1309_v29  ;;  %v1322_v32 = vmul.f32 0.011111111, %v1312_v30  ;;  %v1332_v34 = vmul.f32 %v11378_v26, %v11378_v26  ;;  %v1334_v35 = vmul.f32 %v11381_v27, %v11381_v27 }
 0x106   : > { %v11390_v36 = vsub.f32 %v11355_v8, %v1321_v31  ;;  %v11393_v37 = vsub.f32 %v11357_v9, %v1322_v32  ;;  %v1341_v38 = vsel %vm1294_vm0, %v1332_v34, 0.0  ;;  %v1347_v42 = vsel %vm1294_vm0, %v1334_v35, 0.0 }
 0x107   : > { %v1316_v39 = vpop.xlane.xlu0 %1315  ;;  %1345 = vadd.xlane.f32.xlu1 %v1344_v33  ;;  %1342 = vadd.xlane.f32.xlu0 %v1341_v38 }
 0x108   : > { %v1323_v40 = vmul.f32 0.011111111, %v1316_v39  ;;  %v1335_v41 = vmul.f32 %v11390_v36, %v11390_v36  ;;  %v1336_v43 = vmul.f32 %v11393_v37, %v11393_v37 }
 0x10a   : > { %v11402_v44 = vsub.f32 %v11363_v12, %v1323_v40  ;;  %v1350_v45 = vsel %vm1294_vm0, %v1335_v41, 0.0  ;;  %v1353_v47 = vsel %vm1294_vm0, %v1336_v43, 0.0 }
 0x10b   : > { %1348 = vadd.xlane.f32.xlu0 %v1347_v42  ;;  %1351 = vadd.xlane.f32.xlu1 %v1350_v45 }
 0x10c   : > { %v1337_v46 = vmul.f32 %v11402_v44, %v11402_v44 }
 0x10e   : > { %v1356_v48 = vsel %vm1313_vm1, %v1337_v46, 0.0  ;;  %v8526_v46 = vld [vmem:[%s11083_s13] ss:$0 sm:$0xff] }
 0x10f   : > { %1354 = vadd.xlane.f32.xlu0 %v1353_v47  ;;  %1357 = vadd.xlane.f32.xlu1 %v1356_v48 }
 0x190   : > { %v1340_v49 = vpop.xlane.xlu1 %1339 }
 0x191   : > { %v1359_v50 = vmul.f32 0.011235955, %v1340_v49 }
 0x193   : > { %10044 = vrsqrt.f32 %v1359_v50  ;;  %vm1368_vm2 = vcmp.eq.f32.partialorder %v1359_v50, inf  ;;  %v1371_v4 = vand.u32 2147483648, %v1359_v50  ;;  %vm1370_vm3 = vcmp.eq.f32.partialorder %v1359_v50, 0.0 }
 0x194   : > { %v1346_v51 = vpop.xlane.xlu1 %1345  ;;  %v1343_v52 = vpop.xlane.xlu0 %1342 }
 0x195   : > { %v1361_v53 = vmul.f32 0.011235955, %v1346_v51  ;;  %v1360_v54 = vmul.f32 0.011235955, %v1343_v52 }
 0x197   : > { %10046 = vrsqrt.f32 %v1361_v53  ;;  %vm1382_vm4 = vcmp.eq.f32.partialorder %v1361_v53, inf  ;;  %vm1384_vm5 = vcmp.eq.f32.partialorder %v1361_v53, 0.0  ;;  %v1385_v14 = vand.u32 2147483648, %v1361_v53 }
 0x198   : > { %10048 = vrsqrt.f32 %v1360_v54  ;;  %v1352_v55 = vpop.xlane.xlu1 %1351  ;;  %v1349_v56 = vpop.xlane.xlu0 %1348  ;;  %vm1375_vm6 = vcmp.eq.f32.partialorder %v1360_v54, inf  ;;  %vm1377_vm7 = vcmp.eq.f32.partialorder %v1360_v54, 0.0  ;;  %v1378_v20 = vand.u32 2147483648, %v1360_v54 }
 0x199   : > { %v1363_v57 = vmul.f32 0.011235955, %v1352_v55  ;;  %v1362_v58 = vmul.f32 0.011235955, %v1349_v56 }
 0x19b   : > { %10050 = vrsqrt.f32 %v1363_v57  ;;  %vm1396_vm8 = vcmp.eq.f32.partialorder %v1363_v57, inf  ;;  %vm1398_vm9 = vcmp.eq.f32.partialorder %v1363_v57, 0.0  ;;  %v1399_v28 = vand.u32 2147483648, %v1363_v57 }
 0x19c   : > { %10052 = vrsqrt.f32 %v1362_v58  ;;  %v1358_v59 = vpop.xlane.xlu1 %1357  ;;  %v1355_v60 = vpop.xlane.xlu0 %1354  ;;  %vm1389_vm10 = vcmp.eq.f32.partialorder %v1362_v58, inf  ;;  %vm1391_vm11 = vcmp.eq.f32.partialorder %v1362_v58, 0.0  ;;  %v1392_v34 = vand.u32 2147483648, %v1362_v58 }
 0x19d   : > { %v10045_v61 = vpop.eup %10044  ;;  %v11409_v62 = vmul.f32 0.011235955, %v1358_v59  ;;  %v11411_v63 = vmul.f32 0.011235955, %v1355_v60 }
 0x19e   : > { %v1367_v3 = vmul.f32 %v10045_v61, %v1359_v50  ;;  %v1422_v61 = vmul.f32 %v8526_v46, %v11378_v26  ;;  %v1427_v26 = vmul.f32 %v8526_v46, %v11402_v44 }
 0x19f   : > { %10054 = vrsqrt.f32 %v11409_v62  ;;  %vm1410_vm12 = vcmp.eq.f32.partialorder %v11409_v62, inf  ;;  %v1413_v39 = vand.u32 2147483648, %v11409_v62  ;;  %vm1412_vm13 = vcmp.eq.f32.partialorder %v11409_v62, 0.0 }
 0x1a0   : > { %10056 = vrsqrt.f32 %v11411_v63  ;;  %v1369_v7 = vsel %vm1368_vm2, %v1359_v50, %v1367_v3  ;;  %vm1403_vm14 = vcmp.eq.f32.partialorder %v11411_v63, inf  ;;  %v1406_v50 = vand.u32 2147483648, %v11411_v63 }
 0x1a1   : > { %v10047_v6 = vpop.eup %10046  ;;  %v1372_v13 = vsel %vm1370_vm3, %v1371_v4, %v1369_v7  ;;  %vm1405_vm15 = vcmp.eq.f32.partialorder %v11411_v63, 0.0  ;;  %v1423_v4 = vmul.f32 %v8526_v46, %v11371_v19 }
 0x1a2   : > { %v10049_v10 = vpop.eup %10048  ;;  %v1381_v11 = vmul.f32 %v10047_v6, %v1361_v53  ;;  %v1428_v16 = vadd.f32 1e-06, %v1372_v13  ;;  %v1425_v13 = vmul.f32 %v8526_v46, %v11390_v36 }
 0x1a3   : > { %v1374_v15 = vmul.f32 %v10049_v10, %v1360_v54 }
 0x1a4   : > { %v1383_v17 = vsel %vm1382_vm4, %v1361_v53, %v1381_v11  ;;  %10058 = vrcp.f32 %v1428_v16  ;;  %v1421_v53 = vmul.f32 %v8526_v46, %v11368_v18  ;;  %v1424_v18 = vmul.f32 %v8526_v46, %v11381_v27 }
 0x1a5   : > { %v10051_v21 = vpop.eup %10050  ;;  %v1376_v22 = vsel %vm1375_vm6, %v1360_v54, %v1374_v15  ;;  %v1386_v23 = vsel %vm1384_vm5, %v1385_v14, %v1383_v17  ;;  %v1426_v17 = vmul.f32 %v8526_v46, %v11393_v37 }
 0x1a6   : > { %v10053_v24 = vpop.eup %10052  ;;  %v1395_v25 = vmul.f32 %v10051_v21, %v1363_v57  ;;  %v1379_v29 = vsel %vm1377_vm7, %v1378_v20, %v1376_v22  ;;  %v1430_v30 = vadd.f32 1e-06, %v1386_v23 }
 0x1a7   : > { %v1388_v31 = vmul.f32 %v10053_v24, %v1362_v58  ;;  %v1429_v32 = vadd.f32 1e-06, %v1379_v29 }
 0x1a8   : > { %v1397_v33 = vsel %vm1396_vm8, %v1363_v57, %v1395_v25  ;;  %10060 = vrcp.f32 %v1430_v30  ;;  %v8527_v57 = vld [vmem:[%s11088_s17] ss:$0 sm:$0xff] }
 0x1a9   : > { %v10055_v35 = vpop.eup %10054  ;;  %v1390_v38 = vsel %vm1389_vm10, %v1362_v58, %v1388_v31  ;;  %10062 = vrcp.f32 %v1429_v32  ;;  %v1400_v40 = vsel %vm1398_vm9, %v1399_v28, %v1397_v33 }
 0x1aa   : > { %v10057_v41 = vpop.eup %10056  ;;  %v1409_v42 = vmul.f32 %v10055_v35, %v11409_v62  ;;  %v1393_v43 = vsel %vm1391_vm11, %v1392_v34, %v1390_v38  ;;  %v1432_v45 = vadd.f32 1e-06, %v1400_v40 }
 0x1ab   : > { %v1402_v47 = vmul.f32 %v10057_v41, %v11411_v63  ;;  %v1431_v48 = vadd.f32 1e-06, %v1393_v43 }
 0x1ac   : > { %v1411_v49 = vsel %vm1410_vm12, %v11409_v62, %v1409_v42  ;;  %10064 = vrcp.f32 %v1432_v45 }
 0x1ad   : > { %v1404_v51 = vsel %vm1403_vm14, %v11411_v63, %v1402_v47  ;;  %10066 = vrcp.f32 %v1431_v48  ;;  %v1414_v52 = vsel %vm1412_vm13, %v1413_v39, %v1411_v49 }
 0x1ae   : > { %v1407_v54 = vsel %vm1405_vm15, %v1406_v50, %v1404_v51  ;;  %v1434_v55 = vadd.f32 1e-06, %v1414_v52  ;;  %v10059_v56 = vpop.eup %10058  ;;  %v11484_v50 = vmov 0.0   ;;  %v11486_v51 = vmov 0.0  }
 0x1af   : > { %v1433_v58 = vadd.f32 1e-06, %v1407_v54  ;;  %v1449_v59 = vmul.f32 %v10059_v56, %v1421_v53  ;;  %v11488_v52 = vmov 0.0   ;;  %v11490_v53 = vmov 0.0  }
 0x1b0   : > { %10068 = vrcp.f32 %v1434_v55  ;;  %v11492_v54 = vmov 0.0   ;;  %v11494_v55 = vmov 0.0   ;;  %v11496_v56 = vmov 0.0  }
 0x1b1   : > { %10070 = vrcp.f32 %v1433_v58  ;;  %v1462_v62 = vadd.f32 %v8527_v57, %v1449_v59 }
 0x1b2   : > { %v10061_v60 = vpop.eup %10060 }
 0x1b3   : > { %v10063_v3 = vpop.eup %10062  ;;  %1473 = vxpose.xlu0.b32.start [1/7] (short) (narrow) %v1462_v62, 96  ;;  %v1451_v10 = vmul.f32 %v10061_v60, %v1423_v4 }
 0x1b4   : > { %v1450_v63 = vmul.f32 %v10063_v3, %v1422_v61 }
 0x1b5   : > { %v1464_v19 = vadd.f32 %v8527_v57, %v1451_v10 }
 0x1b6   : > { %v10065_v6 = vpop.eup %10064  ;;  %v1463_v7 = vadd.f32 %v8527_v57, %v1450_v63 }
 0x1b7   : > { %v10067_v11 = vpop.eup %10066  ;;  %v1453_v21 = vmul.f32 %v10065_v6, %v1425_v13 }
 0x1b8   : > { %v11433_v14 = vpack.c.bf16 %v1463_v7, %v1462_v62  ;;  %1474 = vxpose.xlu0.b32.cont [2/7] (short) (narrow) %v1463_v7, 96  ;;  %v1452_v15 = vmul.f32 %v10067_v11, %v1424_v18 }
 0x1b9   : > { %v1466_v25 = vadd.f32 %v8527_v57, %v1453_v21 }
 0x1ba   : > { %v10069_v16 = vpop.eup %10068  ;;  %v1465_v20 = vadd.f32 %v8527_v57, %v1452_v15 }
 0x1bb   : > { %v10071_v22 = vpop.eup %10070  ;;  %v1455_v27 = vmul.f32 %v10069_v16, %v1427_v26 }
 0x1bc   : > { %1475 = vxpose.xlu0.b32.cont [3/7] (short) (narrow) %v1464_v19, 96  ;;  %v11437_v23 = vpack.c.bf16 %v1465_v20, %v1464_v19  ;;  %v1454_v24 = vmul.f32 %v10071_v22, %v1426_v17 }
 0x1bd   : > { %v1468_v36 = vadd.f32 %v8527_v57, %v1455_v27 }
 0x1be   : > { %v1467_v28 = vadd.f32 %v8527_v57, %v1454_v24 }
 0x1bf   : > { %v11439_v29 = vpack.c.bf16 %v1468_v36, %v1468_v36 }
 0x1c0   : > { %1476 = vxpose.xlu0.b32.cont [4/7] (short) (narrow) %v1465_v20, 96  ;;  %v11441_v44 = vpack.c.bf16 %v1467_v28, %v1466_v25 }
 0x1c4   : > { %1477 = vxpose.xlu0.b32.cont [5/7] (short) (narrow) %v1466_v25, 96 }
 0x1c8   : > { %1478 = vxpose.xlu0.b32.cont [6/7] (short) (narrow) %v1467_v28, 96 }
 0x1cc   : > { %1479 = vxpose.xlu0.b32.end [7/7] (short) (narrow) %v1468_v36, 96 }
 0x234   : > { %v11444_v37 = vpop.trf.xlu0 }
 0x238   : > { %v11446_v30 = vpop.trf.xlu0 }
 0x239   : > { %v1505_v31 = vpack.c.bf16 %v11446_v30, %v11444_v37 }
 0x23c   : > { %v11450_v32 = vpop.trf.xlu0 }
 0x240   : > { %v11452_v33 = vpop.trf.xlu0 }
 0x241   : > { %v1506_v34 = vpack.c.bf16 %v11452_v33, %v11450_v32 }
 0x244   : > { %v11456_v35 = vpop.trf.xlu0 }
 0x248   : > { %v11458_v38 = vpop.trf.xlu0 }
 0x249   : > { %v1507_v39 = vpack.c.bf16 %v11458_v38, %v11456_v35 }
 0x24c   : > { %v11462_v40 = vpop.trf.xlu0 }
 0x250   : > { %v11464_v41 = vpop.trf.xlu0 }
 0x251   : > { %v1508_v42 = vpack.c.bf16 %v11464_v41, %v11462_v40 }
 0x254   : > { %v11468_v43 = vpop.trf.xlu0 }
 0x258   : > { %v11470_v45 = vpop.trf.xlu0 }
 0x259   : > { %v1509_v46 = vpack.c.bf16 %v11470_v45, %v11468_v43 }
 0x25c   : > { %v11474_v47 = vpop.trf.xlu0 }
 0x260   : > { %v11476_v48 = vpop.trf.xlu0 }
 0x261   : > { %v1510_v49 = vpack.c.bf16 %v11476_v48, %v11474_v47 }
 0x262 LB: >> { %9352 = vmatprep.mubr.msk.bf16.mxu0 %vm1294_vm0, %v11433_v14  ;;  %v11052_v57 = vmov 0.0   ;;  %vm11053_vm2 = vmmov 0   ;;  %s13455_s28 = smul.u32 48, %s10940_s23  ;;  %s9101_s2 = sshll.u32 %s10940_s23, 3  ;;  %v11054_v58 = vmov 0   ;;  %vm1594_vm3 = vcmask 1044480   ;;  %s10940_s23 = sphi %s11498_s23, %s1516_s23   ;;  %v10936_v56 = vphi %v11496_v56, %v13512_v56   ;;  %v10932_v55 = vphi %v11494_v55, %v13511_v55   ;;  %v10928_v54 = vphi %v11492_v54, %v13510_v54   ;;  %v10924_v53 = vphi %v11490_v53, %v13509_v53   ;;  %v10920_v52 = vphi %v11488_v52, %v13508_v52   ;;  %v10916_v51 = vphi %v11486_v51, %v13507_v51   ;;  %v10912_v50 = vphi %v11484_v50, %v13506_v50  }
 0x263   : >> { %9360 = vmatprep.subr.bf16.mxu1 %v11052_v57  ;;  %9372 = vmatprep.mubr.msk.bf16.mxu1 %vm11053_vm2, %v11052_v57  ;;  %s11532_s5 = scalar_lea.vmem %s11103_s29, %s9101_s2  ;;  %s8542_s18 = sshll.u32 %s10940_s23, 4  ;;  %v1690_v6 = vsel %vm1594_vm3, %v1510_v49, 0  ;;  %vm1862_vm4 = vcmask 80896   ;;  %vm1949_vm5 = vcmask 408576   ;;  %vm1968_vm6 = vcmask 402432  }
 0x264   : >> { %9361 = vmatpush3.bf16.msra.mxu1 %v1505_v31  ;;  %10072 = vset.pattern.permute.xlu0 %v11054_v58  ;;  %s11537_s9 = scalar_lea.vmem %s11093_s21, %s13455_s28  ;;  %s1668_s26 = scalar_lea.vmem %s13497_s3, %s8542_s18  ;;  %v10078_v18 = vld [vmem:[%s11532_s5] sm:$0x1f]   ;;  %vm2048_vm7 = vcmask 1040384  }
 0x265   : >> { %9362 = vmatprep.subr.bf16.mxu1 %v11052_v57  ;;  %v10073_v59 = vld [vmem:[%s11537_s9] sm:$0xff]   ;;  %v10074_v60 = vld [vmem:[%s11537_s9 + $0x8] sm:$0xff]   ;;  %v10075_v61 = vld [vmem:[%s11537_s9 + $0x10] sm:$0xff]   ;;  %s11551_s28 = scalar_lea.vmem %s11123_s19, %s9101_s2  ;;  %s1539_s5 = scalar_lea.vmem %s11098_s25, %s10940_s23 }
 0x266   : >> { %9340 = vmatprep.subr.bf16.mxu0 %v10073_v59  ;;  %v1669_v62 = vld [vmem:[%s1668_s26] sm:$0xff]  ;;  %v10076_v3 = vld [vmem:[%s11537_s9 + $0x18] sm:$0xff]   ;;  %v1670_v4 = vld [vmem:[%s1668_s26 + $0x8] sm:$0x3]  ;;  %s1747_s26 = scalar_lea.vmem %s11118_s14, %s10940_s23 }
 0x267   : >> { %9341 = vmatpush3.bf16.msra.mxu0 %v10073_v59  ;;  %1673 = vperm.xlu0 %10072, %v1669_v62   ;;  %v10077_v63 = vld [vmem:[%s11537_s9 + $0x20] sm:$0xff]   ;;  %v10079_v7 = vld [vmem:[%s11537_s9 + $0x28] sm:$0x1f]   ;;  %s13505_s9 = smul.u32 48, %s10940_s23  ;;  %s1516_s23 = sadd.s32 1, %s10940_s23  }
 0x268   : >> { %9363 = vmatpush3.bf16.msra.mxu1 %v1506_v34  ;;  %9342 = vmatprep.subr.bf16.mxu0 %v10074_v60  ;;  %v1596_v10 = vsel %vm1594_vm3, %v10079_v7, 0  ;;  %v8529_v27 = vld [vmem:[%s1539_s5] ss:$0 sm:$0xff]  ;;  %p1513_p11 = scmp.ge.s32.totalorder %s1516_s23, 9  }
 0x269   : >> { %9364 = vmatprep.subr.bf16.mxu1 %v11052_v57  ;;  %s1734_s18 = scalar_lea.vmem %s11113_s8, %s13505_s9  ;;  %s13513_s2 = sld [smem:[#allocation8_spill]] (%p1513_p11) }
 0x26a   : > { %s13514_s23 = sld [smem:[#allocation9_spill]] (%p1513_p11)  ;;  %s13516_s5 = sld [smem:[#allocation11_spill]] (%p1513_p11) }
 0x26b   : >> { %9343 = vmatpush3.bf16.msra.mxu0 %v10074_v60  ;;  %1678 = vperm.xlu0 %10072, %v1670_v4   ;;  %s12016_s9 = smov (%p1513_p11), 0  }
 0x26c   : >> { %9365 = vmatpush3.bf16.msra.mxu1 %v1507_v39  ;;  %9344 = vmatprep.subr.bf16.mxu0 %v10075_v61 }
 0x26d   : >> { %9366 = vmatprep.subr.bf16.mxu1 %v11052_v57 }
 0x26f   : >> { %9345 = vmatpush3.bf16.msra.mxu0 %v10075_v61 }
 0x270   : >> { %9367 = vmatpush3.bf16.msra.mxu1 %v1508_v42  ;;  %9346 = vmatprep.subr.bf16.mxu0 %v10076_v3 }
 0x271   : >> { %9368 = vmatprep.subr.bf16.mxu1 %v11052_v57 }
 0x273   : >> { %9347 = vmatpush3.bf16.msra.mxu0 %v10076_v3 }
 0x274   : >> { %9369 = vmatpush3.bf16.msra.mxu1 %v1509_v46  ;;  %9348 = vmatprep.subr.bf16.mxu0 %v10077_v63 }
 0x275   : >> { %9370 = vmatprep.subr.bf16.mxu1 %v11052_v57 }
 0x277   : >> { %9349 = vmatpush3.bf16.msra.mxu0 %v10077_v63 }
 0x278   : >> { %9371 = vmatpush3.bf16.msra.mxu1 %v1690_v6  ;;  %9732 = vmatprep.subr.msk.bf16.mxu0 %vm1594_vm3, %v10079_v7 }
 0x27b   : >> { %9373 = vmatmul.mubr.msk.bf16.vlgmr.msra.gmra.mrb[0].mxu1 %vm1294_vm0, %v10078_v18  ;;  %9351 = vmatpush3.bf16.msra.mxu0 %v1596_v10 }
 0x27e   : >> { %9353 = vmatmul.mubr.msk.bf16.vlgmr.msra.gmra.mrb[0].mxu0 %vm1294_vm0, %v11437_v23 }
 0x27f   : >> { %9356 = vmatprep.mubr.msk.bf16.mxu0 %vm1294_vm0, %v11441_v44 }
 0x286   : >> { %9357 = vmatmul.mubr.msk.bf16.gmra.mrb[4].mxu0 %vm1294_vm0, %v11439_v29 }
 0x287   : >> { %9388 = vmatprep.mubr.msk.bf16.mxu0 %vm1294_vm0, %v11433_v14 }
 0x2e6   : >> { %v1674_v11 = vpop.permute.xlu0 %1673 }
 0x2ea   : >> { %v1679_v13 = vpop.permute.xlu0 %1678 }
 0x34e   : >> { %v1726_v15 = vpop.f32.mrb[0].mxu1 }
 0x34f   : >> { %v1727_v26 = vadd.f32 %v1726_v15, %v1674_v11  ;;  %v9374_v16 = vpop.f32.mrb[1].mxu1  ;;  %v10080_v15 = vld [vmem:[%s1734_s18] sm:$0xff]  }
 0x350   : >> { %v1729_v17 = vpop.f32.mrb[2].mxu1  ;;  %9376 = vmatprep.subr.bf16.mxu0 %v10080_v15  ;;  %v10082_v16 = vld [vmem:[%s1734_s18 + $0x10] sm:$0xff]  }
 0x351   : >> { %v1730_v19 = vadd.f32 %v1729_v17, %v1679_v13  ;;  %v9375_v20 = vpop.f32.mrb[3].mxu1  ;;  %v9354_v22 = vpop.f32.mrb[0].mxu0  ;;  %9377 = vmatpush3.bf16.msra.mxu0 %v10080_v15  ;;  %v10083_v17 = vld [vmem:[%s1734_s18 + $0x18] sm:$0xff]  }
 0x352   : >> { %v1632_v24 = vpop.f32.mrb[1].mxu0  ;;  %v1641_v28 = vadd.f32 %v9354_v22, %v8529_v27  ;;  %v10085_v20 = vld [vmem:[%s1734_s18 + $0x28] sm:$0x1f]  }
 0x353   : >> { %v1861_v21 = vpack.c.bf16 %v1730_v19, %v1727_v26  ;;  %v9355_v25 = vpop.f32.mrb[2].mxu0  ;;  %v1633_v59 = vadd.f32 %v8529_v27, %v1632_v24  ;;  %v10081_v26 = vld [vmem:[%s1734_s18 + $0x8] sm:$0xff]   ;;  %v10084_v19 = vld [vmem:[%s1734_s18 + $0x20] sm:$0xff]  }
 0x354   : >> { %v1644_v57 = vadd.f32 %v9355_v25, %v8529_v27  ;;  %v1635_v58 = vpop.f32.mrb[3].mxu0  ;;  %9378 = vmatprep.subr.bf16.mxu0 %v10081_v26 }
 0x355   : >> { %9734 = vmatprep.subr.msk.bf16.mxu1 %vm1594_vm3, %v1861_v21  ;;  %v1876_v36 = vsel %vm1594_vm3, %v1861_v21, 0  ;;  %v1636_v60 = vadd.f32 %v8529_v27, %v1635_v58  ;;  %9379 = vmatpush3.bf16.msra.mxu0 %v10081_v26  ;;  %v1791_v21 = vsel %vm1594_vm3, %v10085_v20, 0  ;;  %v11606_v26 = vld [vmem:[%s1747_s26] ss:$0 sm:$0xff] }
 0x356   : >> { %9397 = vmatpush3.bf16.msra.mxu1 %v1876_v36  ;;  %v1858_v61 = vpack.c.bf16 %v1644_v57, %v1641_v28  ;;  %9380 = vmatprep.subr.bf16.mxu0 %v10082_v16 }
 0x357   : >> { %v1857_v62 = vpack.c.bf16 %v1636_v60, %v1633_v59 }
 0x359   : >> { %v9358_v3 = vpop.f32.mrb[4].mxu0  ;;  %9398 = vmatprep.mubr.msk.bf16.mxu1 %vm1862_vm4, %v1857_v62  ;;  %9381 = vmatpush3.bf16.msra.mxu0 %v10082_v16 }
 0x35a   : >> { %v1657_v4 = vadd.f32 %v9358_v3, %v8529_v27  ;;  %v1648_v63 = vpop.f32.mrb[5].mxu0  ;;  %9399 = vmatmul.mubr.msk.bf16.vlgmr.msra.gmra.mrb[4].mxu1 %vm1862_vm4, %v1858_v61  ;;  %9382 = vmatprep.subr.bf16.mxu0 %v10083_v17 }
 0x35b   : >> { %v1649_v6 = vadd.f32 %v8529_v27, %v1648_v63  ;;  %v9359_v18 = vpop.f32.mrb[6].mxu0 }
 0x35c   : >> { %v1651_v7 = vpop.f32.mrb[7].mxu0  ;;  %v1860_v11 = vpack.c.bf16 %v1657_v4, %v1657_v4 }
 0x35d   : >> { %v1652_v10 = vadd.f32 %v8529_v27, %v1651_v7  ;;  %9383 = vmatpush3.bf16.msra.mxu0 %v10083_v17 }
 0x35e   : >> { %9384 = vmatprep.subr.bf16.mxu0 %v10084_v19 }
 0x35f   : >> { %v1859_v13 = vpack.c.bf16 %v1652_v10, %v1649_v6 }
 0x361   : >> { %9402 = vmatprep.mubr.msk.bf16.mxu1 %vm1862_vm4, %v1859_v13  ;;  %9385 = vmatpush3.bf16.msra.mxu0 %v10084_v19 }
 0x362   : >> { %9403 = vmatmul.mubr.msk.bf16.gmra.mrb[8].mxu1 %vm1862_vm4, %v1860_v11  ;;  %9733 = vmatprep.subr.msk.bf16.mxu0 %vm1594_vm3, %v10085_v20 }
 0x365   : >> { %9387 = vmatpush3.bf16.msra.mxu0 %v1791_v21 }
 0x368   : >> { %9389 = vmatmul.mubr.msk.bf16.vlgmr.msra.gmra.mrb[8].mxu0 %vm1294_vm0, %v11437_v23 }
 0x369   : >> { %9392 = vmatprep.mubr.msk.bf16.mxu0 %vm1294_vm0, %v11441_v44 }
 0x370   : >> { %9393 = vmatmul.mubr.msk.bf16.gmra.mrb[12].mxu0 %vm1294_vm0, %v11439_v29 }
 0x42d   : >> { %v9400_v22 = vpop.f32.mrb[4].mxu1 }
 0x42e   : >> { %v1944_v27 = vmul.f32 0.31622776, %v9400_v22  ;;  %v1912_v24 = vpop.f32.mrb[5].mxu1 }
 0x42f   : >> { %v1942_v36 = vmul.f32 0.31622776, %v1912_v24  ;;  %v9401_v25 = vpop.f32.mrb[6].mxu1 }
 0x430   : >> { %v1915_v28 = vpop.f32.mrb[7].mxu1  ;;  %v1956_v57 = vsel %vm1949_vm5, %v1944_v27, -inf  ;;  %v1945_v58 = vmul.f32 0.31622776, %v9401_v25 }
 0x431   : >> { %1957 = vmax.xlane.f32.xlu0 %v1956_v57  ;;  %v1950_v59 = vsel %vm1949_vm5, %v1942_v36, -inf  ;;  %v1943_v60 = vmul.f32 0.31622776, %v1915_v28 }
 0x432   : >> { %1951 = vmax.xlane.f32.xlu1 %v1950_v59  ;;  %v1959_v62 = vsel %vm1949_vm5, %v1945_v58, -inf }
 0x433   : >> { %v1953_v18 = vsel %vm1949_vm5, %v1943_v60, -inf }
 0x435   : >> { %v9404_v61 = vpop.f32.mrb[8].mxu1 }
 0x436   : >> { %1960 = vmax.xlane.f32.xlu1 %v1959_v62  ;;  %v1928_v3 = vpop.f32.mrb[9].mxu1  ;;  %v1948_v11 = vmul.f32 0.31622776, %v9404_v61 }
 0x437   : >> { %v9405_v4 = vpop.f32.mrb[10].mxu1  ;;  %v1946_v6 = vmul.f32 0.31622776, %v1928_v3 }
 0x438   : >> { %v1931_v63 = vpop.f32.mrb[11].mxu1  ;;  %v1969_v15 = vsel %vm1968_vm6, %v1948_v11, -inf }
 0x439   : >> { %v1947_v7 = vmul.f32 0.31622776, %v1931_v63  ;;  %v1962_v10 = vsel %vm1949_vm5, %v1946_v6, -inf }
 0x43a   : >> { %1954 = vmax.xlane.f32.xlu1 %v1953_v18 }
 0x43b   : >> { %v1965_v13 = vsel %vm1949_vm5, %v1947_v7, -inf  ;;  %v9390_v16 = vpop.f32.mrb[8].mxu0 }
 0x43c   : >> { %v1836_v17 = vadd.f32 %v9390_v16, %v11606_v26  ;;  %v1827_v19 = vpop.f32.mrb[9].mxu0 }
 0x43d   : >> { %v1828_v20 = vadd.f32 %v11606_v26, %v1827_v19  ;;  %v9391_v21 = vpop.f32.mrb[10].mxu0 }
 0x43e   : >> { %1963 = vmax.xlane.f32.xlu1 %v1962_v10  ;;  %v1839_v22 = vadd.f32 %v9391_v21, %v11606_v26  ;;  %v1830_v24 = vpop.f32.mrb[11].mxu0 }
 0x43f   : >> { %v1831_v25 = vadd.f32 %v11606_v26, %v1830_v24 }
 0x440   : >> { %v2033_v28 = vpack.c.bf16 %v1839_v22, %v1836_v17 }
 0x441   : >> { %v2032_v57 = vpack.c.bf16 %v1831_v25, %v1828_v20 }
 0x442   : >> { %1966 = vmax.xlane.f32.xlu1 %v1965_v13 }
 0x443   : >> { %9406 = vmatprep.subr.bf16.mxu1 %v2032_v57 }
 0x444   : >> { %9407 = vmatpush3.bf16.msra.mxu1 %v2032_v57 }
 0x445   : >> { %9408 = vmatprep.subr.bf16.mxu1 %v2033_v28 }
 0x446   : >> { %1970 = vmax.xlane.f32.xlu1 %v1969_v15 }
 0x448   : >> { %9409 = vmatpush3.bf16.msra.mxu1 %v2033_v28 }
 0x4be   : >> { %v1958_v59 = vpop.xlane.xlu0 %1957 }
 0x4bf   : >> { %v1974_v61 = vsub.f32 %v1944_v27, %v1958_v59  ;;  %v1952_v62 = vpop.xlane.xlu1 %1951 }
 0x4c0   : >> { %v1972_v3 = vsub.f32 %v1942_v36, %v1952_v62 }
 0x4c1   : >> { %v1983_v4 = vmul.f32 1.442695, %v1974_v61 }
 0x4c2   : >> { %v1979_v63 = vmul.f32 1.442695, %v1972_v3 }
 0x4c3   : >> { %10087 = vpow2.f32 %v1983_v4  ;;  %v1961_v18 = vpop.xlane.xlu1 %1960 }
 0x4c4   : >> { %10089 = vpow2.f32 %v1979_v63  ;;  %v1975_v10 = vsub.f32 %v1945_v58, %v1961_v18 }
 0x4c6   : >> { %v1985_v16 = vmul.f32 1.442695, %v1975_v10 }
 0x4c7   : >> { %v1955_v13 = vpop.xlane.xlu1 %1954 }
 0x4c8   : >> { %v1973_v15 = vsub.f32 %v1943_v60, %v1955_v13 }
 0x4ca   : >> { %v1981_v19 = vmul.f32 1.442695, %v1973_v15 }
 0x4cb   : >> { %v1964_v17 = vpop.xlane.xlu1 %1963 }
 0x4cc   : >> { %10091 = vpow2.f32 %v1981_v19  ;;  %v1976_v20 = vsub.f32 %v1946_v6, %v1964_v17 }
 0x4cd   : >> { %v11612_v21 = vpop.eup %10087  ;;  %10093 = vpow2.f32 %v1985_v16 }
 0x4ce   : >> { %v1987_v27 = vmul.f32 1.442695, %v1976_v20  ;;  %v1999_v36 = vsel %vm1949_vm5, %v11612_v21, 0.0  ;;  %v11616_v22 = vpop.eup %10089 }
 0x4cf   : >> { %2000 = vadd.xlane.f32.xlu1 %v1999_v36  ;;  %v1967_v24 = vpop.xlane.xlu1 %1966  ;;  %v1993_v60 = vsel %vm1949_vm5, %v11616_v22, 0.0 }
 0x4d0   : >> { %10095 = vpow2.f32 %v1987_v27  ;;  %v1977_v58 = vsub.f32 %v1947_v7, %v1967_v24 }
 0x4d2   : >> { %v1989_v25 = vmul.f32 1.442695, %v1977_v58 }
 0x4d3   : >> { %1994 = vadd.xlane.f32.xlu1 %v1993_v60  ;;  %v1971_v28 = vpop.xlane.xlu1 %1970 }
 0x4d4   : >> { %10097 = vpow2.f32 %v1989_v25  ;;  %v1978_v6 = vsub.f32 %v1948_v11, %v1971_v28  ;;  %v9394_v11 = vpop.f32.mrb[12].mxu0  ;;  %v10086_v25 = vld [vmem:[%s11551_s28] sm:$0x1f]   ;;  %s13515_s28 = sld [smem:[#allocation10_spill]] (%p1513_p11) }
 0x4d5   : >> { %v1843_v15 = vpop.f32.mrb[13].mxu0  ;;  %v1852_v27 = vadd.f32 %v9394_v11, %v11606_v26  ;;  %9736 = vmatprep.subr.msk.bf16.mxu0 %vm1594_vm3, %v10086_v25  ;;  %v2142_v60 = vsel %vm1594_vm3, %v10086_v25, 0 }
 0x4d6   : >> { %v10092_v57 = vpop.eup %10091  ;;  %v1991_v59 = vmul.f32 1.442695, %v1978_v6  ;;  %v9395_v16 = vpop.f32.mrb[14].mxu0  ;;  %v1844_v17 = vadd.f32 %v11606_v26, %v1843_v15  ;;  %9423 = vmatpush3.bf16.msra.mxu0 %v2142_v60 }
 0x4d7   : >> { %v1996_v61 = vsel %vm1949_vm5, %v10092_v57, 0.0  ;;  %v10094_v62 = vpop.eup %10093  ;;  %v1846_v19 = vpop.f32.mrb[15].mxu0  ;;  %v2035_v24 = vpack.c.bf16 %v1852_v27, %v1852_v27 }
 0x4d8   : >> { %10099 = vpow2.f32 %v1991_v59  ;;  %1997 = vadd.xlane.f32.xlu1 %v1996_v61  ;;  %v2002_v7 = vsel %vm1949_vm5, %v10094_v62, 0.0  ;;  %v1847_v20 = vadd.f32 %v11606_v26, %v1846_v19 }
 0x4d9   : >> { %v2050_v58 = vsel %vm2048_vm7, %v2035_v24, 0 }
 0x4da   : >> { %v10096_v3 = vpop.eup %10095  ;;  %v2034_v36 = vpack.c.bf16 %v1847_v20, %v1844_v17 }
 0x4db   : >> { %v2005_v4 = vsel %vm1949_vm5, %v10096_v3, 0.0 }
 0x4dc   : >> { %2006 = vadd.xlane.f32.xlu0 %v2005_v4  ;;  %2003 = vadd.xlane.f32.xlu1 %v2002_v7 }
 0x4dd   : >> { %9410 = vmatprep.subr.bf16.mxu1 %v2034_v36 }
 0x4de   : >> { %v10098_v63 = vpop.eup %10097  ;;  %9411 = vmatpush3.bf16.msra.mxu1 %v2034_v36 }
 0x4df   : >> { %v2008_v18 = vsel %vm1949_vm5, %v10098_v63, 0.0  ;;  %9735 = vmatprep.subr.msk.bf16.mxu1 %vm2048_vm7, %v2035_v24 }
 0x4e0   : >> { %2009 = vadd.xlane.f32.xlu1 %v2008_v18 }
 0x4e2   : >> { %v10100_v10 = vpop.eup %10099  ;;  %9413 = vmatpush3.bf16.msra.mxu1 %v2050_v58 }
 0x4e3   : >> { %v2011_v13 = vsel %vm1968_vm6, %v10100_v10, 0.0  ;;  %9737 = vmatprep.subr.msk.bf16.mxu1 %vm1594_vm3, %v10086_v25 }
 0x4e4   : >> { %2012 = vadd.xlane.f32.xlu0 %v2011_v13 }
 0x55c   : >> { %v2001_v28 = vpop.xlane.xlu1 %2000 }
 0x560   : >> { %v1995_v26 = vpop.xlane.xlu1 %1994 }
 0x561   : >> { %10101 = vrcp.f32 %v1995_v26 }
 0x565   : >> { %v1998_v6 = vpop.xlane.xlu1 %1997 }
 0x566   : >> { %10103 = vrcp.f32 %v1998_v6 }
 0x567   : >> { %10105 = vrcp.f32 %v2001_v28 }
 0x569   : >> { %v2007_v59 = vpop.xlane.xlu0 %2006  ;;  %v2004_v61 = vpop.xlane.xlu1 %2003 }
 0x56a   : >> { %10107 = vrcp.f32 %v2004_v61 }
 0x56b   : >> { %10109 = vrcp.f32 %v2007_v59  ;;  %v10102_v7 = vpop.eup %10101 }
 0x56c   : >> { %v2021_v13 = vmul.f32 %v10102_v7, %v11616_v22 }
 0x56d   : >> { %v2010_v4 = vpop.xlane.xlu1 %2009 }
 0x56e   : >> { %10111 = vrcp.f32 %v2010_v4 }
 0x570   : >> { %v10104_v18 = vpop.eup %10103 }
 0x571   : >> { %v2013_v11 = vpop.xlane.xlu0 %2012  ;;  %v2022_v15 = vmul.f32 %v10104_v18, %v10092_v57  ;;  %v10106_v16 = vpop.eup %10105 }
 0x572   : >> { %10113 = vrcp.f32 %v2013_v11  ;;  %v2023_v27 = vmul.f32 %v10106_v16, %v11612_v21 }
 0x573   : >> { %v2028_v19 = vpack.c.bf16 %v2022_v15, %v2021_v13 }
 0x574   : >> { %v10108_v17 = vpop.eup %10107 }
 0x575   : >> { %9414 = vmatprep.mubr.msk.bf16.mxu1 %vm1949_vm5, %v2028_v19  ;;  %v10110_v20 = vpop.eup %10109  ;;  %v2024_v36 = vmul.f32 %v10108_v17, %v10094_v62 }
 0x576   : >> { %v2025_v25 = vmul.f32 %v10110_v20, %v10096_v3 }
 0x577   : >> { %v2029_v58 = vpack.c.bf16 %v2024_v36, %v2023_v27 }
 0x578   : >> { %v10112_v24 = vpop.eup %10111 }
 0x579   : >> { %v2026_v28 = vmul.f32 %v10112_v24, %v10098_v63  ;;  %9415 = vmatmul.mubr.msk.bf16.vlgmr.msra.gmra.mrb[12].mxu1 %vm1949_vm5, %v2029_v58 }
 0x57a   : >> { %9705 = vmatpush3.bf16.msra.mxu1 %v2142_v60 }
 0x57b   : >> { %v2030_v26 = vpack.c.bf16 %v2026_v28, %v2025_v25 }
 0x57c   : >> { %v10114_v22 = vpop.eup %10113 }
 0x57d   : >> { %9418 = vmatprep.mubr.msk.bf16.mxu1 %vm1949_vm5, %v2030_v26  ;;  %v2027_v57 = vmul.f32 %v10114_v22, %v10100_v10 }
 0x57f   : >> { %v2031_v6 = vpack.c.bf16 %v2027_v57, %v2027_v57 }
 0x581   : >> { %9419 = vmatmul.mubr.msk.bf16.gmra.mrb[16].mxu1 %vm1949_vm5, %v2031_v6  ;;  %v8571_v6 = vld [vmem:[%s11128_s24] ss:$0 sm:$0xff] (%p1513_p11) }
 0x64c   : >> { %v9416_v59 = vpop.f32.mrb[12].mxu1 }
 0x64d   : >> { %v2086_v61 = vpop.f32.mrb[13].mxu1 }
 0x64e   : >> { %v9417_v4 = vpop.f32.mrb[14].mxu1 }
 0x64f   : >> { %v2117_v21 = vpack.c.bf16 %v9417_v4, %v9416_v59  ;;  %v2089_v62 = vpop.f32.mrb[15].mxu1 }
 0x650   : >> { %v2116_v7 = vpack.c.bf16 %v2089_v62, %v2086_v61 }
 0x652   : >> { %9424 = vmatprep.mubr.msk.bf16.mxu0 %vm1862_vm4, %v2116_v7 }
 0x653   : >> { %9425 = vmatmul.mubr.msk.bf16.vlgmr.msra.gmra.mrb[16].mxu0 %vm1862_vm4, %v2117_v21 }
 0x654   : >> { %v9420_v3 = vpop.f32.mrb[16].mxu1 }
 0x655   : >> { %v2102_v63 = vpop.f32.mrb[17].mxu1  ;;  %v2119_v13 = vpack.c.bf16 %v9420_v3, %v9420_v3 }
 0x656   : >> { %v9421_v60 = vpop.f32.mrb[18].mxu1 }
 0x657   : >> { %v2105_v18 = vpop.f32.mrb[19].mxu1 }
 0x658   : >> { %v2118_v11 = vpack.c.bf16 %v2105_v18, %v2102_v63 }
 0x65a   : >> { %9428 = vmatprep.mubr.msk.bf16.mxu1 %vm1862_vm4, %v2118_v11 }
 0x65b   : >> { %9429 = vmatmul.mubr.msk.bf16.vlgmr.msra.gmra.mrb[20].mxu1 %vm1862_vm4, %v2119_v13 }
 0x726   : >> { %v9426_v10 = vpop.f32.mrb[16].mxu0 }
 0x727   : >> { %v2210_v15 = vadd.f32 %v10928_v54, %v9426_v10   ;;  %v2178_v16 = vpop.f32.mrb[17].mxu0 }
 0x728   : >> { %v2208_v19 = vadd.f32 %v10936_v56, %v2178_v16   ;;  %v9427_v17 = vpop.f32.mrb[18].mxu0 }
 0x729   : >> { %v2211_v20 = vadd.f32 %v10924_v53, %v9427_v17   ;;  %v2181_v27 = vpop.f32.mrb[19].mxu0  ;;  %v13510_v54 = vmov %v2210_v15  ;;  %v2217_v59 = vadd.f32 (%p1513_p11), %v2210_v15, %v11341_v1 }
 0x72a   : >> { %v2209_v36 = vadd.f32 %v10932_v55, %v2181_v27   ;;  %v13512_v56 = vmov %v2208_v19 }
 0x72b   : >> { %v13509_v53 = vmov %v2211_v20  ;;  %v2215_v56 = vadd.f32 (%p1513_p11), %v2208_v19, %v11339_v0  ;;  %v2218_v4 = vadd.f32 (%p1513_p11), %v2211_v20, %v11349_v5  ;;  %v11678_v63 = vadd.f32 (%p1513_p11), %v8571_v6, %v2217_v59  ;;  %v10128_v59 = vld [vmem:[%s11143_s12 + $0x38] ss:$12 sps:$4 sm:$0xff] (%p1513_p11)  }
 0x72c   : >> { %v13511_v55 = vmov %v2209_v36  ;;  %v2216_v61 = vadd.f32 (%p1513_p11), %v2209_v36, %v11343_v2 }
 0x72d   : > { %v11676_v3 = vadd.f32 (%p1513_p11), %v8571_v6, %v2215_v56  ;;  %v11682_v0 = vadd.f32 (%p1513_p11), %v8571_v6, %v2218_v4  ;;  %v10125_v56 = vld [vmem:[%s11143_s12 + $0x30] ss:$12 sps:$4 sm:$0xff] (%p1513_p11)  }
 0x72e   : >> { %v9430_v24 = vpop.f32.mrb[20].mxu1  ;;  %1515 = sbr.rel (!%p1513_p11) target bundleno = 610 (0x262), region = 319  ;;  %v11680_v14 = vadd.f32 (%p1513_p11), %v8571_v6, %v2216_v61  ;;  %v10129_v61 = vld [vmem:[%s11143_s12 + $0x48] ss:$12 sps:$4 sm:$0xff] (%p1513_p11)   ;;  %v10130_v4 = vld [vmem:[%s11143_s12 + $0x64] ss:$12 sps:$4 sm:$0xff] (%p1513_p11)  }
 0x72f   : >> { %v2214_v58 = vadd.f32 %v10912_v50, %v9430_v24   ;;  %v2194_v25 = vpop.f32.mrb[21].mxu1  ;;  %v2238_v5 = vsel (%p1513_p11), %vm1294_vm0, %v11676_v3, 0.0  ;;  %v10115_v24 = vld [vmem:[%s11143_s12 + $0x4] ss:$12 sps:$4 sm:$0xff] (%p1513_p11)  }
 0x730   : >> { %v2212_v28 = vadd.f32 %v10920_v52, %v2194_v25   ;;  %v9431_v26 = vpop.f32.mrb[22].mxu1  ;;  %2239 = vadd.xlane.f32.xlu0 (%p1513_p11), %v2238_v5  ;;  %2571 = vmatprep.subr.bf16.mxu0 (%p1513_p11), %v10115_v24  ;;  %v10118_v25 = vld [vmem:[%s11143_s12 + $0x1c] ss:$12 sps:$4 sm:$0xff] (%p1513_p11)  }
 0x731   : >> { %v2197_v22 = vpop.f32.mrb[23].mxu1  ;;  %v13506_v50 = vmov %v2214_v58  ;;  %v2221_v7 = vadd.f32 (%p1513_p11), %v2214_v58, %v11363_v12  ;;  %v2247_v12 = vsel (%p1513_p11), %vm1294_vm0, %v11682_v0, 0.0  ;;  %v10117_v58 = vld [vmem:[%s11143_s12] ss:$12 sps:$4 sm:$0xff] (%p1513_p11)   ;;  %v10121_v26 = vld [vmem:[%s11143_s12 + $0x18] ss:$12 sps:$4 sm:$0xff] (%p1513_p11)  }
 0x732   : >> { %v2213_v57 = vadd.f32 %v10916_v51, %v2197_v22   ;;  %v13508_v52 = vmov %v2212_v28  ;;  %v2219_v21 = vadd.f32 (%p1513_p11), %v2212_v28, %v11355_v8  ;;  %v2244_v8 = vsel (%p1513_p11), %vm1294_vm0, %v11678_v63, 0.0  ;;  %2572 = vmatpush1.bf16.msra.mxu0 (%p1513_p11), %v10117_v58  ;;  %v10120_v28 = vld [vmem:[%s11143_s12 + $0x8] ss:$12 sps:$4 sm:$0xff] (%p1513_p11)  }
 0x733   : > { %v11688_v2 = vadd.f32 (%p1513_p11), %v8571_v6, %v2221_v7  ;;  %2245 = vadd.xlane.f32.xlu1 (%p1513_p11), %v2244_v8  ;;  %2573 = vmatprep.subr.bf16.mxu0 (%p1513_p11), %v10118_v25  ;;  %v10122_v22 = vld [vmem:[%s11143_s12 + $0x34] ss:$12 sps:$4 sm:$0xff] (%p1513_p11)   ;;  %v10134_v7 = vld [vmem:[%s11143_s12 + $0x7c] ss:$12 sps:$4 sm:$0x1f] (%p1513_p11)  }
 0x734   : >> { %v13507_v51 = vmov %v2213_v57  ;;  %v2220_v62 = vadd.f32 (%p1513_p11), %v2213_v57, %v11357_v9  ;;  %v11684_v23 = vadd.f32 (%p1513_p11), %v8571_v6, %v2219_v21  ;;  %v2241_v9 = vsel (%p1513_p11), %vm1294_vm0, %v11680_v14, 0.0  ;;  %9432 = vmatprep.subr.bf16.mxu1 (%p1513_p11), %v10120_v28  ;;  %v10124_v57 = vld [vmem:[%s11143_s12 + $0x20] ss:$12 sps:$4 sm:$0xff] (%p1513_p11)   ;;  %v10132_v21 = vld [vmem:[%s11143_s12 + $0x50] ss:$12 sps:$4 sm:$0xff] (%p1513_p11)  }
 0x735   : > { %v2256_v37 = vsel %vm1313_vm1, %v11688_v2, 0.0  ;;  %2242 = vadd.xlane.f32.xlu0 %v2241_v9  ;;  %9433 = vmatpush3.bf16.msra.mxu1 %v10120_v28  ;;  %v10136_v5 = vld [vmem:[%s11143_s12 + $0x68] ss:$12 sps:$4 sm:$0xff]   ;;  %v10137_v8 = vld [vmem:[%s11143_s12 + $0x78] ss:$12 sps:$4 sm:$0x1f]  }
 0x736   : > { %v11686_v1 = vadd.f32 %v8571_v6, %v2220_v62  ;;  %v2250_v29 = vsel %vm1294_vm0, %v11684_v23, 0.0  ;;  %2574 = vmatpush1.bf16.msra.mxu0 %v10121_v26  ;;  %9434 = vmatprep.subr.bf16.mxu1 %v10124_v57  ;;  %v10126_v6 = vld [vmem:[%s11143_s12 + $0x4c] ss:$12 sps:$4 sm:$0xff]   ;;  %v13456_v9 = vmov 0  }
 0x737   : > { %2248 = vadd.xlane.f32.xlu1 %v2247_v12  ;;  %2575 = vmatprep.subr.bf16.mxu0 %v10122_v22  ;;  %v10133_v62 = vld [vmem:[%s11143_s12 + $0x60] ss:$12 sps:$4 sm:$0xff]   ;;  %v2563_v12 = vsel %vm1594_vm3, %v10137_v8, 0 }
 0x738   : > { %v2253_v44 = vsel %vm1294_vm0, %v11686_v1, 0.0  ;;  %2603 = vmatprep.mubr.bf16.mxu0 %v13456_v9 }
 0x739   : > { %2251 = vadd.xlane.f32.xlu0 %v2250_v29  ;;  %9435 = vmatpush3.bf16.msra.mxu1 %v10124_v57  ;;  %v10138_v29 = vld [vmem:[%s11143_s12 + $0x80] ss:$12 sps:$4 sm:$0x1f]  }
 0x73a   : > { %2576 = vmatpush1.bf16.msra.mxu0 %v10125_v56  ;;  %9436 = vmatprep.subr.bf16.mxu1 %v10128_v59 }
 0x73b   : > { %2254 = vadd.xlane.f32.xlu1 %v2253_v44  ;;  %2577 = vmatprep.subr.bf16.mxu0 %v10126_v6  ;;  %v2569_v44 = vsel %vm1594_vm3, %v10138_v29, 0 }
 0x73d   : > { %2257 = vadd.xlane.f32.xlu0 %v2256_v37  ;;  %9437 = vmatpush3.bf16.msra.mxu1 %v10128_v59  ;;  %v10139_v37 = vld [vmem:[%s11153_s27 + $0x40] sm:$0xff]  }
 0x73e   : > { %2578 = vmatpush1.bf16.msra.mxu0 %v10129_v61  ;;  %9438 = vmatprep.subr.bf16.mxu1 %v10132_v21 }
 0x73f   : > { %2579 = vmatprep.subr.bf16.mxu0 %v10130_v4 }
 0x741   : > { %9439 = vmatpush3.bf16.msra.mxu1 %v10132_v21 }
 0x742   : > { %2580 = vmatpush1.bf16.msra.mxu0 %v10133_v62  ;;  %9440 = vmatprep.subr.bf16.mxu1 %v10136_v5 }
 0x743   : > { %8592 = vmatprep.subr.msk.bf16.mxu0 %vm1594_vm3, %v10134_v7 }
 0x745   : > { %9441 = vmatpush3.bf16.msra.mxu1 %v10136_v5 }
 0x746   : > { %2582 = vmatpush1.bf16.msra.mxu0 %v2563_v12  ;;  %9738 = vmatprep.subr.msk.bf16.mxu1 %vm1594_vm3, %v10138_v29 }
 0x747   : > { %9163 = vmatprep.subr.bf16.mxu0 %v10139_v37 }
 0x749   : > { %9443 = vmatpush3.bf16.msra.mxu1 %v2569_v44 }
 0x7bd   : > { %v2240_v30 = vpop.xlane.xlu0 %2239 }
 0x7be   : > { %v2259_v32 = vmul.f32 0.011111111, %v2240_v30  ;;  %v11771_v30 = vld [vmem:[%s11153_s27 + $0x80] sm:$0xff]  }
 0x7bf   : > { %9452 = vmatprep.subr.bf16.mxu1 %v11771_v30 }
 0x7c0   : > { %v2246_v31 = vpop.xlane.xlu1 %2245  ;;  %v11705_v34 = vsub.f32 %v11676_v3, %v2259_v32 }
 0x7c1   : > { %v2261_v33 = vmul.f32 0.011111111, %v2246_v31 }
 0x7c2   : > { %v2243_v38 = vpop.xlane.xlu0 %2242  ;;  %v2273_v42 = vmul.f32 %v11705_v34, %v11705_v34 }
 0x7c3   : > { %v11708_v35 = vsub.f32 %v11678_v63, %v2261_v33  ;;  %v2260_v40 = vmul.f32 0.011111111, %v2243_v38 }
 0x7c4   : > { %v2249_v39 = vpop.xlane.xlu1 %2248  ;;  %v2280_v47 = vsel %vm1294_vm0, %v2273_v42, 0.0 }
 0x7c5   : > { %v2262_v41 = vmul.f32 0.011111111, %v2249_v39  ;;  %v2275_v43 = vmul.f32 %v11708_v35, %v11708_v35  ;;  %v11715_v45 = vsub.f32 %v11680_v14, %v2260_v40  ;;  %2281 = vadd.xlane.f32.xlu1 %v2280_v47 }
 0x7c6   : > { %v2252_v48 = vpop.xlane.xlu0 %2251 }
 0x7c7   : > { %v11718_v46 = vsub.f32 %v11682_v0, %v2262_v41  ;;  %v2263_v50 = vmul.f32 0.011111111, %v2252_v48  ;;  %v2286_v52 = vsel %vm1294_vm0, %v2275_v43, 0.0  ;;  %v2274_v53 = vmul.f32 %v11715_v45, %v11715_v45 }
 0x7c8   : > { %v2255_v49 = vpop.xlane.xlu1 %2254 }
 0x7c9   : > { %v2264_v51 = vmul.f32 0.011111111, %v2255_v49  ;;  %v2276_v54 = vmul.f32 %v11718_v46, %v11718_v46  ;;  %v11727_v55 = vsub.f32 %v11684_v23, %v2263_v50  ;;  %v2283_v18 = vsel %vm1294_vm0, %v2274_v53, 0.0  ;;  %2287 = vadd.xlane.f32.xlu1 %v2286_v52 }
 0x7ca   : > { %v2258_v11 = vpop.xlane.xlu0 %2257  ;;  %2284 = vadd.xlane.f32.xlu0 %v2283_v18 }
 0x7cb   : > { %v11730_v60 = vsub.f32 %v11686_v1, %v2264_v51  ;;  %v2265_v13 = vmul.f32 0.011111111, %v2258_v11  ;;  %v2277_v10 = vmul.f32 %v11727_v55, %v11727_v55  ;;  %v2289_v15 = vsel %vm1294_vm0, %v2276_v54, 0.0 }
 0x7cd   : > { %v2278_v16 = vmul.f32 %v11730_v60, %v11730_v60  ;;  %v11739_v19 = vsub.f32 %v11688_v2, %v2265_v13  ;;  %v2292_v17 = vsel %vm1294_vm0, %v2277_v10, 0.0 }
 0x7ce   : > { %2290 = vadd.xlane.f32.xlu0 %v2289_v15  ;;  %2293 = vadd.xlane.f32.xlu1 %v2292_v17 }
 0x7cf   : > { %v2279_v20 = vmul.f32 %v11739_v19, %v11739_v19  ;;  %v2295_v27 = vsel %vm1294_vm0, %v2278_v16, 0.0 }
 0x7d1   : > { %v2298_v36 = vsel %vm1313_vm1, %v2279_v20, 0.0 }
 0x7d2   : > { %2296 = vadd.xlane.f32.xlu0 %v2295_v27  ;;  %2299 = vadd.xlane.f32.xlu1 %v2298_v36 }
 0x852   : > { %v2282_v31 = vpop.xlane.xlu1 %2281 }
 0x853   : > { %v2301_v32 = vmul.f32 0.011235955, %v2282_v31 }
 0x855   : > { %10162 = vrsqrt.f32 %v2301_v32  ;;  %vm2310_vm8 = vcmp.eq.f32.partialorder %v2301_v32, inf  ;;  %v2313_v54 = vand.u32 2147483648, %v2301_v32  ;;  %vm2312_vm9 = vcmp.eq.f32.partialorder %v2301_v32, 0.0 }
 0x856   : > { %v2288_v33 = vpop.xlane.xlu1 %2287 }
 0x857   : > { %v2285_v38 = vpop.xlane.xlu0 %2284  ;;  %v2303_v39 = vmul.f32 0.011235955, %v2288_v33 }
 0x858   : > { %v2302_v40 = vmul.f32 0.011235955, %v2285_v38  ;;  %v8572_v38 = vld [vmem:[%s13513_s2] ss:$0 sm:$0xff] }
 0x859   : > { %10164 = vrsqrt.f32 %v2303_v39  ;;  %vm2324_vm10 = vcmp.eq.f32.partialorder %v2303_v39, inf  ;;  %vm2326_vm11 = vcmp.eq.f32.partialorder %v2303_v39, 0.0  ;;  %v2327_v17 = vand.u32 2147483648, %v2303_v39 }
 0x85a   : > { %10166 = vrsqrt.f32 %v2302_v40  ;;  %vm2317_vm12 = vcmp.eq.f32.partialorder %v2302_v40, inf  ;;  %vm2319_vm13 = vcmp.eq.f32.partialorder %v2302_v40, 0.0  ;;  %v2320_v36 = vand.u32 2147483648, %v2302_v40 }
 0x85b   : > { %v2294_v41 = vpop.xlane.xlu1 %2293  ;;  %v2291_v42 = vpop.xlane.xlu0 %2290 }
 0x85c   : > { %v2305_v43 = vmul.f32 0.011235955, %v2294_v41  ;;  %v2304_v47 = vmul.f32 0.011235955, %v2291_v42 }
 0x85e   : > { %10168 = vrsqrt.f32 %v2305_v43  ;;  %vm2338_vm14 = vcmp.eq.f32.partialorder %v2305_v43, inf  ;;  %v2341_v25 = vand.u32 2147483648, %v2305_v43  ;;  %vm2340_vm15 = vcmp.eq.f32.partialorder %v2305_v43, 0.0 }
 0x85f   : > { %10170 = vrsqrt.f32 %v2304_v47  ;;  %v2300_v48 = vpop.xlane.xlu1 %2299  ;;  %v2297_v49 = vpop.xlane.xlu0 %2296  ;;  %vm2331_vm2 = vcmp.eq.f32.partialorder %v2304_v47, inf  ;;  %v2334_v4 = vand.u32 2147483648, %v2304_v47 }
 0x860   : > { %v10163_v50 = vpop.eup %10162  ;;  %v11774_v51 = vmul.f32 0.011235955, %v2300_v48  ;;  %v11776_v52 = vmul.f32 0.011235955, %v2297_v49  ;;  %v2363_v48 = vmul.f32 %v8572_v38, %v11705_v34 }
 0x861   : > { %v2309_v53 = vmul.f32 %v10163_v50, %v2301_v32  ;;  %v2364_v50 = vmul.f32 %v8572_v38, %v11715_v45 }
 0x862   : > { %10172 = vrsqrt.f32 %v11774_v51  ;;  %v2355_v7 = vand.u32 2147483648, %v11774_v51  ;;  %v2348_v33 = vand.u32 2147483648, %v11776_v52 }
 0x863   : > { %v2311_v18 = vsel %vm2310_vm8, %v2301_v32, %v2309_v53  ;;  %10174 = vrsqrt.f32 %v11776_v52  ;;  %v10165_v11 = vpop.eup %10164  ;;  %vm2333_vm8 = vcmp.eq.f32.partialorder %v2304_v47, 0.0 }
 0x864   : > { %v2314_v13 = vsel %vm2312_vm9, %v2313_v54, %v2311_v18  ;;  %v10167_v10 = vpop.eup %10166  ;;  %v2323_v15 = vmul.f32 %v10165_v11, %v2303_v39  ;;  %vm2352_vm9 = vcmp.eq.f32.partialorder %v11774_v51, inf  ;;  %v8573_v54 = vld [vmem:[%s13514_s23] ss:$0 sm:$0xff] }
 0x865   : > { %v2370_v16 = vadd.f32 1e-06, %v2314_v13  ;;  %v2316_v20 = vmul.f32 %v10167_v10, %v2302_v40  ;;  %v2366_v13 = vmul.f32 %v8572_v38, %v11718_v46 }
 0x866   : > { %v2325_v27 = vsel %vm2324_vm10, %v2303_v39, %v2323_v15  ;;  %vm2354_vm10 = vcmp.eq.f32.partialorder %v11774_v51, 0.0 }
 0x867   : > { %v2318_v58 = vsel %vm2317_vm12, %v2302_v40, %v2316_v20  ;;  %10176 = vrcp.f32 %v2370_v16  ;;  %v2328_v28 = vsel %vm2326_vm11, %v2327_v17, %v2325_v27  ;;  %vm2345_vm11 = vcmp.eq.f32.partialorder %v11776_v52, inf  ;;  %v10140_v17 = vld [vmem:[%s11153_s27] sm:$0xff]  }
 0x868   : > { %v10169_v24 = vpop.eup %10168  ;;  %v2321_v57 = vsel %vm2319_vm13, %v2320_v36, %v2318_v58  ;;  %v2372_v56 = vadd.f32 1e-06, %v2328_v28  ;;  %vm2347_vm12 = vcmp.eq.f32.partialorder %v11776_v52, 0.0  ;;  %v2367_v20 = vmul.f32 %v8572_v38, %v11727_v55  ;;  %v10141_v36 = vld [vmem:[%s11153_s27 + $0x48] sm:$0xff]  }
 0x869   : > { %v10171_v26 = vpop.eup %10170  ;;  %v2337_v22 = vmul.f32 %v10169_v24, %v2305_v43  ;;  %v2371_v59 = vadd.f32 1e-06, %v2321_v57  ;;  %v2368_v24 = vmul.f32 %v8572_v38, %v11730_v60  ;;  %v10142_v55 = vld [vmem:[%s11153_s27 + $0x8] sm:$0xff]   ;;  %v10143_v57 = vld [vmem:[%s11153_s27 + $0x50] sm:$0xff]   ;;  %vm2932_vm13 = vcmask 1043456  }
 0x86a   : > { %v2330_v6 = vmul.f32 %v10171_v26, %v2304_v47  ;;  %10178 = vrcp.f32 %v2372_v56  ;;  %v10147_v56 = vld [vmem:[%s11153_s27 + $0x88] sm:$0xff]  }
 0x86b   : > { %v2339_v61 = vsel %vm2338_vm14, %v2305_v43, %v2337_v22  ;;  %10180 = vrcp.f32 %v2371_v59  ;;  %vm2919_vm14 = vcmask 850944  }
 0x86c   : > { %v10173_v21 = vpop.eup %10172  ;;  %v2332_v62 = vsel %vm2331_vm2, %v2304_v47, %v2330_v6  ;;  %v2342_v5 = vsel %vm2340_vm15, %v2341_v25, %v2339_v61  ;;  %v10145_v61 = vld [vmem:[%s11153_s27 + $0x10] sm:$0xff]  }
 0x86d   : > { %v10175_v8 = vpop.eup %10174  ;;  %v2351_v12 = vmul.f32 %v10173_v21, %v11774_v51  ;;  %v2335_v29 = vsel %vm2333_vm8, %v2334_v4, %v2332_v62  ;;  %v2374_v44 = vadd.f32 1e-06, %v2342_v5  ;;  %v10146_v62 = vld [vmem:[%s11153_s27 + $0x58] sm:$0xff]  }
 0x86e   : > { %v2344_v37 = vmul.f32 %v10175_v8, %v11776_v52  ;;  %v2373_v31 = vadd.f32 1e-06, %v2335_v29  ;;  %v10148_v5 = vld [vmem:[%s11153_s27 + $0x18] sm:$0xff]   ;;  %v10151_v29 = vld [vmem:[%s11153_s27 + $0x20] sm:$0xff]  }
 0x86f   : > { %v2353_v32 = vsel %vm2352_vm9, %v11774_v51, %v2351_v12  ;;  %10182 = vrcp.f32 %v2374_v44  ;;  %v10153_v12 = vld [vmem:[%s11153_s27 + $0x98] sm:$0xff]   ;;  %v10152_v44 = vld [vmem:[%s11153_s27 + $0x68] sm:$0xff]  }
 0x870   : > { %v2346_v39 = vsel %vm2345_vm11, %v11776_v52, %v2344_v37  ;;  %10184 = vrcp.f32 %v2373_v31  ;;  %v2356_v40 = vsel %vm2354_vm10, %v2355_v7, %v2353_v32  ;;  %v2365_v52 = vmul.f32 %v8572_v38, %v11708_v35  ;;  %v10150_v7 = vld [vmem:[%s11153_s27 + $0x90] sm:$0xff]   ;;  %v10154_v37 = vld [vmem:[%s11153_s27 + $0x28] sm:$0xff]   ;;  %v10156_v32 = vld [vmem:[%s11153_s27 + $0xa0] sm:$0xff]  }
 0x871   : > { %v2349_v41 = vsel %vm2347_vm12, %v2348_v33, %v2346_v39  ;;  %v2376_v42 = vadd.f32 1e-06, %v2356_v40  ;;  %v10177_v43 = vpop.eup %10176  ;;  %v2369_v35 = vmul.f32 %v8572_v38, %v11739_v19  ;;  %v10155_v31 = vld [vmem:[%s11153_s27 + $0x70] sm:$0xff]   ;;  %v10158_v38 = vld [vmem:[%s11153_s27 + $0x78] sm:$0xff]   ;;  %v10159_v39 = vld [vmem:[%s11153_s27 + $0xa8] sm:$0xff]  }
 0x872   : > { %v2375_v47 = vadd.f32 1e-06, %v2349_v41  ;;  %v2391_v51 = vmul.f32 %v10177_v43, %v2363_v48  ;;  %v10157_v33 = vld [vmem:[%s11153_s27 + $0x30] sm:$0xff]   ;;  %v10160_v40 = vld [vmem:[%s11153_s27 + $0x38] sm:$0xff]   ;;  %v2441_v43 = vlaneseq }
 0x873   : > { %10186 = vrcp.f32 %v2376_v42  ;;  %v10161_v41 = vld [vmem:[%s11153_s27 + $0xb0] ss:$0 sps:$4 sm:$0xff]  }
 0x874   : > { %10188 = vrcp.f32 %v2375_v47  ;;  %v10179_v49 = vpop.eup %10178  ;;  %v2404_v10 = vadd.f32 %v8573_v54, %v2391_v51  ;;  %v2934_v42 = vsel %vm2932_vm13, %v10161_v41, 0  ;;  %v11834_v47 = vshrl.u32 %v2441_v43, 7 }
 0x875   : > { %v10181_v53 = vpop.eup %10180  ;;  %v2393_v16 = vmul.f32 %v10179_v49, %v2365_v52  ;;  %v2439_v49 = vld [vmem:[%s13515_s28] sm:$0x7] }
 0x876   : > { %v2392_v18 = vmul.f32 %v10181_v53, %v2364_v50  ;;  %v11837_v48 = vsub.s32 0, %v11834_v47  ;;  %v11841_v50 = vsub.s32 1, %v11834_v47  ;;  %v11847_v53 = vsub.s32 2, %v11834_v47 }
 0x877   : > { %v2406_v46 = vadd.f32 %v8573_v54, %v2393_v16 }
 0x878   : > { %v2405_v15 = vadd.f32 %v8573_v54, %v2392_v18  ;;  %v11844_v51 = vrot.slane %v2439_v49, %v11837_v48 }
 0x879   : > { %v10183_v11 = vpop.eup %10182 }
 0x87a   : > { %v10185_v34 = vpop.eup %10184  ;;  %v2411_v27 = vpack.c.bf16 %v2405_v15, %v2404_v10  ;;  %v2395_v28 = vmul.f32 %v10183_v11, %v2367_v20 }
 0x87b   : > { %v2394_v45 = vmul.f32 %v10185_v34, %v2366_v13  ;;  %v2452_v13 = vrot.slane %v2439_v49, %v11847_v53 }
 0x87c   : > { %8593 = vmatmul.mubr.msk.bf16.vlgmr.msra.gmra.mrb[0].mxu0 %vm1294_vm0, %v2411_v27  ;;  %9444 = vmatprep.mubr.msk.bf16.mxu1 %vm1294_vm0, %v2411_v27  ;;  %v2408_v6 = vadd.f32 %v8573_v54, %v2395_v28 }
 0x87d   : > { %v10187_v58 = vpop.eup %10186  ;;  %v2407_v25 = vadd.f32 %v8573_v54, %v2394_v45  ;;  %2613 = vmatprep.mubr.bf16.mxu0 %v13456_v9  ;;  %9164 = vmatpush3.bf16.msra.mxu0 %v10140_v17 }
 0x87e   : > { %v10189_v26 = vpop.eup %10188  ;;  %v2397_v19 = vmul.f32 %v10187_v58, %v2369_v35  ;;  %9165 = vmatprep.subr.bf16.mxu0 %v10141_v36 }
 0x87f   : > { %v2412_v60 = vpack.c.bf16 %v2407_v25, %v2406_v46  ;;  %v2396_v22 = vmul.f32 %v10189_v26, %v2368_v24 }
 0x880   : > { %v2410_v21 = vadd.f32 %v8573_v54, %v2397_v19 }
 0x881   : > { %9445 = vmatmul.mubr.msk.bf16.vlgmr.msra.gmra.mrb[0].mxu1 %vm1294_vm0, %v2412_v60  ;;  %v2409_v59 = vadd.f32 %v8573_v54, %v2396_v22  ;;  %9166 = vmatpush3.bf16.msra.mxu0 %v10142_v55  ;;  %v11850_v54 = vrot.slane %v2439_v49, %v11841_v50 }
 0x882   : > { %9453 = vmatpush3.bf16.msra.mxu1 %v11771_v30  ;;  %9167 = vmatprep.subr.bf16.mxu0 %v10143_v57  ;;  %v2414_v8 = vpack.c.bf16 %v2410_v21, %v2410_v21  ;;  %v10149_v30 = vld [vmem:[%s11153_s27 + $0x60] sm:$0xff]  }
 0x883   : > { %v2413_v4 = vpack.c.bf16 %v2409_v59, %v2408_v6  ;;  %9454 = vmatprep.subr.bf16.mxu1 %v10147_v56 }
 0x884   : > { %8594 = vmatmul.mubr.msk.bf16.gmra.mrb[4].mxu0 %vm1294_vm0, %v2412_v60 }
 0x885   : > { %9448 = vmatprep.mubr.msk.bf16.mxu1 %vm1294_vm0, %v2413_v4  ;;  %2623 = vmatprep.mubr.bf16.mxu0 %v13456_v9 }
 0x886   : > { %9168 = vmatpush3.bf16.msra.mxu0 %v10145_v61  ;;  %9455 = vmatpush3.bf16.msra.mxu1 %v10147_v56 }
 0x887   : > { %9169 = vmatprep.subr.bf16.mxu0 %v10146_v62  ;;  %9456 = vmatprep.subr.bf16.mxu1 %v10150_v7 }
 0x889   : > { %9449 = vmatmul.mubr.msk.bf16.gmra.mrb[4].mxu1 %vm1294_vm0, %v2414_v8 }
 0x88a   : > { %9170 = vmatpush3.bf16.msra.mxu0 %v10148_v5  ;;  %9457 = vmatpush3.bf16.msra.mxu1 %v10150_v7 }
 0x88b   : > { %9171 = vmatprep.subr.bf16.mxu0 %v10149_v30  ;;  %9458 = vmatprep.subr.bf16.mxu1 %v10153_v12 }
 0x88c   : > { %8595 = vmatmul.mubr.msk.bf16.gmra.mrb[8].mxu0 %vm1294_vm0, %v2413_v4 }
 0x88d   : > { %2633 = vmatprep.mubr.bf16.mxu0 %v13456_v9 }
 0x88e   : > { %9172 = vmatpush3.bf16.msra.mxu0 %v10151_v29  ;;  %9459 = vmatpush3.bf16.msra.mxu1 %v10153_v12 }
 0x88f   : > { %9173 = vmatprep.subr.bf16.mxu0 %v10152_v44  ;;  %9460 = vmatprep.subr.bf16.mxu1 %v10156_v32 }
 0x892   : > { %9174 = vmatpush3.bf16.msra.mxu0 %v10154_v37  ;;  %9461 = vmatpush3.bf16.msra.mxu1 %v10156_v32 }
 0x893   : > { %9175 = vmatprep.subr.bf16.mxu0 %v10155_v31  ;;  %9462 = vmatprep.subr.bf16.mxu1 %v10159_v39 }
 0x894   : > { %8596 = vmatmul.mubr.msk.bf16.gmra.mrb[12].mxu0 %vm1294_vm0, %v2414_v8 }
 0x896   : > { %9176 = vmatpush3.bf16.msra.mxu0 %v10157_v33  ;;  %9463 = vmatpush3.bf16.msra.mxu1 %v10159_v39 }
 0x897   : > { %9177 = vmatprep.subr.bf16.mxu0 %v10158_v38  ;;  %9739 = vmatprep.subr.msk.bf16.mxu1 %vm2932_vm13, %v10161_v41 }
 0x89a   : > { %9178 = vmatpush3.bf16.msra.mxu0 %v10160_v40  ;;  %9465 = vmatpush3.bf16.msra.mxu1 %v2934_v42 }
 0x94f   : > { %v2605_v52 = vpop.f32.mrb[0].mxu0 }
 0x950   : > { %v2606_v18 = vadd.f32 %v2605_v52, %v11844_v51  ;;  %v2607_v11 = vpop.f32.mrb[1].mxu0 }
 0x951   : > { %v2608_v10 = vadd.f32 %v2607_v11, %v11850_v54  ;;  %v2609_v15 = vpop.f32.mrb[2].mxu0 }
 0x952   : > { %v2610_v16 = vadd.f32 %v2609_v15, %v11844_v51  ;;  %v2611_v34 = vpop.f32.mrb[3].mxu0  ;;  %v2706_v27 = vmax.f32 %v2606_v18, 0.0 }
 0x953   : > { %v2612_v17 = vadd.f32 %v2611_v34, %v11850_v54  ;;  %v2707_v35 = vmax.f32 %v2608_v10, 0.0 }
 0x954   : > { %v9446_v20 = vpop.f32.mrb[0].mxu1  ;;  %v2709_v45 = vmax.f32 %v2610_v16, 0.0 }
 0x955   : > { %v2685_v36 = vadd.f32 %v9446_v20, %v2452_v13  ;;  %v2676_v24 = vpop.f32.mrb[1].mxu1  ;;  %v2710_v58 = vmax.f32 %v2612_v17, 0.0 }
 0x956   : > { %v2677_v46 = vadd.f32 %v2676_v24, %v2452_v13  ;;  %v9447_v25 = vpop.f32.mrb[2].mxu1  ;;  %v2727_v28 = vpack.c.bf16 %v2709_v45, %v2706_v27 }
 0x957   : > { %v2688_v26 = vadd.f32 %v9447_v25, %v2452_v13  ;;  %v2679_v55 = vpop.f32.mrb[3].mxu1  ;;  %v2728_v60 = vpack.c.bf16 %v2710_v58, %v2707_v35  ;;  %v2615_v19 = vpop.f32.mrb[4].mxu0  ;;  %v2714_v57 = vmax.f32 %v2685_v36, 0.0 }
 0x958   : > { %v2680_v22 = vadd.f32 %v2679_v55, %v2452_v13  ;;  %v2616_v6 = vadd.f32 %v2615_v19, %v11844_v51  ;;  %v2617_v59 = vpop.f32.mrb[5].mxu0  ;;  %v2708_v61 = vmax.f32 %v2677_v46, 0.0 }
 0x959   : > { %v2717_v56 = vmax.f32 %v2688_v26, 0.0  ;;  %v2618_v21 = vadd.f32 %v2617_v59, %v11850_v54  ;;  %v2619_v62 = vpop.f32.mrb[6].mxu0  ;;  %2968 = vmatprep.mubr.bf16.mxu0 %v2728_v60 }
 0x95a   : > { %v2711_v4 = vmax.f32 %v2680_v22, 0.0  ;;  %v2620_v5 = vadd.f32 %v2619_v62, %v11844_v51  ;;  %v2621_v8 = vpop.f32.mrb[7].mxu0  ;;  %2969 = vmatmul.mubr.bf16.vlgmr.msra.gmra.mrb[16].mxu0 %v2727_v28  ;;  %v2712_v44 = vmax.f32 %v2616_v6, 0.0 }
 0x95b   : > { %v2732_v7 = vpack.c.bf16 %v2717_v56, %v2714_v57  ;;  %v2622_v12 = vadd.f32 %v2621_v8, %v11850_v54  ;;  %v2713_v33 = vmax.f32 %v2618_v21, 0.0 }
 0x95c   : > { %v2729_v30 = vpack.c.bf16 %v2711_v4, %v2708_v61  ;;  %v9450_v29 = vpop.f32.mrb[4].mxu1  ;;  %v2715_v37 = vmax.f32 %v2620_v5, 0.0 }
 0x95d   : > { %v2701_v31 = vadd.f32 %v9450_v29, %v2452_v13  ;;  %v2692_v32 = vpop.f32.mrb[5].mxu1  ;;  %v2716_v38 = vmax.f32 %v2622_v12, 0.0 }
 0x95e   : > { %v2693_v39 = vadd.f32 %v2692_v32, %v2452_v13  ;;  %v9451_v40 = vpop.f32.mrb[6].mxu1  ;;  %9466 = vmatprep.mubr.msk.bf16.mxu1 %vm2919_vm14, %v2729_v30  ;;  %v2730_v41 = vpack.c.bf16 %v2715_v37, %v2712_v44  ;;  %v8628_v44 = vld [vmem:[%s13516_s5] ss:$0 sm:$0xff] }
 0x95f   : > { %v2695_v42 = vpop.f32.mrb[7].mxu1  ;;  %9467 = vmatmul.mubr.msk.bf16.vlgmr.msra.gmra.mrb[8].mxu1 %vm2919_vm14, %v2732_v7  ;;  %v2731_v43 = vpack.c.bf16 %v2716_v38, %v2713_v33  ;;  %v2625_v52 = vpop.f32.mrb[8].mxu0  ;;  %v2726_v18 = vmax.f32 %v2701_v31, 0.0 }
 0x960   : > { %v2696_v49 = vadd.f32 %v2695_v42, %v2452_v13  ;;  %v2626_v11 = vadd.f32 %v2625_v52, %v11844_v51  ;;  %v2627_v10 = vpop.f32.mrb[9].mxu0  ;;  %v2720_v15 = vmax.f32 %v2693_v39, 0.0 }
 0x961   : > { %v2628_v34 = vadd.f32 %v2627_v10, %v11850_v54  ;;  %v2629_v17 = vpop.f32.mrb[10].mxu0  ;;  %2976 = vmatprep.mubr.bf16.mxu0 %v2731_v43  ;;  %v2738_v24 = vpack.c.bf16 %v2726_v18, %v2726_v18 }
 0x962   : > { %v2723_v16 = vmax.f32 %v2696_v49, 0.0  ;;  %v2630_v20 = vadd.f32 %v2629_v17, %v11844_v51  ;;  %v2631_v27 = vpop.f32.mrb[11].mxu0  ;;  %2977 = vmatmul.mubr.bf16.gmra.mrb[20].mxu0 %v2730_v41  ;;  %v2718_v13 = vmax.f32 %v2626_v11, 0.0 }
 0x963   : > { %v2632_v36 = vadd.f32 %v2631_v27, %v11850_v54  ;;  %v2719_v58 = vmax.f32 %v2628_v34, 0.0 }
 0x964   : > { %v2735_v45 = vpack.c.bf16 %v2723_v16, %v2720_v15  ;;  %v2721_v35 = vmax.f32 %v2630_v20, 0.0 }
 0x965   : > { %v2722_v46 = vmax.f32 %v2632_v36, 0.0 }
 0x966   : > { %9470 = vmatprep.mubr.msk.bf16.mxu1 %vm2919_vm14, %v2735_v45  ;;  %v2733_v25 = vpack.c.bf16 %v2721_v35, %v2718_v13 }
 0x967   : > { %9471 = vmatmul.mubr.msk.bf16.gmra.mrb[12].mxu1 %vm2919_vm14, %v2738_v24  ;;  %v2734_v28 = vpack.c.bf16 %v2722_v46, %v2719_v58  ;;  %v2635_v26 = vpop.f32.mrb[12].mxu0 }
 0x968   : > { %v2636_v55 = vadd.f32 %v2635_v26, %v11844_v51  ;;  %v2637_v60 = vpop.f32.mrb[13].mxu0 }
 0x969   : > { %v2638_v22 = vadd.f32 %v2637_v60, %v11850_v54  ;;  %v2639_v19 = vpop.f32.mrb[14].mxu0  ;;  %2984 = vmatprep.mubr.bf16.mxu0 %v2734_v28 }
 0x96a   : > { %v2640_v57 = vpop.f32.mrb[15].mxu0  ;;  %2985 = vmatmul.mubr.bf16.gmra.mrb[24].mxu0 %v2733_v25  ;;  %v2724_v6 = vmax.f32 %v2636_v55, 0.0 }
 0x96b   : > { %v2725_v56 = vmax.f32 %v2638_v22, 0.0 }
 0x96c   : > { %v2736_v61 = vpack.c.bf16 %v2724_v6, %v2724_v6 }
 0x96d   : > { %v2737_v59 = vpack.c.bf16 %v2725_v56, %v2725_v56 }
 0x96f   : > { %2992 = vmatprep.mubr.bf16.mxu0 %v2737_v59 }
 0x972   : > { %2993 = vmatmul.mubr.bf16.gmra.mrb[28].mxu0 %v2736_v61 }
 0xa2d   : > { %v9179_v4 = vpop.f32.mrb[16].mxu0 }
 0xa2e   : > { %v9180_v21 = vpop.f32.mrb[17].mxu0 }
 0xa2f   : > { %v9181_v62 = vadd.f32 %v9180_v21, %v9179_v4  ;;  %v9182_v7 = vpop.f32.mrb[18].mxu0 }
 0xa30   : > { %v9183_v5 = vpop.f32.mrb[19].mxu0 }
 0xa31   : > { %v9184_v51 = vadd.f32 %v9183_v5, %v9182_v7 }
 0xa32   : > { %v9468_v8 = vpop.f32.mrb[8].mxu1 }
 0xa33   : > { %v3034_v30 = vpop.f32.mrb[9].mxu1 }
 0xa34   : > { %v3035_v54 = vadd.f32 %v9181_v62, %v3034_v30  ;;  %v9469_v12 = vpop.f32.mrb[10].mxu1 }
 0xa35   : > { %v3037_v29 = vpop.f32.mrb[11].mxu1  ;;  %v9185_v32 = vpop.f32.mrb[20].mxu0 }
 0xa36   : > { %v3064_v37 = vadd.f32 %v3035_v54, %v11676_v3  ;;  %v3038_v31 = vadd.f32 %v9184_v51, %v3037_v29  ;;  %v9186_v33 = vpop.f32.mrb[21].mxu0 }
 0xa37   : > { %v9187_v39 = vadd.f32 %v9186_v33, %v9185_v32  ;;  %v9188_v40 = vpop.f32.mrb[22].mxu0 }
 0xa38   : > { %v3065_v38 = vadd.f32 %v3038_v31, %v11680_v14  ;;  %v11874_v41 = vadd.f32 %v8628_v44, %v3064_v37  ;;  %v9189_v42 = vpop.f32.mrb[23].mxu0 }
 0xa39   : > { %v3043_v43 = vadd.f32 %v9468_v8, %v9187_v39  ;;  %v9190_v49 = vadd.f32 %v9189_v42, %v9188_v40 }
 0xa3a   : > { %v9472_v52 = vpop.f32.mrb[12].mxu1  ;;  %v3089_v18 = vsel %vm1294_vm0, %v11874_v41, 0.0  ;;  %v11878_v11 = vadd.f32 %v8628_v44, %v3065_v38 }
 0xa3b   : > { %v3050_v10 = vpop.f32.mrb[13].mxu1  ;;  %3090 = vadd.xlane.f32.xlu0 %v3089_v18  ;;  %v3046_v3 = vadd.f32 %v9469_v12, %v9190_v49  ;;  %v3066_v16 = vadd.f32 %v3043_v43, %v11678_v63 }
 0xa3c   : > { %v9473_v15 = vpop.f32.mrb[14].mxu1  ;;  %v3092_v14 = vsel %vm1294_vm0, %v11878_v11, 0.0 }
 0xa3d   : > { %v3053_v34 = vpop.f32.mrb[15].mxu1  ;;  %3093 = vadd.xlane.f32.xlu1 %v3092_v14  ;;  %v9191_v17 = vpop.f32.mrb[24].mxu0  ;;  %v11883_v20 = vadd.f32 %v8628_v44, %v3066_v16  ;;  %v3067_v27 = vadd.f32 %v3046_v3, %v11682_v0 }
 0xa3e   : > { %v9192_v45 = vpop.f32.mrb[25].mxu0 }
 0xa3f   : > { %v9193_v36 = vadd.f32 %v9192_v45, %v9191_v17  ;;  %v9194_v24 = vpop.f32.mrb[26].mxu0  ;;  %v3095_v13 = vsel %vm1294_vm0, %v11883_v20, 0.0  ;;  %v11888_v35 = vadd.f32 %v8628_v44, %v3067_v27 }
 0xa40   : > { %3096 = vadd.xlane.f32.xlu0 %v3095_v13  ;;  %v9195_v58 = vpop.f32.mrb[27].mxu0 }
 0xa41   : > { %v3051_v46 = vadd.f32 %v9193_v36, %v3050_v10  ;;  %v9196_v25 = vadd.f32 %v9195_v58, %v9194_v24  ;;  %v3098_v63 = vsel %vm1294_vm0, %v11888_v35, 0.0 }
 0xa42   : > { %3099 = vadd.xlane.f32.xlu1 %v3098_v63 }
 0xa43   : > { %v3054_v28 = vadd.f32 %v9196_v25, %v3053_v34  ;;  %v3068_v26 = vadd.f32 %v3051_v46, %v11684_v23 }
 0xa45   : > { %v9197_v0 = vpop.f32.mrb[28].mxu0  ;;  %v11893_v55 = vadd.f32 %v8628_v44, %v3068_v26  ;;  %v3069_v60 = vadd.f32 %v3054_v28, %v11686_v1 }
 0xa46   : > { %v9198_v22 = vpop.f32.mrb[29].mxu0 }
 0xa47   : > { %v9199_v19 = vadd.f32 %v9198_v22, %v9197_v0  ;;  %v9200_v57 = vpop.f32.mrb[30].mxu0  ;;  %v3101_v56 = vsel %vm1294_vm0, %v11893_v55, 0.0  ;;  %v11898_v6 = vadd.f32 %v8628_v44, %v3069_v60 }
 0xa48   : > { %v9201_v59 = vpop.f32.mrb[31].mxu0  ;;  %3102 = vadd.xlane.f32.xlu0 %v3101_v56 }
 0xa49   : > { %v3059_v61 = vadd.f32 %v9472_v52, %v9199_v19  ;;  %v3104_v4 = vsel %vm1294_vm0, %v11898_v6, 0.0 }
 0xa4a   : > { %3105 = vadd.xlane.f32.xlu1 %v3104_v4 }
 0xa4b   : > { %v3070_v23 = vadd.f32 %v3059_v61, %v11688_v2 }
 0xa4d   : > { %v11903_v21 = vadd.f32 %v8628_v44, %v3070_v23 }
 0xa4f   : > { %v3107_v1 = vsel %vm1313_vm1, %v11903_v21, 0.0 }
 0xa50   : > { %3108 = vadd.xlane.f32.xlu0 %v3107_v1 }
 0xac8   : > { %v3091_v62 = vpop.xlane.xlu0 %3090 }
 0xac9   : > { %v3110_v7 = vmul.f32 0.011111111, %v3091_v62 }
 0xaca   : > { %v3094_v5 = vpop.xlane.xlu1 %3093 }
 0xacb   : > { %v11908_v51 = vsub.f32 %v11874_v41, %v3110_v7  ;;  %v3111_v8 = vmul.f32 0.011111111, %v3094_v5 }
 0xacd   : > { %v11911_v30 = vsub.f32 %v11878_v11, %v3111_v8  ;;  %v3124_v54 = vmul.f32 %v11908_v51, %v11908_v51  ;;  %v3097_v2 = vpop.xlane.xlu0 %3096 }
 0xace   : > { %v3112_v12 = vmul.f32 0.011111111, %v3097_v2 }
 0xacf   : > { %v3131_v29 = vsel %vm1294_vm0, %v3124_v54, 0.0  ;;  %v3125_v44 = vmul.f32 %v11911_v30, %v11911_v30  ;;  %v3100_v37 = vpop.xlane.xlu1 %3099 }
 0xad0   : > { %3132 = vadd.xlane.f32.xlu1 %v3131_v29  ;;  %v11919_v31 = vsub.f32 %v11883_v20, %v3112_v12  ;;  %v3113_v32 = vmul.f32 0.011111111, %v3100_v37 }
 0xad1   : > { %v3134_v33 = vsel %vm1294_vm0, %v3125_v44, 0.0 }
 0xad2   : > { %3135 = vadd.xlane.f32.xlu0 %v3134_v33  ;;  %v11923_v38 = vsub.f32 %v11888_v35, %v3113_v32  ;;  %v3126_v39 = vmul.f32 %v11919_v31, %v11919_v31 }
 0xad4   : > { %v3137_v40 = vsel %vm1294_vm0, %v3126_v39, 0.0  ;;  %v3127_v42 = vmul.f32 %v11923_v38, %v11923_v38 }
 0xad5   : > { %3138 = vadd.xlane.f32.xlu1 %v3137_v40  ;;  %v3103_v43 = vpop.xlane.xlu0 %3102 }
 0xad6   : > { %v3114_v49 = vmul.f32 0.011111111, %v3103_v43  ;;  %v3140_v52 = vsel %vm1294_vm0, %v3127_v42, 0.0 }
 0xad7   : > { %v3106_v18 = vpop.xlane.xlu1 %3105  ;;  %3141 = vadd.xlane.f32.xlu0 %v3140_v52 }
 0xad8   : > { %v11932_v10 = vsub.f32 %v11893_v55, %v3114_v49  ;;  %v3115_v3 = vmul.f32 0.011111111, %v3106_v18 }
 0xada   : > { %v11935_v15 = vsub.f32 %v11898_v6, %v3115_v3  ;;  %v3128_v14 = vmul.f32 %v11932_v10, %v11932_v10 }
 0xadc   : > { %v3143_v16 = vsel %vm1294_vm0, %v3128_v14, 0.0  ;;  %v3129_v34 = vmul.f32 %v11935_v15, %v11935_v15 }
 0xadd   : > { %3144 = vadd.xlane.f32.xlu1 %v3143_v16  ;;  %v3109_v17 = vpop.xlane.xlu0 %3108  ;;  %v8631_v16 = vld [vmem:[%s11083_s13 + $0x1] ss:$0 sm:$0xff] }
 0xade   : > { %v3116_v27 = vmul.f32 0.011111111, %v3109_v17  ;;  %v3146_v45 = vsel %vm1294_vm0, %v3129_v34, 0.0 }
 0xadf   : > { %3147 = vadd.xlane.f32.xlu0 %v3146_v45 }
 0xae0   : > { %v11944_v36 = vsub.f32 %v11903_v21, %v3116_v27 }
 0xae2   : > { %v3130_v24 = vmul.f32 %v11944_v36, %v11944_v36 }
 0xae4   : > { %v3149_v13 = vsel %vm1313_vm1, %v3130_v24, 0.0  ;;  %v3214_v24 = vmul.f32 %v8631_v16, %v11908_v51 }
 0xae5   : > { %3150 = vadd.xlane.f32.xlu1 %v3149_v13 }
 0xb5d   : > { %v3133_v58 = vpop.xlane.xlu1 %3132 }
 0xb5e   : > { %v3152_v46 = vmul.f32 0.011235955, %v3133_v58 }
 0xb5f   : > { %v3136_v25 = vpop.xlane.xlu0 %3135 }
 0xb60   : > { %10190 = vrsqrt.f32 %v3152_v46  ;;  %v3153_v63 = vmul.f32 0.011235955, %v3136_v25  ;;  %vm3161_vm15 = vcmp.eq.f32.partialorder %v3152_v46, inf  ;;  %v3164_v61 = vand.u32 2147483648, %v3152_v46 }
 0xb61   : > { %vm3163_vm8 = vcmp.eq.f32.partialorder %v3152_v46, 0.0 }
 0xb62   : > { %10192 = vrsqrt.f32 %v3153_v63  ;;  %v3139_v28 = vpop.xlane.xlu1 %3138  ;;  %vm3168_vm2 = vcmp.eq.f32.partialorder %v3153_v63, inf  ;;  %v3171_v62 = vand.u32 2147483648, %v3153_v63  ;;  %vm3170_vm9 = vcmp.eq.f32.partialorder %v3153_v63, 0.0 }
 0xb63   : > { %v3154_v26 = vmul.f32 0.011235955, %v3139_v28 }
 0xb64   : > { %v3142_v0 = vpop.xlane.xlu0 %3141 }
 0xb65   : > { %10194 = vrsqrt.f32 %v3154_v26  ;;  %v3155_v60 = vmul.f32 0.011235955, %v3142_v0  ;;  %vm3175_vm10 = vcmp.eq.f32.partialorder %v3154_v26, inf  ;;  %v3178_v44 = vand.u32 2147483648, %v3154_v26 }
 0xb66   : > { %vm3177_vm11 = vcmp.eq.f32.partialorder %v3154_v26, 0.0 }
 0xb67   : > { %10196 = vrsqrt.f32 %v3155_v60  ;;  %vm3182_vm12 = vcmp.eq.f32.partialorder %v3155_v60, inf  ;;  %v3185_v49 = vand.u32 2147483648, %v3155_v60 }
 0xb6a   : > { %v10191_v22 = vpop.eup %10190  ;;  %v3145_v57 = vpop.xlane.xlu1 %3144 }
 0xb6b   : > { %v3160_v19 = vmul.f32 %v10191_v22, %v3152_v46  ;;  %v3156_v59 = vmul.f32 0.011235955, %v3145_v57 }
 0xb6c   : > { %v10193_v56 = vpop.eup %10192  ;;  %v3148_v23 = vpop.xlane.xlu0 %3147 }
 0xb6d   : > { %v3167_v4 = vmul.f32 %v10193_v56, %v3153_v63  ;;  %v3162_v1 = vsel %vm3161_vm15, %v3152_v46, %v3160_v19  ;;  %10198 = vrsqrt.f32 %v3156_v59  ;;  %v3157_v5 = vmul.f32 0.011235955, %v3148_v23 }
 0xb6e   : > { %v3165_v8 = vsel %vm3163_vm8, %v3164_v61, %v3162_v1  ;;  %vm3184_vm15 = vcmp.eq.f32.partialorder %v3155_v60, 0.0  ;;  %v3192_v27 = vand.u32 2147483648, %v3156_v59  ;;  %vm3191_vm8 = vcmp.eq.f32.partialorder %v3156_v59, 0.0 }
 0xb6f   : > { %v3169_v7 = vsel %vm3168_vm2, %v3153_v63, %v3167_v4  ;;  %v10195_v54 = vpop.eup %10194  ;;  %v3221_v2 = vadd.f32 1e-06, %v3165_v8  ;;  %10200 = vrsqrt.f32 %v3157_v5  ;;  %vm3189_vm2 = vcmp.eq.f32.partialorder %v3156_v59, inf  ;;  %v8632_v63 = vld [vmem:[%s11088_s17 + $0x1] ss:$0 sm:$0xff] }
 0xb70   : > { %v3172_v12 = vsel %vm3170_vm9, %v3171_v62, %v3169_v7  ;;  %v3174_v29 = vmul.f32 %v10195_v54, %v3154_v26  ;;  %v3215_v46 = vmul.f32 %v8631_v16, %v11911_v30  ;;  %vm3196_vm9 = vcmp.eq.f32.partialorder %v3157_v5, inf }
 0xb71   : > { %10202 = vrcp.f32 %v3221_v2  ;;  %v3222_v37 = vadd.f32 1e-06, %v3172_v12  ;;  %v10197_v32 = vpop.eup %10196  ;;  %v3216_v23 = vmul.f32 %v8631_v16, %v11919_v31  ;;  %v3217_v62 = vmul.f32 %v8631_v16, %v11923_v38 }
 0xb72   : > { %v3176_v33 = vsel %vm3175_vm10, %v3154_v26, %v3174_v29  ;;  %v3151_v39 = vpop.xlane.xlu1 %3150  ;;  %v3181_v40 = vmul.f32 %v10197_v32, %v3155_v60  ;;  %v3199_v26 = vand.u32 2147483648, %v3157_v5  ;;  %vm3198_vm10 = vcmp.eq.f32.partialorder %v3157_v5, 0.0 }
 0xb73   : > { %v3158_v42 = vmul.f32 0.011235955, %v3151_v39  ;;  %10204 = vrcp.f32 %v3222_v37  ;;  %v3179_v43 = vsel %vm3177_vm11, %v3178_v44, %v3176_v33  ;;  %v3218_v33 = vmul.f32 %v8631_v16, %v11932_v10 }
 0xb74   : > { %v3223_v52 = vadd.f32 1e-06, %v3179_v43  ;;  %v3183_v18 = vsel %vm3182_vm12, %v3155_v60, %v3181_v40  ;;  %v3219_v39 = vmul.f32 %v8631_v16, %v11935_v15 }
 0xb75   : > { %10206 = vrsqrt.f32 %v3158_v42  ;;  %v3186_v3 = vsel %vm3184_vm15, %v3185_v49, %v3183_v18  ;;  %vm3203_vm11 = vcmp.eq.f32.partialorder %v3158_v42, inf  ;;  %v3206_v7 = vand.u32 2147483648, %v3158_v42 }
 0xb76   : > { %10208 = vrcp.f32 %v3223_v52  ;;  %v3224_v34 = vadd.f32 1e-06, %v3186_v3  ;;  %vm3205_vm12 = vcmp.eq.f32.partialorder %v3158_v42, 0.0  ;;  %v3220_v18 = vmul.f32 %v8631_v16, %v11944_v36 }
 0xb77   : > { %v10199_v14 = vpop.eup %10198 }
 0xb78   : > { %v3188_v17 = vmul.f32 %v10199_v14, %v3156_v59  ;;  %10210 = vrcp.f32 %v3224_v34 }
 0xb79   : > { %v10201_v45 = vpop.eup %10200 }
 0xb7a   : > { %v3190_v13 = vsel %vm3189_vm2, %v3156_v59, %v3188_v17  ;;  %v3195_v25 = vmul.f32 %v10201_v45, %v3157_v5 }
 0xb7b   : > { %v10203_v58 = vpop.eup %10202  ;;  %v3193_v28 = vsel %vm3191_vm8, %v3192_v27, %v3190_v13 }
 0xb7c   : > { %v3242_v0 = vmul.f32 %v10203_v58, %v3214_v24  ;;  %v3225_v60 = vadd.f32 1e-06, %v3193_v28  ;;  %v3197_v19 = vsel %vm3196_vm9, %v3157_v5, %v3195_v25 }
 0xb7d   : > { %v10205_v22 = vpop.eup %10204  ;;  %v3200_v61 = vsel %vm3198_vm10, %v3199_v26, %v3197_v19 }
 0xb7e   : > { %v3255_v57 = vadd.f32 %v8632_v63, %v3242_v0  ;;  %v3243_v56 = vmul.f32 %v10205_v22, %v3215_v46  ;;  %10212 = vrcp.f32 %v3225_v60  ;;  %v3226_v4 = vadd.f32 1e-06, %v3200_v61 }
 0xb7f   : > { %v10207_v51 = vpop.eup %10206  ;;  %v12004_v61 = vmov 0.0  }
 0xb80   : > { %v10209_v59 = vpop.eup %10208  ;;  %v3202_v30 = vmul.f32 %v10207_v51, %v3158_v42  ;;  %3266 = vxpose.xlu0.b32.start [1/7] (short) (narrow) %v3255_v57, 96  ;;  %v3256_v1 = vadd.f32 %v8632_v63, %v3243_v56  ;;  %10214 = vrcp.f32 %v3226_v4  ;;  %v12002_v56 = vmov 0.0  }
 0xb81   : > { %v3244_v54 = vmul.f32 %v10209_v59, %v3216_v23  ;;  %v12006_v51 = vmov 0.0   ;;  %v12008_v4 = vmov 0.0   ;;  %v12010_v59 = vmov 0.0  }
 0xb82   : > { %v3204_v8 = vsel %vm3203_vm11, %v3158_v42, %v3202_v30  ;;  %v11955_v5 = vpack.c.bf16 %v3256_v1, %v3255_v57  ;;  %v10211_v2 = vpop.eup %10210  ;;  %v12012_v23 = vmov 0.0   ;;  %v12014_v30 = vmov 0.0  }
 0xb83   : > { %v3207_v12 = vsel %vm3205_vm12, %v3206_v7, %v3204_v8  ;;  %v3245_v29 = vmul.f32 %v10211_v2, %v3217_v62  ;;  %v3257_v37 = vadd.f32 %v8632_v63, %v3244_v54 }
 0xb84   : > { %3267 = vxpose.xlu0.b32.cont [2/7] (short) (narrow) %v3256_v1, 96  ;;  %v3227_v44 = vadd.f32 1e-06, %v3207_v12 }
 0xb85   : > { %v3258_v31 = vadd.f32 %v8632_v63, %v3245_v29 }
 0xb86   : > { %10216 = vrcp.f32 %v3227_v44 }
 0xb87   : > { %v11958_v38 = vpack.c.bf16 %v3258_v31, %v3257_v37 }
 0xb88   : > { %v10213_v32 = vpop.eup %10212  ;;  %3268 = vxpose.xlu0.b32.cont [3/7] (short) (narrow) %v3257_v37, 96 }
 0xb89   : > { %v3246_v40 = vmul.f32 %v10213_v32, %v3218_v33 }
 0xb8a   : > { %v10215_v42 = vpop.eup %10214 }
 0xb8b   : > { %v3247_v43 = vmul.f32 %v10215_v42, %v3219_v39  ;;  %v3259_v49 = vadd.f32 %v8632_v63, %v3246_v40 }
 0xb8c   : > { %3269 = vxpose.xlu0.b32.cont [4/7] (short) (narrow) %v3258_v31, 96 }
 0xb8d   : > { %v3260_v52 = vadd.f32 %v8632_v63, %v3247_v43 }
 0xb8f   : > { %v11962_v14 = vpack.c.bf16 %v3260_v52, %v3259_v49 }
 0xb90   : > { %v10217_v3 = vpop.eup %10216  ;;  %3270 = vxpose.xlu0.b32.cont [5/7] (short) (narrow) %v3259_v49, 96 }
 0xb91   : > { %v3248_v34 = vmul.f32 %v10217_v3, %v3220_v18 }
 0xb93   : > { %v3261_v17 = vadd.f32 %v8632_v63, %v3248_v34 }
 0xb94   : > { %3271 = vxpose.xlu0.b32.cont [6/7] (short) (narrow) %v3260_v52, 96 }
 0xb95   : > { %v11964_v10 = vpack.c.bf16 %v3261_v17, %v3261_v17 }
 0xb98   : > { %3272 = vxpose.xlu0.b32.end [7/7] (short) (narrow) %v3261_v17, 96 }
 0xc00   : > { %v11966_v27 = vpop.trf.xlu0 }
 0xc04   : > { %v11968_v15 = vpop.trf.xlu0 }
 0xc08   : > { %v11972_v24 = vpop.trf.xlu0 }
 0xc0c   : > { %v11974_v36 = vpop.trf.xlu0 }
 0xc10   : > { %v11978_v13 = vpop.trf.xlu0 }
 0xc14   : > { %v11980_v58 = vpop.trf.xlu0 }
 0xc15   : > { %v3300_v46 = vpack.c.bf16 %v11980_v58, %v11978_v13 }
 0xc18   : > { %v11984_v25 = vpop.trf.xlu0 }
 0xc1c   : > { %v11986_v63 = vpop.trf.xlu0 }
 0xc20   : > { %v11990_v26 = vpop.trf.xlu0 }
 0xc24   : > { %v11992_v0 = vpop.trf.xlu0 }
 0xc25   : > { %v3302_v60 = vpack.c.bf16 %v11992_v0, %v11990_v26 }
 0xc28   : > { %v11996_v22 = vpop.trf.xlu0 }
 0xc2c   : > { %v11998_v19 = vpop.trf.xlu0 }
 0xc2d   : > { %v3303_v57 = vpack.c.bf16 %v11998_v19, %v11996_v22 }
 0xc2e LB: >> { %9486 = vmatprep.mubr.msk.bf16.mxu0 %vm1294_vm0, %v11955_v5  ;;  %v11056_v1 = vmov 0.0   ;;  %vm11057_vm15 = vmmov 0   ;;  %v13517_v45 = vpack.c.bf16 %v11968_v15, %v11966_v27  ;;  %s8332_s18 = smul.u32 48, %s10972_s9  ;;  %s8657_s26 = sshll.u32 %s10972_s9, 3  ;;  %v11058_v62 = vmov 0   ;;  %s10972_s9 = sphi %s12016_s9, %s3309_s9   ;;  %v10968_v30 = vphi %v12014_v30, %v13526_v30   ;;  %v10964_v23 = vphi %v12012_v23, %v13525_v23   ;;  %v10960_v59 = vphi %v12010_v59, %v13524_v59   ;;  %v10956_v4 = vphi %v12008_v4, %v13523_v4   ;;  %v10952_v51 = vphi %v12006_v51, %v13522_v51   ;;  %v10948_v61 = vphi %v12004_v61, %v13521_v61   ;;  %v10944_v56 = vphi %v12002_v56, %v13520_v56  }
 0xc2f   : >> { %9494 = vmatprep.subr.bf16.mxu1 %v11056_v1  ;;  %9506 = vmatprep.mubr.msk.bf16.mxu1 %vm11057_vm15, %v11056_v1  ;;  %s12052_s2 = scalar_lea.vmem %s11103_s29, %s8657_s26  ;;  %s8660_s28 = sshll.u32 %s10972_s9, 4  ;;  %v13518_v16 = vpack.c.bf16 %v11974_v36, %v11972_v24  ;;  %v13519_v28 = vpack.c.bf16 %v11986_v63, %v11984_v25  ;;  %v3483_v37 = vsel %vm1594_vm3, %v3303_v57, 0 }
 0xc30   : >> { %9495 = vmatpush3.bf16.msra.mxu1 %v13517_v45  ;;  %10218 = vset.pattern.permute.xlu0 %v11058_v62  ;;  %s12057_s23 = scalar_lea.vmem %s11093_s21, %s8332_s18  ;;  %s8341_s5 = scalar_lea.vmem %s13497_s3, %s8660_s28  ;;  %v10224_v31 = vld [vmem:[%s12052_s2 + $0x48] sm:$0x1f]  }
 0xc31   : >> { %9496 = vmatprep.subr.bf16.mxu1 %v11056_v1  ;;  %v10219_v7 = vld [vmem:[%s12057_s23 + $0x1b0] sm:$0xff]   ;;  %v10220_v8 = vld [vmem:[%s12057_s23 + $0x1b8] sm:$0xff]   ;;  %v10221_v54 = vld [vmem:[%s12057_s23 + $0x1c0] sm:$0xff]   ;;  %s8335_s2 = scalar_lea.vmem %s11098_s25, %s10972_s9  ;;  %s8349_s28 = scalar_lea.vmem %s11123_s19, %s8657_s26 }
 0xc32   : >> { %9474 = vmatprep.subr.bf16.mxu0 %v10219_v7  ;;  %v8661_v2 = vld [vmem:[%s8341_s5 + $0x90] sm:$0xff]  ;;  %v10222_v12 = vld [vmem:[%s12057_s23 + $0x1c8] sm:$0xff]   ;;  %v8662_v29 = vld [vmem:[%s8341_s5 + $0x98] sm:$0x3] }
 0xc33   : >> { %9475 = vmatpush3.bf16.msra.mxu0 %v10219_v7  ;;  %3466 = vperm.xlu0 %10218, %v8661_v2   ;;  %v10223_v44 = vld [vmem:[%s12057_s23 + $0x1d0] sm:$0xff]   ;;  %v10225_v32 = vld [vmem:[%s12057_s23 + $0x1d8] sm:$0x1f]   ;;  %s8344_s23 = scalar_lea.vmem %s11113_s8, %s8332_s18  ;;  %s8346_s18 = scalar_lea.vmem %s11118_s14, %s10972_s9 }
 0xc34   : >> { %9497 = vmatpush3.bf16.msra.mxu1 %v13518_v16  ;;  %9476 = vmatprep.subr.bf16.mxu0 %v10220_v8  ;;  %v3389_v33 = vsel %vm1594_vm3, %v10225_v32, 0  ;;  %s3309_s9 = sadd.s32 1, %s10972_s9  }
 0xc35   : >> { %9498 = vmatprep.subr.bf16.mxu1 %v11056_v1  ;;  %p3306_p12 = scmp.ge.s32.totalorder %s3309_s9, 9  }
 0xc36   : > { %s13527_s9 = sld [smem:[#allocation8_spill]] (%p3306_p12)  ;;  %s13528_s26 = sld [smem:[#allocation9_spill]] (%p3306_p12) }
 0xc37   : >> { %9477 = vmatpush3.bf16.msra.mxu0 %v10220_v8  ;;  %3471 = vperm.xlu0 %10218, %v8662_v29   ;;  %s13529_s5 = sld [smem:[#allocation10_spill]] (%p3306_p12) }
 0xc38   : >> { %9499 = vmatpush3.bf16.msra.mxu1 %v3300_v46  ;;  %9478 = vmatprep.subr.bf16.mxu0 %v10221_v54 }
 0xc39   : >> { %9500 = vmatprep.subr.bf16.mxu1 %v11056_v1 }
 0xc3b   : >> { %9479 = vmatpush3.bf16.msra.mxu0 %v10221_v54 }
 0xc3c   : >> { %9501 = vmatpush3.bf16.msra.mxu1 %v13519_v28  ;;  %9480 = vmatprep.subr.bf16.mxu0 %v10222_v12 }
 0xc3d   : >> { %9502 = vmatprep.subr.bf16.mxu1 %v11056_v1 }
 0xc3f   : >> { %9481 = vmatpush3.bf16.msra.mxu0 %v10222_v12 }
 0xc40   : >> { %9503 = vmatpush3.bf16.msra.mxu1 %v3302_v60  ;;  %9482 = vmatprep.subr.bf16.mxu0 %v10223_v44 }
 0xc41   : >> { %9504 = vmatprep.subr.bf16.mxu1 %v11056_v1  ;;  %v8646_v1 = vld [vmem:[%s8335_s2 + $0x9] ss:$0 sm:$0xff]  ;;  %s13531_s2 = sld [smem:[#allocation14_spill]] (%p3306_p12) }
 0xc43   : >> { %9483 = vmatpush3.bf16.msra.mxu0 %v10223_v44 }
 0xc44   : >> { %9505 = vmatpush3.bf16.msra.mxu1 %v3483_v37  ;;  %9740 = vmatprep.subr.msk.bf16.mxu0 %vm1594_vm3, %v10225_v32 }
 0xc47   : >> { %9507 = vmatmul.mubr.msk.bf16.vlgmr.msra.gmra.mrb[0].mxu1 %vm1294_vm0, %v10224_v31  ;;  %9485 = vmatpush3.bf16.msra.mxu0 %v3389_v33 }
 0xc4a   : >> { %9487 = vmatmul.mubr.msk.bf16.vlgmr.msra.gmra.mrb[0].mxu0 %vm1294_vm0, %v11958_v38 }
 0xc4b   : >> { %9490 = vmatprep.mubr.msk.bf16.mxu0 %vm1294_vm0, %v11962_v14 }
 0xc52   : >> { %9491 = vmatmul.mubr.msk.bf16.gmra.mrb[4].mxu0 %vm1294_vm0, %v11964_v10 }
 0xc53   : >> { %9522 = vmatprep.mubr.msk.bf16.mxu0 %vm1294_vm0, %v11955_v5 }
 0xcb2   : >> { %v3467_v39 = vpop.permute.xlu0 %3466 }
 0xcb6   : >> { %v3472_v40 = vpop.permute.xlu0 %3471 }
 0xd1a   : >> { %v3519_v42 = vpop.f32.mrb[0].mxu1 }
 0xd1b   : >> { %v3520_v43 = vadd.f32 %v3519_v42, %v3467_v39  ;;  %v9508_v49 = vpop.f32.mrb[1].mxu1 }
 0xd1c   : >> { %v3522_v52 = vpop.f32.mrb[2].mxu1 }
 0xd1d   : >> { %v3523_v18 = vadd.f32 %v3522_v52, %v3472_v40  ;;  %v9509_v3 = vpop.f32.mrb[3].mxu1  ;;  %v9488_v17 = vpop.f32.mrb[0].mxu0 }
 0xd1e   : >> { %v3425_v62 = vpop.f32.mrb[1].mxu0  ;;  %v3434_v54 = vadd.f32 %v9488_v17, %v8646_v1  ;;  %v10226_v3 = vld [vmem:[%s8344_s23 + $0x1b0] sm:$0xff]   ;;  %v10228_v17 = vld [vmem:[%s8344_s23 + $0x1c0] sm:$0xff]  }
 0xd1f   : >> { %v3654_v34 = vpack.c.bf16 %v3523_v18, %v3520_v43  ;;  %v9489_v8 = vpop.f32.mrb[2].mxu0  ;;  %v3426_v29 = vadd.f32 %v8646_v1, %v3425_v62  ;;  %9510 = vmatprep.subr.bf16.mxu0 %v10226_v3  ;;  %v10229_v62 = vld [vmem:[%s8344_s23 + $0x1c8] sm:$0xff]  }
 0xd20   : >> { %v3437_v2 = vadd.f32 %v9489_v8, %v8646_v1  ;;  %v3428_v12 = vpop.f32.mrb[3].mxu0  ;;  %9511 = vmatpush3.bf16.msra.mxu0 %v10226_v3 }
 0xd21   : >> { %9742 = vmatprep.subr.msk.bf16.mxu1 %vm1594_vm3, %v3654_v34  ;;  %v3669_v7 = vsel %vm1594_vm3, %v3654_v34, 0  ;;  %v3429_v44 = vadd.f32 %v8646_v1, %v3428_v12  ;;  %v10227_v34 = vld [vmem:[%s8344_s23 + $0x1b8] sm:$0xff]  }
 0xd22   : >> { %9531 = vmatpush3.bf16.msra.mxu1 %v3669_v7  ;;  %v3651_v37 = vpack.c.bf16 %v3437_v2, %v3434_v54  ;;  %9512 = vmatprep.subr.bf16.mxu0 %v10227_v34  ;;  %v10231_v7 = vld [vmem:[%s8344_s23 + $0x1d8] sm:$0x1f]  }
 0xd23   : >> { %v3650_v31 = vpack.c.bf16 %v3429_v44, %v3426_v29  ;;  %v3584_v8 = vsel %vm1594_vm3, %v10231_v7, 0 }
 0xd24   : >> { %9513 = vmatpush3.bf16.msra.mxu0 %v10227_v34 }
 0xd25   : >> { %v9492_v32 = vpop.f32.mrb[4].mxu0  ;;  %9532 = vmatprep.mubr.msk.bf16.mxu1 %vm1862_vm4, %v3650_v31  ;;  %9514 = vmatprep.subr.bf16.mxu0 %v10228_v17 }
 0xd26   : >> { %v3450_v33 = vadd.f32 %v9492_v32, %v8646_v1  ;;  %v3441_v39 = vpop.f32.mrb[5].mxu0  ;;  %9533 = vmatmul.mubr.msk.bf16.vlgmr.msra.gmra.mrb[4].mxu1 %vm1862_vm4, %v3651_v37 }
 0xd27   : >> { %v3442_v40 = vadd.f32 %v8646_v1, %v3441_v39  ;;  %v9493_v42 = vpop.f32.mrb[6].mxu0 }
 0xd28   : >> { %v3444_v43 = vpop.f32.mrb[7].mxu0  ;;  %v3653_v52 = vpack.c.bf16 %v3450_v33, %v3450_v33  ;;  %9515 = vmatpush3.bf16.msra.mxu0 %v10228_v17 }
 0xd29   : >> { %v3445_v49 = vadd.f32 %v8646_v1, %v3444_v43  ;;  %9516 = vmatprep.subr.bf16.mxu0 %v10229_v62  ;;  %v10230_v1 = vld [vmem:[%s8344_s23 + $0x1d0] sm:$0xff]   ;;  %s13532_s23 = sld [smem:[#allocation15_spill]] (%p3306_p12) }
 0xd2b   : >> { %v3652_v18 = vpack.c.bf16 %v3445_v49, %v3442_v40 }
 0xd2c   : >> { %9517 = vmatpush3.bf16.msra.mxu0 %v10229_v62 }
 0xd2d   : >> { %9536 = vmatprep.mubr.msk.bf16.mxu1 %vm1862_vm4, %v3652_v18  ;;  %9518 = vmatprep.subr.bf16.mxu0 %v10230_v1 }
 0xd2e   : >> { %9537 = vmatmul.mubr.msk.bf16.gmra.mrb[8].mxu1 %vm1862_vm4, %v3653_v52 }
 0xd30   : >> { %9519 = vmatpush3.bf16.msra.mxu0 %v10230_v1 }
 0xd31   : >> { %9741 = vmatprep.subr.msk.bf16.mxu0 %vm1594_vm3, %v10231_v7 }
 0xd34   : >> { %9521 = vmatpush3.bf16.msra.mxu0 %v3584_v8  ;;  %v12123_v8 = vld [vmem:[%s8346_s18 + $0x9] ss:$0 sm:$0xff]  ;;  %s13533_s18 = sld [smem:[#allocation12_spill]] (%p3306_p12) }
 0xd37   : >> { %9523 = vmatmul.mubr.msk.bf16.vlgmr.msra.gmra.mrb[8].mxu0 %vm1294_vm0, %v11958_v38 }
 0xd38   : >> { %9526 = vmatprep.mubr.msk.bf16.mxu0 %vm1294_vm0, %v11962_v14 }
 0xd3f   : >> { %9527 = vmatmul.mubr.msk.bf16.gmra.mrb[12].mxu0 %vm1294_vm0, %v11964_v10 }
 0xdf9   : >> { %v9534_v54 = vpop.f32.mrb[4].mxu1 }
 0xdfa   : >> { %v3737_v2 = vmul.f32 0.31622776, %v9534_v54  ;;  %v3705_v12 = vpop.f32.mrb[5].mxu1 }
 0xdfb   : >> { %v3735_v29 = vmul.f32 0.31622776, %v3705_v12  ;;  %v9535_v44 = vpop.f32.mrb[6].mxu1 }
 0xdfc   : >> { %v3708_v37 = vpop.f32.mrb[7].mxu1  ;;  %v3749_v31 = vsel %vm1949_vm5, %v3737_v2, -inf  ;;  %v3738_v32 = vmul.f32 0.31622776, %v9535_v44 }
 0xdfd   : >> { %3750 = vmax.xlane.f32.xlu0 %v3749_v31  ;;  %v3743_v33 = vsel %vm1949_vm5, %v3735_v29, -inf  ;;  %v3736_v39 = vmul.f32 0.31622776, %v3708_v37 }
 0xdfe   : >> { %3744 = vmax.xlane.f32.xlu1 %v3743_v33  ;;  %v3752_v42 = vsel %vm1949_vm5, %v3738_v32, -inf }
 0xdff   : >> { %v3746_v3 = vsel %vm1949_vm5, %v3736_v39, -inf }
 0xe01   : >> { %v9538_v40 = vpop.f32.mrb[8].mxu1 }
 0xe02   : >> { %3753 = vmax.xlane.f32.xlu1 %v3752_v42  ;;  %v3721_v43 = vpop.f32.mrb[9].mxu1  ;;  %v3741_v62 = vmul.f32 0.31622776, %v9538_v40 }
 0xe03   : >> { %v9539_v49 = vpop.f32.mrb[10].mxu1  ;;  %v3739_v18 = vmul.f32 0.31622776, %v3721_v43 }
 0xe04   : >> { %v3724_v52 = vpop.f32.mrb[11].mxu1  ;;  %v3762_v7 = vsel %vm1968_vm6, %v3741_v62, -inf }
 0xe05   : >> { %v3740_v34 = vmul.f32 0.31622776, %v3724_v52  ;;  %v3755_v17 = vsel %vm1949_vm5, %v3739_v18, -inf }
 0xe06   : >> { %3747 = vmax.xlane.f32.xlu1 %v3746_v3 }
 0xe07   : >> { %v3758_v1 = vsel %vm1949_vm5, %v3740_v34, -inf }
 0xe0a   : >> { %3756 = vmax.xlane.f32.xlu1 %v3755_v17  ;;  %v9524_v54 = vpop.f32.mrb[8].mxu0 }
 0xe0b   : >> { %v3629_v12 = vadd.f32 %v9524_v54, %v12123_v8  ;;  %v3620_v44 = vpop.f32.mrb[9].mxu0 }
 0xe0c   : >> { %v3621_v37 = vadd.f32 %v12123_v8, %v3620_v44  ;;  %v9525_v31 = vpop.f32.mrb[10].mxu0 }
 0xe0d   : >> { %v3632_v33 = vadd.f32 %v9525_v31, %v12123_v8  ;;  %v3623_v42 = vpop.f32.mrb[11].mxu0 }
 0xe0e   : >> { %3759 = vmax.xlane.f32.xlu1 %v3758_v1  ;;  %v3624_v40 = vadd.f32 %v12123_v8, %v3623_v42 }
 0xe0f   : >> { %v3826_v43 = vpack.c.bf16 %v3632_v33, %v3629_v12 }
 0xe10   : >> { %v3825_v49 = vpack.c.bf16 %v3624_v40, %v3621_v37 }
 0xe12   : >> { %3763 = vmax.xlane.f32.xlu1 %v3762_v7  ;;  %9540 = vmatprep.subr.bf16.mxu1 %v3825_v49 }
 0xe13   : >> { %9541 = vmatpush3.bf16.msra.mxu1 %v3825_v49 }
 0xe14   : >> { %9542 = vmatprep.subr.bf16.mxu1 %v3826_v43 }
 0xe17   : >> { %9543 = vmatpush3.bf16.msra.mxu1 %v3826_v43 }
 0xe8a   : >> { %v3751_v52 = vpop.xlane.xlu0 %3750 }
 0xe8b   : >> { %v3767_v3 = vsub.f32 %v3737_v2, %v3751_v52  ;;  %v3745_v17 = vpop.xlane.xlu1 %3744 }
 0xe8c   : >> { %v3765_v1 = vsub.f32 %v3735_v29, %v3745_v17 }
 0xe8d   : >> { %v3776_v7 = vmul.f32 1.442695, %v3767_v3 }
 0xe8e   : >> { %v3772_v54 = vmul.f32 1.442695, %v3765_v1 }
 0xe8f   : >> { %10233 = vpow2.f32 %v3776_v7  ;;  %v3754_v44 = vpop.xlane.xlu1 %3753 }
 0xe90   : >> { %10235 = vpow2.f32 %v3772_v54  ;;  %v3768_v16 = vsub.f32 %v3738_v32, %v3754_v44 }
 0xe92   : >> { %v3778_v45 = vmul.f32 1.442695, %v3768_v16 }
 0xe93   : >> { %v3748_v31 = vpop.xlane.xlu1 %3747 }
 0xe94   : >> { %v3766_v28 = vsub.f32 %v3736_v39, %v3748_v31 }
 0xe96   : >> { %v3774_v42 = vmul.f32 1.442695, %v3766_v28 }
 0xe97   : >> { %v3757_v12 = vpop.xlane.xlu1 %3756 }
 0xe98   : >> { %10237 = vpow2.f32 %v3774_v42  ;;  %v3769_v37 = vsub.f32 %v3739_v18, %v3757_v12 }
 0xe99   : >> { %v12129_v33 = vpop.eup %10233  ;;  %10239 = vpow2.f32 %v3778_v45 }
 0xe9a   : >> { %v3780_v2 = vmul.f32 1.442695, %v3769_v37  ;;  %v3792_v29 = vsel %vm1949_vm5, %v12129_v33, 0.0  ;;  %v12133_v40 = vpop.eup %10235 }
 0xe9b   : >> { %3793 = vadd.xlane.f32.xlu1 %v3792_v29  ;;  %v3760_v43 = vpop.xlane.xlu1 %3759  ;;  %v3786_v16 = vsel %vm1949_vm5, %v12133_v40, 0.0 }
 0xe9c   : >> { %10241 = vpow2.f32 %v3780_v2  ;;  %v3770_v32 = vsub.f32 %v3740_v34, %v3760_v43 }
 0xe9e   : >> { %v3782_v49 = vmul.f32 1.442695, %v3770_v32 }
 0xe9f   : >> { %3787 = vadd.xlane.f32.xlu1 %v3786_v16  ;;  %v3764_v28 = vpop.xlane.xlu1 %3763 }
 0xea0   : >> { %10243 = vpow2.f32 %v3782_v49  ;;  %v3771_v39 = vsub.f32 %v3741_v62, %v3764_v28  ;;  %v9528_v62 = vpop.f32.mrb[12].mxu0  ;;  %v10232_v28 = vld [vmem:[%s8349_s28 + $0x48] sm:$0x1f]   ;;  %s13534_s28 = sld [smem:[#allocation13_spill]] (%p3306_p12) }
 0xea1   : >> { %v3636_v42 = vpop.f32.mrb[13].mxu0  ;;  %v3645_v43 = vadd.f32 %v9528_v62, %v12123_v8  ;;  %9744 = vmatprep.subr.msk.bf16.mxu0 %vm1594_vm3, %v10232_v28 }
 0xea2   : >> { %v10238_v18 = vpop.eup %10237  ;;  %v3784_v45 = vmul.f32 1.442695, %v3771_v39  ;;  %v9529_v12 = vpop.f32.mrb[14].mxu0  ;;  %v3637_v2 = vadd.f32 %v12123_v8, %v3636_v42  ;;  %v3935_v39 = vsel %vm1594_vm3, %v10232_v28, 0 }
 0xea3   : >> { %v3789_v52 = vsel %vm1949_vm5, %v10238_v18, 0.0  ;;  %v10240_v3 = vpop.eup %10239  ;;  %v3639_v37 = vpop.f32.mrb[15].mxu0  ;;  %v3828_v49 = vpack.c.bf16 %v3645_v43, %v3645_v43  ;;  %9557 = vmatpush3.bf16.msra.mxu0 %v3935_v39 }
 0xea4   : >> { %10245 = vpow2.f32 %v3784_v45  ;;  %3790 = vadd.xlane.f32.xlu1 %v3789_v52  ;;  %v3795_v34 = vsel %vm1949_vm5, %v10240_v3, 0.0  ;;  %v3640_v29 = vadd.f32 %v12123_v8, %v3639_v37 }
 0xea5   : >> { %v3843_v16 = vsel %vm2048_vm7, %v3828_v49, 0 }
 0xea6   : >> { %v10242_v17 = vpop.eup %10241  ;;  %v3827_v32 = vpack.c.bf16 %v3640_v29, %v3637_v2 }
 0xea7   : >> { %v3798_v1 = vsel %vm1949_vm5, %v10242_v17, 0.0 }
 0xea8   : >> { %3799 = vadd.xlane.f32.xlu0 %v3798_v1  ;;  %3796 = vadd.xlane.f32.xlu1 %v3795_v34 }
 0xea9   : >> { %9544 = vmatprep.subr.bf16.mxu1 %v3827_v32 }
 0xeaa   : >> { %v10244_v7 = vpop.eup %10243  ;;  %9545 = vmatpush3.bf16.msra.mxu1 %v3827_v32 }
 0xeab   : >> { %v3801_v54 = vsel %vm1949_vm5, %v10244_v7, 0.0  ;;  %9743 = vmatprep.subr.msk.bf16.mxu1 %vm2048_vm7, %v3828_v49 }
 0xeac   : >> { %3802 = vadd.xlane.f32.xlu1 %v3801_v54 }
 0xeae   : >> { %v10246_v44 = vpop.eup %10245  ;;  %9547 = vmatpush3.bf16.msra.mxu1 %v3843_v16 }
 0xeaf   : >> { %v3804_v31 = vsel %vm1968_vm6, %v10246_v44, 0.0  ;;  %9745 = vmatprep.subr.msk.bf16.mxu1 %vm1594_vm3, %v10232_v28 }
 0xeb0   : >> { %3805 = vadd.xlane.f32.xlu0 %v3804_v31 }
 0xf28   : >> { %v3794_v8 = vpop.xlane.xlu1 %3793 }
 0xf2c   : >> { %v3788_v45 = vpop.xlane.xlu1 %3787 }
 0xf2d   : >> { %10247 = vrcp.f32 %v3788_v45 }
 0xf31   : >> { %v3791_v52 = vpop.xlane.xlu1 %3790 }
 0xf32   : >> { %10249 = vrcp.f32 %v3791_v52 }
 0xf33   : >> { %10251 = vrcp.f32 %v3794_v8 }
 0xf35   : >> { %v3800_v1 = vpop.xlane.xlu0 %3799  ;;  %v3797_v34 = vpop.xlane.xlu1 %3796 }
 0xf36   : >> { %10253 = vrcp.f32 %v3797_v34 }
 0xf37   : >> { %10255 = vrcp.f32 %v3800_v1  ;;  %v10248_v62 = vpop.eup %10247 }
 0xf38   : >> { %v3814_v12 = vmul.f32 %v10248_v62, %v12133_v40 }
 0xf39   : >> { %v3803_v54 = vpop.xlane.xlu1 %3802 }
 0xf3a   : >> { %10257 = vrcp.f32 %v3803_v54 }
 0xf3c   : >> { %v10250_v31 = vpop.eup %10249 }
 0xf3d   : >> { %v3806_v42 = vpop.xlane.xlu0 %3805  ;;  %v3815_v37 = vmul.f32 %v10250_v31, %v10238_v18  ;;  %v10252_v2 = vpop.eup %10251 }
 0xf3e   : >> { %10259 = vrcp.f32 %v3806_v42  ;;  %v3816_v49 = vmul.f32 %v10252_v2, %v12129_v33 }
 0xf3f   : >> { %v3821_v29 = vpack.c.bf16 %v3815_v37, %v3814_v12 }
 0xf40   : >> { %v10254_v43 = vpop.eup %10253 }
 0xf41   : >> { %9548 = vmatprep.mubr.msk.bf16.mxu1 %vm1949_vm5, %v3821_v29  ;;  %v10256_v32 = vpop.eup %10255  ;;  %v3817_v16 = vmul.f32 %v10254_v43, %v10240_v3 }
 0xf42   : >> { %v3818_v45 = vmul.f32 %v10256_v32, %v10242_v17 }
 0xf43   : >> { %v3822_v8 = vpack.c.bf16 %v3817_v16, %v3816_v49 }
 0xf44   : >> { %v10258_v28 = vpop.eup %10257 }
 0xf45   : >> { %v3819_v52 = vmul.f32 %v10258_v28, %v10244_v7  ;;  %9549 = vmatmul.mubr.msk.bf16.vlgmr.msra.gmra.mrb[12].mxu1 %vm1949_vm5, %v3822_v8 }
 0xf46   : >> { %9707 = vmatpush3.bf16.msra.mxu1 %v3935_v39 }
 0xf47   : >> { %v3823_v1 = vpack.c.bf16 %v3819_v52, %v3818_v45 }
 0xf48   : >> { %v10260_v40 = vpop.eup %10259 }
 0xf49   : >> { %9552 = vmatprep.mubr.msk.bf16.mxu1 %vm1949_vm5, %v3823_v1  ;;  %v3820_v18 = vmul.f32 %v10260_v40, %v10246_v44 }
 0xf4b   : >> { %v3824_v34 = vpack.c.bf16 %v3820_v18, %v3820_v18 }
 0xf4d   : >> { %9553 = vmatmul.mubr.msk.bf16.gmra.mrb[16].mxu1 %vm1949_vm5, %v3824_v34 }
0x1018   : >> { %v9550_v54 = vpop.f32.mrb[12].mxu1 }
0x1019   : >> { %v3879_v62 = vpop.f32.mrb[13].mxu1 }
0x101a   : >> { %v9551_v31 = vpop.f32.mrb[14].mxu1 }
0x101b   : >> { %v3910_v33 = vpack.c.bf16 %v9551_v31, %v9550_v54  ;;  %v3882_v3 = vpop.f32.mrb[15].mxu1 }
0x101c   : >> { %v3909_v42 = vpack.c.bf16 %v3882_v3, %v3879_v62  ;;  %v8706_v62 = vld [vmem:[%s11128_s24 + $0x1] ss:$0 sm:$0xff] (%p3306_p12) }
0x101e   : >> { %9558 = vmatprep.mubr.msk.bf16.mxu0 %vm1862_vm4, %v3909_v42 }
0x101f   : >> { %9559 = vmatmul.mubr.msk.bf16.vlgmr.msra.gmra.mrb[16].mxu0 %vm1862_vm4, %v3910_v33 }
0x1020   : >> { %v9554_v17 = vpop.f32.mrb[16].mxu1  ;;  %4400 = vmatprep.mubr.bf16.mxu0 (%p3306_p12), %v13456_v9 }
0x1021   : >> { %v3895_v7 = vpop.f32.mrb[17].mxu1  ;;  %v3912_v2 = vpack.c.bf16 %v9554_v17, %v9554_v17 }
0x1022   : >> { %v9555_v39 = vpop.f32.mrb[18].mxu1 }
0x1023   : >> { %v3898_v12 = vpop.f32.mrb[19].mxu1 }
0x1024   : >> { %v3911_v37 = vpack.c.bf16 %v3898_v12, %v3895_v7 }
0x1026   : >> { %9562 = vmatprep.mubr.msk.bf16.mxu1 %vm1862_vm4, %v3911_v37 }
0x1027   : >> { %9563 = vmatmul.mubr.msk.bf16.vlgmr.msra.gmra.mrb[20].mxu1 %vm1862_vm4, %v3912_v2 }
0x10f2   : >> { %v9560_v44 = vpop.f32.mrb[16].mxu0 }
0x10f3   : >> { %v4003_v29 = vadd.f32 %v10960_v59, %v9560_v44   ;;  %v3971_v43 = vpop.f32.mrb[17].mxu0 }
0x10f4   : >> { %v4001_v32 = vadd.f32 %v10968_v30, %v3971_v43   ;;  %v9561_v49 = vpop.f32.mrb[18].mxu0 }
0x10f5   : >> { %v4004_v16 = vadd.f32 %v10956_v4, %v9561_v49   ;;  %v3974_v28 = vpop.f32.mrb[19].mxu0  ;;  %v13524_v59 = vmov %v4003_v29  ;;  %v4010_v31 = vadd.f32 (%p3306_p12), %v4003_v29, %v11883_v20 }
0x10f6   : >> { %v4002_v8 = vadd.f32 %v10964_v23, %v3974_v28   ;;  %v13526_v30 = vmov %v4001_v32 }
0x10f7   : >> { %v13523_v4 = vmov %v4004_v16  ;;  %v4008_v30 = vadd.f32 (%p3306_p12), %v4001_v32, %v11874_v41  ;;  %v4011_v3 = vadd.f32 (%p3306_p12), %v4004_v16, %v11888_v35  ;;  %v12198_v5 = vadd.f32 (%p3306_p12), %v8706_v62, %v4010_v31  ;;  %v10267_v31 = vld [vmem:[%s11143_s12 + $0xa8] ss:$12 sps:$4 sm:$0xff] (%p3306_p12)  }
0x10f8   : >> { %v13525_v23 = vmov %v4002_v8  ;;  %v4009_v33 = vadd.f32 (%p3306_p12), %v4002_v8, %v11878_v11 }
0x10f9   : > { %v12196_v39 = vadd.f32 (%p3306_p12), %v8706_v62, %v4008_v30  ;;  %v12202_v38 = vadd.f32 (%p3306_p12), %v8706_v62, %v4011_v3  ;;  %v10264_v30 = vld [vmem:[%s11143_s12 + $0xac] ss:$12 sps:$4 sm:$0xff] (%p3306_p12)   ;;  %v10270_v3 = vld [vmem:[%s11143_s12 + $0xb0] ss:$12 sps:$4 sm:$0xff] (%p3306_p12)  }
0x10fa   : >> { %v9564_v45 = vpop.f32.mrb[20].mxu1  ;;  %3308 = sbr.rel (!%p3306_p12) target bundleno = 3118 (0xc2e), region = 330  ;;  %v12200_v41 = vadd.f32 (%p3306_p12), %v8706_v62, %v4009_v33  ;;  %v10268_v33 = vld [vmem:[%s11143_s12 + $0xc4] ss:$12 sps:$4 sm:$0xff] (%p3306_p12)  }
0x10fb   : >> { %v4007_v52 = vadd.f32 %v10944_v56, %v9564_v45   ;;  %v3987_v1 = vpop.f32.mrb[21].mxu1  ;;  %v4043_v14 = vsel (%p3306_p12), %vm1294_vm0, %v12202_v38, 0.0 }
0x10fc   : >> { %v4005_v40 = vadd.f32 %v10952_v51, %v3987_v1   ;;  %v9565_v18 = vpop.f32.mrb[22].mxu1 }
0x10fd   : >> { %v3990_v34 = vpop.f32.mrb[23].mxu1  ;;  %v13520_v56 = vmov %v4007_v52  ;;  %v4014_v7 = vadd.f32 (%p3306_p12), %v4007_v52, %v11903_v21  ;;  %v4037_v21 = vsel (%p3306_p12), %vm1294_vm0, %v12200_v41, 0.0 }
0x10fe   : >> { %v4006_v54 = vadd.f32 %v10948_v61, %v3990_v34   ;;  %v13522_v51 = vmov %v4005_v40  ;;  %v4012_v42 = vadd.f32 (%p3306_p12), %v4005_v40, %v11893_v55  ;;  %v4034_v55 = vsel (%p3306_p12), %vm1294_vm0, %v12196_v39, 0.0  ;;  %v10261_v34 = vld [vmem:[%s11143_s12 + $0x94] ss:$12 sps:$4 sm:$0xff] (%p3306_p12)  }
0x10ff   : > { %v12208_v35 = vadd.f32 (%p3306_p12), %v8706_v62, %v4014_v7  ;;  %4035 = vadd.xlane.f32.xlu0 (%p3306_p12), %v4034_v55  ;;  %4368 = vmatprep.subr.bf16.mxu0 (%p3306_p12), %v10261_v34  ;;  %v10274_v7 = vld [vmem:[%s11143_s12 + $0xc8] ss:$12 sps:$4 sm:$0xff] (%p3306_p12)   ;;  %v10275_v55 = vld [vmem:[%s11143_s12 + $0xd8] ss:$12 sps:$4 sm:$0xff] (%p3306_p12)  }
0x1100   : >> { %v13521_v61 = vmov %v4006_v54  ;;  %v4013_v17 = vadd.f32 (%p3306_p12), %v4006_v54, %v11898_v6  ;;  %v12204_v20 = vadd.f32 (%p3306_p12), %v8706_v62, %v4012_v42  ;;  %v4040_v6 = vsel (%p3306_p12), %vm1294_vm0, %v12198_v5, 0.0  ;;  %v10263_v54 = vld [vmem:[%s11143_s12 + $0x90] ss:$12 sps:$4 sm:$0xff] (%p3306_p12)   ;;  %v10271_v42 = vld [vmem:[%s11143_s12 + $0xc0] ss:$12 sps:$4 sm:$0xff] (%p3306_p12)  }
0x1101   : > { %4041 = vadd.xlane.f32.xlu1 %v4040_v6  ;;  %v4052_v15 = vsel %vm1313_vm1, %v12208_v35, 0.0  ;;  %4369 = vmatpush1.bf16.msra.mxu0 %v10263_v54  ;;  %v10276_v6 = vld [vmem:[%s11143_s12 + $0xf4] ss:$12 sps:$4 sm:$0xff]  }
0x1102   : > { %v12206_v11 = vadd.f32 %v8706_v62, %v4013_v17  ;;  %v4046_v10 = vsel %vm1294_vm0, %v12204_v20, 0.0  ;;  %v10266_v62 = vld [vmem:[%s11143_s12 + $0x98] ss:$12 sps:$4 sm:$0xff]   ;;  %4370 = vmatprep.subr.bf16.mxu0 %v10264_v30  ;;  %v10272_v17 = vld [vmem:[%s11143_s12 + $0xdc] ss:$12 sps:$4 sm:$0xff]  }
0x1103   : > { %4038 = vadd.xlane.f32.xlu0 %v4037_v21  ;;  %9566 = vmatprep.subr.bf16.mxu1 %v10266_v62  ;;  %v10278_v21 = vld [vmem:[%s11143_s12 + $0xe0] ss:$12 sps:$4 sm:$0xff]  }
0x1104   : > { %v4049_v27 = vsel %vm1294_vm0, %v12206_v11, 0.0  ;;  %9567 = vmatpush3.bf16.msra.mxu1 %v10266_v62 }
0x1105   : > { %4044 = vadd.xlane.f32.xlu1 %v4043_v14  ;;  %4371 = vmatpush1.bf16.msra.mxu0 %v10267_v31  ;;  %v10279_v14 = vld [vmem:[%s11143_s12 + $0xf0] ss:$12 sps:$4 sm:$0xff]  }
0x1106   : > { %4372 = vmatprep.subr.bf16.mxu0 %v10268_v33  ;;  %9568 = vmatprep.subr.bf16.mxu1 %v10270_v3 }
0x1107   : > { %4047 = vadd.xlane.f32.xlu0 %v4046_v10  ;;  %v10280_v10 = vld [vmem:[%s11143_s12 + $0x10c] ss:$12 sps:$4 sm:$0x1f]  }
0x1108   : > { %9569 = vmatpush3.bf16.msra.mxu1 %v10270_v3 }
0x1109   : > { %4050 = vadd.xlane.f32.xlu1 %v4049_v27  ;;  %4373 = vmatpush1.bf16.msra.mxu0 %v10271_v42  ;;  %v10282_v27 = vld [vmem:[%s11143_s12 + $0xf8] ss:$12 sps:$4 sm:$0xff]  }
0x110a   : > { %4374 = vmatprep.subr.bf16.mxu0 %v10272_v17  ;;  %9570 = vmatprep.subr.bf16.mxu1 %v10274_v7 }
0x110b   : > { %4053 = vadd.xlane.f32.xlu0 %v4052_v15  ;;  %v10283_v15 = vld [vmem:[%s11143_s12 + $0x108] ss:$12 sps:$4 sm:$0x1f]  }
0x110c   : > { %9571 = vmatpush3.bf16.msra.mxu1 %v10274_v7 }
0x110d   : > { %4375 = vmatpush1.bf16.msra.mxu0 %v10275_v55  ;;  %9572 = vmatprep.subr.bf16.mxu1 %v10278_v21 }
0x110e   : > { %4376 = vmatprep.subr.bf16.mxu0 %v10276_v6 }
0x1110   : > { %9573 = vmatpush3.bf16.msra.mxu1 %v10278_v21 }
0x1111   : > { %4377 = vmatpush1.bf16.msra.mxu0 %v10279_v14  ;;  %9574 = vmatprep.subr.bf16.mxu1 %v10282_v27 }
0x1112   : > { %8754 = vmatprep.subr.msk.bf16.mxu0 %vm1594_vm3, %v10280_v10 }
0x1114   : > { %9575 = vmatpush3.bf16.msra.mxu1 %v10282_v27 }
0x118c   : > { %v4036_v24 = vpop.xlane.xlu0 %4035 }
0x118d   : > { %v4055_v13 = vmul.f32 0.011111111, %v4036_v24  ;;  %v4360_v24 = vsel %vm1594_vm3, %v10283_v15, 0 }
0x118e   : > { %v4042_v36 = vpop.xlane.xlu1 %4041  ;;  %4379 = vmatpush1.bf16.msra.mxu0 %v4360_v24 }
0x118f   : > { %v4057_v58 = vmul.f32 0.011111111, %v4042_v36  ;;  %v12225_v46 = vsub.f32 %v12196_v39, %v4055_v13  ;;  %v10284_v36 = vld [vmem:[%s11143_s12 + $0x110] ss:$12 sps:$4 sm:$0x1f]  }
0x1190   : > { %v4039_v63 = vpop.xlane.xlu0 %4038  ;;  %9746 = vmatprep.subr.msk.bf16.mxu1 %vm1594_vm3, %v10284_v36  ;;  %v4366_v13 = vsel %vm1594_vm3, %v10284_v36, 0 }
0x1191   : > { %v12228_v25 = vsub.f32 %v12198_v5, %v4057_v58  ;;  %v4056_v0 = vmul.f32 0.011111111, %v4039_v63  ;;  %v4069_v22 = vmul.f32 %v12225_v46, %v12225_v46  ;;  %9577 = vmatpush3.bf16.msra.mxu1 %v4366_v13  ;;  %v10285_v58 = vld [vmem:[%s11153_s27 + $0xf4] sm:$0xff]  }
0x1192   : > { %v4045_v26 = vpop.xlane.xlu1 %4044  ;;  %9269 = vmatprep.subr.bf16.mxu0 %v10285_v58  ;;  %v12290_v63 = vld [vmem:[%s11153_s27 + $0x134] sm:$0xff]  }
0x1193   : > { %v4058_v60 = vmul.f32 0.011111111, %v4045_v26  ;;  %v4071_v19 = vmul.f32 %v12228_v25, %v12228_v25  ;;  %v12235_v57 = vsub.f32 %v12200_v41, %v4056_v0  ;;  %v4076_v61 = vsel %vm1294_vm0, %v4069_v22, 0.0  ;;  %9586 = vmatprep.subr.bf16.mxu1 %v12290_v63 }
0x1194   : > { %v4048_v51 = vpop.xlane.xlu0 %4047  ;;  %4077 = vadd.xlane.f32.xlu1 %v4076_v61 }
0x1195   : > { %v12238_v56 = vsub.f32 %v12202_v38, %v4058_v60  ;;  %v4059_v59 = vmul.f32 0.011111111, %v4048_v51  ;;  %v4082_v12 = vsel %vm1294_vm0, %v4071_v19, 0.0  ;;  %v4070_v37 = vmul.f32 %v12235_v57, %v12235_v57 }
0x1196   : > { %v4051_v4 = vpop.xlane.xlu1 %4050 }
0x1197   : > { %v4060_v23 = vmul.f32 0.011111111, %v4051_v4  ;;  %v4072_v2 = vmul.f32 %v12238_v56, %v12238_v56  ;;  %v12247_v44 = vsub.f32 %v12204_v20, %v4059_v59  ;;  %v4079_v43 = vsel %vm1294_vm0, %v4070_v37, 0.0 }
0x1198   : > { %v4054_v32 = vpop.xlane.xlu0 %4053  ;;  %4083 = vadd.xlane.f32.xlu1 %v4082_v12  ;;  %4080 = vadd.xlane.f32.xlu0 %v4079_v43 }
0x1199   : > { %v12250_v29 = vsub.f32 %v12206_v11, %v4060_v23  ;;  %v4061_v49 = vmul.f32 0.011111111, %v4054_v32  ;;  %v4073_v16 = vmul.f32 %v12247_v44, %v12247_v44  ;;  %v4085_v28 = vsel %vm1294_vm0, %v4072_v2, 0.0 }
0x119b   : > { %v4074_v8 = vmul.f32 %v12250_v29, %v12250_v29  ;;  %v12259_v45 = vsub.f32 %v12208_v35, %v4061_v49  ;;  %v4088_v52 = vsel %vm1294_vm0, %v4073_v16, 0.0 }
0x119c   : > { %4086 = vadd.xlane.f32.xlu0 %v4085_v28  ;;  %4089 = vadd.xlane.f32.xlu1 %v4088_v52 }
0x119d   : > { %v4075_v1 = vmul.f32 %v12259_v45, %v12259_v45  ;;  %v4091_v40 = vsel %vm1294_vm0, %v4074_v8, 0.0 }
0x119f   : > { %v4094_v18 = vsel %vm1313_vm1, %v4075_v1, 0.0 }
0x11a0   : > { %4092 = vadd.xlane.f32.xlu0 %v4091_v40  ;;  %4095 = vadd.xlane.f32.xlu1 %v4094_v18 }
0x1221   : > { %v4078_v26 = vpop.xlane.xlu1 %4077 }
0x1222   : > { %v4097_v0 = vmul.f32 0.011235955, %v4078_v26 }
0x1224   : > { %10308 = vrsqrt.f32 %v4097_v0  ;;  %vm4106_vm5 = vcmp.eq.f32.partialorder %v4097_v0, inf  ;;  %v4109_v16 = vand.u32 2147483648, %v4097_v0  ;;  %vm4108_vm6 = vcmp.eq.f32.partialorder %v4097_v0, 0.0 }
0x1225   : > { %v4084_v60 = vpop.xlane.xlu1 %4083  ;;  %v4081_v22 = vpop.xlane.xlu0 %4080 }
0x1226   : > { %v4099_v19 = vmul.f32 0.011235955, %v4084_v60  ;;  %v4098_v61 = vmul.f32 0.011235955, %v4081_v22 }
0x1228   : > { %10310 = vrsqrt.f32 %v4099_v19  ;;  %vm4120_vm7 = vcmp.eq.f32.partialorder %v4099_v19, inf  ;;  %v4123_v34 = vand.u32 2147483648, %v4099_v19  ;;  %vm4122_vm2 = vcmp.eq.f32.partialorder %v4099_v19, 0.0 }
0x1229   : > { %10312 = vrsqrt.f32 %v4098_v61  ;;  %v4090_v51 = vpop.xlane.xlu1 %4089  ;;  %v4087_v4 = vpop.xlane.xlu0 %4086  ;;  %vm4113_vm8 = vcmp.eq.f32.partialorder %v4098_v61, inf  ;;  %v4116_v62 = vand.u32 2147483648, %v4098_v61  ;;  %vm4115_vm9 = vcmp.eq.f32.partialorder %v4098_v61, 0.0 }
0x122a   : > { %v4101_v59 = vmul.f32 0.011235955, %v4090_v51  ;;  %v4100_v23 = vmul.f32 0.011235955, %v4087_v4  ;;  %v8709_v4 = vld [vmem:[%s13527_s9 + $0x1] ss:$0 sm:$0xff] }
0x122b   : > { %s12681_s9 = smov 0  }
0x122c   : > { %10314 = vrsqrt.f32 %v4101_v59  ;;  %vm4134_vm10 = vcmp.eq.f32.partialorder %v4101_v59, inf  ;;  %vm4136_vm11 = vcmp.eq.f32.partialorder %v4101_v59, 0.0  ;;  %v4137_v6 = vand.u32 2147483648, %v4101_v59 }
0x122d   : > { %10316 = vrsqrt.f32 %v4100_v23  ;;  %v4096_v12 = vpop.xlane.xlu1 %4095  ;;  %v4093_v37 = vpop.xlane.xlu0 %4092  ;;  %vm4127_vm12 = vcmp.eq.f32.partialorder %v4100_v23, inf  ;;  %v4130_v27 = vand.u32 2147483648, %v4100_v23  ;;  %vm4129_vm15 = vcmp.eq.f32.partialorder %v4100_v23, 0.0 }
0x122e   : > { %v10309_v2 = vpop.eup %10308  ;;  %v12293_v43 = vmul.f32 0.011235955, %v4096_v12  ;;  %v12295_v32 = vmul.f32 0.011235955, %v4093_v37 }
0x122f   : > { %v4105_v49 = vmul.f32 %v10309_v2, %v4097_v0 }
0x1230   : > { %10318 = vrsqrt.f32 %v12293_v43  ;;  %v4151_v60 = vand.u32 2147483648, %v12293_v43  ;;  %v4144_v51 = vand.u32 2147483648, %v12295_v32 }
0x1231   : > { %v4107_v28 = vsel %vm4106_vm5, %v4097_v0, %v4105_v49  ;;  %10320 = vrsqrt.f32 %v12295_v32  ;;  %vm4148_vm5 = vcmp.eq.f32.partialorder %v12293_v43, inf }
0x1232   : > { %v10311_v8 = vpop.eup %10310  ;;  %v4110_v52 = vsel %vm4108_vm6, %v4109_v16, %v4107_v28  ;;  %vm4150_vm6 = vcmp.eq.f32.partialorder %v12293_v43, 0.0  ;;  %v4159_v16 = vmul.f32 %v8709_v4, %v12225_v46  ;;  %v4160_v28 = vmul.f32 %v8709_v4, %v12235_v57 }
0x1233   : > { %v10313_v1 = vpop.eup %10312  ;;  %v4119_v40 = vmul.f32 %v10311_v8, %v4099_v19  ;;  %v4166_v18 = vadd.f32 1e-06, %v4110_v52 }
0x1234   : > { %v4112_v54 = vmul.f32 %v10313_v1, %v4098_v61  ;;  %v8710_v1 = vld [vmem:[%s13528_s26 + $0x1] ss:$0 sm:$0xff] }
0x1235   : > { %v4121_v30 = vsel %vm4120_vm7, %v4099_v19, %v4119_v40  ;;  %10322 = vrcp.f32 %v4166_v18  ;;  %vm4141_vm7 = vcmp.eq.f32.partialorder %v12295_v32, inf }
0x1236   : > { %v10315_v31 = vpop.eup %10314  ;;  %v4114_v33 = vsel %vm4113_vm8, %v4098_v61, %v4112_v54  ;;  %v4124_v3 = vsel %vm4122_vm2, %v4123_v34, %v4121_v30  ;;  %vm4143_vm2 = vcmp.eq.f32.partialorder %v12295_v32, 0.0  ;;  %v4162_v34 = vmul.f32 %v8709_v4, %v12238_v56 }
0x1237   : > { %v10317_v42 = vpop.eup %10316  ;;  %v4133_v17 = vmul.f32 %v10315_v31, %v4101_v59  ;;  %v4117_v7 = vsel %vm4115_vm9, %v4116_v62, %v4114_v33  ;;  %v4168_v55 = vadd.f32 1e-06, %v4124_v3  ;;  %v10286_v31 = vld [vmem:[%s11153_s27 + $0xb4] sm:$0xff]   ;;  %v4163_v33 = vmul.f32 %v8709_v4, %v12247_v44  ;;  %v10288_v44 = vld [vmem:[%s11153_s27 + $0xbc] sm:$0xff]  }
0x1238   : > { %v4126_v21 = vmul.f32 %v10317_v42, %v4100_v23  ;;  %v4167_v14 = vadd.f32 1e-06, %v4117_v7  ;;  %v10287_v42 = vld [vmem:[%s11153_s27 + $0xfc] sm:$0xff]   ;;  %vm5087_vm8 = vcmask 588800   ;;  %vm5100_vm9 = vcmask 1045504  }
0x1239   : > { %v4135_v10 = vsel %vm4134_vm10, %v4101_v59, %v4133_v17  ;;  %10324 = vrcp.f32 %v4168_v55  ;;  %v4164_v17 = vmul.f32 %v8709_v4, %v12250_v29  ;;  %vm5102_vm10 = vcmask 586752  }
0x123a   : > { %v10319_v15 = vpop.eup %10318  ;;  %v4128_v24 = vsel %vm4127_vm12, %v4100_v23, %v4126_v21  ;;  %10326 = vrcp.f32 %v4167_v14  ;;  %v4138_v36 = vsel %vm4136_vm11, %v4137_v6, %v4135_v10  ;;  %v10289_v10 = vld [vmem:[%s11153_s27 + $0x104] sm:$0xff]  }
0x123b   : > { %v10321_v13 = vpop.eup %10320  ;;  %v4147_v58 = vmul.f32 %v10319_v15, %v12293_v43  ;;  %v4131_v26 = vsel %vm4129_vm15, %v4130_v27, %v4128_v24  ;;  %v4170_v0 = vadd.f32 1e-06, %v4138_v36  ;;  %v10294_v27 = vld [vmem:[%s11153_s27 + $0x13c] sm:$0xff]   ;;  %v10290_v36 = vld [vmem:[%s11153_s27 + $0xc4] sm:$0xff]  }
0x123c   : > { %v4140_v22 = vmul.f32 %v10321_v13, %v12295_v32  ;;  %v4169_v19 = vadd.f32 1e-06, %v4131_v26  ;;  %v10292_v26 = vld [vmem:[%s11153_s27 + $0x10c] sm:$0xff]  }
0x123d   : > { %v4149_v61 = vsel %vm4148_vm5, %v12293_v43, %v4147_v58  ;;  %10328 = vrcp.f32 %v4170_v0  ;;  %v10297_v0 = vld [vmem:[%s11153_s27 + $0x144] sm:$0xff]  }
0x123e   : > { %v4142_v59 = vsel %vm4141_vm7, %v12295_v32, %v4140_v22  ;;  %10330 = vrcp.f32 %v4169_v19  ;;  %v4152_v23 = vsel %vm4150_vm6, %v4151_v60, %v4149_v61  ;;  %v4161_v32 = vmul.f32 %v8709_v4, %v12228_v25  ;;  %v10293_v60 = vld [vmem:[%s11153_s27 + $0xcc] sm:$0xff]   ;;  %v10296_v61 = vld [vmem:[%s11153_s27 + $0xd4] sm:$0xff]  }
0x123f   : > { %v4145_v12 = vsel %vm4143_vm2, %v4144_v51, %v4142_v59  ;;  %v4172_v37 = vadd.f32 1e-06, %v4152_v23  ;;  %v10323_v2 = vpop.eup %10322  ;;  %v4165_v25 = vmul.f32 %v8709_v4, %v12259_v45  ;;  %v10300_v19 = vld [vmem:[%s11153_s27 + $0x14c] sm:$0xff]   ;;  %v10298_v51 = vld [vmem:[%s11153_s27 + $0x11c] sm:$0xff]   ;;  %v10301_v59 = vld [vmem:[%s11153_s27 + $0x124] sm:$0xff]  }
0x1240   : > { %v4171_v49 = vadd.f32 1e-06, %v4145_v12  ;;  %v4187_v8 = vmul.f32 %v10323_v2, %v4159_v16  ;;  %v10299_v4 = vld [vmem:[%s11153_s27 + $0xdc] sm:$0xff]   ;;  %v10303_v23 = vld [vmem:[%s11153_s27 + $0x154] sm:$0xff]   ;;  %v10302_v12 = vld [vmem:[%s11153_s27 + $0xe4] sm:$0xff]  }
0x1241   : > { %10332 = vrcp.f32 %v4172_v37  ;;  %v10304_v37 = vld [vmem:[%s11153_s27 + $0x12c] sm:$0xff]   ;;  %v10306_v2 = vld [vmem:[%s11153_s27 + $0x15c] sm:$0xff]   ;;  %v10307_v16 = vld [vmem:[%s11153_s27 + $0x164] ss:$0 sps:$4 sm:$0xff]  }
0x1242   : > { %10334 = vrcp.f32 %v4171_v49  ;;  %v4200_v54 = vadd.f32 %v8710_v1, %v4187_v8  ;;  %v10305_v49 = vld [vmem:[%s11153_s27 + $0xec] sm:$0xff]  }
0x1243   : > { %v10325_v43 = vpop.eup %10324  ;;  %v12357_v8 = vld [vmem:[%s11336_s1 + $0x8] sm:$0xff] }
0x1244   : > { %v10327_v52 = vpop.eup %10326  ;;  %v4189_v62 = vmul.f32 %v10325_v43, %v4161_v32  ;;  %v4730_v43 = vsel %vm2932_vm13, %v10307_v16, 0  ;;  %v12365_v32 = vld [vmem:[%s11336_s1 + $0x28] sm:$0xff] }
0x1245   : > { %v4188_v40 = vmul.f32 %v10327_v52, %v4160_v28  ;;  %v12354_v28 = vld [vmem:[%s11336_s1] sm:$0xff] }
0x1246   : > { %v4202_v56 = vadd.f32 %v8710_v1, %v4189_v62  ;;  %v12360_v52 = vld [vmem:[%s11336_s1 + $0x20] sm:$0xff]  ;;  %v12379_v62 = vld [vmem:[%s11336_s1 + $0x30] sm:$0x3f] }
0x1247   : > { %v10329_v18 = vpop.eup %10328  ;;  %v4201_v30 = vadd.f32 %v8710_v1, %v4188_v40  ;;  %v12368_v40 = vld [vmem:[%s11336_s1 + $0x10] sm:$0xff] }
0x1248   : > { %v10331_v46 = vpop.eup %10330  ;;  %v4191_v6 = vmul.f32 %v10329_v18, %v4163_v33  ;;  %v12371_v18 = vld [vmem:[%s11336_s1 + $0x18] sm:$0xff]  ;;  %v5101_v33 = vsel %vm5100_vm9, %v12379_v62, 0.0 }
0x1249   : > { %v4207_v3 = vpack.c.bf16 %v4201_v30, %v4200_v54  ;;  %v4190_v57 = vmul.f32 %v10331_v46, %v4162_v34  ;;  %v5096_v54 = vsel %vm5087_vm8, %v12365_v32, 0.0  ;;  %v5092_v30 = vsel %vm5087_vm8, %v12371_v18, 0.0  ;;  %v12382_v46 = vld [vmem:[%s11336_s1 + $0x38] sm:$0x3f]  ;;  %s13530_s1 = sld [smem:[#allocation11_spill]] }
0x124a   : > { %v4204_v15 = vadd.f32 %v8710_v1, %v4191_v6 }
0x124b   : > { %v10333_v7 = vpop.eup %10332  ;;  %8755 = vmatmul.mubr.msk.bf16.vlgmr.msra.gmra.mrb[0].mxu0 %vm1294_vm0, %v4207_v3  ;;  %9578 = vmatprep.mubr.msk.bf16.mxu1 %vm1294_vm0, %v4207_v3  ;;  %v4203_v55 = vadd.f32 %v8710_v1, %v4190_v57  ;;  %v5103_v3 = vsel %vm5102_vm10, %v12382_v46, 0.0  ;;  %v5097_v57 = vadd.f32 %v5096_v54, %v12360_v52 }
0x124c   : > { %v10335_v21 = vpop.eup %10334  ;;  %4410 = vmatprep.mubr.bf16.mxu0 %v13456_v9  ;;  %9270 = vmatpush3.bf16.msra.mxu0 %v10286_v31  ;;  %v4193_v45 = vmul.f32 %v10333_v7, %v4165_v25  ;;  %v5093_v31 = vadd.f32 %v5092_v30, %v12368_v40 }
0x124d   : > { %v4208_v29 = vpack.c.bf16 %v4203_v55, %v4202_v56  ;;  %v4192_v14 = vmul.f32 %v10335_v21, %v4164_v17  ;;  %9271 = vmatprep.subr.bf16.mxu0 %v10287_v42  ;;  %v5104_v42 = vadd.f32 %v5103_v3, %v5101_v33  ;;  %v8735_v17 = vld [vmem:[%s13529_s5 + $0x3] sm:$0x7] }
0x124e   : > { %v4206_v58 = vadd.f32 %v8710_v1, %v4193_v45  ;;  %5094 = vadd.xlane.f32.xlu1 %v5093_v31  ;;  %v12392_v25 = vrot.slane %v8735_v17, %v11837_v48  ;;  %v12395_v7 = vrot.slane %v8735_v17, %v11841_v50  ;;  %v4250_v21 = vrot.slane %v8735_v17, %v11847_v53 }
0x124f   : > { %9579 = vmatmul.mubr.msk.bf16.vlgmr.msra.gmra.mrb[0].mxu1 %vm1294_vm0, %v4208_v29  ;;  %v4205_v24 = vadd.f32 %v8710_v1, %v4192_v14  ;;  %v5088_v1 = vsel %vm5087_vm8, %v12357_v8, 0.0 }
0x1250   : > { %9272 = vmatpush3.bf16.msra.mxu0 %v10288_v44  ;;  %9587 = vmatpush3.bf16.msra.mxu1 %v12290_v63  ;;  %v4210_v22 = vpack.c.bf16 %v4206_v58, %v4206_v58  ;;  %v10295_v63 = vld [vmem:[%s11153_s27 + $0x114] sm:$0xff]   ;;  %v5089_v34 = vadd.f32 %v5088_v1, %v12354_v28 }
0x1251   : > { %v4209_v13 = vpack.c.bf16 %v4205_v24, %v4204_v15  ;;  %9273 = vmatprep.subr.bf16.mxu0 %v10289_v10  ;;  %9588 = vmatprep.subr.bf16.mxu1 %v10294_v27 }
0x1252   : > { %5090 = vadd.xlane.f32.xlu0 %v5089_v34  ;;  %5105 = vadd.xlane.f32.xlu1 %v5104_v42 }
0x1253   : > { %8756 = vmatmul.mubr.msk.bf16.gmra.mrb[4].mxu0 %vm1294_vm0, %v4208_v29  ;;  %9582 = vmatprep.mubr.msk.bf16.mxu1 %vm1294_vm0, %v4209_v13 }
0x1254   : > { %4420 = vmatprep.mubr.bf16.mxu0 %v13456_v9  ;;  %9274 = vmatpush3.bf16.msra.mxu0 %v10290_v36 }
0x1255   : > { %9275 = vmatprep.subr.bf16.mxu0 %v10292_v26  ;;  %9589 = vmatpush3.bf16.msra.mxu1 %v10294_v27 }
0x1256   : > { %9590 = vmatprep.subr.bf16.mxu1 %v10297_v0  ;;  %5098 = vadd.xlane.f32.xlu0 %v5097_v57 }
0x1257   : > { %9583 = vmatmul.mubr.msk.bf16.gmra.mrb[4].mxu1 %vm1294_vm0, %v4210_v22 }
0x1258   : > { %9276 = vmatpush3.bf16.msra.mxu0 %v10293_v60 }
0x1259   : > { %9277 = vmatprep.subr.bf16.mxu0 %v10295_v63  ;;  %9591 = vmatpush3.bf16.msra.mxu1 %v10297_v0 }
0x125a   : > { %9592 = vmatprep.subr.bf16.mxu1 %v10300_v19 }
0x125b   : > { %8757 = vmatmul.mubr.msk.bf16.gmra.mrb[8].mxu0 %vm1294_vm0, %v4209_v13 }
0x125c   : > { %4430 = vmatprep.mubr.bf16.mxu0 %v13456_v9  ;;  %9278 = vmatpush3.bf16.msra.mxu0 %v10296_v61 }
0x125d   : > { %9279 = vmatprep.subr.bf16.mxu0 %v10298_v51  ;;  %9593 = vmatpush3.bf16.msra.mxu1 %v10300_v19 }
0x125e   : > { %9594 = vmatprep.subr.bf16.mxu1 %v10303_v23 }
0x1260   : > { %9280 = vmatpush3.bf16.msra.mxu0 %v10299_v4 }
0x1261   : > { %9281 = vmatprep.subr.bf16.mxu0 %v10301_v59  ;;  %9595 = vmatpush3.bf16.msra.mxu1 %v10303_v23 }
0x1262   : > { %9596 = vmatprep.subr.bf16.mxu1 %v10306_v2 }
0x1263   : > { %8758 = vmatmul.mubr.msk.bf16.gmra.mrb[12].mxu0 %vm1294_vm0, %v4210_v22 }
0x1264   : > { %9282 = vmatpush3.bf16.msra.mxu0 %v10302_v12 }
0x1265   : > { %9283 = vmatprep.subr.bf16.mxu0 %v10304_v37  ;;  %9597 = vmatpush3.bf16.msra.mxu1 %v10306_v2 }
0x1266   : > { %9747 = vmatprep.subr.msk.bf16.mxu1 %vm2932_vm13, %v10307_v16 }
0x1268   : > { %9284 = vmatpush3.bf16.msra.mxu0 %v10305_v49 }
0x1269   : > { %9599 = vmatpush3.bf16.msra.mxu1 %v4730_v43 }
0x131e   : > { %v4402_v56 = vpop.f32.mrb[0].mxu0 }
0x131f   : > { %v4403_v55 = vadd.f32 %v4402_v56, %v12392_v25  ;;  %v4404_v6 = vpop.f32.mrb[1].mxu0 }
0x1320   : > { %v4405_v44 = vadd.f32 %v4404_v6, %v12395_v7  ;;  %v4406_v29 = vpop.f32.mrb[2].mxu0 }
0x1321   : > { %v4407_v14 = vadd.f32 %v4406_v29, %v12392_v25  ;;  %v4408_v45 = vpop.f32.mrb[3].mxu0  ;;  %v4503_v15 = vmax.f32 %v4403_v55, 0.0 }
0x1322   : > { %v4409_v10 = vadd.f32 %v4408_v45, %v12395_v7  ;;  %v9580_v27 = vpop.f32.mrb[0].mxu1  ;;  %v4504_v58 = vmax.f32 %v4405_v44, 0.0 }
0x1323   : > { %v4506_v24 = vmax.f32 %v4407_v14, 0.0  ;;  %v4482_v36 = vadd.f32 %v9580_v27, %v4250_v21  ;;  %v4473_v13 = vpop.f32.mrb[1].mxu1 }
0x1324   : > { %v4507_v26 = vmax.f32 %v4409_v10, 0.0  ;;  %v4474_v0 = vadd.f32 %v4473_v13, %v4250_v21  ;;  %v9581_v60 = vpop.f32.mrb[2].mxu1 }
0x1325   : > { %v4524_v22 = vpack.c.bf16 %v4506_v24, %v4503_v15  ;;  %v4485_v63 = vadd.f32 %v9581_v60, %v4250_v21  ;;  %v4476_v19 = vpop.f32.mrb[3].mxu1  ;;  %v4511_v59 = vmax.f32 %v4482_v36, 0.0 }
0x1326   : > { %v4525_v61 = vpack.c.bf16 %v4507_v26, %v4504_v58  ;;  %v4477_v51 = vadd.f32 %v4476_v19, %v4250_v21  ;;  %v4412_v4 = vpop.f32.mrb[4].mxu0  ;;  %v4505_v2 = vmax.f32 %v4474_v0, 0.0 }
0x1327   : > { %v4514_v23 = vmax.f32 %v4485_v63, 0.0  ;;  %v4413_v12 = vadd.f32 %v4412_v4, %v12392_v25  ;;  %v4414_v37 = vpop.f32.mrb[5].mxu0 }
0x1328   : > { %v4508_v49 = vmax.f32 %v4477_v51, 0.0  ;;  %v4415_v16 = vadd.f32 %v4414_v37, %v12395_v7  ;;  %v4416_v43 = vpop.f32.mrb[6].mxu0  ;;  %4764 = vmatprep.mubr.bf16.mxu0 %v4525_v61 }
0x1329   : > { %v4529_v1 = vpack.c.bf16 %v4514_v23, %v4511_v59  ;;  %v4417_v34 = vadd.f32 %v4416_v43, %v12392_v25  ;;  %v4418_v54 = vpop.f32.mrb[7].mxu0  ;;  %4765 = vmatmul.mubr.bf16.vlgmr.msra.gmra.mrb[16].mxu0 %v4524_v22  ;;  %v4509_v3 = vmax.f32 %v4413_v12, 0.0 }
0x132a   : > { %v4526_v30 = vpack.c.bf16 %v4508_v49, %v4505_v2  ;;  %v4419_v31 = vadd.f32 %v4418_v54, %v12395_v7  ;;  %v9584_v33 = vpop.f32.mrb[4].mxu1  ;;  %v4510_v56 = vmax.f32 %v4415_v16, 0.0 }
0x132b   : > { %v4512_v57 = vmax.f32 %v4417_v34, 0.0  ;;  %v4498_v42 = vadd.f32 %v9584_v33, %v4250_v21  ;;  %v4489_v17 = vpop.f32.mrb[5].mxu1 }
0x132c   : > { %v4513_v55 = vmax.f32 %v4419_v31, 0.0  ;;  %v4490_v6 = vadd.f32 %v4489_v17, %v4250_v21  ;;  %v9585_v44 = vpop.f32.mrb[6].mxu1  ;;  %9600 = vmatprep.mubr.msk.bf16.mxu1 %vm2919_vm14, %v4526_v30 }
0x132d   : > { %v4527_v29 = vpack.c.bf16 %v4512_v57, %v4509_v3  ;;  %v4492_v14 = vpop.f32.mrb[7].mxu1  ;;  %9601 = vmatmul.mubr.msk.bf16.vlgmr.msra.gmra.mrb[8].mxu1 %vm2919_vm14, %v4529_v1  ;;  %v4523_v15 = vmax.f32 %v4498_v42, 0.0 }
0x132e   : > { %v4528_v45 = vpack.c.bf16 %v4513_v55, %v4510_v56  ;;  %v4493_v10 = vadd.f32 %v4492_v14, %v4250_v21  ;;  %v4422_v27 = vpop.f32.mrb[8].mxu0  ;;  %v4517_v13 = vmax.f32 %v4490_v6, 0.0 }
0x132f   : > { %v4423_v24 = vadd.f32 %v4422_v27, %v12392_v25  ;;  %v4424_v36 = vpop.f32.mrb[9].mxu0  ;;  %v4535_v61 = vpack.c.bf16 %v4523_v15, %v4523_v15  ;;  %v5091_v27 = vpop.xlane.xlu0 %5090 }
0x1330   : > { %v4520_v58 = vmax.f32 %v4493_v10, 0.0  ;;  %v4425_v26 = vadd.f32 %v4424_v36, %v12395_v7  ;;  %v4426_v0 = vpop.f32.mrb[10].mxu0  ;;  %4772 = vmatprep.mubr.bf16.mxu0 %v4528_v45 }
0x1331   : > { %v4427_v60 = vadd.f32 %v4426_v0, %v12392_v25  ;;  %v4428_v22 = vpop.f32.mrb[11].mxu0  ;;  %4773 = vmatmul.mubr.bf16.gmra.mrb[20].mxu0 %v4527_v29  ;;  %v4515_v21 = vmax.f32 %v4423_v24, 0.0  ;;  %v12417_v29 = vld [vmem:[%s13530_s1 + $0x1] ss:$0 sm:$0xff] }
0x1332   : > { %v4532_v63 = vpack.c.bf16 %v4520_v58, %v4517_v13  ;;  %v4429_v19 = vadd.f32 %v4428_v22, %v12395_v7  ;;  %v4516_v4 = vmax.f32 %v4425_v26, 0.0 }
0x1333   : > { %v4518_v51 = vmax.f32 %v4427_v60, 0.0 }
0x1334   : > { %v4519_v59 = vmax.f32 %v4429_v19, 0.0  ;;  %9604 = vmatprep.mubr.msk.bf16.mxu1 %vm2919_vm14, %v4532_v63 }
0x1335   : > { %v4530_v23 = vpack.c.bf16 %v4518_v51, %v4515_v21  ;;  %9605 = vmatmul.mubr.msk.bf16.gmra.mrb[12].mxu1 %vm2919_vm14, %v4535_v61  ;;  %v5107_v61 = vmul.f32 0.005, %v5091_v27 }
0x1336   : > { %v4531_v12 = vpack.c.bf16 %v4519_v59, %v4516_v4  ;;  %v4432_v37 = vpop.f32.mrb[12].mxu0  ;;  %v5099_v59 = vpop.xlane.xlu0 %5098 }
0x1337   : > { %v4433_v2 = vadd.f32 %v4432_v37, %v12392_v25  ;;  %v4434_v49 = vpop.f32.mrb[13].mxu0 }
0x1338   : > { %v4435_v16 = vadd.f32 %v4434_v49, %v12395_v7  ;;  %v4436_v43 = vpop.f32.mrb[14].mxu0  ;;  %4780 = vmatprep.mubr.bf16.mxu0 %v4531_v12  ;;  %v5095_v12 = vpop.xlane.xlu1 %5094 }
0x1339   : > { %v4437_v1 = vpop.f32.mrb[15].mxu0  ;;  %4781 = vmatmul.mubr.bf16.gmra.mrb[24].mxu0 %v4530_v23  ;;  %v4521_v54 = vmax.f32 %v4433_v2, 0.0  ;;  %v12437_v43 = vsub.f32 %v12357_v8, %v5107_v61 }
0x133a   : > { %v4522_v34 = vmax.f32 %v4435_v16, 0.0 }
0x133b   : > { %v4533_v31 = vpack.c.bf16 %v4521_v54, %v4521_v54 }
0x133c   : > { %v4534_v30 = vpack.c.bf16 %v4522_v34, %v4522_v34 }
0x133e   : > { %4788 = vmatprep.mubr.bf16.mxu0 %v4534_v30  ;;  %v5109_v30 = vmul.f32 0.005, %v5099_v59 }
0x1341   : > { %4789 = vmatmul.mubr.bf16.gmra.mrb[28].mxu0 %v4533_v31 }
0x13fc   : > { %v9285_v33 = vpop.f32.mrb[16].mxu0 }
0x13fd   : > { %v9286_v3 = vpop.f32.mrb[17].mxu0 }
0x13fe   : > { %v9287_v57 = vadd.f32 %v9286_v3, %v9285_v33  ;;  %v9288_v42 = vpop.f32.mrb[18].mxu0  ;;  %v5108_v33 = vmul.f32 0.005, %v5095_v12 }
0x13ff   : > { %v9289_v17 = vpop.f32.mrb[19].mxu0 }
0x1400   : > { %v9290_v25 = vadd.f32 %v9289_v17, %v9288_v42  ;;  %v9602_v56 = vpop.f32.mrb[8].mxu1  ;;  %v12447_v42 = vsub.f32 %v12354_v28, %v5107_v61  ;;  %v5106_v17 = vpop.xlane.xlu1 %5105 }
0x1401   : > { %v4830_v55 = vpop.f32.mrb[9].mxu1 }
0x1402   : > { %v4831_v7 = vadd.f32 %v9287_v57, %v4830_v55  ;;  %v9603_v6 = vpop.f32.mrb[10].mxu1 }
0x1403   : > { %v4833_v44 = vpop.f32.mrb[11].mxu1 }
0x1404   : > { %v4860_v14 = vadd.f32 %v4831_v7, %v12196_v39  ;;  %v4834_v45 = vadd.f32 %v9290_v25, %v4833_v44  ;;  %v9291_v10 = vpop.f32.mrb[20].mxu0  ;;  %v5120_v25 = vmul.f32 %v12437_v43, %v12437_v43  ;;  %v12453_v7 = vsub.f32 %v12365_v32, %v5109_v30 }
0x1405   : > { %v9292_v15 = vpop.f32.mrb[21].mxu0 }
0x1406   : > { %v4861_v24 = vadd.f32 %v4834_v45, %v12200_v41  ;;  %v9293_v36 = vadd.f32 %v9292_v15, %v9291_v10  ;;  %v9294_v13 = vpop.f32.mrb[22].mxu0  ;;  %v12422_v58 = vadd.f32 %v12417_v29, %v4860_v14  ;;  %v5110_v10 = vmul.f32 0.005, %v5106_v17 }
0x1407   : > { %v9295_v26 = vpop.f32.mrb[23].mxu0  ;;  %v12463_v15 = vsub.f32 %v12360_v52, %v5109_v30 }
0x1408   : > { %v4839_v0 = vadd.f32 %v9602_v56, %v9293_v36  ;;  %v9296_v60 = vadd.f32 %v9295_v26, %v9294_v13  ;;  %v9606_v22 = vpop.f32.mrb[12].mxu1  ;;  %v4884_v63 = vsel %vm1294_vm0, %v12422_v58, 0.0  ;;  %v12427_v39 = vadd.f32 %v12417_v29, %v4861_v24 }
0x1409   : > { %v4846_v19 = vpop.f32.mrb[13].mxu1  ;;  %4885 = vadd.xlane.f32.xlu0 %v4884_v63  ;;  %v5127_v24 = vsel %vm5087_vm8, %v5120_v25, 0.0  ;;  %v12474_v63 = vsub.f32 %v12368_v40, %v5108_v33  ;;  %v5123_v59 = vmul.f32 %v12463_v15, %v12463_v15 }
0x140a   : > { %v4842_v21 = vadd.f32 %v9603_v6, %v9296_v60  ;;  %v9607_v41 = vpop.f32.mrb[14].mxu1  ;;  %v4887_v51 = vsel %vm1294_vm0, %v12427_v39, 0.0  ;;  %v4862_v4 = vadd.f32 %v4839_v0, %v12198_v5  ;;  %v12456_v6 = vsub.f32 %v12371_v18, %v5108_v33 }
0x140b   : > { %v4849_v23 = vpop.f32.mrb[15].mxu1  ;;  %4888 = vadd.xlane.f32.xlu1 %v4887_v51  ;;  %v12480_v41 = vsub.f32 %v12379_v62, %v5110_v10  ;;  %v12483_v51 = vsub.f32 %v12382_v46, %v5110_v10 }
0x140c   : > { %v9297_v37 = vpop.f32.mrb[24].mxu0  ;;  %v12433_v2 = vadd.f32 %v12417_v29, %v4862_v4  ;;  %v4863_v49 = vadd.f32 %v4842_v21, %v12202_v38 }
0x140d   : > { %v9298_v16 = vpop.f32.mrb[25].mxu0 }
0x140e   : > { %v9299_v1 = vadd.f32 %v9298_v16, %v9297_v37  ;;  %v9300_v34 = vpop.f32.mrb[26].mxu0  ;;  %v4890_v54 = vsel %vm1294_vm0, %v12433_v2, 0.0  ;;  %v12442_v5 = vadd.f32 %v12417_v29, %v4863_v49  ;;  %v5125_v16 = vmul.f32 %v12480_v41, %v12480_v41 }
0x140f   : > { %4891 = vadd.xlane.f32.xlu0 %v4890_v54  ;;  %v9301_v31 = vpop.f32.mrb[27].mxu0 }
0x1410   : > { %v4847_v3 = vadd.f32 %v9299_v1, %v4846_v19  ;;  %v9302_v57 = vadd.f32 %v9301_v31, %v9300_v34  ;;  %v4893_v38 = vsel %vm1294_vm0, %v12442_v5, 0.0  ;;  %v5122_v19 = vmul.f32 %v12456_v6, %v12456_v6 }
0x1411   : > { %4894 = vadd.xlane.f32.xlu1 %v4893_v38  ;;  %v5126_v1 = vmul.f32 %v12483_v51, %v12483_v51  ;;  %v5139_v30 = vsel %vm5100_vm9, %v5125_v16, 0.0 }
0x1412   : > { %v4850_v56 = vadd.f32 %v9302_v57, %v4849_v23  ;;  %v4864_v55 = vadd.f32 %v4847_v3, %v12204_v20  ;;  %v5119_v20 = vmul.f32 %v12447_v42, %v12447_v42  ;;  %v5131_v49 = vsel %vm5087_vm8, %v5122_v19, 0.0 }
0x1413   : > { %v5140_v31 = vsel %vm5102_vm10, %v5126_v1, 0.0 }
0x1414   : > { %v9303_v44 = vpop.f32.mrb[28].mxu0  ;;  %v12459_v14 = vadd.f32 %v12417_v29, %v4864_v55  ;;  %v4865_v45 = vadd.f32 %v4850_v56, %v12206_v11  ;;  %v5124_v11 = vmul.f32 %v12453_v7, %v12453_v7  ;;  %v5128_v4 = vadd.f32 %v5127_v24, %v5119_v20 }
0x1415   : > { %v9304_v27 = vpop.f32.mrb[29].mxu0 }
0x1416   : > { %v9305_v36 = vadd.f32 %v9304_v27, %v9303_v44  ;;  %v9306_v13 = vpop.f32.mrb[30].mxu0  ;;  %v4896_v26 = vsel %vm1294_vm0, %v12459_v14, 0.0  ;;  %v4880_v0 = vadd.f32 %v12417_v29, %v4865_v45  ;;  %v5135_v12 = vsel %vm5087_vm8, %v5124_v11, 0.0 }
0x1417   : > { %v9307_v60 = vpop.f32.mrb[31].mxu0  ;;  %4897 = vadd.xlane.f32.xlu0 %v4896_v26  ;;  %v5136_v34 = vadd.f32 %v5135_v12, %v5123_v59 }
0x1418   : > { %v4855_v61 = vadd.f32 %v9606_v22, %v9305_v36  ;;  %v4899_v21 = vsel %vm1294_vm0, %v4880_v0, 0.0  ;;  %v5121_v22 = vmul.f32 %v12474_v63, %v12474_v63 }
0x1419   : > { %4900 = vadd.xlane.f32.xlu1 %v4899_v21 }
0x141a   : > { %v4866_v23 = vadd.f32 %v4855_v61, %v12208_v35  ;;  %v5132_v35 = vadd.f32 %v5131_v49, %v5121_v22 }
0x141c   : > { %v4881_v37 = vadd.f32 %v12417_v29, %v4866_v23  ;;  %v5141_v29 = vadd.f32 %v5140_v31, %v5139_v30 }
0x141d   : > { %5129 = vadd.xlane.f32.xlu1 %v5128_v4 }
0x141e   : > { %v4902_v54 = vsel %vm1313_vm1, %v4881_v37, 0.0 }
0x141f   : > { %4903 = vadd.xlane.f32.xlu0 %v4902_v54 }
0x1421   : > { %5137 = vadd.xlane.f32.xlu1 %v5136_v34 }
0x1423   : > { %5133 = vadd.xlane.f32.xlu0 %v5132_v35 }
0x1427   : > { %5142 = vadd.xlane.f32.xlu0 %v5141_v29 }
0x1496   : > { %v4886_v33 = vpop.xlane.xlu0 %4885 }
0x1497   : > { %v4905_v3 = vmul.f32 0.011111111, %v4886_v33 }
0x1498   : > { %v4889_v57 = vpop.xlane.xlu1 %4888 }
0x1499   : > { %v12501_v38 = vsub.f32 %v12422_v58, %v4905_v3  ;;  %v4906_v17 = vmul.f32 0.011111111, %v4889_v57 }
0x149b   : > { %v12504_v25 = vsub.f32 %v12427_v39, %v4906_v17  ;;  %v4919_v56 = vmul.f32 %v12501_v38, %v12501_v38 }
0x149c   : > { %v4892_v55 = vpop.xlane.xlu0 %4891 }
0x149d   : > { %v4907_v44 = vmul.f32 0.011111111, %v4892_v55  ;;  %v4926_v45 = vsel %vm1294_vm0, %v4919_v56, 0.0  ;;  %v4920_v10 = vmul.f32 %v12504_v25, %v12504_v25 }
0x149e   : > { %v4895_v27 = vpop.xlane.xlu1 %4894  ;;  %4927 = vadd.xlane.f32.xlu1 %v4926_v45 }
0x149f   : > { %v12512_v20 = vsub.f32 %v12433_v2, %v4907_v44  ;;  %v4908_v58 = vmul.f32 0.011111111, %v4895_v27  ;;  %v4929_v24 = vsel %vm1294_vm0, %v4920_v10, 0.0 }
0x14a0   : > { %4930 = vadd.xlane.f32.xlu0 %v4929_v24 }
0x14a1   : > { %v12516_v39 = vsub.f32 %v12442_v5, %v4908_v58  ;;  %v4921_v36 = vmul.f32 %v12512_v20, %v12512_v20 }
0x14a3   : > { %v4932_v13 = vsel %vm1294_vm0, %v4921_v36, 0.0  ;;  %v4922_v26 = vmul.f32 %v12516_v39, %v12516_v39 }
0x14a4   : > { %4933 = vadd.xlane.f32.xlu1 %v4932_v13  ;;  %v4898_v11 = vpop.xlane.xlu0 %4897 }
0x14a5   : > { %v4909_v60 = vmul.f32 0.011111111, %v4898_v11  ;;  %v4935_v2 = vsel %vm1294_vm0, %v4922_v26, 0.0 }
0x14a6   : > { %v4901_v19 = vpop.xlane.xlu1 %4900  ;;  %4936 = vadd.xlane.f32.xlu0 %v4935_v2 }
0x14a7   : > { %v12525_v61 = vsub.f32 %v12459_v14, %v4909_v60  ;;  %v4910_v5 = vmul.f32 0.011111111, %v4901_v19 }
0x14a9   : > { %v12527_v21 = vsub.f32 %v4880_v0, %v4910_v5  ;;  %v4923_v4 = vmul.f32 %v12525_v61, %v12525_v61 }
0x14aa   : > { %v5130_v59 = vpop.xlane.xlu1 %5129 }
0x14ab   : > { %v5144_v23 = vmul.f32 0.0050251256, %v5130_v59  ;;  %v4938_v12 = vsel %vm1294_vm0, %v4923_v4, 0.0  ;;  %v4924_v22 = vmul.f32 %v12527_v21, %v12527_v21 }
0x14ac   : > { %4939 = vadd.xlane.f32.xlu1 %v4938_v12  ;;  %v4904_v49 = vpop.xlane.xlu0 %4903 }
0x14ad   : > { %10336 = vrsqrt.f32 %v5144_v23  ;;  %v4911_v16 = vmul.f32 0.011111111, %v4904_v49  ;;  %v4941_v14 = vsel %vm1294_vm0, %v4924_v22, 0.0  ;;  %vm5150_vm14 = vcmp.eq.f32.partialorder %v5144_v23, inf }
0x14ae   : > { %v5138_v1 = vpop.xlane.xlu1 %5137  ;;  %4942 = vadd.xlane.f32.xlu0 %v4941_v14  ;;  %v5153_v57 = vand.u32 2147483648, %v5144_v23  ;;  %vm5152_vm11 = vcmp.eq.f32.partialorder %v5144_v23, 0.0 }
0x14af   : > { %v12535_v34 = vsub.f32 %v4881_v37, %v4911_v16  ;;  %v5146_v0 = vmul.f32 0.0050251256, %v5138_v1  ;;  %v5086_v1 = vld [vmem:[%s13532_s23] sm:$0x3] }
0x14b0   : > { %v5134_v54 = vpop.xlane.xlu0 %5133 }
0x14b1   : > { %10338 = vrsqrt.f32 %v5146_v0  ;;  %v5145_v35 = vmul.f32 0.0050251256, %v5134_v54  ;;  %v4925_v30 = vmul.f32 %v12535_v34, %v12535_v34  ;;  %vm5164_vm12 = vcmp.eq.f32.partialorder %v5146_v0, inf }
0x14b2   : > { %v5167_v55 = vand.u32 2147483648, %v5146_v0  ;;  %vm5166_vm15 = vcmp.eq.f32.partialorder %v5146_v0, 0.0 }
0x14b3   : > { %10340 = vrsqrt.f32 %v5145_v35  ;;  %v4944_v29 = vsel %vm1313_vm1, %v4925_v30, 0.0  ;;  %vm5157_vm5 = vcmp.eq.f32.partialorder %v5145_v35, inf  ;;  %v5160_v24 = vand.u32 2147483648, %v5145_v35 }
0x14b4   : > { %v5143_v31 = vpop.xlane.xlu0 %5142  ;;  %4945 = vadd.xlane.f32.xlu1 %v4944_v29  ;;  %vm5159_vm6 = vcmp.eq.f32.partialorder %v5145_v35, 0.0 }
0x14b5   : > { %v5147_v33 = vmul.f32 0.0050251256, %v5143_v31 }
0x14b7   : > { %v10337_v3 = vpop.eup %10336  ;;  %10342 = vrsqrt.f32 %v5147_v33  ;;  %vm5171_vm7 = vcmp.eq.f32.partialorder %v5147_v33, inf  ;;  %v5174_v2 = vand.u32 2147483648, %v5147_v33  ;;  %vm5173_vm2 = vcmp.eq.f32.partialorder %v5147_v33, 0.0 }
0x14b8   : > { %v5149_v37 = vmul.f32 %v10337_v3, %v5144_v23 }
0x14ba   : > { %v5151_v17 = vsel %vm5150_vm14, %v5144_v23, %v5149_v37  ;;  %v5085_v23 = vld [vmem:[%s13531_s2] sm:$0x3] }
0x14bb   : > { %v10339_v56 = vpop.eup %10338  ;;  %v5154_v44 = vsel %vm5152_vm11, %v5153_v57, %v5151_v17  ;;  %v5180_v49 = vrot.slane %v5085_v23, %v11837_v48  ;;  %v5184_v16 = vrot.slane %v5085_v23, %v11841_v50  ;;  %v5223_v57 = vrot.slane %v5086_v1, %v11841_v50 }
0x14bc   : > { %v5163_v45 = vmul.f32 %v10339_v56, %v5146_v0  ;;  %v5195_v10 = vadd.f32 1e-06, %v5154_v44 }
0x14bd   : > { %v10341_v27 = vpop.eup %10340  ;;  %v5188_v54 = vmul.f32 %v5184_v16, %v12437_v43  ;;  %v5190_v30 = vmul.f32 %v5184_v16, %v12456_v6  ;;  %v5191_v17 = vmul.f32 %v5180_v49, %v12463_v15  ;;  %v5192_v56 = vmul.f32 %v5184_v16, %v12453_v7 }
0x14be   : > { %v5165_v58 = vsel %vm5164_vm12, %v5146_v0, %v5163_v45  ;;  %v5156_v36 = vmul.f32 %v10341_v27, %v5145_v35  ;;  %10344 = vrcp.f32 %v5195_v10  ;;  %v5187_v0 = vmul.f32 %v5180_v49, %v12447_v42 }
0x14bf   : > { %v5168_v13 = vsel %vm5166_vm15, %v5167_v55, %v5165_v58  ;;  %v5193_v43 = vmul.f32 %v5180_v49, %v12480_v41 }
0x14c0   : > { %v5197_v26 = vadd.f32 1e-06, %v5168_v13  ;;  %v5158_v60 = vsel %vm5157_vm5, %v5145_v35, %v5156_v36  ;;  %v5189_v35 = vmul.f32 %v5180_v49, %v12474_v63  ;;  %v5194_v63 = vmul.f32 %v5184_v16, %v12483_v51 }
0x14c1   : > { %v10343_v11 = vpop.eup %10342  ;;  %v5161_v5 = vsel %vm5159_vm6, %v5160_v24, %v5158_v60 }
0x14c2   : > { %v5170_v19 = vmul.f32 %v10343_v11, %v5147_v33  ;;  %v5196_v4 = vadd.f32 1e-06, %v5161_v5  ;;  %10346 = vrcp.f32 %v5197_v26 }
0x14c4   : > { %v5172_v59 = vsel %vm5171_vm7, %v5147_v33, %v5170_v19  ;;  %10348 = vrcp.f32 %v5196_v4  ;;  %v5219_v33 = vrot.slane %v5086_v1, %v11837_v48 }
0x14c5   : > { %v5175_v12 = vsel %vm5173_vm2, %v5174_v2, %v5172_v59 }
0x14c6   : > { %v5198_v22 = vadd.f32 1e-06, %v5175_v12 }
0x14c8   : > { %10350 = vrcp.f32 %v5198_v22  ;;  %v10345_v14 = vpop.eup %10344 }
0x14c9   : > { %v5207_v29 = vmul.f32 %v10345_v14, %v5187_v0  ;;  %v5208_v3 = vmul.f32 %v10345_v14, %v5188_v54 }
0x14cb   : > { %v5226_v10 = vadd.f32 %v5219_v33, %v5207_v29  ;;  %v5227_v58 = vadd.f32 %v5223_v57, %v5208_v3 }
0x14cc   : > { %v10347_v31 = vpop.eup %10346 }
0x14cd   : > { %v5211_v44 = vmul.f32 %v10347_v31, %v5191_v17  ;;  %v5212_v6 = vmul.f32 %v10347_v31, %v5192_v56 }
0x14ce   : > { %v10349_v37 = vpop.eup %10348 }
0x14cf   : > { %v5209_v55 = vmul.f32 %v10349_v37, %v5189_v35  ;;  %v5210_v42 = vmul.f32 %v10349_v37, %v5190_v30  ;;  %v5230_v7 = vadd.f32 %v5219_v33, %v5211_v44  ;;  %v5231_v60 = vadd.f32 %v5223_v57, %v5212_v6 }
0x14d1   : > { %v5228_v27 = vadd.f32 %v5219_v33, %v5209_v55  ;;  %v5229_v24 = vadd.f32 %v5223_v57, %v5210_v42 }
0x14d2   : > { %v10351_v45 = vpop.eup %10350 }
0x14d3   : > { %v5213_v36 = vmul.f32 %v10351_v45, %v5193_v43  ;;  %v5214_v13 = vmul.f32 %v10351_v45, %v5194_v63  ;;  %v12554_v26 = vpack.c.bf16 %v5228_v27, %v5226_v10  ;;  %v12556_v15 = vpack.c.bf16 %v5229_v24, %v5227_v58 }
0x14d5   : > { %v5232_v11 = vadd.f32 %v5219_v33, %v5213_v36  ;;  %v5233_v2 = vadd.f32 %v5223_v57, %v5214_v13 }
0x14d7   : > { %v12558_v41 = vpack.c.bf16 %v5232_v11, %v5230_v7  ;;  %v12560_v51 = vpack.c.bf16 %v5233_v2, %v5231_v60 }
0x14db   : > { %5238 = vxpose.xlu0.b32.start [1/4] (short) %v5226_v10, 128 }
0x14df   : > { %5239 = vxpose.xlu0.b32.cont [2/4] (short) %v5228_v27, 128 }
0x14e3   : > { %5240 = vxpose.xlu0.b32.cont [3/4] (short) %v5230_v7, 128  ;;  %v12563_v7 = vld [vmem:[%s13533_s18] ss:$0 sm:$0xff] }
0x14e7   : > { %5241 = vxpose.xlu0.b32.end [4/4] (short) %v5232_v11, 128  ;;  %5270 = vxpose.xlu1.b32.start [1/4] (short) (narrow) %v5227_v58, 72 }
0x14eb   : > { %5271 = vxpose.xlu1.b32.cont [2/4] (short) (narrow) %v5229_v24, 72 }
0x14ef   : > { %5272 = vxpose.xlu1.b32.cont [3/4] (short) (narrow) %v5231_v60, 72 }
0x14f3   : > { %5273 = vxpose.xlu1.b32.end [4/4] (short) (narrow) %v5233_v2, 72 }
0x152b   : > { %v4928_v19 = vpop.xlane.xlu1 %4927 }
0x152c   : > { %v4947_v5 = vmul.f32 0.011235955, %v4928_v19 }
0x152d   : > { %v4931_v4 = vpop.xlane.xlu0 %4930 }
0x152e   : > { %10352 = vrsqrt.f32 %v4947_v5  ;;  %v4948_v59 = vmul.f32 0.011235955, %v4931_v4  ;;  %vm4956_vm14 = vcmp.eq.f32.partialorder %v4947_v5, inf  ;;  %v4959_v0 = vand.u32 2147483648, %v4947_v5 }
0x152f   : > { %vm4958_vm11 = vcmp.eq.f32.partialorder %v4947_v5, 0.0 }
0x1530   : > { %10354 = vrsqrt.f32 %v4948_v59  ;;  %vm4963_vm12 = vcmp.eq.f32.partialorder %v4948_v59, inf  ;;  %v4966_v57 = vand.u32 2147483648, %v4948_v59  ;;  %vm4965_vm15 = vcmp.eq.f32.partialorder %v4948_v59, 0.0 }
0x1531   : > { %v4934_v23 = vpop.xlane.xlu1 %4933 }
0x1532   : > { %v4949_v12 = vmul.f32 0.011235955, %v4934_v23 }
0x1533   : > { %v4937_v22 = vpop.xlane.xlu0 %4936 }
0x1534   : > { %10356 = vrsqrt.f32 %v4949_v12  ;;  %v4950_v49 = vmul.f32 0.011235955, %v4937_v22  ;;  %vm4970_vm5 = vcmp.eq.f32.partialorder %v4949_v12, inf  ;;  %v4973_v63 = vand.u32 2147483648, %v4949_v12  ;;  %v8838_v22 = vld [vmem:[%s13534_s28] ss:$0 sm:$0xff] }
0x1535   : > { %vm4972_vm6 = vcmp.eq.f32.partialorder %v4949_v12, 0.0 }
0x1536   : > { %10358 = vrsqrt.f32 %v4950_v49  ;;  %vm4977_vm7 = vcmp.eq.f32.partialorder %v4950_v49, inf  ;;  %v4980_v58 = vand.u32 2147483648, %v4950_v49  ;;  %vm4979_vm2 = vcmp.eq.f32.partialorder %v4950_v49, 0.0 }
0x1538   : > { %v10353_v16 = vpop.eup %10352 }
0x1539   : > { %v4955_v14 = vmul.f32 %v10353_v16, %v4947_v5  ;;  %v4940_v1 = vpop.xlane.xlu1 %4939 }
0x153a   : > { %v4951_v54 = vmul.f32 0.011235955, %v4940_v1  ;;  %v10355_v35 = vpop.eup %10354 }
0x153b   : > { %v4957_v30 = vsel %vm4956_vm14, %v4947_v5, %v4955_v14  ;;  %v4962_v29 = vmul.f32 %v10355_v35, %v4948_v59  ;;  %v4943_v33 = vpop.xlane.xlu0 %4942  ;;  %v5009_v5 = vmul.f32 %v12563_v7, %v12501_v38  ;;  %v5010_v14 = vmul.f32 %v12563_v7, %v12504_v25 }
0x153c   : > { %v4960_v31 = vsel %vm4958_vm11, %v4959_v0, %v4957_v30  ;;  %10360 = vrsqrt.f32 %v4951_v54  ;;  %v4952_v37 = vmul.f32 0.011235955, %v4943_v33  ;;  %vm4984_vm14 = vcmp.eq.f32.partialorder %v4951_v54, inf }
0x153d   : > { %v5016_v3 = vadd.f32 1e-06, %v4960_v31  ;;  %v4964_v56 = vsel %vm4963_vm12, %v4948_v59, %v4962_v29  ;;  %v4987_v4 = vand.u32 2147483648, %v4951_v54  ;;  %vm4986_vm11 = vcmp.eq.f32.partialorder %v4951_v54, 0.0 }
0x153e   : > { %v10357_v17 = vpop.eup %10356  ;;  %v4967_v55 = vsel %vm4965_vm15, %v4966_v57, %v4964_v56  ;;  %vm4991_vm12 = vcmp.eq.f32.partialorder %v4952_v37, inf  ;;  %vm4993_vm15 = vcmp.eq.f32.partialorder %v4952_v37, 0.0  ;;  %v4994_v30 = vand.u32 2147483648, %v4952_v37 }
0x153f   : > { %10362 = vrcp.f32 %v5016_v3  ;;  %v4969_v42 = vmul.f32 %v10357_v17, %v4949_v12  ;;  %v5017_v43 = vadd.f32 1e-06, %v4967_v55  ;;  %v5012_v25 = vmul.f32 %v12563_v7, %v12516_v39 }
0x1540   : > { %10364 = vrsqrt.f32 %v4952_v37  ;;  %v10359_v44 = vpop.eup %10358 }
0x1541   : > { %v4971_v6 = vsel %vm4970_vm5, %v4949_v12, %v4969_v42  ;;  %10366 = vrcp.f32 %v5017_v43  ;;  %v4976_v10 = vmul.f32 %v10359_v44, %v4950_v49  ;;  %v4946_v24 = vpop.xlane.xlu1 %4945 }
0x1542   : > { %v4974_v45 = vsel %vm4972_vm6, %v4973_v63, %v4971_v6  ;;  %v4953_v13 = vmul.f32 0.011235955, %v4946_v24 }
0x1543   : > { %v5018_v27 = vadd.f32 1e-06, %v4974_v45  ;;  %v4978_v36 = vsel %vm4977_vm7, %v4950_v49, %v4976_v10 }
0x1544   : > { %v4981_v11 = vsel %vm4979_vm2, %v4980_v58, %v4978_v36  ;;  %vm4998_vm5 = vcmp.eq.f32.partialorder %v4953_v13, inf  ;;  %vm5000_vm6 = vcmp.eq.f32.partialorder %v4953_v13, 0.0 }
0x1545   : > { %10368 = vrcp.f32 %v5018_v27  ;;  %v5019_v2 = vadd.f32 1e-06, %v4981_v11  ;;  %v5013_v11 = vmul.f32 %v12563_v7, %v12525_v61  ;;  %v5015_v61 = vmul.f32 %v12563_v7, %v12535_v34 }
0x1546   : > { %v10361_v60 = vpop.eup %10360  ;;  %10370 = vrsqrt.f32 %v4953_v13 }
0x1547   : > { %v4983_v19 = vmul.f32 %v10361_v60, %v4951_v54  ;;  %10372 = vrcp.f32 %v5019_v2 }
0x1549   : > { %v10363_v59 = vpop.eup %10362  ;;  %v4985_v23 = vsel %vm4984_vm14, %v4951_v54, %v4983_v19  ;;  %v5011_v54 = vmul.f32 %v12563_v7, %v12512_v20  ;;  %v5001_v20 = vand.u32 2147483648, %v4953_v13 }
0x154a   : > { %v10365_v12 = vpop.eup %10364  ;;  %v5037_v49 = vmul.f32 %v10363_v59, %v5009_v5  ;;  %v4988_v16 = vsel %vm4986_vm11, %v4987_v4, %v4985_v23  ;;  %v5014_v4 = vmul.f32 %v12563_v7, %v12527_v21 }
0x154b   : > { %v5020_v1 = vadd.f32 1e-06, %v4988_v16  ;;  %v4990_v0 = vmul.f32 %v10365_v12, %v4952_v37  ;;  %v10367_v35 = vpop.eup %10366 }
0x154c   : > { %v5050_v38 = vadd.f32 %v8838_v22, %v5037_v49  ;;  %v5038_v31 = vmul.f32 %v10367_v35, %v5010_v14 }
0x154d   : > { %10374 = vrcp.f32 %v5020_v1  ;;  %v4992_v29 = vsel %vm4991_vm12, %v4952_v37, %v4990_v0 }
0x154e   : > { %v4995_v33 = vsel %vm4993_vm15, %v4994_v30, %v4992_v29  ;;  %v5051_v57 = vadd.f32 %v8838_v22, %v5038_v31  ;;  %v5057_v42 = vsel %vm1294_vm0, %v5050_v38, 0.0 }
0x154f   : > { %v10369_v3 = vpop.eup %10368  ;;  %v5021_v17 = vadd.f32 1e-06, %v4995_v33 }
0x1550   : > { %v10371_v56 = vpop.eup %10370  ;;  %v5039_v55 = vmul.f32 %v10369_v3, %v5011_v54  ;;  %v5058_v43 = vsel %vm1294_vm0, %v5051_v57, 0.0 }
0x1551   : > { %10376 = vrcp.f32 %v5021_v17  ;;  %v4997_v63 = vmul.f32 %v10371_v56, %v4953_v13  ;;  %v10373_v44 = vpop.eup %10372  ;;  %v5059_v37 = vadd.f32 %v5058_v43, %v5057_v42 }
0x1552   : > { %v5052_v6 = vadd.f32 %v8838_v22, %v5039_v55  ;;  %v5040_v45 = vmul.f32 %v10373_v44, %v5012_v25 }
0x1553   : > { %v4999_v10 = vsel %vm4998_vm5, %v4953_v13, %v4997_v63 }
0x1554   : > { %v5060_v27 = vsel %vm1294_vm0, %v5052_v6, 0.0  ;;  %v5002_v58 = vsel %vm5000_vm6, %v5001_v20, %v4999_v10  ;;  %v5053_v39 = vadd.f32 %v8838_v22, %v5040_v45 }
0x1555   : > { %v5061_v24 = vadd.f32 %v5060_v27, %v5059_v37  ;;  %v5022_v36 = vadd.f32 1e-06, %v5002_v58 }
0x1556   : > { %v5062_v2 = vsel %vm1294_vm0, %v5053_v39, 0.0 }
0x1557   : > { %v10375_v60 = vpop.eup %10374  ;;  %10378 = vrcp.f32 %v5022_v36  ;;  %v5063_v19 = vadd.f32 %v5062_v2, %v5061_v24 }
0x1558   : > { %v5041_v5 = vmul.f32 %v10375_v60, %v5013_v11 }
0x155a   : > { %v5054_v59 = vadd.f32 %v8838_v22, %v5041_v5 }
0x155b   : > { %v10377_v13 = vpop.eup %10376  ;;  %v12583_v49 = vpop.trf.xlu0 }
0x155c   : > { %v5064_v23 = vsel %vm1294_vm0, %v5054_v59, 0.0  ;;  %v5042_v12 = vmul.f32 %v10377_v13, %v5014_v4 }
0x155d   : > { %v5065_v16 = vadd.f32 %v5064_v23, %v5063_v19 }
0x155e   : > { %v5055_v14 = vadd.f32 %v8838_v22, %v5042_v12 }
0x155f   : > { %v12588_v0 = vpop.trf.xlu0 }
0x1560   : > { %v5066_v1 = vsel %vm1294_vm0, %v5055_v14, 0.0  ;;  %13535 = vst [vmem:[#allocation37_spill] sm:$0xff] %v12588_v0 }
0x1561   : > { %v10379_v35 = vpop.eup %10378  ;;  %v5067_v30 = vadd.f32 %v5066_v1, %v5065_v16 }
0x1562   : > { %v5043_v38 = vmul.f32 %v10379_v35, %v5015_v61 }
0x1563   : > { %v12592_v29 = vpop.trf.xlu0 }
0x1564   : > { %v5056_v31 = vadd.f32 %v8838_v22, %v5043_v38 }
0x1566   : > { %v5068_v54 = vsel %vm1313_vm1, %v5056_v31, 0.0 }
0x1567   : > { %v5069_v33 = vadd.f32 %v5068_v54, %v5067_v30  ;;  %v12595_v3 = vpop.trf.xlu0  ;;  %v12599_v7 = vpop.trf.xlu1  ;;  %v12665_v54 = vmov 0.0  }
0x1568   : > { %13536 = vst [vmem:[#allocation38_spill] sm:$0xff] %v12595_v3 }
0x1569   : > { %v5070_v57 = vrot.slane %v5069_v33, 4 }
0x156b   : > { %v5071_v17 = vadd.f32 %v5070_v57, %v5069_v33  ;;  %v12601_v56 = vpop.trf.xlu0  ;;  %v12603_v55 = vpop.trf.xlu1  ;;  %v12667_v33 = vmov 0.0   ;;  %v12669_v57 = vmov 0.0  }
0x156d   : > { %v5072_v25 = vrot.slane %v5071_v17, 2 }
0x156f   : > { %v5073_v42 = vadd.f32 %v5072_v25, %v5071_v17  ;;  %v12607_v43 = vpop.trf.xlu0  ;;  %v12611_v37 = vpop.trf.xlu1  ;;  %v12671_v17 = vmov 0.0   ;;  %v12673_v25 = vmov 0.0  }
0x1571   : > { %v5074_v63 = vrot.slane %v5073_v42, 1 }
0x1573   : > { %v5075_v6 = vadd.f32 %v5074_v63, %v5073_v42  ;;  %v12613_v20 = vpop.trf.xlu0  ;;  %v12617_v10 = vpop.trf.xlu1  ;;  %v12675_v42 = vmov 0.0   ;;  %v12677_v63 = vmov 0.0  }
0x1575   : > { %v12615_v45 = vmul.f32 0.02, %v5075_v6  ;;  %v12679_v6 = vmov 0.0  }
0x1577   : > { %v12621_v58 = vpop.trf.xlu0  ;;  %v12625_v39 = vpop.trf.xlu1 }
0x157b   : > { %v12627_v36 = vpop.trf.xlu0  ;;  %v12629_v11 = vpop.trf.xlu1 }
0x157f   : > { %v12633_v2 = vpop.trf.xlu0  ;;  %v12637_v5 = vpop.trf.xlu1 }
0x1580   : > { %13537 = vst [vmem:[#allocation39_spill] sm:$0xff] %v12633_v2  ;;  %13538 = vst [vmem:[#allocation40_spill] sm:$0xff] %v12637_v5 }
0x1583   : > { %v12639_v4 = vpop.trf.xlu0  ;;  %v12641_v59 = vpop.trf.xlu1 }
0x1584   : > { %13539 = vst [vmem:[#allocation41_spill] sm:$0xff] %v12639_v4 }
0x1587   : > { %v12645_v23 = vpop.trf.xlu0  ;;  %v12649_v16 = vpop.trf.xlu1 }
0x158b   : > { %v12653_v61 = vpop.trf.xlu0 }
0x158f   : > { %v12655_v1 = vpop.trf.xlu0 }
0x1590   : > { %13540 = vst [vmem:[#allocation42_spill] sm:$0xff] %v12655_v1 }
0x1593   : > { %v12659_v30 = vpop.trf.xlu0 }
0x1597   : > { %v12661_v38 = vpop.trf.xlu0 }
0x1598 LB: >> { %s13541_s26 = sld [smem:[#allocation18_spill]]  ;;  %s13542_s5 = sld [smem:[#allocation16_spill]]  ;;  %8854 = vmatprep.mubr.msk.bf16.mxu0 %vm5087_vm8, %v12556_v15  ;;  %v13459_v9 = vmov 0   ;;  %v13543_v0 = vld [vmem:[#allocation37_spill] sm:$0xff]  ;;  %v13546_v3 = vld [vmem:[#allocation38_spill] sm:$0xff]  ;;  %v13549_v44 = vpack.c.bf16 %v12607_v43, %v12601_v56  ;;  %v13550_v24 = vpack.c.bf16 %v12621_v58, %v12613_v20  ;;  %v13551_v2 = vld [vmem:[#allocation39_spill] sm:$0xff]  ;;  %v13557_v31 = vpack.c.bf16 %v12661_v38, %v12659_v30  ;;  %s11008_s9 = sphi %s12681_s9, %s5320_s9   ;;  %v11004_v6 = vphi %v12679_v6, %v13575_v6   ;;  %v11000_v63 = vphi %v12677_v63, %v13574_v63   ;;  %v10996_v42 = vphi %v12675_v42, %v13573_v42   ;;  %v10992_v25 = vphi %v12673_v25, %v13572_v25   ;;  %v10988_v17 = vphi %v12671_v17, %v13571_v17   ;;  %v10984_v57 = vphi %v12669_v57, %v13570_v57   ;;  %v10980_v33 = vphi %v12667_v33, %v13569_v33   ;;  %v10976_v54 = vphi %v12665_v54, %v13568_v54  }
0x1599   : >> { %5532 = vmatprep.subr.bf16.mxu1 %v13459_v9  ;;  %5449 = vmatprep.subr.bf16.mxu0 %v13459_v9  ;;  %v13544_v21 = vpack.c.bf16 %v13543_v0, %v12583_v49  ;;  %s9104_s1 = smul.u32 100, %s11008_s9  ;;  %s12719_s2 = sshll.u32 %s11008_s9, 4  ;;  %v13547_v34 = vpack.c.bf16 %v13546_v3, %v12592_v29  ;;  %v13552_v19 = vpack.c.bf16 %v13551_v2, %v12627_v36  ;;  %v13553_v4 = vld [vmem:[#allocation41_spill] sm:$0xff]  ;;  %v13555_v1 = vld [vmem:[#allocation42_spill] sm:$0xff]  ;;  %v13561_v5 = vld [vmem:[#allocation40_spill] sm:$0xff]  ;;  %vm5801_vm1 = vcmask 244736  }
0x159a   : >> { %10380 = vset.pattern.permute.xlu0 %v13459_v9  ;;  %s13545_s23 = sld [smem:[#allocation19_spill]]  ;;  %s13548_s3 = sld [smem:[#allocation20_spill]]  ;;  %v13554_v12 = vpack.c.bf16 %v12645_v23, %v13553_v4  ;;  %v13556_v35 = vpack.c.bf16 %v13555_v1, %v12653_v61  ;;  %v13558_v22 = vpack.c.bf16 %v12603_v55, %v12599_v7  ;;  %v13559_v27 = vpack.c.bf16 %v12617_v10, %v12611_v37 }
0x159b   : >> { %5533 = vmatpush1.bf16.msra.mxu1 %v13544_v21  ;;  %v13560_v60 = vpack.c.bf16 %v12629_v11, %v12625_v39  ;;  %vm5811_vm7 = vcmask 242688   ;;  %vm5857_vm2 = vcmask 1046528  }
0x159c   : >> { %5534 = vmatprep.subr.bf16.mxu1 %v13459_v9 }
0x159e   : >> { %s12725_s18 = scalar_lea.vmem %s13541_s26, %s12719_s2  ;;  %s12728_s28 = scalar_lea.vmem %s13542_s5, %s9104_s1 }
0x159f   : >> { %v10381_v14 = vld [vmem:[%s12728_s28] sm:$0xff]   ;;  %5535 = vmatpush1.bf16.msra.mxu1 %v13547_v34  ;;  %v10382_v21 = vld [vmem:[%s12728_s28 + $0x8] sm:$0xff]   ;;  %v10383_v13 = vld [vmem:[%s12728_s28 + $0x10] sm:$0xff]  }
0x15a0   : >> { %5450 = vmatpush1.bf16.msra.mxu0 %v10381_v14  ;;  %5536 = vmatprep.subr.bf16.mxu1 %v13459_v9  ;;  %s5504_s26 = scalar_lea.vmem %s13545_s23, %s12719_s2  ;;  %v10384_v14 = vld [vmem:[%s12728_s28 + $0x18] sm:$0xff]   ;;  %s12752_s5 = scalar_lea.vmem %s13548_s3, %s9104_s1 }
0x15a1   : >> { %5451 = vmatprep.subr.bf16.mxu0 %v13459_v9  ;;  %v5505_v34 = vld [vmem:[%s5504_s26] sm:$0xff]  ;;  %s13564_s3 = sld [smem:[#allocation17_spill]]  ;;  %s13566_s23 = sld [smem:[#allocation21_spill]] }
0x15a2   : >> { %5509 = vperm.xlu0 %10380, %v5505_v34   ;;  %v10387_v34 = vld [vmem:[%s12728_s28 + $0x30] sm:$0xff]  }
0x15a3   : >> { %5537 = vmatpush1.bf16.msra.mxu1 %v13549_v44  ;;  %v10385_v44 = vld [vmem:[%s12728_s28 + $0x20] sm:$0xff]  }
0x15a4   : >> { %5452 = vmatpush1.bf16.msra.mxu0 %v10382_v21  ;;  %5538 = vmatprep.subr.bf16.mxu1 %v13459_v9  ;;  %v10395_v21 = vld [vmem:[%s12725_s18 + $0x4] ss:$8 sps:$4 sm:$0x1f]  }
0x15a5   : >> { %5453 = vmatprep.subr.bf16.mxu0 %v13459_v9  ;;  %8861 = vmatprep.mubr.msk.bf16.mxu1 %vm5087_vm8, %v10395_v21  ;;  %v10391_v21 = vld [vmem:[%s12728_s28 + $0x50] sm:$0xff]  }
0x15a7   : >> { %5539 = vmatpush1.bf16.msra.mxu1 %v13550_v24  ;;  %v5506_v24 = vld [vmem:[%s5504_s26 + $0x8] sm:$0x3]  ;;  %s5357_s1 = scalar_lea.vmem %s13564_s3, %s11008_s9 }
0x15a8   : >> { %5454 = vmatpush1.bf16.msra.mxu0 %v10383_v13  ;;  %5540 = vmatprep.subr.bf16.mxu1 %v13459_v9  ;;  %v10386_v13 = vld [vmem:[%s12728_s28 + $0x28] sm:$0xff]  }
0x15a9   : >> { %5455 = vmatprep.subr.bf16.mxu0 %v13459_v9  ;;  %5514 = vperm.xlu0 %10380, %v5506_v24   ;;  %v10389_v24 = vld [vmem:[%s12728_s28 + $0x40] sm:$0xff]  }
0x15ab   : >> { %5541 = vmatpush1.bf16.msra.mxu1 %v13552_v19 }
0x15ac   : >> { %5456 = vmatpush1.bf16.msra.mxu0 %v10384_v14  ;;  %5542 = vmatprep.subr.bf16.mxu1 %v13459_v9  ;;  %v10390_v14 = vld [vmem:[%s12728_s28 + $0x48] sm:$0xff]  }
0x15ad   : >> { %5457 = vmatprep.subr.bf16.mxu0 %v13459_v9 }
0x15af   : >> { %5543 = vmatpush1.bf16.msra.mxu1 %v13554_v12  ;;  %v10393_v12 = vld [vmem:[%s12725_s18] ss:$8 sps:$4 sm:$0x1f]   ;;  %s5600_s18 = scalar_lea.vmem %s13566_s23, %s11008_s9  ;;  %s5320_s9 = sadd.s32 1, %s11008_s9  }
0x15b0   : >> { %5458 = vmatpush1.bf16.msra.mxu0 %v10385_v44  ;;  %5544 = vmatprep.subr.bf16.mxu1 %v13459_v9  ;;  %v10388_v44 = vld [vmem:[%s12728_s28 + $0x38] sm:$0xff]   ;;  %p5317_p13 = scmp.ge.s32.totalorder %s5320_s9, 20  }
0x15b1   : >> { %5459 = vmatprep.subr.bf16.mxu0 %v13459_v9  ;;  %s13577_s9 = sld [smem:[#allocation26_spill]] (%p5317_p13)  ;;  %s13580_s3 = sld [smem:[#allocation25_spill]] (%p5317_p13) }
0x15b2   : > { %s13582_s23 = sld [smem:[#allocation27_spill]] (%p5317_p13)  ;;  %s13588_s4 = sld [smem:[#allocation33_spill]] (%p5317_p13) }
0x15b3   : >> { %5545 = vmatpush1.bf16.msra.mxu1 %v13556_v35 }
0x15b4   : >> { %5460 = vmatpush1.bf16.msra.mxu0 %v10386_v13  ;;  %5546 = vmatprep.subr.bf16.mxu1 %v13459_v9  ;;  %v13562_v13 = vpack.c.bf16 %v12641_v59, %v13561_v5 }
0x15b5   : >> { %5461 = vmatprep.subr.bf16.mxu0 %v13459_v9 }
0x15b7   : >> { %5547 = vmatpush1.bf16.msra.mxu1 %v13557_v31  ;;  %v10429_v37 = vld [vmem:[%s13577_s9 + $0x4] ss:$28 sps:$4 sm:$0xff] (%p5317_p13)   ;;  %v10431_v20 = vld [vmem:[%s13577_s9 + $0xc] ss:$28 sps:$4 sm:$0xff] (%p5317_p13)   ;;  %v10435_v39 = vld [vmem:[%s13577_s9 + $0x3c] ss:$28 sps:$4 sm:$0xff] (%p5317_p13)  }
0x15b8   : >> { %5462 = vmatpush1.bf16.msra.mxu0 %v10387_v34  ;;  %5548 = vmatprep.subr.bf16.mxu1 %v13459_v9  ;;  %v13563_v34 = vpack.c.bf16 %v12649_v16, %v12649_v16  ;;  %v10433_v10 = vld [vmem:[%s13577_s9] ss:$28 sps:$4 sm:$0xff] (%p5317_p13)   ;;  %v10434_v58 = vld [vmem:[%s13577_s9 + $0x8] ss:$28 sps:$4 sm:$0xff] (%p5317_p13)   ;;  %v10439_v11 = vld [vmem:[%s13577_s9 + $0x38] ss:$28 sps:$4 sm:$0xff] (%p5317_p13)  }
0x15b9   : >> { %5463 = vmatprep.subr.bf16.mxu0 %v13459_v9  ;;  %v10437_v36 = vld [vmem:[%s13577_s9 + $0x44] ss:$28 sps:$4 sm:$0xff] (%p5317_p13)   ;;  %v10441_v23 = vld [vmem:[%s13577_s9 + $0x74] ss:$28 sps:$4 sm:$0xff] (%p5317_p13)   ;;  %v10443_v16 = vld [vmem:[%s13577_s9 + $0x7c] ss:$28 sps:$4 sm:$0xff] (%p5317_p13)  }
0x15ba   : > { %v10440_v59 = vld [vmem:[%s13577_s9 + $0x40] ss:$28 sps:$4 sm:$0xff] (%p5317_p13)   ;;  %v10445_v61 = vld [vmem:[%s13577_s9 + $0x70] ss:$28 sps:$4 sm:$0xff] (%p5317_p13)   ;;  %v10446_v30 = vld [vmem:[%s13577_s9 + $0x78] ss:$28 sps:$4 sm:$0xff] (%p5317_p13)  }
0x15bb   : >> { %5549 = vmatpush1.bf16.msra.mxu1 %v13558_v22 }
0x15bc   : >> { %5464 = vmatpush1.bf16.msra.mxu0 %v10388_v44  ;;  %5550 = vmatprep.subr.bf16.mxu1 %v13459_v9  ;;  %v5530_v44 = vsel %vm2932_vm13, %v13563_v34, 0 }
0x15bd   : >> { %5465 = vmatprep.subr.bf16.mxu0 %v13459_v9 }
0x15bf   : >> { %5551 = vmatpush1.bf16.msra.mxu1 %v13559_v27  ;;  %v8840_v27 = vld [vmem:[%s5357_s1] ss:$0 sm:$0xff]  ;;  %s13581_s1 = sld [smem:[#allocation28_spill]] (%p5317_p13) }
0x15c0   : >> { %5466 = vmatpush1.bf16.msra.mxu0 %v10389_v24  ;;  %5552 = vmatprep.subr.bf16.mxu1 %v13459_v9  ;;  %v10392_v24 = vld [vmem:[%s12728_s28 + $0x58] sm:$0xff]  }
0x15c1   : >> { %5467 = vmatprep.subr.bf16.mxu0 %v13459_v9 }
0x15c3   : >> { %5553 = vmatpush1.bf16.msra.mxu1 %v13560_v60 }
0x15c4   : >> { %5468 = vmatpush1.bf16.msra.mxu0 %v10390_v14  ;;  %5554 = vmatprep.subr.bf16.mxu1 %v13459_v9  ;;  %v10396_v14 = vld [vmem:[%s12728_s28 + $0x60] ss:$0 sps:$4 sm:$0xff]   ;;  %s13567_s28 = sld [smem:[#allocation22_spill]] }
0x15c5   : >> { %5469 = vmatprep.subr.bf16.mxu0 %v13459_v9 }
0x15c7   : >> { %5555 = vmatpush1.bf16.msra.mxu1 %v13562_v13 }
0x15c8   : >> { %5470 = vmatpush1.bf16.msra.mxu0 %v10391_v21  ;;  %5556 = vmatprep.subr.bf16.mxu1 %v13459_v9  ;;  %v5447_v21 = vsel %vm2932_vm13, %v10396_v14, 0 }
0x15c9   : >> { %5471 = vmatprep.subr.bf16.mxu0 %v13459_v9 }
0x15ca   : >> { %s5913_s26 = scalar_lea.vmem %s13567_s28, %s12719_s2  ;;  %s13576_s2 = sld [smem:[#allocation23_spill]] (%p5317_p13) }
0x15cb   : >> { %5557 = vmatpush1.bf16.msra.mxu1 %v5530_v44 }
0x15cc   : >> { %5472 = vmatpush1.bf16.msra.mxu0 %v10392_v24 }
0x15cd   : >> { %5473 = vmatprep.subr.bf16.mxu0 %v13459_v9 }
0x15ce   : >> { %5565 = vmatmul.mubr.bf16.vlgmr.msra.gmra.mrb[0].mxu1 %v10393_v12 }
0x15d0   : >> { %5474 = vmatpush1.bf16.msra.mxu0 %v5447_v21 }
0x15d1   : >> { %5686 = vmatprep.subr.bf16.mxu0 %v13459_v9 }
0x15d3   : >> { %5482 = vmatmul.mubr.bf16.vlgmr.msra.gmra.mrb[0].mxu0 %v12554_v26 }
0x15d4   : >> { %8855 = vmatprep.mubr.msk.bf16.mxu0 %vm5087_vm8, %v12560_v51 }
0x15db   : >> { %5490 = vmatmul.mubr.bf16.gmra.mrb[4].mxu0 %v12558_v41 }
0x15dc   : >> { %8877 = vmatprep.mubr.msk.bf16.mxu0 %vm5087_vm8, %v12556_v15 }
0x1621   : >> { %v5510_v13 = vpop.permute.xlu0 %5509 }
0x1628   : >> { %v5515_v44 = vpop.permute.xlu0 %5514 }
0x16a1   : >> { %v5566_v34 = vpop.f32.mrb[0].mxu1 }
0x16a2   : >> { %v5567_v24 = vadd.f32 %v5566_v34, %v5510_v13  ;;  %v5568_v19 = vpop.f32.mrb[1].mxu1 }
0x16a3   : >> { %v5569_v14 = vpop.f32.mrb[2].mxu1 }
0x16a4   : >> { %v5570_v12 = vadd.f32 %v5569_v14, %v5515_v44  ;;  %v5571_v21 = vpop.f32.mrb[3].mxu1 }
0x16a5   : >> { %v10404_v21 = vld [vmem:[%s12752_s5 + $0x38] sm:$0xff]  }
0x16a6   : >> { %v5737_v22 = vpack.c.bf16 %v5570_v12, %v5567_v24  ;;  %v5483_v31 = vpop.f32.mrb[0].mxu0 }
0x16a7   : >> { %v5485_v35 = vpop.f32.mrb[1].mxu0  ;;  %v5484_v0 = vadd.f32 %v8840_v27, %v5483_v31  ;;  %v10403_v31 = vld [vmem:[%s12752_s5 + $0x30] sm:$0xff]  }
0x16a8   : >> { %v5486_v60 = vpop.f32.mrb[2].mxu0  ;;  %9748 = vmatprep.subr.msk.bf16.mxu1 %vm1594_vm3, %v5737_v22  ;;  %v5746_v9 = vsel %vm1594_vm3, %v5737_v22, 0  ;;  %v10397_v22 = vld [vmem:[%s12752_s5] sm:$0xff]  }
0x16a9   : >> { %v5487_v1 = vadd.f32 %v8840_v27, %v5486_v60  ;;  %v5488_v2 = vpop.f32.mrb[3].mxu0  ;;  %9609 = vmatpush3.bf16.msra.mxu1 %v5746_v9  ;;  %5687 = vmatpush1.bf16.msra.mxu0 %v10397_v22  ;;  %v10398_v9 = vld [vmem:[%s12752_s5 + $0x8] sm:$0xff]   ;;  %v13565_v60 = vmov 0  }
0x16aa   : >> { %5688 = vmatprep.subr.bf16.mxu0 %v13565_v60  ;;  %v10400_v2 = vld [vmem:[%s12752_s5 + $0x18] sm:$0xff]  }
0x16ab   : >> { %v5735_v19 = vpack.c.bf16 %v5487_v1, %v5484_v0  ;;  %v10399_v0 = vld [vmem:[%s12752_s5 + $0x10] sm:$0xff]   ;;  %v10402_v1 = vld [vmem:[%s12752_s5 + $0x28] sm:$0xff]  }
0x16ad   : >> { %9610 = vmatprep.mubr.msk.bf16.mxu1 %vm1862_vm4, %v5735_v19  ;;  %5689 = vmatpush1.bf16.msra.mxu0 %v10398_v9  ;;  %v10405_v19 = vld [vmem:[%s12752_s5 + $0x40] sm:$0xff]  }
0x16ae   : >> { %v5491_v13 = vpop.f32.mrb[4].mxu0  ;;  %5690 = vmatprep.subr.bf16.mxu0 %v13565_v60 }
0x16af   : >> { %v5493_v34 = vpop.f32.mrb[5].mxu0  ;;  %v5492_v35 = vadd.f32 %v8840_v27, %v5491_v13  ;;  %v10406_v13 = vld [vmem:[%s12752_s5 + $0x48] sm:$0xff]  }
0x16b0   : >> { %v5494_v44 = vpop.f32.mrb[6].mxu0  ;;  %v10407_v34 = vld [vmem:[%s12752_s5 + $0x50] sm:$0xff]  }
0x16b1   : >> { %v5495_v24 = vadd.f32 %v8840_v27, %v5494_v44  ;;  %v5496_v14 = vpop.f32.mrb[7].mxu0  ;;  %5691 = vmatpush1.bf16.msra.mxu0 %v10399_v0  ;;  %v10401_v27 = vld [vmem:[%s12752_s5 + $0x20] sm:$0xff]   ;;  %v10408_v44 = vld [vmem:[%s12752_s5 + $0x58] sm:$0xff]  }
0x16b2   : >> { %5692 = vmatprep.subr.bf16.mxu0 %v13565_v60 }
0x16b3   : >> { %v5736_v12 = vpack.c.bf16 %v5495_v24, %v5492_v35  ;;  %v10409_v35 = vld [vmem:[%s12752_s5 + $0x60] ss:$0 sps:$4 sm:$0xff]   ;;  %s13579_s5 = sld [smem:[#allocation24_spill]] (%p5317_p13) }
0x16b4   : >> { %v5684_v24 = vsel %vm2932_vm13, %v10409_v35, 0 }
0x16b5   : >> { %9611 = vmatmul.mubr.msk.bf16.vlgmr.msra.gmra.mrb[4].mxu1 %vm1862_vm4, %v5736_v12  ;;  %5693 = vmatpush1.bf16.msra.mxu0 %v10400_v2 }
0x16b6   : >> { %5694 = vmatprep.subr.bf16.mxu0 %v13565_v60 }
0x16b9   : >> { %5695 = vmatpush1.bf16.msra.mxu0 %v10401_v27 }
0x16ba   : >> { %5696 = vmatprep.subr.bf16.mxu0 %v13565_v60 }
0x16bd   : >> { %5697 = vmatpush1.bf16.msra.mxu0 %v10402_v1 }
0x16be   : >> { %5698 = vmatprep.subr.bf16.mxu0 %v13565_v60 }
0x16c1   : >> { %5699 = vmatpush1.bf16.msra.mxu0 %v10403_v31 }
0x16c2   : >> { %5700 = vmatprep.subr.bf16.mxu0 %v13565_v60 }
0x16c5   : >> { %5701 = vmatpush1.bf16.msra.mxu0 %v10404_v21 }
0x16c6   : >> { %5702 = vmatprep.subr.bf16.mxu0 %v13565_v60 }
0x16c9   : >> { %5703 = vmatpush1.bf16.msra.mxu0 %v10405_v19 }
0x16ca   : >> { %5704 = vmatprep.subr.bf16.mxu0 %v13565_v60 }
0x16cd   : >> { %5705 = vmatpush1.bf16.msra.mxu0 %v10406_v13 }
0x16ce   : >> { %5706 = vmatprep.subr.bf16.mxu0 %v13565_v60 }
0x16d1   : >> { %5707 = vmatpush1.bf16.msra.mxu0 %v10407_v34 }
0x16d2   : >> { %5708 = vmatprep.subr.bf16.mxu0 %v13565_v60 }
0x16d5   : >> { %5709 = vmatpush1.bf16.msra.mxu0 %v10408_v44 }
0x16d6   : >> { %5710 = vmatprep.subr.bf16.mxu0 %v13565_v60 }
0x16d9   : >> { %5711 = vmatpush1.bf16.msra.mxu0 %v5684_v24 }
0x16da   : > { %6789 = vmatprep.subr.bf16.mxu0 (%p5317_p13), %v10429_v37  ;;  %v10457_v37 = vld [vmem:[%s13577_s9 + $0xe0] ss:$28 sps:$4 sm:$0xff] (%p5317_p13)  }
0x16dc   : >> { %5719 = vmatmul.mubr.bf16.vlgmr.msra.gmra.mrb[8].mxu0 %v12554_v26 }
0x16dd   : >> { %8878 = vmatprep.mubr.msk.bf16.mxu0 %vm5087_vm8, %v12560_v51  ;;  %6790 = vmatpush1.bf16.msra.mxu0 (%p5317_p13), %v10433_v10  ;;  %v10459_v10 = vld [vmem:[%s13577_s9 + $0x11c] ss:$28 sps:$4 sm:$0xff] (%p5317_p13)  }
0x16de   : > { %6791 = vmatprep.subr.bf16.mxu0 (%p5317_p13), %v10435_v39  ;;  %v10463_v39 = vld [vmem:[%s13577_s9 + $0x118] ss:$28 sps:$4 sm:$0xff] (%p5317_p13)  }
0x16e1   : > { %6792 = vmatpush1.bf16.msra.mxu0 (%p5317_p13), %v10439_v11  ;;  %v10465_v11 = vld [vmem:[%s13577_s9 + $0x154] ss:$28 sps:$4 sm:$0xff] (%p5317_p13)  }
0x16e2   : > { %6793 = vmatprep.subr.bf16.mxu0 (%p5317_p13), %v10441_v23  ;;  %v10469_v23 = vld [vmem:[%s13577_s9 + $0x150] ss:$28 sps:$4 sm:$0xff] (%p5317_p13)  }
0x16e4   : >> { %5727 = vmatmul.mubr.bf16.gmra.mrb[12].mxu0 %v12558_v41 }
0x16e5   : > { %6794 = vmatpush1.bf16.msra.mxu0 (%p5317_p13), %v10445_v61  ;;  %v10471_v61 = vld [vmem:[%s13577_s9 + $0x18c] ss:$28 sps:$4 sm:$0xff] (%p5317_p13)  }
0x1788   : >> { %v9612_v14 = vpop.f32.mrb[4].mxu1 }
0x1789   : >> { %v5799_v12 = vmul.f32 0.31622776, %v9612_v14  ;;  %v5782_v22 = vpop.f32.mrb[5].mxu1 }
0x178a   : >> { %v5797_v9 = vmul.f32 0.31622776, %v5782_v22  ;;  %v9613_v0 = vpop.f32.mrb[6].mxu1 }
0x178b   : >> { %v5785_v2 = vpop.f32.mrb[7].mxu1  ;;  %v5808_v27 = vsel %vm5801_vm1, %v5799_v12, -inf  ;;  %v5800_v21 = vmul.f32 0.31622776, %v9613_v0 }
0x178c   : >> { %v5798_v1 = vmul.f32 0.31622776, %v5785_v2  ;;  %5809 = vmax.xlane.f32.xlu0 %v5808_v27  ;;  %v5802_v31 = vsel %vm5801_vm1, %v5797_v9, -inf }
0x178d   : >> { %5803 = vmax.xlane.f32.xlu1 %v5802_v31  ;;  %v5812_v13 = vsel %vm5811_vm7, %v5800_v21, -inf }
0x178e   : >> { %v5805_v19 = vsel %vm5801_vm1, %v5798_v1, -inf }
0x1791   : >> { %5806 = vmax.xlane.f32.xlu1 %v5805_v19 }
0x1795   : >> { %5813 = vmax.xlane.f32.xlu1 %v5812_v13 }
0x1819   : >> { %v5810_v34 = vpop.xlane.xlu0 %5809 }
0x181a   : >> { %v5817_v44 = vsub.f32 %v5799_v12, %v5810_v34  ;;  %v5804_v35 = vpop.xlane.xlu1 %5803 }
0x181b   : >> { %v5815_v24 = vsub.f32 %v5797_v9, %v5804_v35 }
0x181c   : >> { %v5823_v14 = vmul.f32 1.442695, %v5817_v44 }
0x181d   : >> { %v5819_v22 = vmul.f32 1.442695, %v5815_v24  ;;  %v8863_v24 = vld [vmem:[%s5600_s18] ss:$0 sm:$0xff]  ;;  %s13583_s18 = sld [smem:[#allocation32_spill]] (%p5317_p13) }
0x181e   : >> { %10413 = vpow2.f32 %v5823_v14  ;;  %v5807_v2 = vpop.xlane.xlu1 %5806 }
0x181f   : >> { %v5816_v27 = vsub.f32 %v5798_v1, %v5807_v2  ;;  %10415 = vpow2.f32 %v5819_v22 }
0x1821   : >> { %v5821_v3 = vmul.f32 1.442695, %v5816_v27 }
0x1822   : >> { %v5814_v31 = vpop.xlane.xlu1 %5813 }
0x1823   : >> { %v5818_v0 = vsub.f32 %v5800_v21, %v5814_v31  ;;  %10417 = vpow2.f32 %v5821_v3  ;;  %v5720_v3 = vpop.f32.mrb[8].mxu0  ;;  %s13584_s28 = smov (%p5317_p13), %s13583_s18 }
0x1824   : >> { %v5722_v35 = vpop.f32.mrb[9].mxu0  ;;  %v5721_v22 = vadd.f32 %v8863_v24, %v5720_v3  ;;  %v10410_v3 = vld [vmem:[%s5913_s26 + $0x4] ss:$8 sps:$4 sm:$0x1f]  }
0x1825   : >> { %v5825_v19 = vmul.f32 1.442695, %v5818_v0  ;;  %v5723_v14 = vpop.f32.mrb[10].mxu0 }
0x1826   : >> { %v5724_v2 = vadd.f32 %v8863_v24, %v5723_v14  ;;  %v5725_v27 = vpop.f32.mrb[11].mxu0 }
0x1827   : >> { %10419 = vpow2.f32 %v5825_v19  ;;  %v5728_v0 = vpop.f32.mrb[12].mxu0 }
0x1828   : >> { %v10414_v4 = vpop.eup %10413  ;;  %v5849_v31 = vpack.c.bf16 %v5724_v2, %v5721_v22  ;;  %v5730_v19 = vpop.f32.mrb[13].mxu0 }
0x1829   : >> { %v5833_v13 = vsel %vm5801_vm1, %v10414_v4, 0.0  ;;  %v10416_v12 = vpop.eup %10415 }
0x182a   : >> { %5834 = vadd.xlane.f32.xlu1 %v5833_v13  ;;  %v5827_v9 = vsel %vm5801_vm1, %v10416_v12, 0.0  ;;  %9614 = vmatprep.subr.bf16.mxu1 %v5849_v31  ;;  %v5731_v13 = vpop.f32.mrb[14].mxu0 }
0x182b   : >> { %9615 = vmatpush3.bf16.msra.mxu1 %v5849_v31  ;;  %v5732_v5 = vadd.f32 %v8863_v24, %v5731_v13 }
0x182d   : >> { %v10418_v34 = vpop.eup %10417 }
0x182e   : >> { %5828 = vadd.xlane.f32.xlu1 %v5827_v9  ;;  %v5830_v1 = vsel %vm5801_vm1, %v10418_v34, 0.0  ;;  %v5733_v9 = vpop.f32.mrb[15].mxu0 }
0x182f   : >> { %v10412_v9 = vld [vmem:[%s5913_s26] ss:$8 sps:$4 sm:$0x1f]   ;;  %s13585_s26 = sld [smem:[#allocation29_spill]] (%p5317_p13) }
0x1831   : >> { %v10420_v44 = vpop.eup %10419 }
0x1832   : >> { %5831 = vadd.xlane.f32.xlu1 %v5830_v1  ;;  %v5836_v21 = vsel %vm5811_vm7, %v10420_v44, 0.0  ;;  %v5729_v1 = vadd.f32 %v8863_v24, %v5728_v0  ;;  %vm8073_vm7 = vcmask (%p5317_p13), 1041408  }
0x1836   : >> { %5837 = vadd.xlane.f32.xlu1 %v5836_v21  ;;  %v5850_v21 = vpack.c.bf16 %v5732_v5, %v5729_v1 }
0x1838   : >> { %9749 = vmatprep.subr.msk.bf16.mxu1 %vm5857_vm2, %v5850_v21  ;;  %v5859_v35 = vsel %vm5857_vm2, %v5850_v21, 0  ;;  %vm11063_vm2 = vmmov (%p5317_p13), 1  }
0x1839   : >> { %9617 = vmatpush3.bf16.msra.mxu1 %v5859_v35 }
0x183a   : >> { %8886 = vmatprep.subr.msk.bf16.mxu1 %vm1594_vm3, %v10410_v3 }
0x18b7   : >> { %v5835_v14 = vpop.xlane.xlu1 %5834 }
0x18bb   : >> { %v5829_v27 = vpop.xlane.xlu1 %5828 }
0x18bc   : >> { %10421 = vrcp.f32 %v5829_v27  ;;  %v5931_v27 = vsel %vm1594_vm3, %v10412_v9, 0 }
0x18bf   : >> { %v5832_v22 = vpop.xlane.xlu1 %5831 }
0x18c0   : >> { %10423 = vrcp.f32 %v5832_v22 }
0x18c1   : >> { %10425 = vrcp.f32 %v5835_v14 }
0x18c3   : >> { %v5838_v2 = vpop.xlane.xlu1 %5837 }
0x18c4   : >> { %10427 = vrcp.f32 %v5838_v2 }
0x18c6   : >> { %v10422_v31 = vpop.eup %10421 }
0x18c7   : >> { %v5843_v24 = vmul.f32 %v10422_v31, %v10416_v12 }
0x18ca   : >> { %v10424_v0 = vpop.eup %10423 }
0x18cb   : >> { %v5844_v5 = vmul.f32 %v10424_v0, %v10418_v34  ;;  %v10426_v19 = vpop.eup %10425 }
0x18cc   : >> { %v5845_v21 = vmul.f32 %v10426_v19, %v10414_v4 }
0x18cd   : >> { %v5847_v13 = vpack.c.bf16 %v5844_v5, %v5843_v24 }
0x18ce   : >> { %v10428_v1 = vpop.eup %10427 }
0x18cf   : >> { %v5846_v35 = vmul.f32 %v10428_v1, %v10420_v44  ;;  %9618 = vmatprep.mubr.msk.bf16.mxu1 %vm5801_vm1, %v5847_v13 }
0x18d1   : >> { %v5848_v3 = vpack.c.bf16 %v5846_v35, %v5845_v21 }
0x18d3   : >> { %9619 = vmatmul.mubr.msk.bf16.vlgmr.msra.gmra.mrb[8].mxu1 %vm5801_vm1, %v5848_v3  ;;  %vm11061_vm1 = vmmov (%p5317_p13), 0  }
0x18d4   : >> { %5937 = vmatpush1.bf16.msra.mxu1 %v5931_v27  ;;  %5968 = vmatprep.mubr.bf16.mxu1 %v13565_v60 }
0x18d5   : > { %6842 = vmatprep.subr.bf16.mxu1 (%p5317_p13), %v10431_v20  ;;  %v10458_v20 = vld [vmem:[%s13577_s9 + $0xe8] ss:$28 sps:$4 sm:$0xff] (%p5317_p13)  }
0x19a6   : >> { %v9620_v14 = vpop.f32.mrb[8].mxu1 }
0x19a7   : >> { %v5895_v22 = vpop.f32.mrb[9].mxu1 }
0x19a8   : >> { %v9621_v12 = vpop.f32.mrb[10].mxu1 }
0x19a9   : >> { %v5911_v34 = vpack.c.bf16 %v9621_v12, %v9620_v14  ;;  %v5898_v2 = vpop.f32.mrb[11].mxu1 }
0x19aa   : >> { %v5910_v31 = vpack.c.bf16 %v5898_v2, %v5895_v22 }
0x19ac   : >> { %8887 = vmatmul.mubr.msk.bf16.vlgmr.msra.gmra.mrb[12].mxu1 %vm1862_vm4, %v5910_v31 }
0x19ad   : >> { %5978 = vmatprep.mubr.bf16.mxu1 %v13565_v60  ;;  %6843 = vmatpush1.bf16.msra.mxu1 (%p5317_p13), %v10434_v58  ;;  %v10461_v58 = vld [vmem:[%s13577_s9 + $0x124] ss:$28 sps:$4 sm:$0xff] (%p5317_p13)  }
0x19ae   : > { %6844 = vmatprep.subr.bf16.mxu1 (%p5317_p13), %v10437_v36  ;;  %v10464_v36 = vld [vmem:[%s13577_s9 + $0x120] ss:$28 sps:$4 sm:$0xff] (%p5317_p13)  }
0x19b1   : > { %6845 = vmatpush1.bf16.msra.mxu1 (%p5317_p13), %v10440_v59  ;;  %v10467_v59 = vld [vmem:[%s13577_s9 + $0x15c] ss:$28 sps:$4 sm:$0xff] (%p5317_p13)  }
0x19b2   : > { %6846 = vmatprep.subr.bf16.mxu1 (%p5317_p13), %v10443_v16  ;;  %v10470_v16 = vld [vmem:[%s13577_s9 + $0x158] ss:$28 sps:$4 sm:$0xff] (%p5317_p13)  }
0x19b4   : >> { %8888 = vmatmul.mubr.msk.bf16.gmra.mrb[16].mxu1 %vm1862_vm4, %v5911_v34  ;;  %v6005_v34 = vld [vmem:[%s13576_s2] sm:$0x3] (%p5317_p13)  ;;  %s13586_s2 = sld [smem:[#allocation30_spill]] (%p5317_p13) }
0x19b5   : > { %6847 = vmatpush1.bf16.msra.mxu1 (%p5317_p13), %v10446_v30  ;;  %v10473_v30 = vld [vmem:[%s13577_s9 + $0x194] ss:$28 sps:$4 sm:$0xff] (%p5317_p13)  }
0x1a7f   : >> { %v5970_v4 = vpop.f32.mrb[12].mxu1 }
0x1a80   : >> { %v5989_v44 = vadd.f32 %v11004_v6, %v5970_v4   ;;  %v5972_v0 = vpop.f32.mrb[13].mxu1  ;;  %v6010_v4 = vrot.slane (%p5317_p13), %v6005_v34, %v11837_v48 }
0x1a81   : >> { %v5990_v24 = vadd.f32 %v11000_v63, %v5972_v0   ;;  %v5974_v5 = vpop.f32.mrb[14].mxu1  ;;  %v6014_v0 = vrot.slane (%p5317_p13), %v6005_v34, %v11841_v50 }
0x1a82   : >> { %v5991_v19 = vadd.f32 %v10996_v42, %v5974_v5   ;;  %v5976_v13 = vpop.f32.mrb[15].mxu1  ;;  %v13575_v6 = vmov %v5989_v44 }
0x1a83   : >> { %v5992_v9 = vadd.f32 %v10992_v25, %v5976_v13   ;;  %v13574_v63 = vmov %v5990_v24  ;;  %v5997_v6 = vadd.f32 (%p5317_p13), %v5989_v44, %v12354_v28  ;;  %v5998_v12 = vadd.f32 (%p5317_p13), %v5990_v24, %v12357_v8 }
0x1a84   : >> { %v13573_v42 = vmov %v5991_v19  ;;  %v5999_v5 = vadd.f32 (%p5317_p13), %v5991_v19, %v12368_v40 }
0x1a85   : >> { %v13572_v25 = vmov %v5992_v9  ;;  %v6000_v13 = vadd.f32 (%p5317_p13), %v5992_v9, %v12371_v18  ;;  %v12913_v28 = vadd.f32 (%p5317_p13), %v6010_v4, %v5997_v6  ;;  %v12915_v8 = vadd.f32 (%p5317_p13), %v6014_v0, %v5998_v12 }
0x1a87   : >> { %v5980_v1 = vpop.f32.mrb[16].mxu1  ;;  %5319 = sbr.rel (!%p5317_p13) target bundleno = 5528 (0x1598), region = 341  ;;  %v12923_v41 = vadd.f32 (%p5317_p13), %v6014_v0, %v6000_v13 }
0x1a88   : >> { %v5993_v21 = vadd.f32 %v10988_v17, %v5980_v1   ;;  %v5982_v35 = vpop.f32.mrb[17].mxu1 }
0x1a89   : >> { %v5994_v60 = vadd.f32 %v10984_v57, %v5982_v35   ;;  %v5984_v3 = vpop.f32.mrb[18].mxu1  ;;  %v6031_v29 = vsel (%p5317_p13), %vm5087_vm8, %v12923_v41, 0.0 }
0x1a8a   : >> { %v5995_v27 = vadd.f32 %v10980_v33, %v5984_v3   ;;  %v5986_v14 = vpop.f32.mrb[19].mxu1  ;;  %v13571_v17 = vmov %v5993_v21  ;;  %v6001_v2 = vadd.f32 (%p5317_p13), %v5993_v21, %v12360_v52 }
0x1a8b   : >> { %v5996_v22 = vadd.f32 %v10976_v54, %v5986_v14   ;;  %v13570_v57 = vmov %v5994_v60  ;;  %v6002_v31 = vadd.f32 (%p5317_p13), %v5994_v60, %v12365_v32  ;;  %v12921_v32 = vadd.f32 (%p5317_p13), %v6010_v4, %v5999_v5 }
0x1a8c   : >> { %v13569_v33 = vmov %v5995_v27  ;;  %v6003_v1 = vadd.f32 (%p5317_p13), %v5995_v27, %v12379_v62  ;;  %v12917_v15 = vadd.f32 (%p5317_p13), %v6010_v4, %v6001_v2  ;;  %v6027_v62 = vsel (%p5317_p13), %vm5087_vm8, %v12915_v8, 0.0 }
0x1a8d   : >> { %v13568_v54 = vmov %v5996_v22  ;;  %v6004_v26 = vadd.f32 (%p5317_p13), %v5996_v22, %v12382_v46  ;;  %v12919_v52 = vadd.f32 (%p5317_p13), %v6014_v0, %v6002_v31  ;;  %v6028_v51 = vadd.f32 (%p5317_p13), %v6027_v62, %v12913_v28 }
0x1a8e   : > { %v12925_v40 = vadd.f32 %v6010_v4, %v6003_v1  ;;  %v6032_v55 = vadd.f32 %v6031_v29, %v12921_v32  ;;  %v10449_v29 = vld [vmem:[%s13577_s9 + $0xb4] ss:$28 sps:$4 sm:$0xff]  }
0x1a8f   : > { %v12927_v18 = vadd.f32 %v6014_v0, %v6004_v26  ;;  %v6035_v46 = vsel %vm5087_vm8, %v12919_v52, 0.0  ;;  %6029 = vadd.xlane.f32.xlu0 %v6028_v51  ;;  %6848 = vmatprep.subr.bf16.mxu1 %v10449_v29  ;;  %v10507_v29 = vld [vmem:[%s13577_s9 + $0x14] ss:$28 sps:$4 sm:$0xff]  }
0x1a90   : > { %v6036_v49 = vadd.f32 %v6035_v46, %v12917_v15  ;;  %v6039_v7 = vsel %vm5100_vm9, %v12925_v40, 0.0 }
0x1a91   : > { %v6040_v56 = vsel %vm5102_vm10, %v12927_v18, 0.0 }
0x1a92   : > { %6037 = vadd.xlane.f32.xlu1 %v6036_v49  ;;  %v6041_v43 = vadd.f32 %v6040_v56, %v6039_v7  ;;  %v10447_v49 = vld [vmem:[%s13577_s9 + $0xac] ss:$28 sps:$4 sm:$0xff]  }
0x1a93   : > { %6033 = vadd.xlane.f32.xlu0 %v6032_v55  ;;  %v10451_v7 = vld [vmem:[%s13577_s9 + $0xa8] ss:$28 sps:$4 sm:$0xff]   ;;  %v10452_v56 = vld [vmem:[%s13577_s9 + $0xb0] ss:$28 sps:$4 sm:$0xff]   ;;  %6795 = vmatprep.subr.bf16.mxu0 %v10447_v49 }
0x1a94   : > { %6796 = vmatpush1.bf16.msra.mxu0 %v10451_v7  ;;  %6849 = vmatpush1.bf16.msra.mxu1 %v10452_v56  ;;  %v10453_v55 = vld [vmem:[%s13577_s9 + $0xe4] ss:$28 sps:$4 sm:$0xff]   ;;  %v13578_v7 = vmov 0  }
0x1a95   : > { %6797 = vmatprep.subr.bf16.mxu0 %v10453_v55 }
0x1a96   : > { %6042 = vadd.xlane.f32.xlu1 %v6041_v43  ;;  %v10455_v43 = vld [vmem:[%s13577_s9 + $0xec] ss:$28 sps:$4 sm:$0xff]  }
0x1a97   : > { %6850 = vmatprep.subr.bf16.mxu1 %v10455_v43 }
0x1a98   : > { %6798 = vmatpush1.bf16.msra.mxu0 %v10457_v37  ;;  %6851 = vmatpush1.bf16.msra.mxu1 %v10458_v20 }
0x1a99   : > { %6799 = vmatprep.subr.bf16.mxu0 %v10459_v10  ;;  %6852 = vmatprep.subr.bf16.mxu1 %v10461_v58 }
0x1a9c   : > { %6800 = vmatpush1.bf16.msra.mxu0 %v10463_v39  ;;  %6853 = vmatpush1.bf16.msra.mxu1 %v10464_v36 }
0x1a9d   : > { %6801 = vmatprep.subr.bf16.mxu0 %v10465_v11  ;;  %6854 = vmatprep.subr.bf16.mxu1 %v10467_v59 }
0x1aa0   : > { %6802 = vmatpush1.bf16.msra.mxu0 %v10469_v23  ;;  %6855 = vmatpush1.bf16.msra.mxu1 %v10470_v16 }
0x1aa1   : > { %6803 = vmatprep.subr.bf16.mxu0 %v10471_v61  ;;  %6856 = vmatprep.subr.bf16.mxu1 %v10473_v30 }
0x1b1c   : > { %v6030_v38 = vpop.xlane.xlu0 %6029 }
0x1b1d   : > { %v6044_v33 = vmul.f32 0.005, %v6030_v38  ;;  %v10475_v38 = vld [vmem:[%s13577_s9 + $0x188] ss:$28 sps:$4 sm:$0xff]  }
0x1b1e   : > { %6804 = vmatpush1.bf16.msra.mxu0 %v10475_v38 }
0x1b1f   : > { %v6038_v54 = vpop.xlane.xlu1 %6037  ;;  %v12955_v17 = vsub.f32 %v12913_v28, %v6044_v33  ;;  %v12958_v25 = vsub.f32 %v12915_v8, %v6044_v33  ;;  %v10477_v33 = vld [vmem:[%s13577_s9 + $0x1c4] ss:$28 sps:$4 sm:$0xff]  }
0x1b20   : > { %v6046_v57 = vmul.f32 0.005, %v6038_v54  ;;  %v6034_v63 = vpop.xlane.xlu0 %6033  ;;  %v10476_v54 = vld [vmem:[%s13577_s9 + $0x190] ss:$28 sps:$4 sm:$0xff]   ;;  %6805 = vmatprep.subr.bf16.mxu0 %v10477_v33 }
0x1b21   : > { %v6045_v19 = vmul.f32 0.005, %v6034_v63  ;;  %v6057_v21 = vmul.f32 %v12958_v25, %v12958_v25  ;;  %v6056_v35 = vmul.f32 %v12955_v17, %v12955_v17  ;;  %6857 = vmatpush1.bf16.msra.mxu1 %v10476_v54  ;;  %v10481_v63 = vld [vmem:[%s13577_s9 + $0x1c0] ss:$28 sps:$4 sm:$0xff]  }
0x1b22   : > { %v12961_v42 = vsub.f32 %v12919_v52, %v6046_v57  ;;  %v12964_v24 = vsub.f32 %v12917_v15, %v6046_v57  ;;  %v10479_v57 = vld [vmem:[%s13577_s9 + $0x1cc] ss:$28 sps:$4 sm:$0xff]   ;;  %6806 = vmatpush1.bf16.msra.mxu0 %v10481_v63 }
0x1b23   : > { %v6043_v44 = vpop.xlane.xlu1 %6042  ;;  %v12973_v3 = vsub.f32 %v12921_v32, %v6045_v19  ;;  %v12976_v27 = vsub.f32 %v12923_v41, %v6045_v19  ;;  %v6064_v6 = vsel %vm5087_vm8, %v6057_v21, 0.0  ;;  %6858 = vmatprep.subr.bf16.mxu1 %v10479_v57  ;;  %v10483_v19 = vld [vmem:[%s13577_s9 + $0x1fc] ss:$28 sps:$4 sm:$0xff]  }
0x1b24   : > { %v6047_v9 = vmul.f32 0.005, %v6043_v44  ;;  %v6061_v60 = vmul.f32 %v12961_v42, %v12961_v42  ;;  %v6060_v12 = vmul.f32 %v12964_v24, %v12964_v24  ;;  %v6065_v2 = vadd.f32 %v6064_v6, %v6056_v35  ;;  %v10482_v44 = vld [vmem:[%s13577_s9 + $0x1c8] ss:$28 sps:$4 sm:$0xff]   ;;  %v10487_v21 = vld [vmem:[%s13577_s9 + $0x1f8] ss:$28 sps:$4 sm:$0xff]   ;;  %6807 = vmatprep.subr.bf16.mxu0 %v10483_v19 }
0x1b25   : > { %v6058_v31 = vmul.f32 %v12973_v3, %v12973_v3  ;;  %v6059_v4 = vmul.f32 %v12976_v27, %v12976_v27  ;;  %6859 = vmatpush1.bf16.msra.mxu1 %v10482_v44  ;;  %v10488_v35 = vld [vmem:[%s13577_s9 + $0x200] ss:$28 sps:$4 sm:$0xff]  }
0x1b26   : > { %v12979_v14 = vsub.f32 %v12925_v40, %v6047_v9  ;;  %v12982_v22 = vsub.f32 %v12927_v18, %v6047_v9  ;;  %v6072_v34 = vsel %vm5087_vm8, %v6061_v60, 0.0  ;;  %6066 = vadd.xlane.f32.xlu0 %v6065_v2  ;;  %v10485_v9 = vld [vmem:[%s13577_s9 + $0x204] ss:$28 sps:$4 sm:$0xff]   ;;  %6808 = vmatpush1.bf16.msra.mxu0 %v10487_v21  ;;  %v10489_v60 = vld [vmem:[%s13577_s9 + $0x234] ss:$28 sps:$4 sm:$0xff]  }
0x1b27   : > { %v6073_v13 = vadd.f32 %v6072_v34, %v6060_v12  ;;  %v6068_v1 = vsel %vm5087_vm8, %v6059_v4, 0.0  ;;  %6860 = vmatprep.subr.bf16.mxu1 %v10485_v9  ;;  %v10491_v6 = vld [vmem:[%s13577_s9 + $0x23c] ss:$28 sps:$4 sm:$0xff]   ;;  %v10493_v12 = vld [vmem:[%s13577_s9 + $0x230] ss:$28 sps:$4 sm:$0xff]   ;;  %6809 = vmatprep.subr.bf16.mxu0 %v10489_v60  ;;  %v6271_v4 = vld [vmem:[%s13577_s9 + $0x2a0] sm:$0xff] }
0x1b28   : > { %v6062_v0 = vmul.f32 %v12979_v14, %v12979_v14  ;;  %v6063_v5 = vmul.f32 %v12982_v22, %v12982_v22  ;;  %v6069_v26 = vadd.f32 %v6068_v1, %v6058_v31  ;;  %v10494_v34 = vld [vmem:[%s13577_s9 + $0x238] ss:$28 sps:$4 sm:$0xff]   ;;  %v10495_v2 = vld [vmem:[%s13577_s9 + $0x26c] ss:$28 sps:$4 sm:$0xff]  }
0x1b29   : > { %6861 = vmatpush1.bf16.msra.mxu1 %v10488_v35  ;;  %v10497_v31 = vld [vmem:[%s13577_s9 + $0x274] ss:$28 sps:$4 sm:$0xff]   ;;  %v6272_v1 = vld [vmem:[%s13577_s9 + $0x2a8] sm:$0xff] }
0x1b2a   : > { %v6076_v62 = vsel %vm5100_vm9, %v6062_v0, 0.0  ;;  %v6077_v46 = vsel %vm5102_vm10, %v6063_v5, 0.0  ;;  %6070 = vadd.xlane.f32.xlu1 %v6069_v26  ;;  %6074 = vadd.xlane.f32.xlu0 %v6073_v13  ;;  %v10499_v0 = vld [vmem:[%s13577_s9 + $0x268] ss:$28 sps:$4 sm:$0xff]   ;;  %v10500_v5 = vld [vmem:[%s13577_s9 + $0x270] ss:$28 sps:$4 sm:$0xff]   ;;  %v8974_v13 = vcombine.high %v6271_v4, %v6271_v4  ;;  %v8976_v26 = vcombine.high %v6272_v1, %v6272_v1 }
0x1b2b   : > { %v6078_v51 = vadd.f32 %v6077_v46, %v6076_v62  ;;  %6862 = vmatprep.subr.bf16.mxu1 %v10491_v6  ;;  %6810 = vmatpush1.bf16.msra.mxu0 %v10493_v12  ;;  %v8973_v62 = vcombine.low %v6271_v4, %v6271_v4  ;;  %v8975_v46 = vcombine.low %v6272_v1, %v6272_v1  ;;  %v6026_v1 = vld [vmem:[%s13580_s3] sm:$0x3]  ;;  %s9096_s3 = sshll.u32 %s11306_s0, 4  ;;  %s11064_s0 = smov [#allocation2]  }
0x1b2c   : > { %6811 = vmatprep.subr.bf16.mxu0 %v10495_v2 }
0x1b2d   : > { %6863 = vmatpush1.bf16.msra.mxu1 %v10494_v34  ;;  %v6775_v49 = vsel %vm2932_vm13, %v8975_v46, 0  ;;  %v6025_v34 = vld [vmem:[%s13579_s5] sm:$0x3]  ;;  %s13587_s5 = sld [smem:[#allocation31_spill]] }
0x1b2e   : > { %6079 = vadd.xlane.f32.xlu1 %v6078_v51  ;;  %6864 = vmatprep.subr.bf16.mxu1 %v10497_v31  ;;  %v6769_v51 = vsel %vm2932_vm13, %v8973_v62, 0 }
0x1b2f   : > { %6812 = vmatpush1.bf16.msra.mxu0 %v10499_v0  ;;  %v6121_v0 = vrot.slane %v6025_v34, %v11841_v50 }
0x1b30   : > { %8980 = vmatprep.subr.msk.bf16.mxu0 %vm2932_vm13, %v8974_v13  ;;  %v6117_v13 = vrot.slane %v6025_v34, %v11837_v48  ;;  %v10519_v34 = vld [vmem:[%s13577_s9 + $0xbc] ss:$28 sps:$4 sm:$0xff]  }
0x1b31   : > { %6865 = vmatpush1.bf16.msra.mxu1 %v10500_v5 }
0x1b32   : > { %8983 = vmatprep.subr.msk.bf16.mxu1 %vm2932_vm13, %v8976_v26  ;;  %v6125_v26 = vmul.f32 %v6121_v0, %v12958_v25  ;;  %v6124_v46 = vmul.f32 %v6117_v13, %v12955_v17  ;;  %v6128_v25 = vmul.f32 %v6117_v13, %v12964_v24  ;;  %v10508_v24 = vld [vmem:[%s13577_s9 + $0x18] ss:$28 sps:$4 sm:$0xff]  }
0x1b33   : > { %6814 = vmatpush1.bf16.msra.mxu0 %v6769_v51 }
0x1b34   : > { %6895 = vmatprep.subr.bf16.mxu0 %v10507_v29  ;;  %v6126_v29 = vmul.f32 %v6117_v13, %v12973_v3  ;;  %v6131_v3 = vmul.f32 %v6121_v0, %v12982_v22 }
0x1b35   : > { %6867 = vmatpush1.bf16.msra.mxu1 %v6775_v49  ;;  %v6160_v49 = vrot.slane %v6026_v1, %v11841_v50 }
0x1b36   : > { %6948 = vmatprep.subr.bf16.mxu1 %v13578_v7 }
0x1bb3   : > { %v6067_v56 = vpop.xlane.xlu0 %6066 }
0x1bb4   : > { %v6081_v55 = vmul.f32 0.0050251256, %v6067_v56  ;;  %v6127_v56 = vmul.f32 %v6121_v0, %v12976_v27 }
0x1bb6   : > { %10706 = vrsqrt.f32 %v6081_v55  ;;  %vm6087_vm3 = vcmp.eq.f32.partialorder %v6081_v55, inf  ;;  %v6090_v59 = vand.u32 2147483648, %v6081_v55  ;;  %vm6089_vm4 = vcmp.eq.f32.partialorder %v6081_v55, 0.0 }
0x1bb7   : > { %v6071_v43 = vpop.xlane.xlu1 %6070  ;;  %v6075_v20 = vpop.xlane.xlu0 %6074 }
0x1bb8   : > { %v6082_v37 = vmul.f32 0.0050251256, %v6071_v43  ;;  %v6083_v10 = vmul.f32 0.0050251256, %v6075_v20  ;;  %v6156_v43 = vrot.slane %v6026_v1, %v11837_v48  ;;  %v6129_v20 = vmul.f32 %v6121_v0, %v12961_v42  ;;  %v10505_v42 = vld [vmem:[%s13577_s9 + $0x10] ss:$28 sps:$4 sm:$0xff]  }
0x1bb9   : > { %v10521_v0 = vld [vmem:[%s13577_s9 + $0xf0] ss:$28 sps:$4 sm:$0xff]   ;;  %v10525_v1 = vld [vmem:[%s13577_s9 + $0x128] ss:$28 sps:$4 sm:$0xff]  }
0x1bba   : > { %10708 = vrsqrt.f32 %v6082_v37  ;;  %vm6094_vm14 = vcmp.eq.f32.partialorder %v6082_v37, inf  ;;  %vm6101_vm11 = vcmp.eq.f32.partialorder %v6083_v10, inf  ;;  %v6104_v54 = vand.u32 2147483648, %v6083_v10 }
0x1bbb   : > { %10710 = vrsqrt.f32 %v6083_v10  ;;  %v6080_v58 = vpop.xlane.xlu1 %6079  ;;  %v6097_v57 = vand.u32 2147483648, %v6082_v37  ;;  %vm6103_vm12 = vcmp.eq.f32.partialorder %v6083_v10, 0.0  ;;  %vm6096_vm15 = vcmp.eq.f32.partialorder %v6082_v37, 0.0 }
0x1bbc   : > { %v6084_v39 = vmul.f32 0.0050251256, %v6080_v58 }
0x1bbe   : > { %10712 = vrsqrt.f32 %v6084_v39  ;;  %vm6108_vm5 = vcmp.eq.f32.partialorder %v6084_v39, inf  ;;  %v6111_v35 = vand.u32 2147483648, %v6084_v39  ;;  %vm6110_vm6 = vcmp.eq.f32.partialorder %v6084_v39, 0.0 }
0x1bc0   : > { %v10707_v36 = vpop.eup %10706 }
0x1bc1   : > { %v6086_v11 = vmul.f32 %v10707_v36, %v6081_v55 }
0x1bc3   : > { %v6088_v16 = vsel %vm6087_vm3, %v6081_v55, %v6086_v11  ;;  %vm9666_vm3 = vmpackc.low %vm8073_vm7, %vm11063_vm2 }
0x1bc4   : > { %v10709_v23 = vpop.eup %10708  ;;  %v6091_v30 = vsel %vm6089_vm4, %v6090_v59, %v6088_v16 }
0x1bc5   : > { %v10711_v61 = vpop.eup %10710  ;;  %v6093_v38 = vmul.f32 %v10709_v23, %v6082_v37  ;;  %v6132_v33 = vadd.f32 1e-06, %v6091_v30 }
0x1bc6   : > { %v6100_v63 = vmul.f32 %v10711_v61, %v6083_v10 }
0x1bc7   : > { %v6095_v44 = vsel %vm6094_vm14, %v6082_v37, %v6093_v38  ;;  %10714 = vrcp.f32 %v6132_v33 }
0x1bc8   : > { %v10713_v19 = vpop.eup %10712  ;;  %v6098_v9 = vsel %vm6096_vm15, %v6097_v57, %v6095_v44  ;;  %v6102_v21 = vsel %vm6101_vm11, %v6083_v10, %v6100_v63  ;;  %v10511_v57 = vld [vmem:[%s13577_s9 + $0x4c] ss:$28 sps:$4 sm:$0xff]  }
0x1bc9   : > { %v6133_v60 = vadd.f32 1e-06, %v6098_v9  ;;  %v6105_v6 = vsel %vm6103_vm12, %v6104_v54, %v6102_v21  ;;  %v6107_v12 = vmul.f32 %v10713_v19, %v6084_v39  ;;  %v10509_v9 = vld [vmem:[%s13577_s9 + $0x48] ss:$28 sps:$4 sm:$0xff]   ;;  %v10512_v21 = vld [vmem:[%s13577_s9 + $0x50] ss:$28 sps:$4 sm:$0xff]  }
0x1bca   : > { %v6134_v2 = vadd.f32 1e-06, %v6105_v6  ;;  %v10513_v6 = vld [vmem:[%s13577_s9 + $0x80] ss:$28 sps:$4 sm:$0xff]  }
0x1bcb   : > { %10716 = vrcp.f32 %v6133_v60  ;;  %v6109_v31 = vsel %vm6108_vm5, %v6084_v39, %v6107_v12  ;;  %v6130_v39 = vmul.f32 %v6117_v13, %v12979_v14  ;;  %v10515_v60 = vld [vmem:[%s13577_s9 + $0x84] ss:$28 sps:$4 sm:$0xff]   ;;  %v10527_v13 = vld [vmem:[%s13577_s9 + $0x12c] ss:$28 sps:$4 sm:$0xff]  }
0x1bcc   : > { %10718 = vrcp.f32 %v6134_v2  ;;  %v6112_v4 = vsel %vm6110_vm6, %v6111_v35, %v6109_v31  ;;  %v10516_v12 = vld [vmem:[%s13577_s9 + $0x88] ss:$28 sps:$4 sm:$0xff]   ;;  %v10517_v2 = vld [vmem:[%s13577_s9 + $0xb8] ss:$28 sps:$4 sm:$0xff]   ;;  %v10520_v31 = vld [vmem:[%s13577_s9 + $0xc0] ss:$28 sps:$4 sm:$0xff]  }
0x1bcd   : > { %v6135_v5 = vadd.f32 1e-06, %v6112_v4  ;;  %v10523_v4 = vld [vmem:[%s13577_s9 + $0xf4] ss:$28 sps:$4 sm:$0xff]  }
0x1bcf   : > { %10720 = vrcp.f32 %v6135_v5  ;;  %v10524_v5 = vld [vmem:[%s13577_s9 + $0xf8] ss:$28 sps:$4 sm:$0xff]  }
0x1bd1   : > { %v10715_v62 = vpop.eup %10714 }
0x1bd2   : > { %v6145_v51 = vmul.f32 %v10715_v62, %v6125_v26  ;;  %v6144_v55 = vmul.f32 %v10715_v62, %v6124_v46  ;;  %v10528_v26 = vld [vmem:[%s13577_s9 + $0x130] ss:$28 sps:$4 sm:$0xff]   ;;  %v10531_v62 = vld [vmem:[%s13577_s9 + $0x164] ss:$28 sps:$4 sm:$0xff]  }
0x1bd3   : > { %v10529_v46 = vld [vmem:[%s13577_s9 + $0x160] ss:$28 sps:$4 sm:$0xff]  }
0x1bd4   : > { %v6164_v36 = vadd.f32 %v6160_v49, %v6145_v51  ;;  %v6163_v59 = vadd.f32 %v6156_v43, %v6144_v55  ;;  %v10532_v51 = vld [vmem:[%s13577_s9 + $0x168] ss:$28 sps:$4 sm:$0xff]   ;;  %v10539_v55 = vld [vmem:[%s13577_s9 + $0x1d4] ss:$28 sps:$4 sm:$0xff]  }
0x1bd5   : > { %v10717_v37 = vpop.eup %10716 }
0x1bd6   : > { %v10719_v10 = vpop.eup %10718  ;;  %v6147_v58 = vmul.f32 %v10717_v37, %v6127_v56  ;;  %v6146_v17 = vmul.f32 %v10717_v37, %v6126_v29  ;;  %v10533_v29 = vld [vmem:[%s13577_s9 + $0x198] ss:$28 sps:$4 sm:$0xff]   ;;  %v10536_v56 = vld [vmem:[%s13577_s9 + $0x1a0] ss:$28 sps:$4 sm:$0xff]  }
0x1bd7   : > { %v6149_v27 = vmul.f32 %v10719_v10, %v6129_v20  ;;  %v6148_v16 = vmul.f32 %v10719_v10, %v6128_v25  ;;  %v10540_v37 = vld [vmem:[%s13577_s9 + $0x1d8] ss:$28 sps:$4 sm:$0xff]   ;;  %v10543_v20 = vld [vmem:[%s13577_s9 + $0x20c] ss:$28 sps:$4 sm:$0xff]  }
0x1bd8   : > { %v6166_v11 = vadd.f32 %v6160_v49, %v6147_v58  ;;  %v6165_v23 = vadd.f32 %v6156_v43, %v6146_v17  ;;  %v10541_v10 = vld [vmem:[%s13577_s9 + $0x208] ss:$28 sps:$4 sm:$0xff]   ;;  %v10544_v25 = vld [vmem:[%s13577_s9 + $0x210] ss:$28 sps:$4 sm:$0xff]   ;;  %v10545_v17 = vld [vmem:[%s13577_s9 + $0x240] ss:$28 sps:$4 sm:$0xff]  }
0x1bd9   : > { %v10721_v61 = vpop.eup %10720  ;;  %v6168_v14 = vadd.f32 %v6160_v49, %v6149_v27  ;;  %v6167_v63 = vadd.f32 %v6156_v43, %v6148_v16  ;;  %v10547_v58 = vld [vmem:[%s13577_s9 + $0x244] ss:$28 sps:$4 sm:$0xff]   ;;  %v10549_v27 = vld [vmem:[%s13577_s9 + $0x278] ss:$28 sps:$4 sm:$0xff]  }
0x1bda   : > { %v6172_v30 = vpack.c.bf16 %v6166_v11, %v6164_v36  ;;  %v13058_v38 = vpack.c.bf16 %v6165_v23, %v6163_v59  ;;  %v6151_v54 = vmul.f32 %v10721_v61, %v6131_v3  ;;  %v6150_v33 = vmul.f32 %v10721_v61, %v6130_v39  ;;  %v10548_v39 = vld [vmem:[%s13577_s9 + $0x248] ss:$28 sps:$4 sm:$0xff]   ;;  %v10551_v3 = vld [vmem:[%s13577_s9 + $0x27c] ss:$28 sps:$4 sm:$0xff]   ;;  %v6273_v36 = vld [vmem:[%s13577_s9 + $0x2b0] sm:$0xff] }
0x1bdb   : > { %v10552_v11 = vld [vmem:[%s13577_s9 + $0x280] ss:$28 sps:$4 sm:$0xff]   ;;  %v8978_v59 = vcombine.high %v6273_v36, %v6273_v36  ;;  %v8977_v23 = vcombine.low %v6273_v36, %v6273_v36  ;;  %v10555_v16 = vld [vmem:[%s13577_s9 + $0x2b8] ss:$0 sps:$4 sm:$0xff]  }
0x1bdc   : > { %8981 = vmatprep.mubr.msk.bf16.mxu0 %vm5087_vm8, %v6172_v30  ;;  %8984 = vmatprep.mubr.msk.bf16.mxu1 %vm5087_vm8, %v6172_v30  ;;  %v6170_v22 = vadd.f32 %v6160_v49, %v6151_v54  ;;  %v6169_v44 = vadd.f32 %v6156_v43, %v6150_v33  ;;  %v10535_v49 = vld [vmem:[%s13577_s9 + $0x19c] ss:$28 sps:$4 sm:$0xff]   ;;  %v10537_v43 = vld [vmem:[%s13577_s9 + $0x1d0] ss:$28 sps:$4 sm:$0xff]   ;;  %v10556_v54 = vld [vmem:[%s13581_s1 + $0x100] ss:$8 sps:$4 sm:$0xff]  }
0x1bdd   : > { %6822 = vmatmul.mubr.bf16.vlgmr.msra.gmra.mrb[0].mxu0 %v13058_v38  ;;  %6875 = vmatmul.mubr.bf16.vlgmr.msra.gmra.mrb[0].mxu1 %v13058_v38  ;;  %v6781_v61 = vsel %vm2932_vm13, %v8977_v23, 0  ;;  %v10559_v33 = vld [vmem:[%s13581_s1] ss:$8 sps:$4 sm:$0xff]   ;;  %v10622_v23 = vld [vmem:[%s13581_s1 + $0x1b0] ss:$8 sps:$4 sm:$0xff]  }
0x1bde   : > { %6896 = vmatpush1.bf16.msra.mxu0 %v10505_v42  ;;  %6949 = vmatpush1.bf16.msra.mxu1 %v10508_v24  ;;  %v13066_v19 = vpack.c.bf16 %v6170_v22, %v6168_v14  ;;  %v13070_v35 = vpack.c.bf16 %v6169_v44, %v6167_v63  ;;  %v10558_v42 = vld [vmem:[%s13581_s1 + $0x104] ss:$8 sps:$4 sm:$0xff]   ;;  %v10564_v14 = vld [vmem:[%s13581_s1 + $0x114] ss:$8 sps:$4 sm:$0xff]   ;;  %v10562_v22 = vld [vmem:[%s13581_s1 + $0x110] ss:$8 sps:$4 sm:$0xff]  }
0x1bdf   : > { %6897 = vmatprep.subr.bf16.mxu0 %v10511_v57  ;;  %6950 = vmatprep.subr.bf16.mxu1 %v13578_v7  ;;  %v10561_v24 = vld [vmem:[%s13581_s1 + $0x4] ss:$8 sps:$4 sm:$0xff]   ;;  %v10567_v57 = vld [vmem:[%s13581_s1 + $0x14] ss:$8 sps:$4 sm:$0xff]   ;;  %v10565_v63 = vld [vmem:[%s13581_s1 + $0x10] ss:$8 sps:$4 sm:$0xff]  }
0x1be0   : > { %8982 = vmatprep.mubr.msk.bf16.mxu0 %vm5087_vm8, %v13066_v19  ;;  %8985 = vmatprep.mubr.msk.bf16.mxu1 %vm5087_vm8, %v13066_v19  ;;  %v10570_v44 = vld [vmem:[%s13581_s1 + $0x124] ss:$8 sps:$4 sm:$0xff]   ;;  %v10616_v36 = vld [vmem:[%s13581_s1 + $0x1a0] ss:$8 sps:$4 sm:$0xff]  }
0x1be2   : > { %6898 = vmatpush1.bf16.msra.mxu0 %v10509_v9  ;;  %6951 = vmatpush1.bf16.msra.mxu1 %v10512_v21  ;;  %v10573_v9 = vld [vmem:[%s13581_s1 + $0x24] ss:$8 sps:$4 sm:$0xff]   ;;  %v10571_v21 = vld [vmem:[%s13581_s1 + $0x20] ss:$8 sps:$4 sm:$0xff]  }
0x1be3   : > { %6899 = vmatprep.subr.bf16.mxu0 %v10515_v60  ;;  %6952 = vmatprep.subr.bf16.mxu1 %v13578_v7  ;;  %v10579_v60 = vld [vmem:[%s13581_s1 + $0x34] ss:$8 sps:$4 sm:$0xff]  }
0x1be5   : > { %6832 = vmatmul.mubr.bf16.gmra.mrb[4].mxu0 %v13070_v35  ;;  %6885 = vmatmul.mubr.bf16.gmra.mrb[4].mxu1 %v13070_v35 }
0x1be6   : > { %6900 = vmatpush1.bf16.msra.mxu0 %v10513_v6  ;;  %6953 = vmatpush1.bf16.msra.mxu1 %v10516_v12  ;;  %v10574_v6 = vld [vmem:[%s13581_s1 + $0x130] ss:$8 sps:$4 sm:$0xff]  }
0x1be7   : > { %8987 = vmatprep.mubr.msk.bf16.mxu0 %vm5087_vm8, %v6172_v30  ;;  %8989 = vmatprep.mubr.msk.bf16.mxu1 %vm5087_vm8, %v6172_v30  ;;  %v6787_v30 = vsel %vm2932_vm13, %v10555_v16, 0  ;;  %v10577_v12 = vld [vmem:[%s13581_s1 + $0x30] ss:$8 sps:$4 sm:$0xff]  }
0x1be8   : > { %6901 = vmatprep.subr.bf16.mxu0 %v10519_v34  ;;  %6954 = vmatprep.subr.bf16.mxu1 %v13578_v7  ;;  %v10582_v34 = vld [vmem:[%s13581_s1 + $0x144] ss:$8 sps:$4 sm:$0xff]   ;;  %v10625_v16 = vld [vmem:[%s13581_s1 + $0xb0] ss:$8 sps:$4 sm:$0xff]  }
0x1bea   : > { %6902 = vmatpush1.bf16.msra.mxu0 %v10517_v2  ;;  %6955 = vmatpush1.bf16.msra.mxu1 %v10520_v31  ;;  %v10585_v2 = vld [vmem:[%s13581_s1 + $0x44] ss:$8 sps:$4 sm:$0xff]   ;;  %v10580_v31 = vld [vmem:[%s13581_s1 + $0x140] ss:$8 sps:$4 sm:$0xff]  }
0x1beb   : > { %6903 = vmatprep.subr.bf16.mxu0 %v10523_v4  ;;  %6956 = vmatprep.subr.bf16.mxu1 %v13578_v7  ;;  %v10583_v4 = vld [vmem:[%s13581_s1 + $0x40] ss:$8 sps:$4 sm:$0xff]  }
0x1bee   : > { %6904 = vmatpush1.bf16.msra.mxu0 %v10521_v0  ;;  %6957 = vmatpush1.bf16.msra.mxu1 %v10524_v5  ;;  %v10591_v0 = vld [vmem:[%s13581_s1 + $0x54] ss:$8 sps:$4 sm:$0xff]   ;;  %v10586_v5 = vld [vmem:[%s13581_s1 + $0x150] ss:$8 sps:$4 sm:$0xff]  }
0x1bef   : > { %6905 = vmatprep.subr.bf16.mxu0 %v10527_v13  ;;  %6958 = vmatprep.subr.bf16.mxu1 %v13578_v7  ;;  %v10589_v13 = vld [vmem:[%s13581_s1 + $0x50] ss:$8 sps:$4 sm:$0xff]  }
0x1bf2   : > { %6906 = vmatpush1.bf16.msra.mxu0 %v10525_v1  ;;  %6959 = vmatpush1.bf16.msra.mxu1 %v10528_v26  ;;  %v10594_v1 = vld [vmem:[%s13581_s1 + $0x164] ss:$8 sps:$4 sm:$0xff]  }
0x1bf3   : > { %6907 = vmatprep.subr.bf16.mxu0 %v10531_v62  ;;  %6960 = vmatprep.subr.bf16.mxu1 %v13578_v7  ;;  %v10597_v26 = vld [vmem:[%s13581_s1 + $0x64] ss:$8 sps:$4 sm:$0xff]   ;;  %v10592_v62 = vld [vmem:[%s13581_s1 + $0x160] ss:$8 sps:$4 sm:$0xff]  }
0x1bf6   : > { %6908 = vmatpush1.bf16.msra.mxu0 %v10529_v46  ;;  %6961 = vmatpush1.bf16.msra.mxu1 %v10532_v51  ;;  %v10595_v46 = vld [vmem:[%s13581_s1 + $0x60] ss:$8 sps:$4 sm:$0xff]   ;;  %v10600_v51 = vld [vmem:[%s13581_s1 + $0x174] ss:$8 sps:$4 sm:$0xff]  }
0x1bf7   : > { %6909 = vmatprep.subr.bf16.mxu0 %v10535_v49  ;;  %6962 = vmatprep.subr.bf16.mxu1 %v13578_v7  ;;  %v10603_v49 = vld [vmem:[%s13581_s1 + $0x74] ss:$8 sps:$4 sm:$0xff]  }
0x1bfa   : > { %6910 = vmatpush1.bf16.msra.mxu0 %v10533_v29  ;;  %6963 = vmatpush1.bf16.msra.mxu1 %v10536_v56  ;;  %v10598_v29 = vld [vmem:[%s13581_s1 + $0x170] ss:$8 sps:$4 sm:$0xff]  }
0x1bfb   : > { %6911 = vmatprep.subr.bf16.mxu0 %v10539_v55  ;;  %6964 = vmatprep.subr.bf16.mxu1 %v13578_v7  ;;  %v10601_v56 = vld [vmem:[%s13581_s1 + $0x70] ss:$8 sps:$4 sm:$0xff]   ;;  %v10606_v55 = vld [vmem:[%s13581_s1 + $0x184] ss:$8 sps:$4 sm:$0xff]  }
0x1bfe   : > { %6912 = vmatpush1.bf16.msra.mxu0 %v10537_v43  ;;  %6965 = vmatpush1.bf16.msra.mxu1 %v10540_v37  ;;  %v10609_v43 = vld [vmem:[%s13581_s1 + $0x84] ss:$8 sps:$4 sm:$0xff]   ;;  %v10604_v37 = vld [vmem:[%s13581_s1 + $0x180] ss:$8 sps:$4 sm:$0xff]  }
0x1bff   : > { %6913 = vmatprep.subr.bf16.mxu0 %v10543_v20  ;;  %6966 = vmatprep.subr.bf16.mxu1 %v13578_v7  ;;  %v10607_v20 = vld [vmem:[%s13581_s1 + $0x80] ss:$8 sps:$4 sm:$0xff]  }
0x1c02   : > { %6914 = vmatpush1.bf16.msra.mxu0 %v10541_v10  ;;  %6967 = vmatpush1.bf16.msra.mxu1 %v10544_v25  ;;  %v10612_v10 = vld [vmem:[%s13581_s1 + $0x194] ss:$8 sps:$4 sm:$0xff]  }
0x1c03   : > { %6915 = vmatprep.subr.bf16.mxu0 %v10547_v58  ;;  %6968 = vmatprep.subr.bf16.mxu1 %v13578_v7  ;;  %v10615_v25 = vld [vmem:[%s13581_s1 + $0x94] ss:$8 sps:$4 sm:$0xff]   ;;  %v10610_v58 = vld [vmem:[%s13581_s1 + $0x190] ss:$8 sps:$4 sm:$0xff]  }
0x1c06   : > { %6916 = vmatpush1.bf16.msra.mxu0 %v10545_v17  ;;  %6969 = vmatpush1.bf16.msra.mxu1 %v10548_v39  ;;  %v10613_v17 = vld [vmem:[%s13581_s1 + $0x90] ss:$8 sps:$4 sm:$0xff]   ;;  %v10618_v39 = vld [vmem:[%s13581_s1 + $0x1a4] ss:$8 sps:$4 sm:$0xff]  }
0x1c07   : > { %6917 = vmatprep.subr.bf16.mxu0 %v10551_v3  ;;  %6970 = vmatprep.subr.bf16.mxu1 %v13578_v7  ;;  %v10621_v3 = vld [vmem:[%s13581_s1 + $0xa4] ss:$8 sps:$4 sm:$0xff]  }
0x1c0a   : > { %6918 = vmatpush1.bf16.msra.mxu0 %v10549_v27  ;;  %6971 = vmatpush1.bf16.msra.mxu1 %v10552_v11  ;;  %v10619_v27 = vld [vmem:[%s13581_s1 + $0xa0] ss:$8 sps:$4 sm:$0xff]   ;;  %v10624_v11 = vld [vmem:[%s13581_s1 + $0x1b4] ss:$8 sps:$4 sm:$0xff]  }
0x1c0b   : > { %8986 = vmatprep.subr.msk.bf16.mxu0 %vm2932_vm13, %v8978_v59  ;;  %6972 = vmatprep.subr.bf16.mxu1 %v13578_v7  ;;  %v10627_v59 = vld [vmem:[%s13581_s1 + $0xb4] ss:$8 sps:$4 sm:$0xff]   ;;  %vm7639_vm13 = vcmask 261120  }
0x1c0e   : > { %6920 = vmatpush1.bf16.msra.mxu0 %v6781_v61  ;;  %6973 = vmatpush1.bf16.msra.mxu1 %v6787_v30  ;;  %v10630_v61 = vld [vmem:[%s13581_s1 + $0x1c4] ss:$8 sps:$4 sm:$0xff]  }
0x1c0f   : > { %7699 = vmatprep.subr.bf16.mxu0 %v10558_v42  ;;  %7646 = vmatprep.subr.bf16.mxu1 %v10561_v24  ;;  %v10633_v30 = vld [vmem:[%s13581_s1 + $0xc4] ss:$8 sps:$4 sm:$0xff]   ;;  %v10628_v42 = vld [vmem:[%s13581_s1 + $0x1c0] ss:$8 sps:$4 sm:$0xff]  }
0x1c10   : > { %v10631_v24 = vld [vmem:[%s13581_s1 + $0xc0] ss:$8 sps:$4 sm:$0xff]  }
0x1c11   : > { %6928 = vmatmul.mubr.bf16.vlgmr.msra.gmra.mrb[8].mxu0 %v13058_v38  ;;  %6981 = vmatmul.mubr.bf16.vlgmr.msra.gmra.mrb[8].mxu1 %v13058_v38  ;;  %v10568_v38 = vld [vmem:[%s13581_s1 + $0x120] ss:$8 sps:$4 sm:$0xff]  }
0x1c12   : > { %8988 = vmatprep.mubr.msk.bf16.mxu0 %vm5087_vm8, %v13066_v19  ;;  %8990 = vmatprep.mubr.msk.bf16.mxu1 %vm5087_vm8, %v13066_v19  ;;  %v10576_v19 = vld [vmem:[%s13581_s1 + $0x134] ss:$8 sps:$4 sm:$0xff]  }
0x1c13   : > { %7700 = vmatpush1.bf16.msra.mxu0 %v10556_v54  ;;  %7647 = vmatpush1.bf16.msra.mxu1 %v10559_v33  ;;  %v10636_v54 = vld [vmem:[%s13581_s1 + $0x1d4] ss:$8 sps:$4 sm:$0xff]  }
0x1c14   : > { %7701 = vmatprep.subr.bf16.mxu0 %v10564_v14  ;;  %7648 = vmatprep.subr.bf16.mxu1 %v10567_v57  ;;  %v10639_v33 = vld [vmem:[%s13581_s1 + $0xd4] ss:$8 sps:$4 sm:$0xff]   ;;  %v10634_v14 = vld [vmem:[%s13581_s1 + $0x1d0] ss:$8 sps:$4 sm:$0xff]  }
0x1c15   : > { %v10637_v57 = vld [vmem:[%s13581_s1 + $0xd0] ss:$8 sps:$4 sm:$0xff]  }
0x1c17   : > { %7702 = vmatpush1.bf16.msra.mxu0 %v10562_v22  ;;  %7649 = vmatpush1.bf16.msra.mxu1 %v10565_v63  ;;  %v10642_v22 = vld [vmem:[%s13581_s1 + $0x1e4] ss:$8 sps:$4 sm:$0xff]  }
0x1c18   : > { %7703 = vmatprep.subr.bf16.mxu0 %v10570_v44  ;;  %7650 = vmatprep.subr.bf16.mxu1 %v10573_v9  ;;  %v10645_v63 = vld [vmem:[%s13581_s1 + $0xe4] ss:$8 sps:$4 sm:$0xff]   ;;  %v10640_v44 = vld [vmem:[%s13581_s1 + $0x1e0] ss:$8 sps:$4 sm:$0xff]  }
0x1c19   : > { %6938 = vmatmul.mubr.bf16.gmra.mrb[12].mxu0 %v13070_v35  ;;  %6989 = vmatmul.mubr.bf16.gmra.mrb[12].mxu1 %v13070_v35  ;;  %v10588_v35 = vld [vmem:[%s13581_s1 + $0x154] ss:$8 sps:$4 sm:$0xff]   ;;  %v10643_v9 = vld [vmem:[%s13581_s1 + $0xe0] ss:$8 sps:$4 sm:$0xff]  }
0x1c1b   : > { %7704 = vmatpush1.bf16.msra.mxu0 %v10568_v38  ;;  %7651 = vmatpush1.bf16.msra.mxu1 %v10571_v21  ;;  %v10648_v38 = vld [vmem:[%s13581_s1 + $0x1f4] ss:$8 sps:$4 sm:$0xff]  }
0x1c1c   : > { %7705 = vmatprep.subr.bf16.mxu0 %v10576_v19  ;;  %7652 = vmatprep.subr.bf16.mxu1 %v10579_v60  ;;  %v10651_v21 = vld [vmem:[%s13581_s1 + $0xf4] ss:$8 sps:$4 sm:$0xff]   ;;  %v10646_v19 = vld [vmem:[%s13581_s1 + $0x1f0] ss:$8 sps:$4 sm:$0xff]  }
0x1c1d   : > { %v10649_v60 = vld [vmem:[%s13581_s1 + $0xf0] ss:$8 sps:$4 sm:$0xff]  }
0x1c1f   : > { %7706 = vmatpush1.bf16.msra.mxu0 %v10574_v6  ;;  %7653 = vmatpush1.bf16.msra.mxu1 %v10577_v12  ;;  %v10654_v6 = vld [vmem:[%s13581_s1 + $0x204] ss:$8 sps:$4 sm:$0xff]  }
0x1c20   : > { %7707 = vmatprep.subr.bf16.mxu0 %v10582_v34  ;;  %7654 = vmatprep.subr.bf16.mxu1 %v10585_v2  ;;  %v10687_v12 = vld [vmem:[%s13581_s1 + $0x304] ss:$8 sps:$4 sm:$0xff]   ;;  %v6291_v2 = vsub.s32 3, %v11834_v47 }
0x1c21   : > { %v13202_v34 = vld [vmem:[%s13582_s23] sm:$0x7f]  ;;  %s8286_s23 = sshll.u32 %s11482_s11, 4  ;;  %s13407_s23 = int_to_ptr.vmem [resolvable:$true] %s8286_s23 }
0x1c23   : > { %7708 = vmatpush1.bf16.msra.mxu0 %v10580_v31  ;;  %7655 = vmatpush1.bf16.msra.mxu1 %v10583_v4  ;;  %v6280_v31 = vrot.slane %v13202_v34, %v11837_v48  ;;  %v6288_v4 = vrot.slane %v13202_v34, %v11847_v53 }
0x1c24   : > { %7709 = vmatprep.subr.bf16.mxu0 %v10588_v35  ;;  %7656 = vmatprep.subr.bf16.mxu1 %v10591_v0  ;;  %v6284_v35 = vrot.slane %v13202_v34, %v11841_v50  ;;  %v6292_v0 = vrot.slane %v13202_v34, %v6291_v2 }
0x1c27   : > { %7710 = vmatpush1.bf16.msra.mxu0 %v10586_v5  ;;  %7657 = vmatpush1.bf16.msra.mxu1 %v10589_v13 }
0x1c28   : > { %7711 = vmatprep.subr.bf16.mxu0 %v10594_v1  ;;  %7658 = vmatprep.subr.bf16.mxu1 %v10597_v26 }
0x1c2b   : > { %7712 = vmatpush1.bf16.msra.mxu0 %v10592_v62  ;;  %7659 = vmatpush1.bf16.msra.mxu1 %v10595_v46 }
0x1c2c   : > { %7713 = vmatprep.subr.bf16.mxu0 %v10600_v51  ;;  %7660 = vmatprep.subr.bf16.mxu1 %v10603_v49 }
0x1c2f   : > { %7714 = vmatpush1.bf16.msra.mxu0 %v10598_v29  ;;  %7661 = vmatpush1.bf16.msra.mxu1 %v10601_v56 }
0x1c30   : > { %7715 = vmatprep.subr.bf16.mxu0 %v10606_v55  ;;  %7662 = vmatprep.subr.bf16.mxu1 %v10609_v43 }
0x1c33   : > { %7716 = vmatpush1.bf16.msra.mxu0 %v10604_v37  ;;  %7663 = vmatpush1.bf16.msra.mxu1 %v10607_v20 }
0x1c34   : > { %7717 = vmatprep.subr.bf16.mxu0 %v10612_v10  ;;  %7664 = vmatprep.subr.bf16.mxu1 %v10615_v25 }
0x1c37   : > { %7718 = vmatpush1.bf16.msra.mxu0 %v10610_v58  ;;  %7665 = vmatpush1.bf16.msra.mxu1 %v10613_v17 }
0x1c38   : > { %7719 = vmatprep.subr.bf16.mxu0 %v10618_v39  ;;  %7666 = vmatprep.subr.bf16.mxu1 %v10621_v3 }
0x1c3b   : > { %7720 = vmatpush1.bf16.msra.mxu0 %v10616_v36  ;;  %7667 = vmatpush1.bf16.msra.mxu1 %v10619_v27 }
0x1c3c   : > { %7721 = vmatprep.subr.bf16.mxu0 %v10624_v11  ;;  %7668 = vmatprep.subr.bf16.mxu1 %v10627_v59 }
0x1c3f   : > { %7722 = vmatpush1.bf16.msra.mxu0 %v10622_v23  ;;  %7669 = vmatpush1.bf16.msra.mxu1 %v10625_v16 }
0x1c40   : > { %7723 = vmatprep.subr.bf16.mxu0 %v10630_v61  ;;  %7670 = vmatprep.subr.bf16.mxu1 %v10633_v30 }
0x1c43   : > { %7724 = vmatpush1.bf16.msra.mxu0 %v10628_v42  ;;  %7671 = vmatpush1.bf16.msra.mxu1 %v10631_v24  ;;  %v10652_v24 = vld [vmem:[%s13581_s1 + $0x200] ss:$8 sps:$4 sm:$0xff]  }
0x1c44   : > { %7725 = vmatprep.subr.bf16.mxu0 %v10636_v54  ;;  %7672 = vmatprep.subr.bf16.mxu1 %v10639_v33  ;;  %v10685_v54 = vld [vmem:[%s13581_s1 + $0x300] ss:$8 sps:$4 sm:$0xff]  }
0x1c47   : > { %7726 = vmatpush1.bf16.msra.mxu0 %v10634_v14  ;;  %7673 = vmatpush1.bf16.msra.mxu1 %v10637_v57 }
0x1c48   : > { %7727 = vmatprep.subr.bf16.mxu0 %v10642_v22  ;;  %7674 = vmatprep.subr.bf16.mxu1 %v10645_v63  ;;  %v10657_v63 = vld [vmem:[%s13581_s1 + $0x214] ss:$8 sps:$4 sm:$0xff]  }
0x1c4b   : > { %7728 = vmatpush1.bf16.msra.mxu0 %v10640_v44  ;;  %7675 = vmatpush1.bf16.msra.mxu1 %v10643_v9  ;;  %v10693_v44 = vld [vmem:[%s13581_s1 + $0x314] ss:$8 sps:$4 sm:$0xff]  }
0x1c4c   : > { %7729 = vmatprep.subr.bf16.mxu0 %v10648_v38  ;;  %7676 = vmatprep.subr.bf16.mxu1 %v10651_v21 }
0x1c4f   : > { %7730 = vmatpush1.bf16.msra.mxu0 %v10646_v19  ;;  %7677 = vmatpush1.bf16.msra.mxu1 %v10649_v60 }
0x1c50   : > { %7752 = vmatprep.subr.bf16.mxu0 %v10654_v6  ;;  %7805 = vmatprep.subr.bf16.mxu1 %v10687_v12 }
0x1cb0   : > { %v6823_v5 = vpop.f32.mrb[0].mxu0  ;;  %v6876_v13 = vpop.f32.mrb[0].mxu1 }
0x1cb1   : > { %v6824_v1 = vadd.f32 %v6823_v5, %v6280_v31  ;;  %v6877_v26 = vadd.f32 %v6876_v13, %v6288_v4  ;;  %v6825_v62 = vpop.f32.mrb[1].mxu0  ;;  %v6878_v46 = vpop.f32.mrb[1].mxu1 }
0x1cb2   : > { %v6826_v51 = vadd.f32 %v6825_v62, %v6284_v35  ;;  %v6879_v49 = vadd.f32 %v6878_v46, %v6292_v0  ;;  %v6827_v29 = vpop.f32.mrb[2].mxu0  ;;  %v6880_v56 = vpop.f32.mrb[2].mxu1 }
0x1cb3   : > { %v6828_v55 = vadd.f32 %v6827_v29, %v6280_v31  ;;  %v6881_v43 = vadd.f32 %v6880_v56, %v6288_v4  ;;  %v6829_v37 = vpop.f32.mrb[3].mxu0  ;;  %v6882_v20 = vpop.f32.mrb[3].mxu1  ;;  %v6997_v25 = vmax.f32 %v6824_v1, 0.0  ;;  %v6999_v58 = vmax.f32 %v6877_v26, 0.0  ;;  %v10655_v1 = vld [vmem:[%s13581_s1 + $0x210] ss:$8 sps:$4 sm:$0xff]  }
0x1cb4   : > { %v6830_v53 = vadd.f32 %v6829_v37, %v6284_v35  ;;  %v6883_v10 = vadd.f32 %v6882_v20, %v6292_v0  ;;  %v6998_v3 = vmax.f32 %v6826_v51, 0.0  ;;  %v7000_v36 = vmax.f32 %v6879_v49, 0.0  ;;  %v10691_v26 = vld [vmem:[%s13581_s1 + $0x310] ss:$8 sps:$4 sm:$0xff]   ;;  %v10658_v20 = vld [vmem:[%s13581_s1 + $0x220] ss:$8 sps:$4 sm:$0xff]  }
0x1cb5   : > { %v7004_v17 = vmax.f32 %v6828_v55, 0.0  ;;  %v7006_v39 = vmax.f32 %v6881_v43, 0.0 }
0x1cb6   : > { %v7005_v27 = vmax.f32 %v6830_v53, 0.0  ;;  %v7007_v11 = vmax.f32 %v6883_v10, 0.0  ;;  %v10663_v53 = vld [vmem:[%s13581_s1 + $0x234] ss:$8 sps:$4 sm:$0xff]   ;;  %v10661_v10 = vld [vmem:[%s13581_s1 + $0x230] ss:$8 sps:$4 sm:$0xff]  }
0x1cb7   : > { %v7025_v59 = vpack.c.bf16 %v7004_v17, %v6997_v25  ;;  %v7027_v23 = vpack.c.bf16 %v7006_v39, %v6999_v58  ;;  %v10666_v25 = vld [vmem:[%s13581_s1 + $0x244] ss:$8 sps:$4 sm:$0xff]   ;;  %v10664_v58 = vld [vmem:[%s13581_s1 + $0x240] ss:$8 sps:$4 sm:$0xff]   ;;  %v10669_v17 = vld [vmem:[%s13581_s1 + $0x254] ss:$8 sps:$4 sm:$0xff]  }
0x1cb8   : > { %v7026_v16 = vpack.c.bf16 %v7005_v27, %v6998_v3  ;;  %v7028_v61 = vpack.c.bf16 %v7007_v11, %v7000_v36  ;;  %v6833_v30 = vpop.f32.mrb[4].mxu0  ;;  %v6886_v42 = vpop.f32.mrb[4].mxu1  ;;  %v10667_v39 = vld [vmem:[%s13581_s1 + $0x250] ss:$8 sps:$4 sm:$0xff]   ;;  %v10672_v3 = vld [vmem:[%s13581_s1 + $0x264] ss:$8 sps:$4 sm:$0xff]  }
0x1cb9   : > { %v6834_v33 = vadd.f32 %v6833_v30, %v6280_v31  ;;  %v6887_v14 = vadd.f32 %v6886_v42, %v6288_v4  ;;  %v6835_v57 = vpop.f32.mrb[5].mxu0  ;;  %v6888_v22 = vpop.f32.mrb[5].mxu1  ;;  %v10670_v36 = vld [vmem:[%s13581_s1 + $0x260] ss:$8 sps:$4 sm:$0xff]   ;;  %v10675_v27 = vld [vmem:[%s13581_s1 + $0x274] ss:$8 sps:$4 sm:$0xff]  }
0x1cba   : > { %v6836_v9 = vadd.f32 %v6835_v57, %v6284_v35  ;;  %v6889_v38 = vadd.f32 %v6888_v22, %v6292_v0  ;;  %v6837_v21 = vpop.f32.mrb[6].mxu0  ;;  %v6890_v19 = vpop.f32.mrb[6].mxu1  ;;  %7678 = vmatprep.mubr.bf16.mxu1 %v7026_v16  ;;  %7731 = vmatprep.mubr.bf16.mxu0 %v7028_v61  ;;  %v10673_v11 = vld [vmem:[%s13581_s1 + $0x270] ss:$8 sps:$4 sm:$0xff]   ;;  %v10681_v16 = vld [vmem:[%s13581_s1 + $0x294] ss:$8 sps:$4 sm:$0xff]  }
0x1cbb   : > { %v6838_v60 = vadd.f32 %v6837_v21, %v6280_v31  ;;  %v6891_v6 = vadd.f32 %v6890_v19, %v6288_v4  ;;  %v6839_v12 = vpop.f32.mrb[7].mxu0  ;;  %v6892_v2 = vpop.f32.mrb[7].mxu1  ;;  %7679 = vmatmul.mubr.bf16.vlgmr.msra.gmra.mrb[16].mxu1 %v7025_v59  ;;  %7732 = vmatmul.mubr.bf16.vlgmr.msra.gmra.mrb[16].mxu0 %v7027_v23  ;;  %v7011_v62 = vmax.f32 %v6834_v33, 0.0  ;;  %v7013_v46 = vmax.f32 %v6887_v14, 0.0  ;;  %v10660_v31 = vld [vmem:[%s13581_s1 + $0x224] ss:$8 sps:$4 sm:$0xff]  }
0x1cbc   : > { %v6840_v5 = vadd.f32 %v6839_v12, %v6284_v35  ;;  %v6893_v13 = vadd.f32 %v6892_v2, %v6292_v0  ;;  %7753 = vmatpush1.bf16.msra.mxu0 %v10652_v24  ;;  %7806 = vmatpush1.bf16.msra.mxu1 %v10685_v54  ;;  %v7012_v4 = vmax.f32 %v6836_v9, 0.0  ;;  %v7014_v29 = vmax.f32 %v6889_v38, 0.0  ;;  %v10678_v59 = vld [vmem:[%s13581_s1 + $0x284] ss:$8 sps:$4 sm:$0xff]   ;;  %v10676_v23 = vld [vmem:[%s13581_s1 + $0x280] ss:$8 sps:$4 sm:$0xff]  }
0x1cbd   : > { %v7018_v51 = vmax.f32 %v6838_v60, 0.0  ;;  %v7020_v49 = vmax.f32 %v6891_v6, 0.0  ;;  %7754 = vmatprep.subr.bf16.mxu0 %v10657_v63  ;;  %7807 = vmatprep.subr.bf16.mxu1 %v10693_v44  ;;  %v10679_v61 = vld [vmem:[%s13581_s1 + $0x290] ss:$8 sps:$4 sm:$0xff]   ;;  %v10684_v30 = vld [vmem:[%s13581_s1 + $0x2a4] ss:$8 sps:$4 sm:$0xff]  }
0x1cbe   : > { %v7019_v56 = vmax.f32 %v6840_v5, 0.0  ;;  %v7021_v55 = vmax.f32 %v6893_v13, 0.0  ;;  %v6295_v42 = vsub.s32 4, %v11834_v47  ;;  %v6303_v24 = vsub.s32 6, %v11834_v47  ;;  %v10682_v33 = vld [vmem:[%s13581_s1 + $0x2a0] ss:$8 sps:$4 sm:$0xff]  }
0x1cbf   : > { %v7032_v35 = vpack.c.bf16 %v7018_v51, %v7011_v62  ;;  %v7034_v0 = vpack.c.bf16 %v7020_v49, %v7013_v46  ;;  %v6299_v54 = vsub.s32 5, %v11834_v47  ;;  %v10690_v22 = vld [vmem:[%s13581_s1 + $0x2b4] ss:$8 sps:$4 sm:$0xff]   ;;  %v10688_v38 = vld [vmem:[%s13581_s1 + $0x2b0] ss:$8 sps:$4 sm:$0xff]  }
0x1cc0   : > { %v7033_v43 = vpack.c.bf16 %v7019_v56, %v7012_v4  ;;  %v7035_v37 = vpack.c.bf16 %v7021_v55, %v7014_v29  ;;  %7755 = vmatpush1.bf16.msra.mxu0 %v10655_v1  ;;  %7808 = vmatpush1.bf16.msra.mxu1 %v10691_v26  ;;  %v6296_v14 = vrot.slane %v13202_v34, %v6295_v42  ;;  %v10696_v6 = vld [vmem:[%s13581_s1 + $0x2c4] ss:$8 sps:$4 sm:$0xff]   ;;  %v10694_v46 = vld [vmem:[%s13581_s1 + $0x2c0] ss:$8 sps:$4 sm:$0xff]   ;;  %v10699_v29 = vld [vmem:[%s13581_s1 + $0x2d4] ss:$8 sps:$4 sm:$0xff]  }
0x1cc1   : > { %7756 = vmatprep.subr.bf16.mxu0 %v10660_v31  ;;  %v6304_v57 = vrot.slane %v13202_v34, %v6303_v24  ;;  %v6300_v63 = vrot.slane %v13202_v34, %v6299_v54 }
0x1cc2   : > { %7688 = vmatprep.mubr.bf16.mxu1 %v7033_v43  ;;  %7741 = vmatprep.mubr.bf16.mxu0 %v7035_v37 }
0x1cc3   : > { %7689 = vmatmul.mubr.bf16.gmra.mrb[20].mxu1 %v7032_v35  ;;  %7742 = vmatmul.mubr.bf16.gmra.mrb[20].mxu0 %v7034_v0 }
0x1cc4   : > { %7757 = vmatpush1.bf16.msra.mxu0 %v10658_v20  ;;  %7837 = vmatprep.mubr.bf16.mxu1 %v13578_v7 }
0x1cc5   : > { %7758 = vmatprep.subr.bf16.mxu0 %v10663_v53  ;;  %v10697_v53 = vld [vmem:[%s13581_s1 + $0x2d0] ss:$8 sps:$4 sm:$0xff]  }
0x1cc8   : > { %7759 = vmatpush1.bf16.msra.mxu0 %v10661_v10 }
0x1cc9   : > { %7760 = vmatprep.subr.bf16.mxu0 %v10666_v25 }
0x1ccc   : > { %7761 = vmatpush1.bf16.msra.mxu0 %v10664_v58 }
0x1ccd   : > { %7762 = vmatprep.subr.bf16.mxu0 %v10669_v17 }
0x1cd0   : > { %7763 = vmatpush1.bf16.msra.mxu0 %v10667_v39  ;;  %v10702_v39 = vld [vmem:[%s13581_s1 + $0x2e4] ss:$8 sps:$4 sm:$0xff]  }
0x1cd1   : > { %7764 = vmatprep.subr.bf16.mxu0 %v10672_v3 }
0x1cd4   : > { %7765 = vmatpush1.bf16.msra.mxu0 %v10670_v36 }
0x1cd5   : > { %7766 = vmatprep.subr.bf16.mxu0 %v10675_v27 }
0x1cd8   : > { %7767 = vmatpush1.bf16.msra.mxu0 %v10673_v11 }
0x1cd9   : > { %7768 = vmatprep.subr.bf16.mxu0 %v10678_v59 }
0x1cdc   : > { %7769 = vmatpush1.bf16.msra.mxu0 %v10676_v23 }
0x1cdd   : > { %7770 = vmatprep.subr.bf16.mxu0 %v10681_v16 }
0x1ce0   : > { %7771 = vmatpush1.bf16.msra.mxu0 %v10679_v61 }
0x1ce1   : > { %7772 = vmatprep.subr.bf16.mxu0 %v10684_v30  ;;  %v10700_v30 = vld [vmem:[%s13581_s1 + $0x2e0] ss:$8 sps:$4 sm:$0xff]  }
0x1ce4   : > { %v6929_v44 = vpop.f32.mrb[8].mxu0  ;;  %v6982_v9 = vpop.f32.mrb[8].mxu1  ;;  %7773 = vmatpush1.bf16.msra.mxu0 %v10682_v33 }
0x1ce5   : > { %v6930_v21 = vadd.f32 %v6929_v44, %v6296_v14  ;;  %v6983_v19 = vadd.f32 %v6982_v9, %v6304_v57  ;;  %v6931_v60 = vpop.f32.mrb[9].mxu0  ;;  %v6984_v47 = vpop.f32.mrb[9].mxu1  ;;  %7774 = vmatprep.subr.bf16.mxu0 %v10690_v22  ;;  %v10705_v22 = vld [vmem:[%s13581_s1 + $0x2f4] ss:$8 sps:$4 sm:$0xff]  }
0x1ce6   : > { %v6932_v12 = vadd.f32 %v6931_v60, %v6300_v63  ;;  %v6933_v2 = vpop.f32.mrb[10].mxu0  ;;  %v6985_v5 = vpop.f32.mrb[10].mxu1  ;;  %v11060_v60 = vmov 0.0|0.0  }
0x1ce7   : > { %v6934_v13 = vadd.f32 %v6933_v2, %v6296_v14  ;;  %v6986_v1 = vadd.f32 %v6985_v5, %v6304_v57  ;;  %v6935_v26 = vpop.f32.mrb[11].mxu0  ;;  %v6987_v62 = vpop.f32.mrb[11].mxu1  ;;  %v7001_v51 = vmax.f32 %v6930_v21, 0.0  ;;  %v7003_v49 = vmax.f32 %v6983_v19, 0.0  ;;  %v8058_v21 = vld [vmem:[%s13584_s28 + $0x8] sm:$0xff]  ;;  %v8059_v19 = vld [vmem:[%s13584_s28 + $0x10] sm:$0xff]  ;;  %9668 = vmatprep.subr.bf16.mxu1 %v11060_v60 }
0x1ce8   : > { %v6936_v34 = vadd.f32 %v6935_v26, %v6300_v63  ;;  %7775 = vmatpush1.bf16.msra.mxu0 %v10688_v38  ;;  %v7002_v56 = vmax.f32 %v6932_v12, 0.0  ;;  %v10703_v38 = vld [vmem:[%s13581_s1 + $0x2f0] ss:$8 sps:$4 sm:$0xff]   ;;  %v11062_v12 = vmov 0.0   ;;  %v8061_v5 = vld [vmem:[%s13584_s28 + $0x20] sm:$0xff]  ;;  %s10750_s1 = sshll.u32 %s11064_s0, 4  ;;  %s10751_s1 = int_to_ptr.vmem [resolvable:$false] %s10750_s1 }
0x1ce9   : > { %v7008_v31 = vmax.f32 %v6934_v13, 0.0  ;;  %v7010_v4 = vmax.f32 %v6986_v1, 0.0  ;;  %7776 = vmatprep.subr.bf16.mxu0 %v10696_v6  ;;  %v8060_v6 = vld [vmem:[%s13584_s28 + $0x18] sm:$0xff]  ;;  %v8062_v13 = vld [vmem:[%s13584_s28 + $0x28] sm:$0xff]  ;;  %v8063_v26 = vld [vmem:[%s13584_s28 + $0x30] sm:$0xff]  ;;  %p10753_p3 = scmp.lt.s32.totalorder %s13407_s23, %s10751_s1 }
0x1cea   : > { %v7009_v55 = vmax.f32 %v6936_v34, 0.0  ;;  %v9653_v2 = vpack.c.bf16 %v8060_v6, %v8059_v19  ;;  %v9656_v1 = vpack.c.bf16 %v8062_v13, %v8061_v5  ;;  %v8064_v62 = vld [vmem:[%s13584_s28 + $0x38] sm:$0xff] }
0x1ceb   : > { %v7029_v35 = vpack.c.bf16 %v7008_v31, %v7001_v51  ;;  %v7031_v0 = vpack.c.bf16 %v7010_v4, %v7003_v49  ;;  %v9659_v34 = vpack.c.bf16 %v8064_v62, %v8063_v26  ;;  %v8066_v51 = vld [vmem:[%s13584_s28 + $0x48] sm:$0xff]  ;;  %v8067_v31 = vld [vmem:[%s13584_s28 + $0x50] sm:$0xff]  ;;  %v8068_v4 = vld [vmem:[%s13584_s28 + $0x58] sm:$0x3] }
0x1cec   : > { %v7030_v43 = vpack.c.bf16 %v7009_v55, %v7002_v56  ;;  %v6939_v37 = vpop.f32.mrb[12].mxu0  ;;  %v6990_v20 = vpop.f32.mrb[12].mxu1  ;;  %7777 = vmatpush1.bf16.msra.mxu0 %v10694_v46  ;;  %v8065_v46 = vld [vmem:[%s13584_s28 + $0x40] sm:$0xff] }
0x1ced   : > { %v6940_v10 = vadd.f32 %v6939_v37, %v6296_v14  ;;  %v6991_v25 = vadd.f32 %v6990_v20, %v6304_v57  ;;  %v6941_v58 = vpop.f32.mrb[13].mxu0  ;;  %v6992_v17 = vpop.f32.mrb[13].mxu1  ;;  %9091 = vmatmul.mubr.msk.bf16.vlgmr.msra.gmra.mrb[24].mxu1 %vm7639_vm13, %v7031_v0  ;;  %7778 = vmatprep.subr.bf16.mxu0 %v10699_v29  ;;  %v9662_v49 = vpack.c.bf16 %v8066_v51, %v8065_v46 }
0x1cee   : > { %v6942_v3 = vadd.f32 %v6941_v58, %v6300_v63  ;;  %v6943_v36 = vpop.f32.mrb[14].mxu0  ;;  %v6993_v27 = vpop.f32.mrb[14].mxu1  ;;  %7784 = vmatprep.mubr.bf16.mxu0 %v7030_v43  ;;  %7847 = vmatprep.mubr.bf16.mxu1 %v13578_v7  ;;  %v9665_v29 = vpack.c.bf16 %v8068_v4, %v8067_v31 }
0x1cef   : > { %v6944_v11 = vadd.f32 %v6943_v36, %v6296_v14  ;;  %v6994_v59 = vadd.f32 %v6993_v27, %v6304_v57  ;;  %v6945_v23 = vpop.f32.mrb[15].mxu0  ;;  %v6995_v16 = vpop.f32.mrb[15].mxu1  ;;  %v7015_v42 = vmax.f32 %v6940_v10, 0.0  ;;  %v7017_v24 = vmax.f32 %v6991_v25, 0.0 }
0x1cf0   : > { %v6946_v61 = vadd.f32 %v6945_v23, %v6300_v63  ;;  %7779 = vmatpush1.bf16.msra.mxu0 %v10697_v53  ;;  %v7016_v44 = vmax.f32 %v6942_v3, 0.0  ;;  %v8057_v63 = vld [vmem:[%s13583_s18] sm:$0xff]  ;;  %s13405_s18 = scalar_lea.hbm %s11283_s6, %s9096_s3 }
0x1cf1   : > { %v7022_v54 = vmax.f32 %v6944_v11, 0.0  ;;  %v7024_v33 = vmax.f32 %v6994_v59, 0.0  ;;  %7780 = vmatprep.subr.bf16.mxu0 %v10702_v39  ;;  %v9650_v47 = vpack.c.bf16 %v8058_v21, %v8057_v63  ;;  %v7866_v23 = vld [vmem:[%s13585_s26] sm:$0x3]  ;;  %s13589_s26 = sand.u32 1, %s10900_s16  }
0x1cf2   : > { %v7023_v9 = vmax.f32 %v6946_v61, 0.0 }
0x1cf3   : > { %v7036_v7 = vpack.c.bf16 %v7022_v54, %v7015_v42  ;;  %v7038_v14 = vpack.c.bf16 %v7024_v33, %v7017_v24 }
0x1cf4   : > { %v7037_v57 = vpack.c.bf16 %v7023_v9, %v7016_v44  ;;  %7781 = vmatpush1.bf16.msra.mxu0 %v10700_v30 }
0x1cf5   : > { %9092 = vmatmul.mubr.msk.bf16.gmra.mrb[28].mxu1 %vm7639_vm13, %v7038_v14  ;;  %7782 = vmatprep.subr.bf16.mxu0 %v10705_v22  ;;  %v7875_v22 = vrot.slane %v7866_v23, %v11841_v50 }
0x1cf8   : > { %7783 = vmatpush1.bf16.msra.mxu0 %v10703_v38 }
0x1cf9   : > { %9649 = vmatprep.subr.bf16.mxu0 %v11060_v60 }
0x1cfb   : > { %7785 = vmatmul.mubr.bf16.vlgmr.msra.gmra.mrb[16].mxu0 %v7029_v35 }
0x1cfc   : > { %7794 = vmatprep.mubr.bf16.mxu0 %v7037_v57  ;;  %9651 = vmatpush3.bf16.msra.mxu0 %v9650_v47 }
0x1cfd   : > { %9652 = vmatprep.subr.bf16.mxu0 %v11060_v60 }
0x1d00   : > { %9654 = vmatpush3.bf16.msra.mxu0 %v9653_v2 }
0x1d01   : > { %9655 = vmatprep.subr.bf16.mxu0 %v11060_v60 }
0x1d03   : > { %7795 = vmatmul.mubr.bf16.gmra.mrb[20].mxu0 %v7036_v7  ;;  %v7871_v7 = vrot.slane %v7866_v23, %v11837_v48 }
0x1d04   : > { %9646 = vmatprep.mubr.msk.f32.mxu0 %vm11061_vm1, %v11062_v12  ;;  %9657 = vmatpush3.bf16.msra.mxu0 %v9656_v1 }
0x1d05   : > { %9658 = vmatprep.subr.bf16.mxu0 %v11060_v60 }
0x1d08   : > { %9660 = vmatpush3.bf16.msra.mxu0 %v9659_v34 }
0x1d09   : > { %9661 = vmatprep.subr.bf16.mxu0 %v11060_v60 }
0x1d0c   : > { %9663 = vmatpush3.bf16.msra.mxu0 %v9662_v49 }
0x1d0d   : > { %9664 = vmatprep.subr.bf16.mxu0 %v11060_v60 }
0x1d10   : > { %9667 = vmatpush3.bf16.msk.msra.mxu0 %vm9666_vm3, %v9665_v29 }
0x1d13   : > { %9647 = vmatmul.mubr.msk.f32.vlgmr.msra.gmra.mrb[24].mxu0 %vm1294_vm0, %v12615_v45  ;;  %vm8246_vm0 = vcmask 81920  }
0x1d8e   : > { %v7680_v56 = vpop.f32.mrb[16].mxu1 }
0x1d8f   : > { %v7682_v55 = vpop.f32.mrb[17].mxu1 }
0x1d90   : > { %v7684_v35 = vpop.f32.mrb[18].mxu1 }
0x1d91   : > { %v7686_v0 = vpop.f32.mrb[19].mxu1 }
0x1d96   : > { %v7690_v43 = vpop.f32.mrb[20].mxu1 }
0x1d97   : > { %v7692_v37 = vpop.f32.mrb[21].mxu1 }
0x1d98   : > { %v7694_v20 = vpop.f32.mrb[22].mxu1 }
0x1d99   : > { %v7696_v53 = vpop.f32.mrb[23].mxu1 }
0x1dc0   : > { %v7839_v10 = vpop.f32.mrb[24].mxu1 }
0x1dc1   : > { %v7841_v25 = vpop.f32.mrb[25].mxu1 }
0x1dc2   : > { %v7843_v58 = vpop.f32.mrb[26].mxu1 }
0x1dc3   : > { %v7845_v17 = vpop.f32.mrb[27].mxu1 }
0x1dc8   : > { %v7849_v39 = vpop.f32.mrb[28].mxu1 }
0x1dc9   : > { %v7851_v3 = vpop.f32.mrb[29].mxu1 }
0x1dca   : > { %v7853_v36 = vpop.f32.mrb[30].mxu1 }
0x1dcb   : > { %v7855_v27 = vpop.f32.mrb[31].mxu1 }
0x1dce   : > { %v7786_v11 = vpop.f32.mrb[16].mxu0 }
0x1dcf   : > { %v9708_v59 = vadd.f32 %v7786_v11, %v7680_v56  ;;  %v7788_v45 = vpop.f32.mrb[17].mxu0 }
0x1dd0   : > { %v9710_v16 = vadd.f32 %v7788_v45, %v7682_v55  ;;  %v7790_v61 = vpop.f32.mrb[18].mxu0 }
0x1dd1   : > { %v9709_v30 = vadd.f32 %v9708_v59, %v7839_v10  ;;  %v9712_v42 = vadd.f32 %v7790_v61, %v7684_v35  ;;  %v7792_v24 = vpop.f32.mrb[19].mxu0 }
0x1dd2   : > { %v9711_v54 = vadd.f32 %v9710_v16, %v7841_v25  ;;  %v9714_v33 = vadd.f32 %v7792_v24, %v7686_v0 }
0x1dd3   : > { %v7858_v44 = vadd.f32 %v9709_v30, %v12913_v28  ;;  %v9713_v9 = vadd.f32 %v9712_v42, %v7843_v58 }
0x1dd4   : > { %v7859_v14 = vadd.f32 %v9711_v54, %v12915_v8  ;;  %v9715_v57 = vadd.f32 %v9714_v33, %v7845_v17 }
0x1dd5   : > { %v7860_v38 = vadd.f32 %v9713_v9, %v12921_v32  ;;  %v7878_v2 = vadd.f32 %v7871_v7, %v7858_v44 }
0x1dd6   : > { %v7861_v63 = vadd.f32 %v9715_v57, %v12923_v41  ;;  %v7796_v21 = vpop.f32.mrb[20].mxu0  ;;  %v7879_v19 = vadd.f32 %v7875_v22, %v7859_v14 }
0x1dd7   : > { %v9716_v47 = vadd.f32 %v7796_v21, %v7690_v43  ;;  %v7798_v6 = vpop.f32.mrb[21].mxu0  ;;  %v7880_v8 = vadd.f32 %v7871_v7, %v7860_v38 }
0x1dd8   : > { %v9718_v5 = vadd.f32 %v7798_v6, %v7692_v37  ;;  %v7800_v13 = vpop.f32.mrb[22].mxu0  ;;  %v7888_v1 = vsel %vm5087_vm8, %v7879_v19, 0.0  ;;  %v7881_v28 = vadd.f32 %v7875_v22, %v7861_v63  ;;  %v8069_v63 = vld [vmem:[%s11268_s20] sm:$0x1] }
0x1dd9   : > { %v9717_v26 = vadd.f32 %v9716_v47, %v7849_v39  ;;  %v9720_v62 = vadd.f32 %v7800_v13, %v7694_v20  ;;  %v7802_v34 = vpop.f32.mrb[23].mxu0  ;;  %v7889_v46 = vadd.f32 %v7888_v1, %v7878_v2 }
0x1dda   : > { %v9719_v51 = vadd.f32 %v9718_v5, %v7851_v3  ;;  %v9722_v49 = vadd.f32 %v7802_v34, %v7696_v53  ;;  %v7892_v32 = vsel %vm5087_vm8, %v7881_v28, 0.0  ;;  %v8147_v34 = vld [vmem:[%s11273_s30] sm:$0xff] }
0x1ddb   : > { %v7862_v41 = vadd.f32 %v9717_v26, %v12917_v15  ;;  %v9721_v31 = vadd.f32 %v9720_v62, %v7853_v36  ;;  %7890 = vadd.xlane.f32.xlu0 %v7889_v46  ;;  %v7893_v4 = vadd.f32 %v7892_v32, %v7880_v8  ;;  %v8148_v46 = vld [vmem:[%s11273_s30 + $0x8] sm:$0xff] }
0x1ddc   : > { %v7863_v29 = vadd.f32 %v9719_v51, %v12919_v52  ;;  %v9723_v56 = vadd.f32 %v9722_v49, %v7855_v27  ;;  %v8149_v51 = vld [vmem:[%s11273_s30 + $0x10] sm:$0xff]  ;;  %v8150_v49 = vld [vmem:[%s11273_s30 + $0x18] sm:$0xff] }
0x1ddd   : > { %v7864_v55 = vadd.f32 %v9721_v31, %v12925_v40  ;;  %7894 = vadd.xlane.f32.xlu1 %v7893_v4  ;;  %v7882_v43 = vadd.f32 %v7871_v7, %v7862_v41  ;;  %v9672_v32 = vpack.c.bf16 %v8150_v49, %v8149_v51  ;;  %v8151_v41 = vld [vmem:[%s11273_s30 + $0x20] sm:$0xff]  ;;  %v8152_v31 = vld [vmem:[%s11273_s30 + $0x28] sm:$0xff] }
0x1dde   : > { %v7865_v35 = vadd.f32 %v9723_v56, %v12927_v18  ;;  %v7883_v0 = vadd.f32 %v7875_v22, %v7863_v29  ;;  %v9675_v4 = vpack.c.bf16 %v8152_v31, %v8151_v41  ;;  %v8153_v29 = vld [vmem:[%s11273_s30 + $0x30] sm:$0xff]  ;;  %v8154_v56 = vld [vmem:[%s11273_s30 + $0x38] sm:$0xff]  ;;  %v7886_v41 = vld [vmem:[%s13586_s2] sm:$0x3]  ;;  %s8274_s2 = scalar_lea.sflag [#allocation3], %s13589_s26 }
0x1ddf   : > { %v7884_v37 = vadd.f32 %v7871_v7, %v7864_v55  ;;  %v9678_v55 = vpack.c.bf16 %v8154_v56, %v8153_v29  ;;  %v7978_v56 = vrot.slane %v7886_v41, %v11837_v48 }
0x1de0   : > { %v7896_v20 = vsel %vm5087_vm8, %v7883_v0, 0.0  ;;  %v7885_v53 = vadd.f32 %v7875_v22, %v7865_v35  ;;  %v8155_v35 = vld [vmem:[%s11273_s30 + $0x40] sm:$0xff] }
0x1de1   : > { %v7897_v10 = vadd.f32 %v7896_v20, %v7882_v43  ;;  %v7900_v15 = vsel %vm5100_vm9, %v7884_v37, 0.0  ;;  %v8158_v20 = vld [vmem:[%s11273_s30 + $0x58] sm:$0xff] }
0x1de2   : > { %v7901_v25 = vsel %vm5102_vm10, %v7885_v53, 0.0 }
0x1de3   : > { %7898 = vadd.xlane.f32.xlu0 %v7897_v10  ;;  %v7902_v58 = vadd.f32 %v7901_v25, %v7900_v15  ;;  %v8159_v10 = vld [vmem:[%s11273_s30 + $0x60] sm:$0xff]  ;;  %v8160_v15 = vld [vmem:[%s11273_s30 + $0x68] sm:$0xff] }
0x1de4   : > { %v9687_v25 = vpack.c.bf16 %v8160_v15, %v8159_v10 }
0x1de5   : > { %7903 = vadd.xlane.f32.xlu1 %v7902_v58  ;;  %v8161_v58 = vld [vmem:[%s11273_s30 + $0x70] sm:$0xff] }
0x1de6   : > { %v8143_v52 = vpop.f32.mrb[24].mxu0 }
0x1de7   : > { %v9648_v17 = vpop.f32.mrb[25].mxu0  ;;  %v13330_v5 = vadd.f32 %v8143_v52, %v8069_v63  ;;  %v8162_v52 = vld [vmem:[%s11273_s30 + $0x78] sm:$0xff] }
0x1de8   : > { %v9690_v17 = vpack.c.bf16 %v8162_v52, %v8161_v58 }
0x1de9   : > { %v8247_v62 = vsel %vm8246_vm0, %v13330_v5, -inf }
0x1e68   : > { %v7891_v40 = vpop.xlane.xlu0 %7890 }
0x1e69   : > { %v7905_v39 = vmul.f32 0.005, %v7891_v40  ;;  %v8163_v40 = vld [vmem:[%s11273_s30 + $0x80] sm:$0xff] }
0x1e6a   : > { %v7895_v3 = vpop.xlane.xlu1 %7894 }
0x1e6b   : > { %v13294_v18 = vsub.f32 %v7878_v2, %v7905_v39  ;;  %v13296_v36 = vsub.f32 %v7879_v19, %v7905_v39  ;;  %v7906_v27 = vmul.f32 0.005, %v7895_v3  ;;  %v8164_v39 = vld [vmem:[%s11273_s30 + $0x88] sm:$0xff] }
0x1e6c   : > { %v9693_v3 = vpack.c.bf16 %v8164_v39, %v8163_v40 }
0x1e6d   : > { %v13298_v11 = vsub.f32 %v7880_v8, %v7906_v27  ;;  %v13300_v59 = vsub.f32 %v7881_v28, %v7906_v27  ;;  %v7917_v45 = vmul.f32 %v13294_v18, %v13294_v18  ;;  %v7918_v23 = vmul.f32 %v13296_v36, %v13296_v36  ;;  %v8165_v27 = vld [vmem:[%s11273_s30 + $0x90] sm:$0xff] }
0x1e6e   : > { %v9669_v8 = vpack.c.bf16 %v8148_v46, %v8147_v34  ;;  %v7985_v40 = vmul.f32 %v7978_v56, %v13294_v18 }
0x1e6f   : > { %v7919_v16 = vmul.f32 %v13298_v11, %v13298_v11  ;;  %v7920_v61 = vmul.f32 %v13300_v59, %v13300_v59  ;;  %v7925_v42 = vsel %vm5087_vm8, %v7918_v23, 0.0 }
0x1e70   : > { %v7899_v30 = vpop.xlane.xlu0 %7898  ;;  %v7926_v54 = vadd.f32 %v7925_v42, %v7917_v45  ;;  %9670 = vmatpush1.bf16.msra.mxu1 %v9669_v8  ;;  %v8166_v45 = vld [vmem:[%s11273_s30 + $0x98] sm:$0xff]  ;;  %v8169_v42 = vld [vmem:[%s11273_s30 + $0xb0] sm:$0xff] }
0x1e71   : > { %v7907_v24 = vmul.f32 0.005, %v7899_v30  ;;  %v7929_v33 = vsel %vm5087_vm8, %v7920_v61, 0.0  ;;  %9671 = vmatprep.subr.bf16.mxu1 %v11060_v60  ;;  %v9696_v23 = vpack.c.bf16 %v8166_v45, %v8165_v27  ;;  %v8168_v61 = vld [vmem:[%s11273_s30 + $0xa8] sm:$0xff]  ;;  %v7987_v45 = vmul.f32 %v7978_v56, %v13298_v11 }
0x1e72   : > { %v7904_v22 = vpop.xlane.xlu1 %7903  ;;  %v7930_v44 = vadd.f32 %v7929_v33, %v7919_v16  ;;  %7927 = vadd.xlane.f32.xlu0 %v7926_v54  ;;  %v8167_v16 = vld [vmem:[%s11273_s30 + $0xa0] sm:$0xff] }
0x1e73   : > { %v13312_v9 = vsub.f32 %v7882_v43, %v7907_v24  ;;  %v13314_v7 = vsub.f32 %v7883_v0, %v7907_v24  ;;  %v7908_v14 = vmul.f32 0.005, %v7904_v22  ;;  %v8156_v0 = vld [vmem:[%s11273_s30 + $0x48] sm:$0xff]  ;;  %v9699_v30 = vpack.c.bf16 %v8168_v61, %v8167_v16  ;;  %v8170_v24 = vld [vmem:[%s11273_s30 + $0xb8] sm:$0xff]  ;;  %v8171_v33 = vld [vmem:[%s11273_s30 + $0xc0] sm:$0xff] }
0x1e74   : > { %7931 = vadd.xlane.f32.xlu1 %v7930_v44  ;;  %9673 = vmatpush1.bf16.msra.mxu1 %v9672_v32  ;;  %v9681_v43 = vpack.c.bf16 %v8156_v0, %v8155_v35  ;;  %v9702_v54 = vpack.c.bf16 %v8170_v24, %v8169_v42 }
0x1e75   : > { %v13316_v57 = vsub.f32 %v7884_v37, %v7908_v14  ;;  %v13318_v38 = vsub.f32 %v7885_v53, %v7908_v14  ;;  %v7921_v21 = vmul.f32 %v13312_v9, %v13312_v9  ;;  %v7922_v19 = vmul.f32 %v13314_v7, %v13314_v7  ;;  %9674 = vmatprep.subr.bf16.mxu1 %v11060_v60  ;;  %v8157_v37 = vld [vmem:[%s11273_s30 + $0x50] sm:$0xff] }
0x1e76   : > { %v9684_v53 = vpack.c.bf16 %v8158_v20, %v8157_v37  ;;  %v7982_v37 = vrot.slane %v7886_v41, %v11841_v50  ;;  %v7989_v11 = vmul.f32 %v7978_v56, %v13312_v9 }
0x1e77   : > { %v7923_v47 = vmul.f32 %v13316_v57, %v13316_v57  ;;  %v7924_v6 = vmul.f32 %v13318_v38, %v13318_v38  ;;  %v7933_v2 = vsel %vm5087_vm8, %v7922_v19, 0.0 }
0x1e78   : > { %v7934_v13 = vadd.f32 %v7933_v2, %v7921_v21  ;;  %9676 = vmatpush1.bf16.msra.mxu1 %v9675_v4  ;;  %v7986_v39 = vmul.f32 %v7982_v37, %v13296_v36 }
0x1e79   : > { %v7937_v1 = vsel %vm5100_vm9, %v7923_v47, 0.0  ;;  %v7938_v28 = vsel %vm5102_vm10, %v7924_v6, 0.0  ;;  %9677 = vmatprep.subr.bf16.mxu1 %v11060_v60 }
0x1e7a   : > { %v7939_v26 = vadd.f32 %v7938_v28, %v7937_v1  ;;  %7935 = vadd.xlane.f32.xlu0 %v7934_v13 }
0x1e7c   : > { %7940 = vadd.xlane.f32.xlu1 %v7939_v26  ;;  %9679 = vmatpush1.bf16.msra.mxu1 %v9678_v55 }
0x1e7d   : > { %9680 = vmatprep.subr.bf16.mxu1 %v11060_v60 }
0x1e7e   : > { %8248 = vmax.xlane.f32.xlu0 %v8247_v62 }
0x1e80   : > { %9682 = vmatpush1.bf16.msra.mxu1 %v9681_v43 }
0x1e81   : > { %9683 = vmatprep.subr.bf16.mxu1 %v11060_v60 }
0x1e84   : > { %9685 = vmatpush1.bf16.msra.mxu1 %v9684_v53 }
0x1e85   : > { %9686 = vmatprep.subr.bf16.mxu1 %v11060_v60 }
0x1e88   : > { %9688 = vmatpush1.bf16.msra.mxu1 %v9687_v25  ;;  %v7887_v25 = vld [vmem:[%s13587_s5] sm:$0x3]  ;;  %s10746_s5 = scalar_lea.vmem %s13407_s23, 16 }
0x1e89   : > { %9689 = vmatprep.subr.bf16.mxu1 %v11060_v60  ;;  %v8017_v16 = vrot.slane %v7887_v25, %v11837_v48  ;;  %p10747_p0 = scmp.ne.s32.totalorder %s13407_s23, %s10746_s5 }
0x1e8b   : > { %p10748_p1 = pnand %p10747_p0, %p11323_p5 }
0x1e8c   : > { %9691 = vmatpush1.bf16.msra.mxu1 %v9690_v17 }
0x1e8d   : > { %9692 = vmatprep.subr.bf16.mxu1 %v11060_v60  ;;  %p10749_p2 = pneg %p10748_p1 }
0x1e90   : > { %9694 = vmatpush1.bf16.msra.mxu1 %v9693_v3  ;;  %v8021_v3 = vrot.slane %v7887_v25, %v11841_v50 }
0x1e91   : > { %9695 = vmatprep.subr.bf16.mxu1 %v11060_v60 }
0x1e94   : > { %9697 = vmatpush1.bf16.msra.mxu1 %v9696_v23  ;;  %v7988_v23 = vmul.f32 %v7982_v37, %v13300_v59  ;;  %v7990_v59 = vmul.f32 %v7982_v37, %v13314_v7 }
0x1e95   : > { %9698 = vmatprep.subr.bf16.mxu1 %v11060_v60 }
0x1e98   : > { %9700 = vmatpush1.bf16.msra.mxu1 %v9699_v30 }
0x1e99   : > { %9701 = vmatprep.subr.bf16.mxu1 %v11060_v60 }
0x1e9c   : > { %9703 = vmatpush1.bf16.msra.mxu1 %v9702_v54 }
0x1e9d   : > { %8224 = vmatprep.subr.mxu1 %v11062_v12 }
0x1ea0   : > { %8225 = vmatpush1.msra.mxu1 %v8171_v33 }
0x1eff   : > { %v7928_v22 = vpop.xlane.xlu0 %7927 }
0x1f00   : > { %v7942_v44 = vmul.f32 0.0050251256, %v7928_v22 }
0x1f01   : > { %v7932_v14 = vpop.xlane.xlu1 %7931 }
0x1f02   : > { %v7943_v63 = vmul.f32 0.0050251256, %v7932_v14  ;;  %10722 = vrsqrt.f32 %v7942_v44  ;;  %vm7948_vm4 = vcmp.eq.f32.partialorder %v7942_v44, inf  ;;  %v7951_v28 = vand.u32 2147483648, %v7942_v44 }
0x1f03   : > { %vm7950_vm14 = vcmp.eq.f32.partialorder %v7942_v44, 0.0 }
0x1f04   : > { %10724 = vrsqrt.f32 %v7943_v63  ;;  %vm7955_vm11 = vcmp.eq.f32.partialorder %v7943_v63, inf  ;;  %v7958_v46 = vand.u32 2147483648, %v7943_v63  ;;  %vm7957_vm12 = vcmp.eq.f32.partialorder %v7943_v63, 0.0 }
0x1f07   : > { %v7936_v21 = vpop.xlane.xlu0 %7935 }
0x1f08   : > { %v7944_v19 = vmul.f32 0.0050251256, %v7936_v21  ;;  %v7991_v21 = vmul.f32 %v7978_v56, %v13316_v57 }
0x1f09   : > { %v7941_v47 = vpop.xlane.xlu1 %7940 }
0x1f0a   : > { %v7945_v6 = vmul.f32 0.0050251256, %v7941_v47  ;;  %10726 = vrsqrt.f32 %v7944_v19  ;;  %vm7962_vm15 = vcmp.eq.f32.partialorder %v7944_v19, inf  ;;  %v7965_v55 = vand.u32 2147483648, %v7944_v19 }
0x1f0b   : > { %v8249_v2 = vpop.xlane.xlu0 %8248  ;;  %vm7964_vm5 = vcmp.eq.f32.partialorder %v7944_v19, 0.0 }
0x1f0c   : > { %10728 = vrsqrt.f32 %v7945_v6  ;;  %v10723_v13 = vpop.eup %10722  ;;  %v13374_v60 = vsub.f32 %v13330_v5, %v8249_v2  ;;  %vm7969_vm6 = vcmp.eq.f32.partialorder %v7945_v6, inf  ;;  %v7972_v43 = vand.u32 2147483648, %v7945_v6 }
0x1f0d   : > { %v7947_v1 = vmul.f32 %v10723_v13, %v7942_v44  ;;  %vm7971_vm13 = vcmp.eq.f32.partialorder %v7945_v6, 0.0 }
0x1f0e   : > { %v10725_v12 = vpop.eup %10724  ;;  %v8251_v62 = vmul.f32 1.442695, %v13374_v60 }
0x1f0f   : > { %v7954_v26 = vmul.f32 %v10725_v12, %v7943_v63  ;;  %v7949_v34 = vsel %vm7948_vm4, %v7942_v44, %v7947_v1 }
0x1f10   : > { %v7952_v8 = vsel %vm7950_vm14, %v7951_v28, %v7949_v34  ;;  %10730 = vpow2.f32 %v8251_v62 }
0x1f11   : > { %v7956_v51 = vsel %vm7955_vm11, %v7943_v63, %v7954_v26  ;;  %v7993_v49 = vadd.f32 1e-06, %v7952_v8 }
0x1f12   : > { %v7959_v32 = vsel %vm7957_vm12, %v7958_v46, %v7956_v51 }
0x1f13   : > { %v7994_v5 = vadd.f32 1e-06, %v7959_v32  ;;  %10732 = vrcp.f32 %v7993_v49 }
0x1f14   : > { %v10727_v31 = vpop.eup %10726 }
0x1f15   : > { %10734 = vrcp.f32 %v7994_v5  ;;  %v7961_v29 = vmul.f32 %v10727_v31, %v7944_v19 }
0x1f16   : > { %v10729_v4 = vpop.eup %10728 }
0x1f17   : > { %v7968_v35 = vmul.f32 %v10729_v4, %v7945_v6  ;;  %v7963_v0 = vsel %vm7962_vm15, %v7944_v19, %v7961_v29  ;;  %v7992_v19 = vmul.f32 %v7982_v37, %v13318_v38 }
0x1f18   : > { %v7966_v20 = vsel %vm7964_vm5, %v7965_v55, %v7963_v0 }
0x1f19   : > { %v7970_v53 = vsel %vm7969_vm6, %v7945_v6, %v7968_v35  ;;  %v7995_v10 = vadd.f32 1e-06, %v7966_v20  ;;  %v8172_v20 = vld [vmem:[%s13588_s4] sm:$0x1]  ;;  %s10752_s4 = scalar_lea.vmem %s10751_s1, 32 }
0x1f1a   : > { %v7973_v15 = vsel %vm7971_vm13, %v7972_v43, %v7970_v53  ;;  %v10731_v58 = vpop.eup %10730  ;;  %p10754_p4 = scmp.lt.s32.totalorder %s10752_s4, %s10746_s5 }
0x1f1b   : > { %v7996_v52 = vadd.f32 1e-06, %v7973_v15  ;;  %10736 = vrcp.f32 %v7995_v10  ;;  %v8253_v17 = vsel %vm8246_vm0, %v10731_v58, 0.0 }
0x1f1c   : > { %8254 = vadd.xlane.f32.xlu0 %v8253_v17  ;;  %p10755_p7 = por %p10754_p4, %p10753_p3 }
0x1f1d   : > { %10738 = vrcp.f32 %v7996_v52  ;;  %v10733_v27 = vpop.eup %10732 }
0x1f1e   : > { %v8006_v30 = vmul.f32 %v10733_v27, %v7986_v39  ;;  %v8005_v42 = vmul.f32 %v10733_v27, %v7985_v40  ;;  %p10756_p8 = pnand %p10755_p7, %p10749_p2 }
0x1f1f   : > { %v10735_v61 = vpop.eup %10734 }
0x1f20   : > { %v8008_v24 = vmul.f32 %v10735_v61, %v7988_v23  ;;  %v8007_v54 = vmul.f32 %v10735_v61, %v7987_v45  ;;  %v8025_v33 = vadd.f32 %v8021_v3, %v8006_v30  ;;  %v8024_v22 = vadd.f32 %v8017_v16, %v8005_v42 }
0x1f22   : > { %v8027_v18 = vadd.f32 %v8021_v3, %v8008_v24  ;;  %v8026_v36 = vadd.f32 %v8017_v16, %v8007_v54  ;;  %v8042_v44 = vsel %vm5087_vm8, %v8025_v33, 0.0 }
0x1f24   : > { %v8043_v50 = vsel %vm5087_vm8, %v8027_v18, 0.0  ;;  %v8032_v14 = vadd.f32 %v8026_v36, %v8024_v22 }
0x1f25   : > { %v8044_v63 = vadd.f32 %v8043_v50, %v8042_v44  ;;  %v10737_v48 = vpop.eup %10736 }
0x1f26   : > { %v8010_v6 = vmul.f32 %v10737_v48, %v7990_v59  ;;  %v8009_v2 = vmul.f32 %v10737_v48, %v7989_v11 }
0x1f27   : > { %v10739_v47 = vpop.eup %10738 }
0x1f28   : > { %v8012_v13 = vmul.f32 %v10739_v47, %v7992_v19  ;;  %v8011_v12 = vmul.f32 %v10739_v47, %v7991_v21  ;;  %v8029_v1 = vadd.f32 %v8021_v3, %v8010_v6  ;;  %v8028_v28 = vadd.f32 %v8017_v16, %v8009_v2 }
0x1f2a   : > { %v8031_v26 = vadd.f32 %v8021_v3, %v8012_v13  ;;  %v8030_v62 = vadd.f32 %v8017_v16, %v8011_v12  ;;  %v8045_v34 = vsel %vm5087_vm8, %v8029_v1, 0.0  ;;  %v8033_v9 = vadd.f32 %v8032_v14, %v8028_v28 }
0x1f2b   : > { %v8046_v46 = vadd.f32 %v8045_v34, %v8044_v63 }
0x1f2c   : > { %v8047_v7 = vsel %vm5102_vm10, %v8031_v26, 0.0  ;;  %v8034_v8 = vsel %vm5100_vm9, %v8030_v62, 0.0 }
0x1f2d   : > { %v8035_v57 = vadd.f32 %v8034_v8, %v8033_v9  ;;  %v8048_v51 = vadd.f32 %v8047_v7, %v8046_v46 }
0x1f2f   : > { %v8036_v38 = vrot.slane %v8035_v57, 4  ;;  %v8049_v49 = vrot.slane %v8048_v51, 4 }
0x1f31   : > { %v8037_v32 = vadd.f32 %v8036_v38, %v8035_v57  ;;  %v8050_v5 = vadd.f32 %v8049_v49, %v8048_v51 }
0x1f33   : > { %v8038_v41 = vrot.slane %v8037_v32, 2  ;;  %v8051_v31 = vrot.slane %v8050_v5, 2 }
0x1f35   : > { %v8039_v4 = vadd.f32 %v8038_v41, %v8037_v32  ;;  %v8052_v29 = vadd.f32 %v8051_v31, %v8050_v5 }
0x1f37   : > { %v8040_v56 = vrot.slane %v8039_v4, 1  ;;  %v8053_v55 = vrot.slane %v8052_v29, 1 }
0x1f39   : > { %v8041_v35 = vadd.f32 %v8040_v56, %v8039_v4  ;;  %v8054_v0 = vadd.f32 %v8053_v55, %v8052_v29 }
0x1f3b   : > { %v8055_v43 = vmul.f32 0.011111111, %v8041_v35  ;;  %v8056_v37 = vmul.f32 0.011111111, %v8054_v0 }
0x1f3d   : > { %9095 = vmatprep.mubr.msk.f32.mxu1 %vm5087_vm8, %v8056_v37 }
0x1f3e   : > { %8241 = vmatmul.mubr.f32.vlgmr.msra.gmra.mrb[32].mxu1 %v8055_v43 }
0x1fa9   : > { %v8255_v3 = vpop.xlane.xlu0 %8254 }
0x2011   : > { %v8242_v53 = vpop.f32.mrb[32].mxu1 }
0x2012   : > { %v8243_v10 = vadd.f32 %v8242_v53, %v8172_v20  ;;  %v8244_v15 = vpop.f32.mrb[33].mxu1 }
0x2014   : > { %v8259_v25 = vsel %vm8246_vm0, %v8243_v10, -inf }
0x2015   : > { %8260 = vmax.xlane.f32.xlu1 %v8259_v25 }
0x20a2   : > { %v8261_v58 = vpop.xlane.xlu1 %8260 }
0x20a3   : > { %v8262_v52 = vsub.f32 %v8243_v10, %v8261_v58 }
0x20a5   : > { %v8263_v17 = vmul.f32 1.442695, %v8262_v52 }
0x20a7   : > { %10740 = vpow2.f32 %v8263_v17 }
0x20a8   : > { %10742 = vlog2.f32 %v8255_v3 }
0x20b1   : > { %v10741_v40 = vpop.eup %10740 }
0x20b2   : > { %v8265_v39 = vsel %vm8246_vm0, %v10741_v40, 0.0  ;;  %v10743_v45 = vpop.eup %10742 }
0x20b3   : > { %8266 = vadd.xlane.f32.xlu1 %v8265_v39  ;;  %v8257_v23 = vmul.f32 0.6931472, %v10743_v45 }
0x20b5   : > { %v8258_v30 = vsub.f32 %v13374_v60, %v8257_v23 }
0x2140   : > { %v8267_v27 = vpop.xlane.xlu1 %8266 }
0x2141   : > { %10744 = vlog2.f32 %v8267_v27 }
0x214b   : > { %v10745_v16 = vpop.eup %10744 }
0x214c   : > { %v8269_v61 = vmul.f32 0.6931472, %v10745_v16 }
0x214e   : > { %v8270_v42 = vsub.f32 %v8262_v52, %v8269_v61 }
0x2150   : > { %v8271_v24 = vadd.f32 %v8270_v42, %v8258_v30 }
0x2152   : > { %8272 = vst.msk [vmem:[%s11482_s11] sm:$0x1] %vm8246_vm0, %v8271_v24 }
0x2153   : > { %10759 = shalt.err (!%p10756_p8)
}
0x2154   : > { %s10760_s11 = scalar_lea.hbm %s13405_s18, 16  ;;  %s10764_s3 = scalar_lea.hbm %s11283_s6, 32 }
0x2155   : > { %p10761_p9 = scmp.ne.s32.totalorder %s13405_s18, %s10760_s11  ;;  %p10765_p12 = scmp.lt.u32.totalorder %s13405_s18, %s11283_s6 }
0x2156   : > { %p10766_p13 = scmp.lt.u32.totalorder %s10764_s3, %s10760_s11  ;;  %p10768_p1 = scmp.lt.u32.totalorder %s10760_s11, %s13405_s18 }
0x2157   : > { %p10762_p10 = pnand %p10761_p9, %p11323_p5 }
0x2158   : > { %p10767_p0 = por %p10766_p13, %p10765_p12 }
0x2159   : > { %p10763_p11 = pneg %p10762_p10 }
0x215a   : > { %p10769_p3 = por %p10768_p1, %p10767_p0 }
0x215c   : > { %p10770_p2 = pnand %p10769_p3, %p10763_p11 }
0x215e   : > { %10773 = shalt.err (!%p10770_p2)
}
0x215f   : > { %9751 = dma.vmem_to_hbm [thread:$0]  (%p11323_p5), %s13407_s23, 16, %s13405_s18, %s8274_s2  }
0x2160 PF: > { %p9757_p4 = scmp.ge.s32.totalorder %s10908_s22, 2  ;;  %s8298_s4 = sand.u32 1, %s10896_s15  }
0x2161   : > { %s8299_s1 = scalar_lea.sflag [#allocation3], %s8298_s4 }
0x2162   : > { %p9754_p7 = pnand %p9757_p4, %p11327_p6 }
0x2164   : > { %10891 = dma.done.wait (!%p9754_p7), %s8299_s1, 16  }
0x2165   : > { %10893 = vsyncadd (!%p9754_p7), %s8299_s1, 4294967280  ;;  %s13590_s22 = sld [smem:[#allocation35_spill]]  ;;  %s13591_s26 = sld [smem:[#allocation34_spill]] }
0x2166   : > { %s13592_s18 = sld [smem:[#allocation36_spill]]  ;;  %s13593_s15 = smov %s10900_s16 }
0x216b   : > { %p95_p8 = scmp.ge.s32.totalorder %s13590_s22, 4   ;;  %s13594_s16 = smov %s13591_s26 }
0x216d   :  { %97 = sbr.rel (!%p95_p8) target bundleno = 80 (0x50), region = 352 }
0x2174   :  { %8303 = vsyncpa [#allocation3], 1 }
0x2175   :  { %8305 = vsyncpa [#allocation3 + $0x1], 1 }

</bundles_post_ra>
